<compile_context>
chip_gen: v7x
topology: tpu7x:2x2x1
jax: 0.10.0
libtpu: 0.0.40
codegen_flags: <defaults>
</compile_context>

<pallas_src>
import jax
import jax.numpy as jnp
from jax.experimental import pallas as pl
from jax.experimental.pallas import tpu as pltpu

_K = 5                                # kernel_size of every Conv1d
_EPS = 1e-5                           # BatchNorm1d eps
_HI = jax.lax.Precision.HIGHEST       # used only for the reference + head


# ------------------------------- Pallas kernel ------------------------------

def _make_kernel(TB, lengths):
    """Build the fused forward kernel for a fixed batch tile TB / length chain."""
    l1, l2, l2p, l3, l4, l4p, l5, l6 = lengths
    n1, n2 = l1 * TB, l2 * TB
    n3, n4 = l3 * TB, l4 * TB
    n5, n6 = l5 * TB, l6 * TB

    def kernel(x_ref,
               w1, b1, w2, b2, w3, b3, w4, b4, w5, b5, w6, b6,
               lw_ref, lb_ref,
               o_ref,
               s1, s2, p1, s3, s4, p2, s5, s6):
        # Layout convention: every activation slab is (l * TB, C) with
        # row j*TB + b  <->  (batch element b of this tile, position j).

        def conv_relu(load, w_ref, b_ref, rows):
            # Conv1d(K=5, VALID) + folded BN bias + ReLU as K accumulated
            # matmuls.  Tap k is the contiguous row block starting at k*TB.
            cin, cout = w_ref.shape[1], w_ref.shape[2]
            acc = jnp.zeros((rows, cout), jnp.float32)
            for k in range(_K):
                a = load(k, rows)                          # (rows, Cin) f32
                if cin == 1:
                    # First layer: Cin == 1 -> outer-product broadcast (VPU).
                    acc = acc + a * w_ref[k]
                else:
                    # bf16 x bf16 -> f32 accumulate: single MXU pass per tap.
                    acc = acc + jnp.dot(a.astype(jnp.bfloat16), w_ref[k],
                                        preferred_element_type=jnp.float32)
            # TODO(synk): Dropout(0.2) is identity at inference; training-mode
            # dropout / BN batch statistics are not reproduced here.
            return jnp.maximum(acc + b_ref[...], 0.0)      # bias + ReLU

        def maxpool2(src_ref, dst_ref, n_pos):
            # MaxPool1d(2): positions (2i, 2i+1) are the contiguous row blocks
            # [2i*TB, ...) and [(2i+1)*TB, ...); pure VPU max, no MXU.
            for i in range(n_pos):
                lo = src_ref[pl.ds((2 * i) * TB, TB), :]
                hi = src_ref[pl.ds((2 * i + 1) * TB, TB), :]
                dst_ref[pl.ds(i * TB, TB), :] = jnp.maximum(lo, hi)

        def reader(ref):
            return lambda k, rows: ref[pl.ds(k * TB, rows), :]

        load_x = lambda k, rows: x_ref[0, pl.ds(k * TB, rows), :]

        s1[...] = conv_relu(load_x, w1, b1, n1)          # Conv1d(1,   16, 5)
        s2[...] = conv_relu(reader(s1), w2, b2, n2)      # Conv1d(16,  32, 5)
        maxpool2(s2, p1, l2p)                            # MaxPool1d(2)
        s3[...] = conv_relu(reader(p1), w3, b3, n3)      # Conv1d(32,  64, 5)
        s4[...] = conv_relu(reader(s3), w4, b4, n4)      # Conv1d(64, 128, 5)
        maxpool2(s4, p2, l4p)                            # MaxPool1d(2)
        s5[...] = conv_relu(reader(p2), w5, b5, n5)      # Conv1d(128, 256, 5)
        s6[...] = conv_relu(reader(s5), w6, b6, n6)      # Conv1d(256, 512, 5)

        # AdaptiveAvgPool1d(1): mean over the l6 valid positions per element.
        acc = s6[pl.ds(0, TB), :]
        for i in range(1, l6):
            acc = acc + s6[pl.ds(i * TB, TB), :]
        pooled = acc * (1.0 / l6)                        # (TB, 512)

        # Linear(512, 8) + Softmax(dim=1); tiny, keep it in full f32.
        logits = jnp.dot(pooled, lw_ref[...],
                         preferred_element_type=jnp.float32,
                         precision=_HI) + lb_ref[...]    # (TB, 8)
        z = logits - jnp.max(logits, axis=1, keepdims=True)
        e = jnp.exp(z)
        o_ref[0] = e / jnp.sum(e, axis=1, keepdims=True)

    return kernel


# ------------------------------ wrapper / glue -------------------------------

def _length_chain(L):
    l1 = L - 4
    l2 = l1 - 4
    l2p = l2 // 2
    l3 = l2p - 4
    l4 = l3 - 4
    l4p = l4 // 2
    l5 = l4p - 4
    l6 = l5 - 4
    assert l6 >= 1, f"input length {L} too short for Model_CNN_1D"
    return l1, l2, l2p, l3, l4, l4p, l5, l6


def _choose_tb(n):
    # Batch tile: big enough to give deep-layer matmuls a large M, small
    # enough to keep >= 2 grid steps (v7x has 2 TensorCores) when N allows.
    tb = min(64, n)
    while tb > 1 and -(-n // tb) < 2:
        tb //= 2
    return max(tb, 1)


def _fold_bn(conv_params, w_dtype=jnp.float32, eps=_EPS):
    """Fold BatchNorm1d (running stats) and the conv bias into the weights."""
    w, b, gamma, beta, mean, var = conv_params             # w: (Cout, Cin, K)
    scale = gamma * jax.lax.rsqrt(var + eps)                # (Cout,)
    w_f = w * scale[:, None, None]
    b_f = (b - mean) * scale + beta
    w_kc = jnp.transpose(w_f, (2, 1, 0)).astype(w_dtype)    # (K, Cin, Cout)
    return w_kc, b_f.reshape(1, -1).astype(jnp.float32)


def _resident_spec(shape):
    """Full-array block whose index never changes with the grid step, so it is
    DMA'd to VMEM once and stays resident across all batch tiles."""
    nd = len(shape)
    return pl.BlockSpec(shape, lambda n, _nd=nd: (0,) * _nd)


@jax.jit
def model_cnn_1d(x, params):
    """x: (N, 1, L) float32 (PyTorch NCL layout) -> (N, 8) softmax probs."""
    conv_ps = params[:6]
    lw, lb = params[6]
    N, c_in, L = x.shape
    assert c_in == 1

    lengths = _length_chain(L)
    l1, l2, l2p, l3, l4, l4p, l5, l6 = lengths
    TB = _choose_tb(N)
    n_tiles = -(-N // TB)
    N_pad = n_tiles * TB

    # Position-major, batch-tiled input layout:
    #   tile n, row j*TB + b, lane 0  <-  x[n*TB + b, 0, j]
    xf = jnp.reshape(x.astype(jnp.float32), (N, L))
    xf = jnp.pad(xf, ((0, N_pad - N), (0, 0)))
    x_slab = jnp.transpose(xf.reshape(n_tiles, TB, L), (0, 2, 1))
    x_slab = x_slab.reshape(n_tiles, L * TB, 1)

    args = [x_slab]
    specs = [pl.BlockSpec((1, L * TB, 1), lambda n: (n, 0, 0))]
    for cp in conv_ps:
        cin = cp[0].shape[1]
        w_dtype = jnp.float32 if cin == 1 else jnp.bfloat16   # conv1 is VPU-only
        w_kc, b_f = _fold_bn(cp, w_dtype)
        args += [w_kc, b_f]
        specs += [_resident_spec(w_kc.shape), _resident_spec(b_f.shape)]
    lw_t = jnp.transpose(lw).astype(jnp.float32)               # (512, 8)
    lb_r = lb.reshape(1, -1).astype(jnp.float32)               # (1, 8)
    args += [lw_t, lb_r]
    specs += [_resident_spec(lw_t.shape), _resident_spec(lb_r.shape)]

    couts = [cp[0].shape[0] for cp in conv_ps]                 # 16 ... 512
    scratch = [
        pltpu.VMEM((l1 * TB, couts[0]), jnp.float32),          # s1
        pltpu.VMEM((l2 * TB, couts[1]), jnp.float32),          # s2
        pltpu.VMEM((l2p * TB, couts[1]), jnp.float32),         # p1 (pooled)
        pltpu.VMEM((l3 * TB, couts[2]), jnp.float32),          # s3
        pltpu.VMEM((l4 * TB, couts[3]), jnp.float32),          # s4
        pltpu.VMEM((l4p * TB, couts[3]), jnp.float32),         # p2 (pooled)
        pltpu.VMEM((l5 * TB, couts[4]), jnp.float32),          # s5
        pltpu.VMEM((l6 * TB, couts[5]), jnp.float32),          # s6
    ]

    out = pl.pallas_call(
        _make_kernel(TB, lengths),
        grid=(n_tiles,),
        in_specs=specs,
        out_specs=pl.BlockSpec((1, TB, 8), lambda n: (n, 0, 0)),
        out_shape=jax.ShapeDtypeStruct((n_tiles, TB, 8), jnp.float32),
        scratch_shapes=scratch,
        compiler_params=pltpu.CompilerParams(
            dimension_semantics=("parallel",)),
    )(*args)
    return out.reshape(N_pad, 8)[:N]


# --------------------------- pure-JAX reference ------------------------------

def reference_model(x, params, eps=_EPS):
    def conv_block(h, p):
        w, b, gamma, beta, mean, var = p
        y = jax.lax.conv_general_dilated(
            h, w, window_strides=(1,), padding="VALID",
            dimension_numbers=("NCH", "OIH", "NCH"), precision=_HI)
        y = y + b[None, :, None]
        y = (y - mean[None, :, None]) * jax.lax.rsqrt(var[None, :, None] + eps)
        y = y * gamma[None, :, None] + beta[None, :, None]
        return jnp.maximum(y, 0.0)

    def maxpool2(h):
        n, c, l = h.shape
        return jnp.max(h[:, :, :(l // 2) * 2].reshape(n, c, l // 2, 2), axis=-1)

    c1, c2, c3, c4, c5, c6, (lw, lb) = params
    h = conv_block(x, c1)
    h = conv_block(h, c2)
    h = maxpool2(h)
    h = conv_block(h, c3)
    h = conv_block(h, c4)
    h = maxpool2(h)
    h = conv_block(h, c5)
    h = conv_block(h, c6)
    pooled = jnp.mean(h, axis=2)                                # (N, 512)
    logits = jnp.dot(pooled, lw.T, precision=_HI) + lb
    return jax.nn.softmax(logits, axis=1)


# --------------------------- parameter construction --------------------------

def init_conv_params(key, cin, cout, K=_K):
    k_w, k_b, k_g, k_be, k_m, k_v = jax.random.split(key, 6)
    fan_in = cin * K
    w = jax.random.normal(k_w, (cout, cin, K), jnp.float32) * jnp.sqrt(2.0 / fan_in)
    bound = 1.0 / jnp.sqrt(fan_in)
    b = jax.random.uniform(k_b, (cout,), jnp.float32, -bound, bound)
    gamma = 1.0 + 0.1 * jax.random.normal(k_g, (cout,), jnp.float32)
    beta = 0.1 * jax.random.normal(k_be, (cout,), jnp.float32)
    mean = 0.1 * jax.random.normal(k_m, (cout,), jnp.float32)
    var = jnp.abs(jax.random.normal(k_v, (cout,), jnp.float32)) + 0.5
    return (w, b, gamma, beta, mean, var)


def init_linear_params(key, din, dout):
    k_w, k_b = jax.random.split(key)
    bound = 1.0 / jnp.sqrt(din)
    w = jax.random.uniform(k_w, (dout, din), jnp.float32, -bound, bound)
    b = jax.random.uniform(k_b, (dout,), jnp.float32, -bound, bound)
    return (w, b)


# ----------------------------------- main ------------------------------------

if __name__ == "__main__":
    key = jax.random.PRNGKey(0)
    keys = jax.random.split(key, 8)
    params = (
        init_conv_params(keys[0], 1, 16),
        init_conv_params(keys[1], 16, 32),
        init_conv_params(keys[2], 32, 64),
        init_conv_params(keys[3], 64, 128),
        init_conv_params(keys[4], 128, 256),
        init_conv_params(keys[5], 256, 512),
        init_linear_params(keys[6], 512, 8),
    )
    # PyTorch input layout (N, C=1, L); L=64 keeps the length chain valid:
    # 64 -> 60 -> 56 -> 28 -> 24 -> 20 -> 10 -> 6 -> 2.
    # N=16 exercises batch tiling (TB=8) with 2 grid steps.
    x = jax.random.normal(keys[7], (16, 1, 64), jnp.float32)

    out = model_cnn_1d(x, params)
    jax.block_until_ready(out)

    assert out.shape == (16, 8)
    assert bool(jnp.all(jnp.isfinite(out)))
    assert bool(jnp.allclose(jnp.sum(out, axis=1), 1.0, atol=1e-4))

    ref = reference_model(x, params)
    # Kernel convs run as single-pass bf16 MXU matmuls (f32 accumulate), so
    # allow bf16-level numerical noise against the f32-HIGHEST reference.
    assert bool(jnp.allclose(out, ref, atol=2e-2, rtol=0.0)), (
        float(jnp.max(jnp.abs(out - ref))))

    print("KERNEL_OK")
</pallas_src>

<mosaic_0001>
module attributes {stable_mosaic.version = 11 : i64} {
  func.func @kernel(%arg0: i32, %arg1: memref<1x512x1xf32, #tpu.memory_space<vmem>>, %arg2: memref<5x1x16xf32, #tpu.memory_space<vmem>>, %arg3: memref<1x16xf32, #tpu.memory_space<vmem>>, %arg4: memref<5x16x32xbf16, #tpu.memory_space<vmem>>, %arg5: memref<1x32xf32, #tpu.memory_space<vmem>>, %arg6: memref<5x32x64xbf16, #tpu.memory_space<vmem>>, %arg7: memref<1x64xf32, #tpu.memory_space<vmem>>, %arg8: memref<5x64x128xbf16, #tpu.memory_space<vmem>>, %arg9: memref<1x128xf32, #tpu.memory_space<vmem>>, %arg10: memref<5x128x256xbf16, #tpu.memory_space<vmem>>, %arg11: memref<1x256xf32, #tpu.memory_space<vmem>>, %arg12: memref<5x256x512xbf16, #tpu.memory_space<vmem>>, %arg13: memref<1x512xf32, #tpu.memory_space<vmem>>, %arg14: memref<512x8xf32, #tpu.memory_space<vmem>>, %arg15: memref<1x8xf32, #tpu.memory_space<vmem>>, %arg16: memref<1x8x8xf32, #tpu.memory_space<vmem>>, %arg17: memref<480x16xf32, #tpu.memory_space<vmem>>, %arg18: memref<448x32xf32, #tpu.memory_space<vmem>>, %arg19: memref<224x32xf32, #tpu.memory_space<vmem>>, %arg20: memref<192x64xf32, #tpu.memory_space<vmem>>, %arg21: memref<160x128xf32, #tpu.memory_space<vmem>>, %arg22: memref<80x128xf32, #tpu.memory_space<vmem>>, %arg23: memref<48x256xf32, #tpu.memory_space<vmem>>, %arg24: memref<16x512xf32, #tpu.memory_space<vmem>>) attributes {dimension_semantics = [#tpu.dimension_semantics<parallel>], iteration_bounds = array<i64: 2>, scalar_prefetch = 0 : i64, scratch_operands = 8 : i64, tpu.core_type = #tpu.core_type<tc>, window_params = [{transform_indices = @transform_0, window_bounds = array<i64: 1, 512, 1>}, {pipeline_mode = #tpu.pipeline_mode<synchronous>, transform_indices = @transform_1, window_bounds = array<i64: 5, 1, 16>}, {pipeline_mode = #tpu.pipeline_mode<synchronous>, transform_indices = @transform_2, window_bounds = array<i64: 1, 16>}, {pipeline_mode = #tpu.pipeline_mode<synchronous>, transform_indices = @transform_3, window_bounds = array<i64: 5, 16, 32>}, {pipeline_mode = #tpu.pipeline_mode<synchronous>, transform_indices = @transform_4, window_bounds = array<i64: 1, 32>}, {pipeline_mode = #tpu.pipeline_mode<synchronous>, transform_indices = @transform_5, window_bounds = array<i64: 5, 32, 64>}, {pipeline_mode = #tpu.pipeline_mode<synchronous>, transform_indices = @transform_6, window_bounds = array<i64: 1, 64>}, {pipeline_mode = #tpu.pipeline_mode<synchronous>, transform_indices = @transform_7, window_bounds = array<i64: 5, 64, 128>}, {pipeline_mode = #tpu.pipeline_mode<synchronous>, transform_indices = @transform_8, window_bounds = array<i64: 1, 128>}, {pipeline_mode = #tpu.pipeline_mode<synchronous>, transform_indices = @transform_9, window_bounds = array<i64: 5, 128, 256>}, {pipeline_mode = #tpu.pipeline_mode<synchronous>, transform_indices = @transform_10, window_bounds = array<i64: 1, 256>}, {pipeline_mode = #tpu.pipeline_mode<synchronous>, transform_indices = @transform_11, window_bounds = array<i64: 5, 256, 512>}, {pipeline_mode = #tpu.pipeline_mode<synchronous>, transform_indices = @transform_12, window_bounds = array<i64: 1, 512>}, {pipeline_mode = #tpu.pipeline_mode<synchronous>, transform_indices = @transform_13, window_bounds = array<i64: 512, 8>}, {pipeline_mode = #tpu.pipeline_mode<synchronous>, transform_indices = @transform_14, window_bounds = array<i64: 1, 8>}, {transform_indices = @transform_15, window_bounds = array<i64: 1, 8, 8>}]} {
    %cst = arith.constant 0.000000e+00 : f32
    %0 = vector.broadcast %cst : f32 to vector<480x16xf32>
    %c0 = arith.constant 0 : index
    %c0_0 = arith.constant 0 : index
    %c0_1 = arith.constant 0 : index
    %1 = vector.load %arg1[%c0, %c0_0, %c0_1] : memref<1x512x1xf32, #tpu.memory_space<vmem>>, vector<1x480x1xf32>
    %2 = vector.shape_cast %1 : vector<1x480x1xf32> to vector<480x1xf32>
    %c0_2 = arith.constant 0 : index
    %c0_3 = arith.constant 0 : index
    %c0_4 = arith.constant 0 : index
    %3 = vector.load %arg2[%c0_2, %c0_3, %c0_4] : memref<5x1x16xf32, #tpu.memory_space<vmem>>, vector<1x1x16xf32>
    %4 = vector.shape_cast %3 : vector<1x1x16xf32> to vector<1x16xf32>
    %5 = vector.broadcast %2 : vector<480x1xf32> to vector<480x16xf32>
    %6 = vector.broadcast %4 : vector<1x16xf32> to vector<480x16xf32>
    %7 = arith.mulf %5, %6 : vector<480x16xf32>
    %8 = arith.addf %0, %7 : vector<480x16xf32>
    %c0_5 = arith.constant 0 : index
    %c8 = arith.constant 8 : index
    %c0_6 = arith.constant 0 : index
    %9 = vector.load %arg1[%c0_5, %c8, %c0_6] : memref<1x512x1xf32, #tpu.memory_space<vmem>>, vector<1x480x1xf32>
    %10 = vector.shape_cast %9 : vector<1x480x1xf32> to vector<480x1xf32>
    %c1 = arith.constant 1 : index
    %c0_7 = arith.constant 0 : index
    %c0_8 = arith.constant 0 : index
    %11 = vector.load %arg2[%c1, %c0_7, %c0_8] : memref<5x1x16xf32, #tpu.memory_space<vmem>>, vector<1x1x16xf32>
    %12 = vector.shape_cast %11 : vector<1x1x16xf32> to vector<1x16xf32>
    %13 = vector.broadcast %10 : vector<480x1xf32> to vector<480x16xf32>
    %14 = vector.broadcast %12 : vector<1x16xf32> to vector<480x16xf32>
    %15 = arith.mulf %13, %14 : vector<480x16xf32>
    %16 = arith.addf %8, %15 : vector<480x16xf32>
    %c0_9 = arith.constant 0 : index
    %c16 = arith.constant 16 : index
    %c0_10 = arith.constant 0 : index
    %17 = vector.load %arg1[%c0_9, %c16, %c0_10] : memref<1x512x1xf32, #tpu.memory_space<vmem>>, vector<1x480x1xf32>
    %18 = vector.shape_cast %17 : vector<1x480x1xf32> to vector<480x1xf32>
    %c2 = arith.constant 2 : index
    %c0_11 = arith.constant 0 : index
    %c0_12 = arith.constant 0 : index
    %19 = vector.load %arg2[%c2, %c0_11, %c0_12] : memref<5x1x16xf32, #tpu.memory_space<vmem>>, vector<1x1x16xf32>
    %20 = vector.shape_cast %19 : vector<1x1x16xf32> to vector<1x16xf32>
    %21 = vector.broadcast %18 : vector<480x1xf32> to vector<480x16xf32>
    %22 = vector.broadcast %20 : vector<1x16xf32> to vector<480x16xf32>
    %23 = arith.mulf %21, %22 : vector<480x16xf32>
    %24 = arith.addf %16, %23 : vector<480x16xf32>
    %c0_13 = arith.constant 0 : index
    %c24 = arith.constant 24 : index
    %c0_14 = arith.constant 0 : index
    %25 = vector.load %arg1[%c0_13, %c24, %c0_14] : memref<1x512x1xf32, #tpu.memory_space<vmem>>, vector<1x480x1xf32>
    %26 = vector.shape_cast %25 : vector<1x480x1xf32> to vector<480x1xf32>
    %c3 = arith.constant 3 : index
    %c0_15 = arith.constant 0 : index
    %c0_16 = arith.constant 0 : index
    %27 = vector.load %arg2[%c3, %c0_15, %c0_16] : memref<5x1x16xf32, #tpu.memory_space<vmem>>, vector<1x1x16xf32>
    %28 = vector.shape_cast %27 : vector<1x1x16xf32> to vector<1x16xf32>
    %29 = vector.broadcast %26 : vector<480x1xf32> to vector<480x16xf32>
    %30 = vector.broadcast %28 : vector<1x16xf32> to vector<480x16xf32>
    %31 = arith.mulf %29, %30 : vector<480x16xf32>
    %32 = arith.addf %24, %31 : vector<480x16xf32>
    %c0_17 = arith.constant 0 : index
    %c32 = arith.constant 32 : index
    %c0_18 = arith.constant 0 : index
    %33 = vector.load %arg1[%c0_17, %c32, %c0_18] : memref<1x512x1xf32, #tpu.memory_space<vmem>>, vector<1x480x1xf32>
    %34 = vector.shape_cast %33 : vector<1x480x1xf32> to vector<480x1xf32>
    %c4 = arith.constant 4 : index
    %c0_19 = arith.constant 0 : index
    %c0_20 = arith.constant 0 : index
    %35 = vector.load %arg2[%c4, %c0_19, %c0_20] : memref<5x1x16xf32, #tpu.memory_space<vmem>>, vector<1x1x16xf32>
    %36 = vector.shape_cast %35 : vector<1x1x16xf32> to vector<1x16xf32>
    %37 = vector.broadcast %34 : vector<480x1xf32> to vector<480x16xf32>
    %38 = vector.broadcast %36 : vector<1x16xf32> to vector<480x16xf32>
    %39 = arith.mulf %37, %38 : vector<480x16xf32>
    %40 = arith.addf %32, %39 : vector<480x16xf32>
    %c0_21 = arith.constant 0 : index
    %c0_22 = arith.constant 0 : index
    %41 = vector.load %arg3[%c0_21, %c0_22] : memref<1x16xf32, #tpu.memory_space<vmem>>, vector<1x16xf32>
    %42 = vector.broadcast %41 : vector<1x16xf32> to vector<480x16xf32>
    %43 = arith.addf %40, %42 : vector<480x16xf32>
    %cst_23 = arith.constant 0.000000e+00 : f32
    %44 = vector.broadcast %cst_23 : f32 to vector<480x16xf32>
    %45 = arith.maximumf %43, %44 : vector<480x16xf32>
    %c0_24 = arith.constant 0 : index
    %c0_25 = arith.constant 0 : index
    %46 = vector.load %arg17[%c0_24, %c0_25] : memref<480x16xf32, #tpu.memory_space<vmem>>, vector<480x16xf32>
    tpu.vector_store %arg17[%c0_24, %c0_25], %45 {strides = array<i32>} : memref<480x16xf32, #tpu.memory_space<vmem>>, vector<480x16xf32>,
    %cst_26 = arith.constant 0.000000e+00 : f32
    %47 = vector.broadcast %cst_26 : f32 to vector<448x32xf32>
    %c0_27 = arith.constant 0 : index
    %c0_28 = arith.constant 0 : index
    %48 = vector.load %arg17[%c0_27, %c0_28] : memref<480x16xf32, #tpu.memory_space<vmem>>, vector<448x16xf32>
    %49 = arith.truncf %48 : vector<448x16xf32> to vector<448x16xbf16>
    %c0_29 = arith.constant 0 : index
    %c0_30 = arith.constant 0 : index
    %c0_31 = arith.constant 0 : index
    %50 = vector.load %arg4[%c0_29, %c0_30, %c0_31] : memref<5x16x32xbf16, #tpu.memory_space<vmem>>, vector<1x16x32xbf16>
    %51 = vector.shape_cast %50 : vector<1x16x32xbf16> to vector<16x32xbf16>
    %cst_32 = arith.constant dense<0.000000e+00> : vector<448x32xf32>
    %52 = tpu.matmul %49, %51, %cst_32 {dimension_numbers = #tpu.dot_dimension_numbers<[1], [0], [0], [1], [0, 0, 1, 1], [], []>} : vector<448x16xbf16>, vector<16x32xbf16>, vector<448x32xf32> -> vector<448x32xf32>
    %53 = arith.addf %47, %52 : vector<448x32xf32>
    %c8_33 = arith.constant 8 : index
    %c0_34 = arith.constant 0 : index
    %54 = vector.load %arg17[%c8_33, %c0_34] : memref<480x16xf32, #tpu.memory_space<vmem>>, vector<448x16xf32>
    %55 = arith.truncf %54 : vector<448x16xf32> to vector<448x16xbf16>
    %c1_35 = arith.constant 1 : index
    %c0_36 = arith.constant 0 : index
    %c0_37 = arith.constant 0 : index
    %56 = vector.load %arg4[%c1_35, %c0_36, %c0_37] : memref<5x16x32xbf16, #tpu.memory_space<vmem>>, vector<1x16x32xbf16>
    %57 = vector.shape_cast %56 : vector<1x16x32xbf16> to vector<16x32xbf16>
    %cst_38 = arith.constant dense<0.000000e+00> : vector<448x32xf32>
    %58 = tpu.matmul %55, %57, %cst_38 {dimension_numbers = #tpu.dot_dimension_numbers<[1], [0], [0], [1], [0, 0, 1, 1], [], []>} : vector<448x16xbf16>, vector<16x32xbf16>, vector<448x32xf32> -> vector<448x32xf32>
    %59 = arith.addf %53, %58 : vector<448x32xf32>
    %c16_39 = arith.constant 16 : index
    %c0_40 = arith.constant 0 : index
    %60 = vector.load %arg17[%c16_39, %c0_40] : memref<480x16xf32, #tpu.memory_space<vmem>>, vector<448x16xf32>
    %61 = arith.truncf %60 : vector<448x16xf32> to vector<448x16xbf16>
    %c2_41 = arith.constant 2 : index
    %c0_42 = arith.constant 0 : index
    %c0_43 = arith.constant 0 : index
    %62 = vector.load %arg4[%c2_41, %c0_42, %c0_43] : memref<5x16x32xbf16, #tpu.memory_space<vmem>>, vector<1x16x32xbf16>
    %63 = vector.shape_cast %62 : vector<1x16x32xbf16> to vector<16x32xbf16>
    %cst_44 = arith.constant dense<0.000000e+00> : vector<448x32xf32>
    %64 = tpu.matmul %61, %63, %cst_44 {dimension_numbers = #tpu.dot_dimension_numbers<[1], [0], [0], [1], [0, 0, 1, 1], [], []>} : vector<448x16xbf16>, vector<16x32xbf16>, vector<448x32xf32> -> vector<448x32xf32>
    %65 = arith.addf %59, %64 : vector<448x32xf32>
    %c24_45 = arith.constant 24 : index
    %c0_46 = arith.constant 0 : index
    %66 = vector.load %arg17[%c24_45, %c0_46] : memref<480x16xf32, #tpu.memory_space<vmem>>, vector<448x16xf32>
    %67 = arith.truncf %66 : vector<448x16xf32> to vector<448x16xbf16>
    %c3_47 = arith.constant 3 : index
    %c0_48 = arith.constant 0 : index
    %c0_49 = arith.constant 0 : index
    %68 = vector.load %arg4[%c3_47, %c0_48, %c0_49] : memref<5x16x32xbf16, #tpu.memory_space<vmem>>, vector<1x16x32xbf16>
    %69 = vector.shape_cast %68 : vector<1x16x32xbf16> to vector<16x32xbf16>
    %cst_50 = arith.constant dense<0.000000e+00> : vector<448x32xf32>
    %70 = tpu.matmul %67, %69, %cst_50 {dimension_numbers = #tpu.dot_dimension_numbers<[1], [0], [0], [1], [0, 0, 1, 1], [], []>} : vector<448x16xbf16>, vector<16x32xbf16>, vector<448x32xf32> -> vector<448x32xf32>
    %71 = arith.addf %65, %70 : vector<448x32xf32>
    %c32_51 = arith.constant 32 : index
    %c0_52 = arith.constant 0 : index
    %72 = vector.load %arg17[%c32_51, %c0_52] : memref<480x16xf32, #tpu.memory_space<vmem>>, vector<448x16xf32>
    %73 = arith.truncf %72 : vector<448x16xf32> to vector<448x16xbf16>
    %c4_53 = arith.constant 4 : index
    %c0_54 = arith.constant 0 : index
    %c0_55 = arith.constant 0 : index
    %74 = vector.load %arg4[%c4_53, %c0_54, %c0_55] : memref<5x16x32xbf16, #tpu.memory_space<vmem>>, vector<1x16x32xbf16>
    %75 = vector.shape_cast %74 : vector<1x16x32xbf16> to vector<16x32xbf16>
    %cst_56 = arith.constant dense<0.000000e+00> : vector<448x32xf32>
    %76 = tpu.matmul %73, %75, %cst_56 {dimension_numbers = #tpu.dot_dimension_numbers<[1], [0], [0], [1], [0, 0, 1, 1], [], []>} : vector<448x16xbf16>, vector<16x32xbf16>, vector<448x32xf32> -> vector<448x32xf32>
    %77 = arith.addf %71, %76 : vector<448x32xf32>
    %c0_57 = arith.constant 0 : index
    %c0_58 = arith.constant 0 : index
    %78 = vector.load %arg5[%c0_57, %c0_58] : memref<1x32xf32, #tpu.memory_space<vmem>>, vector<1x32xf32>
    %79 = vector.broadcast %78 : vector<1x32xf32> to vector<448x32xf32>
    %80 = arith.addf %77, %79 : vector<448x32xf32>
    %cst_59 = arith.constant 0.000000e+00 : f32
    %81 = vector.broadcast %cst_59 : f32 to vector<448x32xf32>
    %82 = arith.maximumf %80, %81 : vector<448x32xf32>
    %c0_60 = arith.constant 0 : index
    %c0_61 = arith.constant 0 : index
    %83 = vector.load %arg18[%c0_60, %c0_61] : memref<448x32xf32, #tpu.memory_space<vmem>>, vector<448x32xf32>
    tpu.vector_store %arg18[%c0_60, %c0_61], %82 {strides = array<i32>} : memref<448x32xf32, #tpu.memory_space<vmem>>, vector<448x32xf32>,
    %c0_62 = arith.constant 0 : index
    %c0_63 = arith.constant 0 : index
    %84 = vector.load %arg18[%c0_62, %c0_63] : memref<448x32xf32, #tpu.memory_space<vmem>>, vector<8x32xf32>
    %c8_64 = arith.constant 8 : index
    %c0_65 = arith.constant 0 : index
    %85 = vector.load %arg18[%c8_64, %c0_65] : memref<448x32xf32, #tpu.memory_space<vmem>>, vector<8x32xf32>
    %86 = arith.maximumf %84, %85 : vector<8x32xf32>
    %c0_66 = arith.constant 0 : index
    %c0_67 = arith.constant 0 : index
    %87 = vector.load %arg19[%c0_66, %c0_67] : memref<224x32xf32, #tpu.memory_space<vmem>>, vector<8x32xf32>
    tpu.vector_store %arg19[%c0_66, %c0_67], %86 {strides = array<i32>} : memref<224x32xf32, #tpu.memory_space<vmem>>, vector<8x32xf32>,
    %c16_68 = arith.constant 16 : index
    %c0_69 = arith.constant 0 : index
    %88 = vector.load %arg18[%c16_68, %c0_69] : memref<448x32xf32, #tpu.memory_space<vmem>>, vector<8x32xf32>
    %c24_70 = arith.constant 24 : index
    %c0_71 = arith.constant 0 : index
    %89 = vector.load %arg18[%c24_70, %c0_71] : memref<448x32xf32, #tpu.memory_space<vmem>>, vector<8x32xf32>
    %90 = arith.maximumf %88, %89 : vector<8x32xf32>
    %c8_72 = arith.constant 8 : index
    %c0_73 = arith.constant 0 : index
    %91 = vector.load %arg19[%c8_72, %c0_73] : memref<224x32xf32, #tpu.memory_space<vmem>>, vector<8x32xf32>
    tpu.vector_store %arg19[%c8_72, %c0_73], %90 {strides = array<i32>} : memref<224x32xf32, #tpu.memory_space<vmem>>, vector<8x32xf32>,
    %c32_74 = arith.constant 32 : index
    %c0_75 = arith.constant 0 : index
    %92 = vector.load %arg18[%c32_74, %c0_75] : memref<448x32xf32, #tpu.memory_space<vmem>>, vector<8x32xf32>
    %c40 = arith.constant 40 : index
    %c0_76 = arith.constant 0 : index
    %93 = vector.load %arg18[%c40, %c0_76] : memref<448x32xf32, #tpu.memory_space<vmem>>, vector<8x32xf32>
    %94 = arith.maximumf %92, %93 : vector<8x32xf32>
    %c16_77 = arith.constant 16 : index
    %c0_78 = arith.constant 0 : index
    %95 = vector.load %arg19[%c16_77, %c0_78] : memref<224x32xf32, #tpu.memory_space<vmem>>, vector<8x32xf32>
    tpu.vector_store %arg19[%c16_77, %c0_78], %94 {strides = array<i32>} : memref<224x32xf32, #tpu.memory_space<vmem>>, vector<8x32xf32>,
    %c48 = arith.constant 48 : index
    %c0_79 = arith.constant 0 : index
    %96 = vector.load %arg18[%c48, %c0_79] : memref<448x32xf32, #tpu.memory_space<vmem>>, vector<8x32xf32>
    %c56 = arith.constant 56 : index
    %c0_80 = arith.constant 0 : index
    %97 = vector.load %arg18[%c56, %c0_80] : memref<448x32xf32, #tpu.memory_space<vmem>>, vector<8x32xf32>
    %98 = arith.maximumf %96, %97 : vector<8x32xf32>
    %c24_81 = arith.constant 24 : index
    %c0_82 = arith.constant 0 : index
    %99 = vector.load %arg19[%c24_81, %c0_82] : memref<224x32xf32, #tpu.memory_space<vmem>>, vector<8x32xf32>
    tpu.vector_store %arg19[%c24_81, %c0_82], %98 {strides = array<i32>} : memref<224x32xf32, #tpu.memory_space<vmem>>, vector<8x32xf32>,
    %c64 = arith.constant 64 : index
    %c0_83 = arith.constant 0 : index
    %100 = vector.load %arg18[%c64, %c0_83] : memref<448x32xf32, #tpu.memory_space<vmem>>, vector<8x32xf32>
    %c72 = arith.constant 72 : index
    %c0_84 = arith.constant 0 : index
    %101 = vector.load %arg18[%c72, %c0_84] : memref<448x32xf32, #tpu.memory_space<vmem>>, vector<8x32xf32>
    %102 = arith.maximumf %100, %101 : vector<8x32xf32>
    %c32_85 = arith.constant 32 : index
    %c0_86 = arith.constant 0 : index
    %103 = vector.load %arg19[%c32_85, %c0_86] : memref<224x32xf32, #tpu.memory_space<vmem>>, vector<8x32xf32>
    tpu.vector_store %arg19[%c32_85, %c0_86], %102 {strides = array<i32>} : memref<224x32xf32, #tpu.memory_space<vmem>>, vector<8x32xf32>,
    %c80 = arith.constant 80 : index
    %c0_87 = arith.constant 0 : index
    %104 = vector.load %arg18[%c80, %c0_87] : memref<448x32xf32, #tpu.memory_space<vmem>>, vector<8x32xf32>
    %c88 = arith.constant 88 : index
    %c0_88 = arith.constant 0 : index
    %105 = vector.load %arg18[%c88, %c0_88] : memref<448x32xf32, #tpu.memory_space<vmem>>, vector<8x32xf32>
    %106 = arith.maximumf %104, %105 : vector<8x32xf32>
    %c40_89 = arith.constant 40 : index
    %c0_90 = arith.constant 0 : index
    %107 = vector.load %arg19[%c40_89, %c0_90] : memref<224x32xf32, #tpu.memory_space<vmem>>, vector<8x32xf32>
    tpu.vector_store %arg19[%c40_89, %c0_90], %106 {strides = array<i32>} : memref<224x32xf32, #tpu.memory_space<vmem>>, vector<8x32xf32>,
    %c96 = arith.constant 96 : index
    %c0_91 = arith.constant 0 : index
    %108 = vector.load %arg18[%c96, %c0_91] : memref<448x32xf32, #tpu.memory_space<vmem>>, vector<8x32xf32>
    %c104 = arith.constant 104 : index
    %c0_92 = arith.constant 0 : index
    %109 = vector.load %arg18[%c104, %c0_92] : memref<448x32xf32, #tpu.memory_space<vmem>>, vector<8x32xf32>
    %110 = arith.maximumf %108, %109 : vector<8x32xf32>
    %c48_93 = arith.constant 48 : index
    %c0_94 = arith.constant 0 : index
    %111 = vector.load %arg19[%c48_93, %c0_94] : memref<224x32xf32, #tpu.memory_space<vmem>>, vector<8x32xf32>
    tpu.vector_store %arg19[%c48_93, %c0_94], %110 {strides = array<i32>} : memref<224x32xf32, #tpu.memory_space<vmem>>, vector<8x32xf32>,
    %c112 = arith.constant 112 : index
    %c0_95 = arith.constant 0 : index
    %112 = vector.load %arg18[%c112, %c0_95] : memref<448x32xf32, #tpu.memory_space<vmem>>, vector<8x32xf32>
    %c120 = arith.constant 120 : index
    %c0_96 = arith.constant 0 : index
    %113 = vector.load %arg18[%c120, %c0_96] : memref<448x32xf32, #tpu.memory_space<vmem>>, vector<8x32xf32>
    %114 = arith.maximumf %112, %113 : vector<8x32xf32>
    %c56_97 = arith.constant 56 : index
    %c0_98 = arith.constant 0 : index
    %115 = vector.load %arg19[%c56_97, %c0_98] : memref<224x32xf32, #tpu.memory_space<vmem>>, vector<8x32xf32>
    tpu.vector_store %arg19[%c56_97, %c0_98], %114 {strides = array<i32>} : memref<224x32xf32, #tpu.memory_space<vmem>>, vector<8x32xf32>,
    %c128 = arith.constant 128 : index
    %c0_99 = arith.constant 0 : index
    %116 = vector.load %arg18[%c128, %c0_99] : memref<448x32xf32, #tpu.memory_space<vmem>>, vector<8x32xf32>
    %c136 = arith.constant 136 : index
    %c0_100 = arith.constant 0 : index
    %117 = vector.load %arg18[%c136, %c0_100] : memref<448x32xf32, #tpu.memory_space<vmem>>, vector<8x32xf32>
    %118 = arith.maximumf %116, %117 : vector<8x32xf32>
    %c64_101 = arith.constant 64 : index
    %c0_102 = arith.constant 0 : index
    %119 = vector.load %arg19[%c64_101, %c0_102] : memref<224x32xf32, #tpu.memory_space<vmem>>, vector<8x32xf32>
    tpu.vector_store %arg19[%c64_101, %c0_102], %118 {strides = array<i32>} : memref<224x32xf32, #tpu.memory_space<vmem>>, vector<8x32xf32>,
    %c144 = arith.constant 144 : index
    %c0_103 = arith.constant 0 : index
    %120 = vector.load %arg18[%c144, %c0_103] : memref<448x32xf32, #tpu.memory_space<vmem>>, vector<8x32xf32>
    %c152 = arith.constant 152 : index
    %c0_104 = arith.constant 0 : index
    %121 = vector.load %arg18[%c152, %c0_104] : memref<448x32xf32, #tpu.memory_space<vmem>>, vector<8x32xf32>
    %122 = arith.maximumf %120, %121 : vector<8x32xf32>
    %c72_105 = arith.constant 72 : index
    %c0_106 = arith.constant 0 : index
    %123 = vector.load %arg19[%c72_105, %c0_106] : memref<224x32xf32, #tpu.memory_space<vmem>>, vector<8x32xf32>
    tpu.vector_store %arg19[%c72_105, %c0_106], %122 {strides = array<i32>} : memref<224x32xf32, #tpu.memory_space<vmem>>, vector<8x32xf32>,
    %c160 = arith.constant 160 : index
    %c0_107 = arith.constant 0 : index
    %124 = vector.load %arg18[%c160, %c0_107] : memref<448x32xf32, #tpu.memory_space<vmem>>, vector<8x32xf32>
    %c168 = arith.constant 168 : index
    %c0_108 = arith.constant 0 : index
    %125 = vector.load %arg18[%c168, %c0_108] : memref<448x32xf32, #tpu.memory_space<vmem>>, vector<8x32xf32>
    %126 = arith.maximumf %124, %125 : vector<8x32xf32>
    %c80_109 = arith.constant 80 : index
    %c0_110 = arith.constant 0 : index
    %127 = vector.load %arg19[%c80_109, %c0_110] : memref<224x32xf32, #tpu.memory_space<vmem>>, vector<8x32xf32>
    tpu.vector_store %arg19[%c80_109, %c0_110], %126 {strides = array<i32>} : memref<224x32xf32, #tpu.memory_space<vmem>>, vector<8x32xf32>,
    %c176 = arith.constant 176 : index
    %c0_111 = arith.constant 0 : index
    %128 = vector.load %arg18[%c176, %c0_111] : memref<448x32xf32, #tpu.memory_space<vmem>>, vector<8x32xf32>
    %c184 = arith.constant 184 : index
    %c0_112 = arith.constant 0 : index
    %129 = vector.load %arg18[%c184, %c0_112] : memref<448x32xf32, #tpu.memory_space<vmem>>, vector<8x32xf32>
    %130 = arith.maximumf %128, %129 : vector<8x32xf32>
    %c88_113 = arith.constant 88 : index
    %c0_114 = arith.constant 0 : index
    %131 = vector.load %arg19[%c88_113, %c0_114] : memref<224x32xf32, #tpu.memory_space<vmem>>, vector<8x32xf32>
    tpu.vector_store %arg19[%c88_113, %c0_114], %130 {strides = array<i32>} : memref<224x32xf32, #tpu.memory_space<vmem>>, vector<8x32xf32>,
    %c192 = arith.constant 192 : index
    %c0_115 = arith.constant 0 : index
    %132 = vector.load %arg18[%c192, %c0_115] : memref<448x32xf32, #tpu.memory_space<vmem>>, vector<8x32xf32>
    %c200 = arith.constant 200 : index
    %c0_116 = arith.constant 0 : index
    %133 = vector.load %arg18[%c200, %c0_116] : memref<448x32xf32, #tpu.memory_space<vmem>>, vector<8x32xf32>
    %134 = arith.maximumf %132, %133 : vector<8x32xf32>
    %c96_117 = arith.constant 96 : index
    %c0_118 = arith.constant 0 : index
    %135 = vector.load %arg19[%c96_117, %c0_118] : memref<224x32xf32, #tpu.memory_space<vmem>>, vector<8x32xf32>
    tpu.vector_store %arg19[%c96_117, %c0_118], %134 {strides = array<i32>} : memref<224x32xf32, #tpu.memory_space<vmem>>, vector<8x32xf32>,
    %c208 = arith.constant 208 : index
    %c0_119 = arith.constant 0 : index
    %136 = vector.load %arg18[%c208, %c0_119] : memref<448x32xf32, #tpu.memory_space<vmem>>, vector<8x32xf32>
    %c216 = arith.constant 216 : index
    %c0_120 = arith.constant 0 : index
    %137 = vector.load %arg18[%c216, %c0_120] : memref<448x32xf32, #tpu.memory_space<vmem>>, vector<8x32xf32>
    %138 = arith.maximumf %136, %137 : vector<8x32xf32>
    %c104_121 = arith.constant 104 : index
    %c0_122 = arith.constant 0 : index
    %139 = vector.load %arg19[%c104_121, %c0_122] : memref<224x32xf32, #tpu.memory_space<vmem>>, vector<8x32xf32>
    tpu.vector_store %arg19[%c104_121, %c0_122], %138 {strides = array<i32>} : memref<224x32xf32, #tpu.memory_space<vmem>>, vector<8x32xf32>,
    %c224 = arith.constant 224 : index
    %c0_123 = arith.constant 0 : index
    %140 = vector.load %arg18[%c224, %c0_123] : memref<448x32xf32, #tpu.memory_space<vmem>>, vector<8x32xf32>
    %c232 = arith.constant 232 : index
    %c0_124 = arith.constant 0 : index
    %141 = vector.load %arg18[%c232, %c0_124] : memref<448x32xf32, #tpu.memory_space<vmem>>, vector<8x32xf32>
    %142 = arith.maximumf %140, %141 : vector<8x32xf32>
    %c112_125 = arith.constant 112 : index
    %c0_126 = arith.constant 0 : index
    %143 = vector.load %arg19[%c112_125, %c0_126] : memref<224x32xf32, #tpu.memory_space<vmem>>, vector<8x32xf32>
    tpu.vector_store %arg19[%c112_125, %c0_126], %142 {strides = array<i32>} : memref<224x32xf32, #tpu.memory_space<vmem>>, vector<8x32xf32>,
    %c240 = arith.constant 240 : index
    %c0_127 = arith.constant 0 : index
    %144 = vector.load %arg18[%c240, %c0_127] : memref<448x32xf32, #tpu.memory_space<vmem>>, vector<8x32xf32>
    %c248 = arith.constant 248 : index
    %c0_128 = arith.constant 0 : index
    %145 = vector.load %arg18[%c248, %c0_128] : memref<448x32xf32, #tpu.memory_space<vmem>>, vector<8x32xf32>
    %146 = arith.maximumf %144, %145 : vector<8x32xf32>
    %c120_129 = arith.constant 120 : index
    %c0_130 = arith.constant 0 : index
    %147 = vector.load %arg19[%c120_129, %c0_130] : memref<224x32xf32, #tpu.memory_space<vmem>>, vector<8x32xf32>
    tpu.vector_store %arg19[%c120_129, %c0_130], %146 {strides = array<i32>} : memref<224x32xf32, #tpu.memory_space<vmem>>, vector<8x32xf32>,
    %c256 = arith.constant 256 : index
    %c0_131 = arith.constant 0 : index
    %148 = vector.load %arg18[%c256, %c0_131] : memref<448x32xf32, #tpu.memory_space<vmem>>, vector<8x32xf32>
    %c264 = arith.constant 264 : index
    %c0_132 = arith.constant 0 : index
    %149 = vector.load %arg18[%c264, %c0_132] : memref<448x32xf32, #tpu.memory_space<vmem>>, vector<8x32xf32>
    %150 = arith.maximumf %148, %149 : vector<8x32xf32>
    %c128_133 = arith.constant 128 : index
    %c0_134 = arith.constant 0 : index
    %151 = vector.load %arg19[%c128_133, %c0_134] : memref<224x32xf32, #tpu.memory_space<vmem>>, vector<8x32xf32>
    tpu.vector_store %arg19[%c128_133, %c0_134], %150 {strides = array<i32>} : memref<224x32xf32, #tpu.memory_space<vmem>>, vector<8x32xf32>,
    %c272 = arith.constant 272 : index
    %c0_135 = arith.constant 0 : index
    %152 = vector.load %arg18[%c272, %c0_135] : memref<448x32xf32, #tpu.memory_space<vmem>>, vector<8x32xf32>
    %c280 = arith.constant 280 : index
    %c0_136 = arith.constant 0 : index
    %153 = vector.load %arg18[%c280, %c0_136] : memref<448x32xf32, #tpu.memory_space<vmem>>, vector<8x32xf32>
    %154 = arith.maximumf %152, %153 : vector<8x32xf32>
    %c136_137 = arith.constant 136 : index
    %c0_138 = arith.constant 0 : index
    %155 = vector.load %arg19[%c136_137, %c0_138] : memref<224x32xf32, #tpu.memory_space<vmem>>, vector<8x32xf32>
    tpu.vector_store %arg19[%c136_137, %c0_138], %154 {strides = array<i32>} : memref<224x32xf32, #tpu.memory_space<vmem>>, vector<8x32xf32>,
    %c288 = arith.constant 288 : index
    %c0_139 = arith.constant 0 : index
    %156 = vector.load %arg18[%c288, %c0_139] : memref<448x32xf32, #tpu.memory_space<vmem>>, vector<8x32xf32>
    %c296 = arith.constant 296 : index
    %c0_140 = arith.constant 0 : index
    %157 = vector.load %arg18[%c296, %c0_140] : memref<448x32xf32, #tpu.memory_space<vmem>>, vector<8x32xf32>
    %158 = arith.maximumf %156, %157 : vector<8x32xf32>
    %c144_141 = arith.constant 144 : index
    %c0_142 = arith.constant 0 : index
    %159 = vector.load %arg19[%c144_141, %c0_142] : memref<224x32xf32, #tpu.memory_space<vmem>>, vector<8x32xf32>
    tpu.vector_store %arg19[%c144_141, %c0_142], %158 {strides = array<i32>} : memref<224x32xf32, #tpu.memory_space<vmem>>, vector<8x32xf32>,
    %c304 = arith.constant 304 : index
    %c0_143 = arith.constant 0 : index
    %160 = vector.load %arg18[%c304, %c0_143] : memref<448x32xf32, #tpu.memory_space<vmem>>, vector<8x32xf32>
    %c312 = arith.constant 312 : index
    %c0_144 = arith.constant 0 : index
    %161 = vector.load %arg18[%c312, %c0_144] : memref<448x32xf32, #tpu.memory_space<vmem>>, vector<8x32xf32>
    %162 = arith.maximumf %160, %161 : vector<8x32xf32>
    %c152_145 = arith.constant 152 : index
    %c0_146 = arith.constant 0 : index
    %163 = vector.load %arg19[%c152_145, %c0_146] : memref<224x32xf32, #tpu.memory_space<vmem>>, vector<8x32xf32>
    tpu.vector_store %arg19[%c152_145, %c0_146], %162 {strides = array<i32>} : memref<224x32xf32, #tpu.memory_space<vmem>>, vector<8x32xf32>,
    %c320 = arith.constant 320 : index
    %c0_147 = arith.constant 0 : index
    %164 = vector.load %arg18[%c320, %c0_147] : memref<448x32xf32, #tpu.memory_space<vmem>>, vector<8x32xf32>
    %c328 = arith.constant 328 : index
    %c0_148 = arith.constant 0 : index
    %165 = vector.load %arg18[%c328, %c0_148] : memref<448x32xf32, #tpu.memory_space<vmem>>, vector<8x32xf32>
    %166 = arith.maximumf %164, %165 : vector<8x32xf32>
    %c160_149 = arith.constant 160 : index
    %c0_150 = arith.constant 0 : index
    %167 = vector.load %arg19[%c160_149, %c0_150] : memref<224x32xf32, #tpu.memory_space<vmem>>, vector<8x32xf32>
    tpu.vector_store %arg19[%c160_149, %c0_150], %166 {strides = array<i32>} : memref<224x32xf32, #tpu.memory_space<vmem>>, vector<8x32xf32>,
    %c336 = arith.constant 336 : index
    %c0_151 = arith.constant 0 : index
    %168 = vector.load %arg18[%c336, %c0_151] : memref<448x32xf32, #tpu.memory_space<vmem>>, vector<8x32xf32>
    %c344 = arith.constant 344 : index
    %c0_152 = arith.constant 0 : index
    %169 = vector.load %arg18[%c344, %c0_152] : memref<448x32xf32, #tpu.memory_space<vmem>>, vector<8x32xf32>
    %170 = arith.maximumf %168, %169 : vector<8x32xf32>
    %c168_153 = arith.constant 168 : index
    %c0_154 = arith.constant 0 : index
    %171 = vector.load %arg19[%c168_153, %c0_154] : memref<224x32xf32, #tpu.memory_space<vmem>>, vector<8x32xf32>
    tpu.vector_store %arg19[%c168_153, %c0_154], %170 {strides = array<i32>} : memref<224x32xf32, #tpu.memory_space<vmem>>, vector<8x32xf32>,
    %c352 = arith.constant 352 : index
    %c0_155 = arith.constant 0 : index
    %172 = vector.load %arg18[%c352, %c0_155] : memref<448x32xf32, #tpu.memory_space<vmem>>, vector<8x32xf32>
    %c360 = arith.constant 360 : index
    %c0_156 = arith.constant 0 : index
    %173 = vector.load %arg18[%c360, %c0_156] : memref<448x32xf32, #tpu.memory_space<vmem>>, vector<8x32xf32>
    %174 = arith.maximumf %172, %173 : vector<8x32xf32>
    %c176_157 = arith.constant 176 : index
    %c0_158 = arith.constant 0 : index
    %175 = vector.load %arg19[%c176_157, %c0_158] : memref<224x32xf32, #tpu.memory_space<vmem>>, vector<8x32xf32>
    tpu.vector_store %arg19[%c176_157, %c0_158], %174 {strides = array<i32>} : memref<224x32xf32, #tpu.memory_space<vmem>>, vector<8x32xf32>,
    %c368 = arith.constant 368 : index
    %c0_159 = arith.constant 0 : index
    %176 = vector.load %arg18[%c368, %c0_159] : memref<448x32xf32, #tpu.memory_space<vmem>>, vector<8x32xf32>
    %c376 = arith.constant 376 : index
    %c0_160 = arith.constant 0 : index
    %177 = vector.load %arg18[%c376, %c0_160] : memref<448x32xf32, #tpu.memory_space<vmem>>, vector<8x32xf32>
    %178 = arith.maximumf %176, %177 : vector<8x32xf32>
    %c184_161 = arith.constant 184 : index
    %c0_162 = arith.constant 0 : index
    %179 = vector.load %arg19[%c184_161, %c0_162] : memref<224x32xf32, #tpu.memory_space<vmem>>, vector<8x32xf32>
    tpu.vector_store %arg19[%c184_161, %c0_162], %178 {strides = array<i32>} : memref<224x32xf32, #tpu.memory_space<vmem>>, vector<8x32xf32>,
    %c384 = arith.constant 384 : index
    %c0_163 = arith.constant 0 : index
    %180 = vector.load %arg18[%c384, %c0_163] : memref<448x32xf32, #tpu.memory_space<vmem>>, vector<8x32xf32>
    %c392 = arith.constant 392 : index
    %c0_164 = arith.constant 0 : index
    %181 = vector.load %arg18[%c392, %c0_164] : memref<448x32xf32, #tpu.memory_space<vmem>>, vector<8x32xf32>
    %182 = arith.maximumf %180, %181 : vector<8x32xf32>
    %c192_165 = arith.constant 192 : index
    %c0_166 = arith.constant 0 : index
    %183 = vector.load %arg19[%c192_165, %c0_166] : memref<224x32xf32, #tpu.memory_space<vmem>>, vector<8x32xf32>
    tpu.vector_store %arg19[%c192_165, %c0_166], %182 {strides = array<i32>} : memref<224x32xf32, #tpu.memory_space<vmem>>, vector<8x32xf32>,
    %c400 = arith.constant 400 : index
    %c0_167 = arith.constant 0 : index
    %184 = vector.load %arg18[%c400, %c0_167] : memref<448x32xf32, #tpu.memory_space<vmem>>, vector<8x32xf32>
    %c408 = arith.constant 408 : index
    %c0_168 = arith.constant 0 : index
    %185 = vector.load %arg18[%c408, %c0_168] : memref<448x32xf32, #tpu.memory_space<vmem>>, vector<8x32xf32>
    %186 = arith.maximumf %184, %185 : vector<8x32xf32>
    %c200_169 = arith.constant 200 : index
    %c0_170 = arith.constant 0 : index
    %187 = vector.load %arg19[%c200_169, %c0_170] : memref<224x32xf32, #tpu.memory_space<vmem>>, vector<8x32xf32>
    tpu.vector_store %arg19[%c200_169, %c0_170], %186 {strides = array<i32>} : memref<224x32xf32, #tpu.memory_space<vmem>>, vector<8x32xf32>,
    %c416 = arith.constant 416 : index
    %c0_171 = arith.constant 0 : index
    %188 = vector.load %arg18[%c416, %c0_171] : memref<448x32xf32, #tpu.memory_space<vmem>>, vector<8x32xf32>
    %c424 = arith.constant 424 : index
    %c0_172 = arith.constant 0 : index
    %189 = vector.load %arg18[%c424, %c0_172] : memref<448x32xf32, #tpu.memory_space<vmem>>, vector<8x32xf32>
    %190 = arith.maximumf %188, %189 : vector<8x32xf32>
    %c208_173 = arith.constant 208 : index
    %c0_174 = arith.constant 0 : index
    %191 = vector.load %arg19[%c208_173, %c0_174] : memref<224x32xf32, #tpu.memory_space<vmem>>, vector<8x32xf32>
    tpu.vector_store %arg19[%c208_173, %c0_174], %190 {strides = array<i32>} : memref<224x32xf32, #tpu.memory_space<vmem>>, vector<8x32xf32>,
    %c432 = arith.constant 432 : index
    %c0_175 = arith.constant 0 : index
    %192 = vector.load %arg18[%c432, %c0_175] : memref<448x32xf32, #tpu.memory_space<vmem>>, vector<8x32xf32>
    %c440 = arith.constant 440 : index
    %c0_176 = arith.constant 0 : index
    %193 = vector.load %arg18[%c440, %c0_176] : memref<448x32xf32, #tpu.memory_space<vmem>>, vector<8x32xf32>
    %194 = arith.maximumf %192, %193 : vector<8x32xf32>
    %c216_177 = arith.constant 216 : index
    %c0_178 = arith.constant 0 : index
    %195 = vector.load %arg19[%c216_177, %c0_178] : memref<224x32xf32, #tpu.memory_space<vmem>>, vector<8x32xf32>
    tpu.vector_store %arg19[%c216_177, %c0_178], %194 {strides = array<i32>} : memref<224x32xf32, #tpu.memory_space<vmem>>, vector<8x32xf32>,
    %cst_179 = arith.constant 0.000000e+00 : f32
    %196 = vector.broadcast %cst_179 : f32 to vector<192x64xf32>
    %c0_180 = arith.constant 0 : index
    %c0_181 = arith.constant 0 : index
    %197 = vector.load %arg19[%c0_180, %c0_181] : memref<224x32xf32, #tpu.memory_space<vmem>>, vector<192x32xf32>
    %198 = arith.truncf %197 : vector<192x32xf32> to vector<192x32xbf16>
    %c0_182 = arith.constant 0 : index
    %c0_183 = arith.constant 0 : index
    %c0_184 = arith.constant 0 : index
    %199 = vector.load %arg6[%c0_182, %c0_183, %c0_184] : memref<5x32x64xbf16, #tpu.memory_space<vmem>>, vector<1x32x64xbf16>
    %200 = vector.shape_cast %199 : vector<1x32x64xbf16> to vector<32x64xbf16>
    %cst_185 = arith.constant dense<0.000000e+00> : vector<192x64xf32>
    %201 = tpu.matmul %198, %200, %cst_185 {dimension_numbers = #tpu.dot_dimension_numbers<[1], [0], [0], [1], [0, 0, 1, 1], [], []>} : vector<192x32xbf16>, vector<32x64xbf16>, vector<192x64xf32> -> vector<192x64xf32>
    %202 = arith.addf %196, %201 : vector<192x64xf32>
    %c8_186 = arith.constant 8 : index
    %c0_187 = arith.constant 0 : index
    %203 = vector.load %arg19[%c8_186, %c0_187] : memref<224x32xf32, #tpu.memory_space<vmem>>, vector<192x32xf32>
    %204 = arith.truncf %203 : vector<192x32xf32> to vector<192x32xbf16>
    %c1_188 = arith.constant 1 : index
    %c0_189 = arith.constant 0 : index
    %c0_190 = arith.constant 0 : index
    %205 = vector.load %arg6[%c1_188, %c0_189, %c0_190] : memref<5x32x64xbf16, #tpu.memory_space<vmem>>, vector<1x32x64xbf16>
    %206 = vector.shape_cast %205 : vector<1x32x64xbf16> to vector<32x64xbf16>
    %cst_191 = arith.constant dense<0.000000e+00> : vector<192x64xf32>
    %207 = tpu.matmul %204, %206, %cst_191 {dimension_numbers = #tpu.dot_dimension_numbers<[1], [0], [0], [1], [0, 0, 1, 1], [], []>} : vector<192x32xbf16>, vector<32x64xbf16>, vector<192x64xf32> -> vector<192x64xf32>
    %208 = arith.addf %202, %207 : vector<192x64xf32>
    %c16_192 = arith.constant 16 : index
    %c0_193 = arith.constant 0 : index
    %209 = vector.load %arg19[%c16_192, %c0_193] : memref<224x32xf32, #tpu.memory_space<vmem>>, vector<192x32xf32>
    %210 = arith.truncf %209 : vector<192x32xf32> to vector<192x32xbf16>
    %c2_194 = arith.constant 2 : index
    %c0_195 = arith.constant 0 : index
    %c0_196 = arith.constant 0 : index
    %211 = vector.load %arg6[%c2_194, %c0_195, %c0_196] : memref<5x32x64xbf16, #tpu.memory_space<vmem>>, vector<1x32x64xbf16>
    %212 = vector.shape_cast %211 : vector<1x32x64xbf16> to vector<32x64xbf16>
    %cst_197 = arith.constant dense<0.000000e+00> : vector<192x64xf32>
    %213 = tpu.matmul %210, %212, %cst_197 {dimension_numbers = #tpu.dot_dimension_numbers<[1], [0], [0], [1], [0, 0, 1, 1], [], []>} : vector<192x32xbf16>, vector<32x64xbf16>, vector<192x64xf32> -> vector<192x64xf32>
    %214 = arith.addf %208, %213 : vector<192x64xf32>
    %c24_198 = arith.constant 24 : index
    %c0_199 = arith.constant 0 : index
    %215 = vector.load %arg19[%c24_198, %c0_199] : memref<224x32xf32, #tpu.memory_space<vmem>>, vector<192x32xf32>
    %216 = arith.truncf %215 : vector<192x32xf32> to vector<192x32xbf16>
    %c3_200 = arith.constant 3 : index
    %c0_201 = arith.constant 0 : index
    %c0_202 = arith.constant 0 : index
    %217 = vector.load %arg6[%c3_200, %c0_201, %c0_202] : memref<5x32x64xbf16, #tpu.memory_space<vmem>>, vector<1x32x64xbf16>
    %218 = vector.shape_cast %217 : vector<1x32x64xbf16> to vector<32x64xbf16>
    %cst_203 = arith.constant dense<0.000000e+00> : vector<192x64xf32>
    %219 = tpu.matmul %216, %218, %cst_203 {dimension_numbers = #tpu.dot_dimension_numbers<[1], [0], [0], [1], [0, 0, 1, 1], [], []>} : vector<192x32xbf16>, vector<32x64xbf16>, vector<192x64xf32> -> vector<192x64xf32>
    %220 = arith.addf %214, %219 : vector<192x64xf32>
    %c32_204 = arith.constant 32 : index
    %c0_205 = arith.constant 0 : index
    %221 = vector.load %arg19[%c32_204, %c0_205] : memref<224x32xf32, #tpu.memory_space<vmem>>, vector<192x32xf32>
    %222 = arith.truncf %221 : vector<192x32xf32> to vector<192x32xbf16>
    %c4_206 = arith.constant 4 : index
    %c0_207 = arith.constant 0 : index
    %c0_208 = arith.constant 0 : index
    %223 = vector.load %arg6[%c4_206, %c0_207, %c0_208] : memref<5x32x64xbf16, #tpu.memory_space<vmem>>, vector<1x32x64xbf16>
    %224 = vector.shape_cast %223 : vector<1x32x64xbf16> to vector<32x64xbf16>
    %cst_209 = arith.constant dense<0.000000e+00> : vector<192x64xf32>
    %225 = tpu.matmul %222, %224, %cst_209 {dimension_numbers = #tpu.dot_dimension_numbers<[1], [0], [0], [1], [0, 0, 1, 1], [], []>} : vector<192x32xbf16>, vector<32x64xbf16>, vector<192x64xf32> -> vector<192x64xf32>
    %226 = arith.addf %220, %225 : vector<192x64xf32>
    %c0_210 = arith.constant 0 : index
    %c0_211 = arith.constant 0 : index
    %227 = vector.load %arg7[%c0_210, %c0_211] : memref<1x64xf32, #tpu.memory_space<vmem>>, vector<1x64xf32>
    %228 = vector.broadcast %227 : vector<1x64xf32> to vector<192x64xf32>
    %229 = arith.addf %226, %228 : vector<192x64xf32>
    %cst_212 = arith.constant 0.000000e+00 : f32
    %230 = vector.broadcast %cst_212 : f32 to vector<192x64xf32>
    %231 = arith.maximumf %229, %230 : vector<192x64xf32>
    %c0_213 = arith.constant 0 : index
    %c0_214 = arith.constant 0 : index
    %232 = vector.load %arg20[%c0_213, %c0_214] : memref<192x64xf32, #tpu.memory_space<vmem>>, vector<192x64xf32>
    tpu.vector_store %arg20[%c0_213, %c0_214], %231 {strides = array<i32>} : memref<192x64xf32, #tpu.memory_space<vmem>>, vector<192x64xf32>,
    %cst_215 = arith.constant 0.000000e+00 : f32
    %233 = vector.broadcast %cst_215 : f32 to vector<160x128xf32>
    %c0_216 = arith.constant 0 : index
    %c0_217 = arith.constant 0 : index
    %234 = vector.load %arg20[%c0_216, %c0_217] : memref<192x64xf32, #tpu.memory_space<vmem>>, vector<160x64xf32>
    %235 = arith.truncf %234 : vector<160x64xf32> to vector<160x64xbf16>
    %c0_218 = arith.constant 0 : index
    %c0_219 = arith.constant 0 : index
    %c0_220 = arith.constant 0 : index
    %236 = vector.load %arg8[%c0_218, %c0_219, %c0_220] : memref<5x64x128xbf16, #tpu.memory_space<vmem>>, vector<1x64x128xbf16>
    %237 = vector.shape_cast %236 : vector<1x64x128xbf16> to vector<64x128xbf16>
    %cst_221 = arith.constant dense<0.000000e+00> : vector<160x128xf32>
    %238 = tpu.matmul %235, %237, %cst_221 {dimension_numbers = #tpu.dot_dimension_numbers<[1], [0], [0], [1], [0, 0, 1, 1], [], []>} : vector<160x64xbf16>, vector<64x128xbf16>, vector<160x128xf32> -> vector<160x128xf32>
    %239 = arith.addf %233, %238 : vector<160x128xf32>
    %c8_222 = arith.constant 8 : index
    %c0_223 = arith.constant 0 : index
    %240 = vector.load %arg20[%c8_222, %c0_223] : memref<192x64xf32, #tpu.memory_space<vmem>>, vector<160x64xf32>
    %241 = arith.truncf %240 : vector<160x64xf32> to vector<160x64xbf16>
    %c1_224 = arith.constant 1 : index
    %c0_225 = arith.constant 0 : index
    %c0_226 = arith.constant 0 : index
    %242 = vector.load %arg8[%c1_224, %c0_225, %c0_226] : memref<5x64x128xbf16, #tpu.memory_space<vmem>>, vector<1x64x128xbf16>
    %243 = vector.shape_cast %242 : vector<1x64x128xbf16> to vector<64x128xbf16>
    %cst_227 = arith.constant dense<0.000000e+00> : vector<160x128xf32>
    %244 = tpu.matmul %241, %243, %cst_227 {dimension_numbers = #tpu.dot_dimension_numbers<[1], [0], [0], [1], [0, 0, 1, 1], [], []>} : vector<160x64xbf16>, vector<64x128xbf16>, vector<160x128xf32> -> vector<160x128xf32>
    %245 = arith.addf %239, %244 : vector<160x128xf32>
    %c16_228 = arith.constant 16 : index
    %c0_229 = arith.constant 0 : index
    %246 = vector.load %arg20[%c16_228, %c0_229] : memref<192x64xf32, #tpu.memory_space<vmem>>, vector<160x64xf32>
    %247 = arith.truncf %246 : vector<160x64xf32> to vector<160x64xbf16>
    %c2_230 = arith.constant 2 : index
    %c0_231 = arith.constant 0 : index
    %c0_232 = arith.constant 0 : index
    %248 = vector.load %arg8[%c2_230, %c0_231, %c0_232] : memref<5x64x128xbf16, #tpu.memory_space<vmem>>, vector<1x64x128xbf16>
    %249 = vector.shape_cast %248 : vector<1x64x128xbf16> to vector<64x128xbf16>
    %cst_233 = arith.constant dense<0.000000e+00> : vector<160x128xf32>
    %250 = tpu.matmul %247, %249, %cst_233 {dimension_numbers = #tpu.dot_dimension_numbers<[1], [0], [0], [1], [0, 0, 1, 1], [], []>} : vector<160x64xbf16>, vector<64x128xbf16>, vector<160x128xf32> -> vector<160x128xf32>
    %251 = arith.addf %245, %250 : vector<160x128xf32>
    %c24_234 = arith.constant 24 : index
    %c0_235 = arith.constant 0 : index
    %252 = vector.load %arg20[%c24_234, %c0_235] : memref<192x64xf32, #tpu.memory_space<vmem>>, vector<160x64xf32>
    %253 = arith.truncf %252 : vector<160x64xf32> to vector<160x64xbf16>
    %c3_236 = arith.constant 3 : index
    %c0_237 = arith.constant 0 : index
    %c0_238 = arith.constant 0 : index
    %254 = vector.load %arg8[%c3_236, %c0_237, %c0_238] : memref<5x64x128xbf16, #tpu.memory_space<vmem>>, vector<1x64x128xbf16>
    %255 = vector.shape_cast %254 : vector<1x64x128xbf16> to vector<64x128xbf16>
    %cst_239 = arith.constant dense<0.000000e+00> : vector<160x128xf32>
    %256 = tpu.matmul %253, %255, %cst_239 {dimension_numbers = #tpu.dot_dimension_numbers<[1], [0], [0], [1], [0, 0, 1, 1], [], []>} : vector<160x64xbf16>, vector<64x128xbf16>, vector<160x128xf32> -> vector<160x128xf32>
    %257 = arith.addf %251, %256 : vector<160x128xf32>
    %c32_240 = arith.constant 32 : index
    %c0_241 = arith.constant 0 : index
    %258 = vector.load %arg20[%c32_240, %c0_241] : memref<192x64xf32, #tpu.memory_space<vmem>>, vector<160x64xf32>
    %259 = arith.truncf %258 : vector<160x64xf32> to vector<160x64xbf16>
    %c4_242 = arith.constant 4 : index
    %c0_243 = arith.constant 0 : index
    %c0_244 = arith.constant 0 : index
    %260 = vector.load %arg8[%c4_242, %c0_243, %c0_244] : memref<5x64x128xbf16, #tpu.memory_space<vmem>>, vector<1x64x128xbf16>
    %261 = vector.shape_cast %260 : vector<1x64x128xbf16> to vector<64x128xbf16>
    %cst_245 = arith.constant dense<0.000000e+00> : vector<160x128xf32>
    %262 = tpu.matmul %259, %261, %cst_245 {dimension_numbers = #tpu.dot_dimension_numbers<[1], [0], [0], [1], [0, 0, 1, 1], [], []>} : vector<160x64xbf16>, vector<64x128xbf16>, vector<160x128xf32> -> vector<160x128xf32>
    %263 = arith.addf %257, %262 : vector<160x128xf32>
    %c0_246 = arith.constant 0 : index
    %c0_247 = arith.constant 0 : index
    %264 = vector.load %arg9[%c0_246, %c0_247] : memref<1x128xf32, #tpu.memory_space<vmem>>, vector<1x128xf32>
    %265 = vector.broadcast %264 : vector<1x128xf32> to vector<160x128xf32>
    %266 = arith.addf %263, %265 : vector<160x128xf32>
    %cst_248 = arith.constant 0.000000e+00 : f32
    %267 = vector.broadcast %cst_248 : f32 to vector<160x128xf32>
    %268 = arith.maximumf %266, %267 : vector<160x128xf32>
    %c0_249 = arith.constant 0 : index
    %c0_250 = arith.constant 0 : index
    %269 = vector.load %arg21[%c0_249, %c0_250] : memref<160x128xf32, #tpu.memory_space<vmem>>, vector<160x128xf32>
    tpu.vector_store %arg21[%c0_249, %c0_250], %268 {strides = array<i32>} : memref<160x128xf32, #tpu.memory_space<vmem>>, vector<160x128xf32>,
    %c0_251 = arith.constant 0 : index
    %c0_252 = arith.constant 0 : index
    %270 = vector.load %arg21[%c0_251, %c0_252] : memref<160x128xf32, #tpu.memory_space<vmem>>, vector<8x128xf32>
    %c8_253 = arith.constant 8 : index
    %c0_254 = arith.constant 0 : index
    %271 = vector.load %arg21[%c8_253, %c0_254] : memref<160x128xf32, #tpu.memory_space<vmem>>, vector<8x128xf32>
    %272 = arith.maximumf %270, %271 : vector<8x128xf32>
    %c0_255 = arith.constant 0 : index
    %c0_256 = arith.constant 0 : index
    %273 = vector.load %arg22[%c0_255, %c0_256] : memref<80x128xf32, #tpu.memory_space<vmem>>, vector<8x128xf32>
    tpu.vector_store %arg22[%c0_255, %c0_256], %272 {strides = array<i32>} : memref<80x128xf32, #tpu.memory_space<vmem>>, vector<8x128xf32>,
    %c16_257 = arith.constant 16 : index
    %c0_258 = arith.constant 0 : index
    %274 = vector.load %arg21[%c16_257, %c0_258] : memref<160x128xf32, #tpu.memory_space<vmem>>, vector<8x128xf32>
    %c24_259 = arith.constant 24 : index
    %c0_260 = arith.constant 0 : index
    %275 = vector.load %arg21[%c24_259, %c0_260] : memref<160x128xf32, #tpu.memory_space<vmem>>, vector<8x128xf32>
    %276 = arith.maximumf %274, %275 : vector<8x128xf32>
    %c8_261 = arith.constant 8 : index
    %c0_262 = arith.constant 0 : index
    %277 = vector.load %arg22[%c8_261, %c0_262] : memref<80x128xf32, #tpu.memory_space<vmem>>, vector<8x128xf32>
    tpu.vector_store %arg22[%c8_261, %c0_262], %276 {strides = array<i32>} : memref<80x128xf32, #tpu.memory_space<vmem>>, vector<8x128xf32>,
    %c32_263 = arith.constant 32 : index
    %c0_264 = arith.constant 0 : index
    %278 = vector.load %arg21[%c32_263, %c0_264] : memref<160x128xf32, #tpu.memory_space<vmem>>, vector<8x128xf32>
    %c40_265 = arith.constant 40 : index
    %c0_266 = arith.constant 0 : index
    %279 = vector.load %arg21[%c40_265, %c0_266] : memref<160x128xf32, #tpu.memory_space<vmem>>, vector<8x128xf32>
    %280 = arith.maximumf %278, %279 : vector<8x128xf32>
    %c16_267 = arith.constant 16 : index
    %c0_268 = arith.constant 0 : index
    %281 = vector.load %arg22[%c16_267, %c0_268] : memref<80x128xf32, #tpu.memory_space<vmem>>, vector<8x128xf32>
    tpu.vector_store %arg22[%c16_267, %c0_268], %280 {strides = array<i32>} : memref<80x128xf32, #tpu.memory_space<vmem>>, vector<8x128xf32>,
    %c48_269 = arith.constant 48 : index
    %c0_270 = arith.constant 0 : index
    %282 = vector.load %arg21[%c48_269, %c0_270] : memref<160x128xf32, #tpu.memory_space<vmem>>, vector<8x128xf32>
    %c56_271 = arith.constant 56 : index
    %c0_272 = arith.constant 0 : index
    %283 = vector.load %arg21[%c56_271, %c0_272] : memref<160x128xf32, #tpu.memory_space<vmem>>, vector<8x128xf32>
    %284 = arith.maximumf %282, %283 : vector<8x128xf32>
    %c24_273 = arith.constant 24 : index
    %c0_274 = arith.constant 0 : index
    %285 = vector.load %arg22[%c24_273, %c0_274] : memref<80x128xf32, #tpu.memory_space<vmem>>, vector<8x128xf32>
    tpu.vector_store %arg22[%c24_273, %c0_274], %284 {strides = array<i32>} : memref<80x128xf32, #tpu.memory_space<vmem>>, vector<8x128xf32>,
    %c64_275 = arith.constant 64 : index
    %c0_276 = arith.constant 0 : index
    %286 = vector.load %arg21[%c64_275, %c0_276] : memref<160x128xf32, #tpu.memory_space<vmem>>, vector<8x128xf32>
    %c72_277 = arith.constant 72 : index
    %c0_278 = arith.constant 0 : index
    %287 = vector.load %arg21[%c72_277, %c0_278] : memref<160x128xf32, #tpu.memory_space<vmem>>, vector<8x128xf32>
    %288 = arith.maximumf %286, %287 : vector<8x128xf32>
    %c32_279 = arith.constant 32 : index
    %c0_280 = arith.constant 0 : index
    %289 = vector.load %arg22[%c32_279, %c0_280] : memref<80x128xf32, #tpu.memory_space<vmem>>, vector<8x128xf32>
    tpu.vector_store %arg22[%c32_279, %c0_280], %288 {strides = array<i32>} : memref<80x128xf32, #tpu.memory_space<vmem>>, vector<8x128xf32>,
    %c80_281 = arith.constant 80 : index
    %c0_282 = arith.constant 0 : index
    %290 = vector.load %arg21[%c80_281, %c0_282] : memref<160x128xf32, #tpu.memory_space<vmem>>, vector<8x128xf32>
    %c88_283 = arith.constant 88 : index
    %c0_284 = arith.constant 0 : index
    %291 = vector.load %arg21[%c88_283, %c0_284] : memref<160x128xf32, #tpu.memory_space<vmem>>, vector<8x128xf32>
    %292 = arith.maximumf %290, %291 : vector<8x128xf32>
    %c40_285 = arith.constant 40 : index
    %c0_286 = arith.constant 0 : index
    %293 = vector.load %arg22[%c40_285, %c0_286] : memref<80x128xf32, #tpu.memory_space<vmem>>, vector<8x128xf32>
    tpu.vector_store %arg22[%c40_285, %c0_286], %292 {strides = array<i32>} : memref<80x128xf32, #tpu.memory_space<vmem>>, vector<8x128xf32>,
    %c96_287 = arith.constant 96 : index
    %c0_288 = arith.constant 0 : index
    %294 = vector.load %arg21[%c96_287, %c0_288] : memref<160x128xf32, #tpu.memory_space<vmem>>, vector<8x128xf32>
    %c104_289 = arith.constant 104 : index
    %c0_290 = arith.constant 0 : index
    %295 = vector.load %arg21[%c104_289, %c0_290] : memref<160x128xf32, #tpu.memory_space<vmem>>, vector<8x128xf32>
    %296 = arith.maximumf %294, %295 : vector<8x128xf32>
    %c48_291 = arith.constant 48 : index
    %c0_292 = arith.constant 0 : index
    %297 = vector.load %arg22[%c48_291, %c0_292] : memref<80x128xf32, #tpu.memory_space<vmem>>, vector<8x128xf32>
    tpu.vector_store %arg22[%c48_291, %c0_292], %296 {strides = array<i32>} : memref<80x128xf32, #tpu.memory_space<vmem>>, vector<8x128xf32>,
    %c112_293 = arith.constant 112 : index
    %c0_294 = arith.constant 0 : index
    %298 = vector.load %arg21[%c112_293, %c0_294] : memref<160x128xf32, #tpu.memory_space<vmem>>, vector<8x128xf32>
    %c120_295 = arith.constant 120 : index
    %c0_296 = arith.constant 0 : index
    %299 = vector.load %arg21[%c120_295, %c0_296] : memref<160x128xf32, #tpu.memory_space<vmem>>, vector<8x128xf32>
    %300 = arith.maximumf %298, %299 : vector<8x128xf32>
    %c56_297 = arith.constant 56 : index
    %c0_298 = arith.constant 0 : index
    %301 = vector.load %arg22[%c56_297, %c0_298] : memref<80x128xf32, #tpu.memory_space<vmem>>, vector<8x128xf32>
    tpu.vector_store %arg22[%c56_297, %c0_298], %300 {strides = array<i32>} : memref<80x128xf32, #tpu.memory_space<vmem>>, vector<8x128xf32>,
    %c128_299 = arith.constant 128 : index
    %c0_300 = arith.constant 0 : index
    %302 = vector.load %arg21[%c128_299, %c0_300] : memref<160x128xf32, #tpu.memory_space<vmem>>, vector<8x128xf32>
    %c136_301 = arith.constant 136 : index
    %c0_302 = arith.constant 0 : index
    %303 = vector.load %arg21[%c136_301, %c0_302] : memref<160x128xf32, #tpu.memory_space<vmem>>, vector<8x128xf32>
    %304 = arith.maximumf %302, %303 : vector<8x128xf32>
    %c64_303 = arith.constant 64 : index
    %c0_304 = arith.constant 0 : index
    %305 = vector.load %arg22[%c64_303, %c0_304] : memref<80x128xf32, #tpu.memory_space<vmem>>, vector<8x128xf32>
    tpu.vector_store %arg22[%c64_303, %c0_304], %304 {strides = array<i32>} : memref<80x128xf32, #tpu.memory_space<vmem>>, vector<8x128xf32>,
    %c144_305 = arith.constant 144 : index
    %c0_306 = arith.constant 0 : index
    %306 = vector.load %arg21[%c144_305, %c0_306] : memref<160x128xf32, #tpu.memory_space<vmem>>, vector<8x128xf32>
    %c152_307 = arith.constant 152 : index
    %c0_308 = arith.constant 0 : index
    %307 = vector.load %arg21[%c152_307, %c0_308] : memref<160x128xf32, #tpu.memory_space<vmem>>, vector<8x128xf32>
    %308 = arith.maximumf %306, %307 : vector<8x128xf32>
    %c72_309 = arith.constant 72 : index
    %c0_310 = arith.constant 0 : index
    %309 = vector.load %arg22[%c72_309, %c0_310] : memref<80x128xf32, #tpu.memory_space<vmem>>, vector<8x128xf32>
    tpu.vector_store %arg22[%c72_309, %c0_310], %308 {strides = array<i32>} : memref<80x128xf32, #tpu.memory_space<vmem>>, vector<8x128xf32>,
    %cst_311 = arith.constant 0.000000e+00 : f32
    %310 = vector.broadcast %cst_311 : f32 to vector<48x256xf32>
    %c0_312 = arith.constant 0 : index
    %c0_313 = arith.constant 0 : index
    %311 = vector.load %arg22[%c0_312, %c0_313] : memref<80x128xf32, #tpu.memory_space<vmem>>, vector<48x128xf32>
    %312 = arith.truncf %311 : vector<48x128xf32> to vector<48x128xbf16>
    %c0_314 = arith.constant 0 : index
    %c0_315 = arith.constant 0 : index
    %c0_316 = arith.constant 0 : index
    %313 = vector.load %arg10[%c0_314, %c0_315, %c0_316] : memref<5x128x256xbf16, #tpu.memory_space<vmem>>, vector<1x128x256xbf16>
    %314 = vector.shape_cast %313 : vector<1x128x256xbf16> to vector<128x256xbf16>
    %cst_317 = arith.constant dense<0.000000e+00> : vector<48x256xf32>
    %315 = tpu.matmul %312, %314, %cst_317 {dimension_numbers = #tpu.dot_dimension_numbers<[1], [0], [0], [1], [0, 0, 1, 1], [], []>} : vector<48x128xbf16>, vector<128x256xbf16>, vector<48x256xf32> -> vector<48x256xf32>
    %316 = arith.addf %310, %315 : vector<48x256xf32>
    %c8_318 = arith.constant 8 : index
    %c0_319 = arith.constant 0 : index
    %317 = vector.load %arg22[%c8_318, %c0_319] : memref<80x128xf32, #tpu.memory_space<vmem>>, vector<48x128xf32>
    %318 = arith.truncf %317 : vector<48x128xf32> to vector<48x128xbf16>
    %c1_320 = arith.constant 1 : index
    %c0_321 = arith.constant 0 : index
    %c0_322 = arith.constant 0 : index
    %319 = vector.load %arg10[%c1_320, %c0_321, %c0_322] : memref<5x128x256xbf16, #tpu.memory_space<vmem>>, vector<1x128x256xbf16>
    %320 = vector.shape_cast %319 : vector<1x128x256xbf16> to vector<128x256xbf16>
    %cst_323 = arith.constant dense<0.000000e+00> : vector<48x256xf32>
    %321 = tpu.matmul %318, %320, %cst_323 {dimension_numbers = #tpu.dot_dimension_numbers<[1], [0], [0], [1], [0, 0, 1, 1], [], []>} : vector<48x128xbf16>, vector<128x256xbf16>, vector<48x256xf32> -> vector<48x256xf32>
    %322 = arith.addf %316, %321 : vector<48x256xf32>
    %c16_324 = arith.constant 16 : index
    %c0_325 = arith.constant 0 : index
    %323 = vector.load %arg22[%c16_324, %c0_325] : memref<80x128xf32, #tpu.memory_space<vmem>>, vector<48x128xf32>
    %324 = arith.truncf %323 : vector<48x128xf32> to vector<48x128xbf16>
    %c2_326 = arith.constant 2 : index
    %c0_327 = arith.constant 0 : index
    %c0_328 = arith.constant 0 : index
    %325 = vector.load %arg10[%c2_326, %c0_327, %c0_328] : memref<5x128x256xbf16, #tpu.memory_space<vmem>>, vector<1x128x256xbf16>
    %326 = vector.shape_cast %325 : vector<1x128x256xbf16> to vector<128x256xbf16>
    %cst_329 = arith.constant dense<0.000000e+00> : vector<48x256xf32>
    %327 = tpu.matmul %324, %326, %cst_329 {dimension_numbers = #tpu.dot_dimension_numbers<[1], [0], [0], [1], [0, 0, 1, 1], [], []>} : vector<48x128xbf16>, vector<128x256xbf16>, vector<48x256xf32> -> vector<48x256xf32>
    %328 = arith.addf %322, %327 : vector<48x256xf32>
    %c24_330 = arith.constant 24 : index
    %c0_331 = arith.constant 0 : index
    %329 = vector.load %arg22[%c24_330, %c0_331] : memref<80x128xf32, #tpu.memory_space<vmem>>, vector<48x128xf32>
    %330 = arith.truncf %329 : vector<48x128xf32> to vector<48x128xbf16>
    %c3_332 = arith.constant 3 : index
    %c0_333 = arith.constant 0 : index
    %c0_334 = arith.constant 0 : index
    %331 = vector.load %arg10[%c3_332, %c0_333, %c0_334] : memref<5x128x256xbf16, #tpu.memory_space<vmem>>, vector<1x128x256xbf16>
    %332 = vector.shape_cast %331 : vector<1x128x256xbf16> to vector<128x256xbf16>
    %cst_335 = arith.constant dense<0.000000e+00> : vector<48x256xf32>
    %333 = tpu.matmul %330, %332, %cst_335 {dimension_numbers = #tpu.dot_dimension_numbers<[1], [0], [0], [1], [0, 0, 1, 1], [], []>} : vector<48x128xbf16>, vector<128x256xbf16>, vector<48x256xf32> -> vector<48x256xf32>
    %334 = arith.addf %328, %333 : vector<48x256xf32>
    %c32_336 = arith.constant 32 : index
    %c0_337 = arith.constant 0 : index
    %335 = vector.load %arg22[%c32_336, %c0_337] : memref<80x128xf32, #tpu.memory_space<vmem>>, vector<48x128xf32>
    %336 = arith.truncf %335 : vector<48x128xf32> to vector<48x128xbf16>
    %c4_338 = arith.constant 4 : index
    %c0_339 = arith.constant 0 : index
    %c0_340 = arith.constant 0 : index
    %337 = vector.load %arg10[%c4_338, %c0_339, %c0_340] : memref<5x128x256xbf16, #tpu.memory_space<vmem>>, vector<1x128x256xbf16>
    %338 = vector.shape_cast %337 : vector<1x128x256xbf16> to vector<128x256xbf16>
    %cst_341 = arith.constant dense<0.000000e+00> : vector<48x256xf32>
    %339 = tpu.matmul %336, %338, %cst_341 {dimension_numbers = #tpu.dot_dimension_numbers<[1], [0], [0], [1], [0, 0, 1, 1], [], []>} : vector<48x128xbf16>, vector<128x256xbf16>, vector<48x256xf32> -> vector<48x256xf32>
    %340 = arith.addf %334, %339 : vector<48x256xf32>
    %c0_342 = arith.constant 0 : index
    %c0_343 = arith.constant 0 : index
    %341 = vector.load %arg11[%c0_342, %c0_343] : memref<1x256xf32, #tpu.memory_space<vmem>>, vector<1x256xf32>
    %342 = vector.broadcast %341 : vector<1x256xf32> to vector<48x256xf32>
    %343 = arith.addf %340, %342 : vector<48x256xf32>
    %cst_344 = arith.constant 0.000000e+00 : f32
    %344 = vector.broadcast %cst_344 : f32 to vector<48x256xf32>
    %345 = arith.maximumf %343, %344 : vector<48x256xf32>
    %c0_345 = arith.constant 0 : index
    %c0_346 = arith.constant 0 : index
    %346 = vector.load %arg23[%c0_345, %c0_346] : memref<48x256xf32, #tpu.memory_space<vmem>>, vector<48x256xf32>
    tpu.vector_store %arg23[%c0_345, %c0_346], %345 {strides = array<i32>} : memref<48x256xf32, #tpu.memory_space<vmem>>, vector<48x256xf32>,
    %cst_347 = arith.constant 0.000000e+00 : f32
    %347 = vector.broadcast %cst_347 : f32 to vector<16x512xf32>
    %c0_348 = arith.constant 0 : index
    %c0_349 = arith.constant 0 : index
    %348 = vector.load %arg23[%c0_348, %c0_349] : memref<48x256xf32, #tpu.memory_space<vmem>>, vector<16x256xf32>
    %349 = arith.truncf %348 : vector<16x256xf32> to vector<16x256xbf16>
    %c0_350 = arith.constant 0 : index
    %c0_351 = arith.constant 0 : index
    %c0_352 = arith.constant 0 : index
    %350 = vector.load %arg12[%c0_350, %c0_351, %c0_352] : memref<5x256x512xbf16, #tpu.memory_space<vmem>>, vector<1x256x512xbf16>
    %351 = vector.shape_cast %350 : vector<1x256x512xbf16> to vector<256x512xbf16>
    %cst_353 = arith.constant dense<0.000000e+00> : vector<16x512xf32>
    %352 = tpu.matmul %349, %351, %cst_353 {dimension_numbers = #tpu.dot_dimension_numbers<[1], [0], [0], [1], [0, 0, 1, 1], [], []>} : vector<16x256xbf16>, vector<256x512xbf16>, vector<16x512xf32> -> vector<16x512xf32>
    %353 = arith.addf %347, %352 : vector<16x512xf32>
    %c8_354 = arith.constant 8 : index
    %c0_355 = arith.constant 0 : index
    %354 = vector.load %arg23[%c8_354, %c0_355] : memref<48x256xf32, #tpu.memory_space<vmem>>, vector<16x256xf32>
    %355 = arith.truncf %354 : vector<16x256xf32> to vector<16x256xbf16>
    %c1_356 = arith.constant 1 : index
    %c0_357 = arith.constant 0 : index
    %c0_358 = arith.constant 0 : index
    %356 = vector.load %arg12[%c1_356, %c0_357, %c0_358] : memref<5x256x512xbf16, #tpu.memory_space<vmem>>, vector<1x256x512xbf16>
    %357 = vector.shape_cast %356 : vector<1x256x512xbf16> to vector<256x512xbf16>
    %cst_359 = arith.constant dense<0.000000e+00> : vector<16x512xf32>
    %358 = tpu.matmul %355, %357, %cst_359 {dimension_numbers = #tpu.dot_dimension_numbers<[1], [0], [0], [1], [0, 0, 1, 1], [], []>} : vector<16x256xbf16>, vector<256x512xbf16>, vector<16x512xf32> -> vector<16x512xf32>
    %359 = arith.addf %353, %358 : vector<16x512xf32>
    %c16_360 = arith.constant 16 : index
    %c0_361 = arith.constant 0 : index
    %360 = vector.load %arg23[%c16_360, %c0_361] : memref<48x256xf32, #tpu.memory_space<vmem>>, vector<16x256xf32>
    %361 = arith.truncf %360 : vector<16x256xf32> to vector<16x256xbf16>
    %c2_362 = arith.constant 2 : index
    %c0_363 = arith.constant 0 : index
    %c0_364 = arith.constant 0 : index
    %362 = vector.load %arg12[%c2_362, %c0_363, %c0_364] : memref<5x256x512xbf16, #tpu.memory_space<vmem>>, vector<1x256x512xbf16>
    %363 = vector.shape_cast %362 : vector<1x256x512xbf16> to vector<256x512xbf16>
    %cst_365 = arith.constant dense<0.000000e+00> : vector<16x512xf32>
    %364 = tpu.matmul %361, %363, %cst_365 {dimension_numbers = #tpu.dot_dimension_numbers<[1], [0], [0], [1], [0, 0, 1, 1], [], []>} : vector<16x256xbf16>, vector<256x512xbf16>, vector<16x512xf32> -> vector<16x512xf32>
    %365 = arith.addf %359, %364 : vector<16x512xf32>
    %c24_366 = arith.constant 24 : index
    %c0_367 = arith.constant 0 : index
    %366 = vector.load %arg23[%c24_366, %c0_367] : memref<48x256xf32, #tpu.memory_space<vmem>>, vector<16x256xf32>
    %367 = arith.truncf %366 : vector<16x256xf32> to vector<16x256xbf16>
    %c3_368 = arith.constant 3 : index
    %c0_369 = arith.constant 0 : index
    %c0_370 = arith.constant 0 : index
    %368 = vector.load %arg12[%c3_368, %c0_369, %c0_370] : memref<5x256x512xbf16, #tpu.memory_space<vmem>>, vector<1x256x512xbf16>
    %369 = vector.shape_cast %368 : vector<1x256x512xbf16> to vector<256x512xbf16>
    %cst_371 = arith.constant dense<0.000000e+00> : vector<16x512xf32>
    %370 = tpu.matmul %367, %369, %cst_371 {dimension_numbers = #tpu.dot_dimension_numbers<[1], [0], [0], [1], [0, 0, 1, 1], [], []>} : vector<16x256xbf16>, vector<256x512xbf16>, vector<16x512xf32> -> vector<16x512xf32>
    %371 = arith.addf %365, %370 : vector<16x512xf32>
    %c32_372 = arith.constant 32 : index
    %c0_373 = arith.constant 0 : index
    %372 = vector.load %arg23[%c32_372, %c0_373] : memref<48x256xf32, #tpu.memory_space<vmem>>, vector<16x256xf32>
    %373 = arith.truncf %372 : vector<16x256xf32> to vector<16x256xbf16>
    %c4_374 = arith.constant 4 : index
    %c0_375 = arith.constant 0 : index
    %c0_376 = arith.constant 0 : index
    %374 = vector.load %arg12[%c4_374, %c0_375, %c0_376] : memref<5x256x512xbf16, #tpu.memory_space<vmem>>, vector<1x256x512xbf16>
    %375 = vector.shape_cast %374 : vector<1x256x512xbf16> to vector<256x512xbf16>
    %cst_377 = arith.constant dense<0.000000e+00> : vector<16x512xf32>
    %376 = tpu.matmul %373, %375, %cst_377 {dimension_numbers = #tpu.dot_dimension_numbers<[1], [0], [0], [1], [0, 0, 1, 1], [], []>} : vector<16x256xbf16>, vector<256x512xbf16>, vector<16x512xf32> -> vector<16x512xf32>
    %377 = arith.addf %371, %376 : vector<16x512xf32>
    %c0_378 = arith.constant 0 : index
    %c0_379 = arith.constant 0 : index
    %378 = vector.load %arg13[%c0_378, %c0_379] : memref<1x512xf32, #tpu.memory_space<vmem>>, vector<1x512xf32>
    %379 = vector.broadcast %378 : vector<1x512xf32> to vector<16x512xf32>
    %380 = arith.addf %377, %379 : vector<16x512xf32>
    %cst_380 = arith.constant 0.000000e+00 : f32
    %381 = vector.broadcast %cst_380 : f32 to vector<16x512xf32>
    %382 = arith.maximumf %380, %381 : vector<16x512xf32>
    %c0_381 = arith.constant 0 : index
    %c0_382 = arith.constant 0 : index
    %383 = vector.load %arg24[%c0_381, %c0_382] : memref<16x512xf32, #tpu.memory_space<vmem>>, vector<16x512xf32>
    tpu.vector_store %arg24[%c0_381, %c0_382], %382 {strides = array<i32>} : memref<16x512xf32, #tpu.memory_space<vmem>>, vector<16x512xf32>,
    %c0_383 = arith.constant 0 : index
    %c0_384 = arith.constant 0 : index
    %384 = vector.load %arg24[%c0_383, %c0_384] : memref<16x512xf32, #tpu.memory_space<vmem>>, vector<8x512xf32>
    %c8_385 = arith.constant 8 : index
    %c0_386 = arith.constant 0 : index
    %385 = vector.load %arg24[%c8_385, %c0_386] : memref<16x512xf32, #tpu.memory_space<vmem>>, vector<8x512xf32>
    %386 = arith.addf %384, %385 : vector<8x512xf32>
    %cst_387 = arith.constant 5.000000e-01 : f32
    %387 = vector.broadcast %cst_387 : f32 to vector<8x512xf32>
    %388 = arith.mulf %386, %387 : vector<8x512xf32>
    %c0_388 = arith.constant 0 : index
    %c0_389 = arith.constant 0 : index
    %389 = vector.load %arg14[%c0_388, %c0_389] : memref<512x8xf32, #tpu.memory_space<vmem>>, vector<512x8xf32>
    %cst_390 = arith.constant dense<0.000000e+00> : vector<8x8xf32>
    %390 = tpu.matmul %388, %389, %cst_390 {dimension_numbers = #tpu.dot_dimension_numbers<[1], [0], [0], [1], [0, 0, 1, 1], [], []>, precision = #tpu.contract_precision<fp32>} : vector<8x512xf32>, vector<512x8xf32>, vector<8x8xf32> -> vector<8x8xf32>
    %c0_391 = arith.constant 0 : index
    %c0_392 = arith.constant 0 : index
    %391 = vector.load %arg15[%c0_391, %c0_392] : memref<1x8xf32, #tpu.memory_space<vmem>>, vector<1x8xf32>
    %392 = vector.broadcast %391 : vector<1x8xf32> to vector<8x8xf32>
    %393 = arith.addf %390, %392 : vector<8x8xf32>
    %cst_393 = arith.constant dense<0xFF800000> : vector<8xf32>
    %394 = vector.multi_reduction <maximumf>, %393, %cst_393 [1] : vector<8x8xf32> to vector<8xf32>
    %395 = vector.shape_cast %394 : vector<8xf32> to vector<8x1xf32>
    %396 = vector.broadcast %395 : vector<8x1xf32> to vector<8x8xf32>
    %397 = arith.subf %393, %396 : vector<8x8xf32>
    %398 = math.exp %397 : vector<8x8xf32>
    %cst_394 = arith.constant dense<0.000000e+00> : vector<8xf32>
    %399 = vector.multi_reduction <add>, %398, %cst_394 [1] : vector<8x8xf32> to vector<8xf32>
    %400 = vector.shape_cast %399 : vector<8xf32> to vector<8x1xf32>
    %401 = vector.broadcast %400 : vector<8x1xf32> to vector<8x8xf32>
    %402 = arith.divf %398, %401 : vector<8x8xf32>
    %c0_395 = arith.constant 0 : index
    %c0_396 = arith.constant 0 : index
    %c0_397 = arith.constant 0 : index
    %403 = vector.load %arg16[%c0_395, %c0_396, %c0_397] : memref<1x8x8xf32, #tpu.memory_space<vmem>>, vector<1x8x8xf32>
    %404 = vector.shape_cast %403 : vector<1x8x8xf32> to vector<8x8xf32>
    %405 = vector.shape_cast %402 : vector<8x8xf32> to vector<1x8x8xf32>
    tpu.vector_store %arg16[%c0_395, %c0_396, %c0_397], %405 {strides = array<i32>} : memref<1x8x8xf32, #tpu.memory_space<vmem>>, vector<1x8x8xf32>,
    return
  }
  func.func @transform_0(%arg0: i32) -> (i32, i32, i32) {
    %c0_i32 = arith.constant 0 : i32
    %c0_i32_0 = arith.constant 0 : i32
    %c0_i32_1 = arith.constant 0 : i32
    return %arg0, %c0_i32, %c0_i32_0 : i32, i32, i32
  }
  func.func @transform_1(%arg0: i32) -> (i32, i32, i32) {
    %c0_i32 = arith.constant 0 : i32
    %c0_i32_0 = arith.constant 0 : i32
    %c0_i32_1 = arith.constant 0 : i32
    %c0_i32_2 = arith.constant 0 : i32
    return %c0_i32, %c0_i32_0, %c0_i32_1 : i32, i32, i32
  }
  func.func @transform_2(%arg0: i32) -> (i32, i32) {
    %c0_i32 = arith.constant 0 : i32
    %c0_i32_0 = arith.constant 0 : i32
    %c0_i32_1 = arith.constant 0 : i32
    return %c0_i32, %c0_i32_0 : i32, i32
  }
  func.func @transform_3(%arg0: i32) -> (i32, i32, i32) {
    %c0_i32 = arith.constant 0 : i32
    %c0_i32_0 = arith.constant 0 : i32
    %c0_i32_1 = arith.constant 0 : i32
    %c0_i32_2 = arith.constant 0 : i32
    return %c0_i32, %c0_i32_0, %c0_i32_1 : i32, i32, i32
  }
  func.func @transform_4(%arg0: i32) -> (i32, i32) {
    %c0_i32 = arith.constant 0 : i32
    %c0_i32_0 = arith.constant 0 : i32
    %c0_i32_1 = arith.constant 0 : i32
    return %c0_i32, %c0_i32_0 : i32, i32
  }
  func.func @transform_5(%arg0: i32) -> (i32, i32, i32) {
    %c0_i32 = arith.constant 0 : i32
    %c0_i32_0 = arith.constant 0 : i32
    %c0_i32_1 = arith.constant 0 : i32
    %c0_i32_2 = arith.constant 0 : i32
    return %c0_i32, %c0_i32_0, %c0_i32_1 : i32, i32, i32
  }
  func.func @transform_6(%arg0: i32) -> (i32, i32) {
    %c0_i32 = arith.constant 0 : i32
    %c0_i32_0 = arith.constant 0 : i32
    %c0_i32_1 = arith.constant 0 : i32
    return %c0_i32, %c0_i32_0 : i32, i32
  }
  func.func @transform_7(%arg0: i32) -> (i32, i32, i32) {
    %c0_i32 = arith.constant 0 : i32
    %c0_i32_0 = arith.constant 0 : i32
    %c0_i32_1 = arith.constant 0 : i32
    %c0_i32_2 = arith.constant 0 : i32
    return %c0_i32, %c0_i32_0, %c0_i32_1 : i32, i32, i32
  }
  func.func @transform_8(%arg0: i32) -> (i32, i32) {
    %c0_i32 = arith.constant 0 : i32
    %c0_i32_0 = arith.constant 0 : i32
    %c0_i32_1 = arith.constant 0 : i32
    return %c0_i32, %c0_i32_0 : i32, i32
  }
  func.func @transform_9(%arg0: i32) -> (i32, i32, i32) {
    %c0_i32 = arith.constant 0 : i32
    %c0_i32_0 = arith.constant 0 : i32
    %c0_i32_1 = arith.constant 0 : i32
    %c0_i32_2 = arith.constant 0 : i32
    return %c0_i32, %c0_i32_0, %c0_i32_1 : i32, i32, i32
  }
  func.func @transform_10(%arg0: i32) -> (i32, i32) {
    %c0_i32 = arith.constant 0 : i32
    %c0_i32_0 = arith.constant 0 : i32
    %c0_i32_1 = arith.constant 0 : i32
    return %c0_i32, %c0_i32_0 : i32, i32
  }
  func.func @transform_11(%arg0: i32) -> (i32, i32, i32) {
    %c0_i32 = arith.constant 0 : i32
    %c0_i32_0 = arith.constant 0 : i32
    %c0_i32_1 = arith.constant 0 : i32
    %c0_i32_2 = arith.constant 0 : i32
    return %c0_i32, %c0_i32_0, %c0_i32_1 : i32, i32, i32
  }
  func.func @transform_12(%arg0: i32) -> (i32, i32) {
    %c0_i32 = arith.constant 0 : i32
    %c0_i32_0 = arith.constant 0 : i32
    %c0_i32_1 = arith.constant 0 : i32
    return %c0_i32, %c0_i32_0 : i32, i32
  }
  func.func @transform_13(%arg0: i32) -> (i32, i32) {
    %c0_i32 = arith.constant 0 : i32
    %c0_i32_0 = arith.constant 0 : i32
    %c0_i32_1 = arith.constant 0 : i32
    return %c0_i32, %c0_i32_0 : i32, i32
  }
  func.func @transform_14(%arg0: i32) -> (i32, i32) {
    %c0_i32 = arith.constant 0 : i32
    %c0_i32_0 = arith.constant 0 : i32
    %c0_i32_1 = arith.constant 0 : i32
    return %c0_i32, %c0_i32_0 : i32, i32
  }
  func.func @transform_15(%arg0: i32) -> (i32, i32, i32) {
    %c0_i32 = arith.constant 0 : i32
    %c0_i32_0 = arith.constant 0 : i32
    %c0_i32_1 = arith.constant 0 : i32
    return %arg0, %c0_i32, %c0_i32_0 : i32, i32, i32
  }
}

</mosaic_0001>

<bundles_post_ra>
// kernel: model_cnn_1d.1
= control target key start
LH: loop header
LB: loop body
LE: loop exit
PB: predicated region body
PF: predicated region fallthrough
CT: control target
= control target key end

     0   :  { %s17351_s18 = smov 0   ;;  %s22158_s0 = inlined_call_operand.vmem [shape: f32[2,512,1], index: 0, kind: input, shape index: {}]   ;;  %s22159_s1 = inlined_call_operand.vmem [shape: f32[5,1,16], index: 1, kind: input, shape index: {}]   ;;  %s22160_s2 = inlined_call_operand.vmem [shape: f32[1,16], index: 2, kind: input, shape index: {}]   ;;  %s22161_s3 = inlined_call_operand.vmem [shape: bf16[5,16,32], index: 3, kind: input, shape index: {}]   ;;  %s22162_s4 = inlined_call_operand.vmem [shape: f32[1,32], index: 4, kind: input, shape index: {}]   ;;  %s22163_s5 = inlined_call_operand.vmem [shape: bf16[5,32,64], index: 5, kind: input, shape index: {}]   ;;  %s22164_s6 = inlined_call_operand.vmem [shape: f32[1,64], index: 6, kind: input, shape index: {}]   ;;  %s22165_s7 = inlined_call_operand.vmem [shape: bf16[5,64,128], index: 7, kind: input, shape index: {}]   ;;  %s22166_s8 = inlined_call_operand.vmem [shape: f32[1,128], index: 8, kind: input, shape index: {}]   ;;  %s22167_s9 = inlined_call_operand.vmem [shape: bf16[5,128,256], index: 9, kind: input, shape index: {}]   ;;  %s22168_s10 = inlined_call_operand.vmem [shape: f32[1,256], index: 10, kind: input, shape index: {}]   ;;  %s22169_s11 = inlined_call_operand.vmem [shape: bf16[5,256,512], index: 11, kind: input, shape index: {}]   ;;  %s22170_s12 = inlined_call_operand.vmem [shape: f32[1,512], index: 12, kind: input, shape index: {}]   ;;  %s22171_s13 = inlined_call_operand.vmem [shape: f32[512,8], index: 13, kind: input, shape index: {}]   ;;  %s22172_s14 = inlined_call_operand.vmem [shape: f32[1,8], index: 14, kind: input, shape index: {}]   ;;  %s22173_s15 = inlined_call_operand.vmem [shape: f32[2,8,8], index: 15, kind: output, shape index: {}]  }
   0x1 LB: > { %s13338_s19 = sadd.s32 4294967295, %s17268_s18   ;;  %p13342_p0 = scmp.ge.s32.totalorder %s17268_s18, 1  ;;  %s17268_s18 = sphi %s17351_s18, %s25_s18  }
   0x2   : > { %p437_p1 = scmp.lt.s32.totalorder %s17268_s18, 3 }
   0x4   : > { %p438_p2 = pnand %p13342_p0, %p437_p1 }
   0x6   : > { %441 = sbr.rel (%p438_p2) target bundleno = 4055 (0xfd7), region = 80 }
   0xd   : > { %p484_p3 = scmp.lt.s32.totalorder %s13338_s19, 1  ;;  %v22174_v0 = vmov 0   ;;  %v16576_v10 = vld [vmem:[%s22161_s3 + $0x8] sm:$0xff]   ;;  %v17421_v28 = vld [vmem:[%s22161_s3] sm:$0xff]   ;;  %vm3060_vm0 = vcmask 130048   ;;  %vm5522_vm1 = vcmask 261120  }
   0xe   : > { %16575 = vset.pattern.permute.xlu1 %v22174_v0  ;;  %16574 = vset.pattern.permute.xlu0 %v22174_v0  ;;  %v17429_v31 = vld [vmem:[%s22159_s1 + $0x1] ss:$0 sm:$0xff]  ;;  %v17434_v32 = vld [vmem:[%s22159_s1] ss:$0 sm:$0xff]  ;;  %v17439_v35 = vld [vmem:[%s22159_s1 + $0x2] ss:$0 sm:$0xff] }
   0xf   : > { %s22611_s19 = smov (!%p484_p3, %s13338_s19), 1  ;;  %15129 = vmatprep.subr.bf16.mxu0 %v16576_v10  ;;  %16083 = vmatprep.subr.bf16.mxu1 %v16576_v10  ;;  %v17449_v37 = vld [vmem:[%s22159_s1 + $0x3] ss:$0 sm:$0xff]  ;;  %v17468_v53 = vld [vmem:[%s22159_s1 + $0x4] ss:$0 sm:$0xff]  ;;  %vm6884_vm2 = vcmask 523264  }
  0x10   : > { %s14423_s20 = sshll.u32 %s22611_s19, 9  ;;  %15130 = vmatpush3.bf16.msra.mxu0 %v16576_v10  ;;  %16084 = vmatpush3.bf16.msra.mxu1 %v16576_v10  ;;  %vm13272_vm3 = vcmask 64512   ;;  %s13345_s26 = sshll.u32 %s22611_s19, 3 }
  0x11   : > { %s17367_s23 = scalar_lea.vmem %s22158_s0, %s14423_s20  ;;  %15187 = vmatprep.subr.bf16.mxu0 %v17421_v28  ;;  %s492_s29 = scalar_lea.vmem %s22173_s15, %s13345_s26 }
  0x12   : > { %v17370_v1 = vld [vmem:[%s17367_s23 + $0x10] sm:$0xff]  ;;  %v17373_v2 = vld [vmem:[%s17367_s23 + $0x8] sm:$0xff]  ;;  %v17378_v3 = vld [vmem:[%s17367_s23 + $0x18] sm:$0xff] }
  0x13   : > { %1050 = vperm.xlu1 %16575, %v17370_v1   ;;  %562 = vperm.xlu0 %16574, %v17373_v2   ;;  %v17383_v4 = vld [vmem:[%s17367_s23 + $0x20] sm:$0xff]  ;;  %v985_v5 = vld [vmem:[%s17367_s23 + $0x28] sm:$0xff]  ;;  %v1473_v6 = vld [vmem:[%s17367_s23 + $0x30] sm:$0xff] }
  0x14   : > { %v1961_v7 = vld [vmem:[%s17367_s23 + $0x38] sm:$0xff]  ;;  %v2449_v8 = vld [vmem:[%s17367_s23 + $0x40] sm:$0xff]  ;;  %v989_v9 = vld [vmem:[%s17367_s23 + $0x48] sm:$0xff] }
  0x15   : > { %v1477_v11 = vld [vmem:[%s17367_s23 + $0x50] sm:$0xff]  ;;  %v1965_v12 = vld [vmem:[%s17367_s23 + $0x58] sm:$0xff]  ;;  %v2453_v13 = vld [vmem:[%s17367_s23 + $0x60] sm:$0xff] }
  0x16   : > { %v993_v14 = vld [vmem:[%s17367_s23 + $0x68] sm:$0xff]  ;;  %v1481_v15 = vld [vmem:[%s17367_s23 + $0x70] sm:$0xff]  ;;  %v1969_v16 = vld [vmem:[%s17367_s23 + $0x78] sm:$0xff] }
  0x17   : > { %1055 = vperm.xlu1 %16575, %v17378_v3   ;;  %567 = vperm.xlu0 %16574, %v17370_v1   ;;  %v17406_v17 = vld [vmem:[%s17367_s23 + $0x80] sm:$0xff]  ;;  %v17416_v27 = vld [vmem:[%s17367_s23 + $0x88] sm:$0xff]  ;;  %v17444_v36 = vld [vmem:[%s17367_s23 + $0x90] sm:$0xff] }
  0x18   : > { %v494_v18 = vld [vmem:[%s17367_s23] sm:$0xff]  ;;  %v17454_v42 = vld [vmem:[%s17367_s23 + $0x98] sm:$0xff] }
  0x1b   : > { %577 = vperm.xlu1 %16575, %v17383_v4   ;;  %572 = vperm.xlu0 %16574, %v17378_v3  }
  0x1f   : > { %1065 = vperm.xlu1 %16575, %v985_v5   ;;  %1060 = vperm.xlu0 %16574, %v17383_v4  }
  0x23   : > { %1543 = vperm.xlu1 %16575, %v17383_v4   ;;  %1538 = vperm.xlu0 %16574, %v17378_v3  }
  0x27   : > { %1553 = vperm.xlu1 %16575, %v1473_v6   ;;  %1548 = vperm.xlu0 %16574, %v985_v5  }
  0x2b   : > { %2031 = vperm.xlu1 %16575, %v985_v5   ;;  %2026 = vperm.xlu0 %16574, %v17383_v4  }
  0x2f   : > { %2041 = vperm.xlu1 %16575, %v1961_v7   ;;  %2036 = vperm.xlu0 %16574, %v1473_v6  }
  0x33   : > { %2519 = vperm.xlu1 %16575, %v1473_v6   ;;  %2514 = vperm.xlu0 %16574, %v985_v5  }
  0x37   : > { %2529 = vperm.xlu1 %16575, %v2449_v8   ;;  %2524 = vperm.xlu0 %16574, %v1961_v7  }
  0x3b   : > { %587 = vperm.xlu1 %16575, %v1473_v6   ;;  %582 = vperm.xlu0 %16574, %v985_v5  }
  0x3f   : > { %1075 = vperm.xlu1 %16575, %v1961_v7   ;;  %1070 = vperm.xlu0 %16574, %v1473_v6  }
  0x43   : > { %597 = vperm.xlu1 %16575, %v2449_v8   ;;  %592 = vperm.xlu0 %16574, %v1961_v7  }
  0x47   : > { %1085 = vperm.xlu1 %16575, %v989_v9   ;;  %1080 = vperm.xlu0 %16574, %v2449_v8  }
  0x4b   : > { %1563 = vperm.xlu1 %16575, %v2449_v8   ;;  %1558 = vperm.xlu0 %16574, %v1961_v7  }
  0x4f   : > { %1573 = vperm.xlu1 %16575, %v1477_v11   ;;  %1568 = vperm.xlu0 %16574, %v989_v9  }
  0x53   : > { %2051 = vperm.xlu1 %16575, %v989_v9   ;;  %2046 = vperm.xlu0 %16574, %v2449_v8  }
  0x57   : > { %2061 = vperm.xlu1 %16575, %v1965_v12   ;;  %2056 = vperm.xlu0 %16574, %v1477_v11  }
  0x5b   : > { %2539 = vperm.xlu1 %16575, %v1477_v11   ;;  %2534 = vperm.xlu0 %16574, %v989_v9  }
  0x5f   : > { %2549 = vperm.xlu1 %16575, %v2453_v13   ;;  %2544 = vperm.xlu0 %16574, %v1965_v12  }
  0x63   : > { %607 = vperm.xlu1 %16575, %v1477_v11   ;;  %602 = vperm.xlu0 %16574, %v989_v9  }
  0x67   : > { %1095 = vperm.xlu1 %16575, %v1965_v12   ;;  %1090 = vperm.xlu0 %16574, %v1477_v11  }
  0x6b   : > { %617 = vperm.xlu1 %16575, %v2453_v13   ;;  %612 = vperm.xlu0 %16574, %v1965_v12  }
  0x6f   : > { %1105 = vperm.xlu1 %16575, %v993_v14   ;;  %1100 = vperm.xlu0 %16574, %v2453_v13  }
  0x73   : > { %1583 = vperm.xlu1 %16575, %v2453_v13   ;;  %1578 = vperm.xlu0 %16574, %v1965_v12  }
  0x77   : > { %1593 = vperm.xlu1 %16575, %v1481_v15   ;;  %1588 = vperm.xlu0 %16574, %v993_v14  }
  0x7b   : > { %2071 = vperm.xlu1 %16575, %v993_v14   ;;  %2066 = vperm.xlu0 %16574, %v2453_v13  }
  0x7f   : > { %2081 = vperm.xlu1 %16575, %v1969_v16   ;;  %2076 = vperm.xlu0 %16574, %v1481_v15  }
  0x83   : > { %2559 = vperm.xlu1 %16575, %v1481_v15   ;;  %2554 = vperm.xlu0 %16574, %v993_v14  }
  0x87   : > { %2569 = vperm.xlu1 %16575, %v17406_v17   ;;  %2564 = vperm.xlu0 %16574, %v1969_v16  }
  0x8b   : > { %1045 = vperm.xlu1 %16575, %v17373_v2   ;;  %557 = vperm.xlu0 %16574, %v494_v18  }
  0x8f   : > { %2021 = vperm.xlu1 %16575, %v17378_v3   ;;  %1533 = vperm.xlu0 %16574, %v17370_v1  }
  0x92   : > { %v1051_v19 = vpop.permute.xlu1 %1050  ;;  %v563_v20 = vpop.permute.xlu0 %562 }
  0x93   : > { %622 = vperm.xlu1 %16575, %v993_v14   ;;  %2509 = vperm.xlu0 %16574, %v17383_v4   ;;  %v1350_v43 = vmul.f32 %v17429_v31, %v1051_v19  ;;  %v862_v44 = vmul.f32 %v17434_v32, %v563_v20  ;;  %v17482_v4 = vld [vmem:[%s22160_s2] ss:$0 sm:$0xff] }
  0x95   : > { %v1410_v54 = vadd.f32 %v1350_v43, %v862_v44 }
  0x96   : > { %v1056_v21 = vpop.permute.xlu1 %1055  ;;  %v568_v22 = vpop.permute.xlu0 %567 }
  0x97   : > { %627 = vperm.xlu1 %16575, %v1481_v15   ;;  %1110 = vperm.xlu0 %16574, %v1481_v15   ;;  %v1351_v38 = vmul.f32 %v17429_v31, %v1056_v21  ;;  %v863_v39 = vmul.f32 %v17434_v32, %v568_v22 }
  0x99   : > { %v1411_v48 = vadd.f32 %v1351_v38, %v863_v39 }
  0x9a   : > { %v578_v23 = vpop.permute.xlu1 %577  ;;  %v573_v24 = vpop.permute.xlu0 %572 }
  0x9b   : > { %1115 = vperm.xlu1 %16575, %v1969_v16   ;;  %632 = vperm.xlu0 %16574, %v1969_v16   ;;  %v865_v55 = vmul.f32 %v17434_v32, %v578_v23  ;;  %v864_v57 = vmul.f32 %v17434_v32, %v573_v24 }
  0x9e   : > { %v1066_v25 = vpop.permute.xlu1 %1065  ;;  %v1061_v26 = vpop.permute.xlu0 %1060 }
  0x9f   : > { %1598 = vperm.xlu1 %16575, %v1969_v16   ;;  %1120 = vperm.xlu0 %16574, %v17406_v17   ;;  %v1353_v46 = vmul.f32 %v17429_v31, %v1066_v25  ;;  %v1352_v49 = vmul.f32 %v17429_v31, %v1061_v26 }
  0xa1   : > { %v1413_v61 = vadd.f32 %v1353_v46, %v865_v55  ;;  %v1412_v63 = vadd.f32 %v1352_v49, %v864_v57 }
  0xa2   : > { %v1544_v29 = vpop.permute.xlu1 %1543  ;;  %v1539_v30 = vpop.permute.xlu0 %1538 }
  0xa3   : > { %1608 = vperm.xlu1 %16575, %v17416_v27   ;;  %1603 = vperm.xlu0 %16574, %v17406_v17   ;;  %v1839_v45 = vmul.f32 %v17439_v35, %v1544_v29  ;;  %v1838_v47 = vmul.f32 %v17439_v35, %v1539_v30 }
  0xa5   : > { %v1899_v58 = vadd.f32 %v1839_v45, %v1411_v48  ;;  %v1898_v62 = vadd.f32 %v1838_v47, %v1410_v54  ;;  %v17516_v47 = vld [vmem:[%s17367_s23 + $0xa8] sm:$0xff] }
  0xa6   : > { %v1554_v33 = vpop.permute.xlu1 %1553  ;;  %v1549_v34 = vpop.permute.xlu0 %1548 }
  0xa7   : > { %2091 = vperm.xlu1 %16575, %v17416_v27   ;;  %2086 = vperm.xlu0 %16574, %v17406_v17   ;;  %v1841_v59 = vmul.f32 %v17439_v35, %v1554_v33  ;;  %v1840_v60 = vmul.f32 %v17439_v35, %v1549_v34  ;;  %v17501_v34 = vld [vmem:[%s17367_s23 + $0xa0] sm:$0xff] }
  0xa9   : > { %v1901_v10 = vadd.f32 %v1841_v59, %v1413_v61  ;;  %v1900_v11 = vadd.f32 %v1840_v60, %v1412_v63  ;;  %v17540_v59 = vld [vmem:[%s17367_s23 + $0xb0] sm:$0xff] }
  0xaa   : > { %v2032_v40 = vpop.permute.xlu1 %2031  ;;  %v2027_v41 = vpop.permute.xlu0 %2026 }
  0xab   : > { %2574 = vperm.xlu1 %16575, %v17416_v27   ;;  %2096 = vperm.xlu0 %16574, %v17444_v36   ;;  %v2327_v50 = vmul.f32 %v17449_v37, %v2032_v40  ;;  %v2326_v56 = vmul.f32 %v17449_v37, %v2027_v41 }
  0xad   : > { %v2387_v1 = vadd.f32 %v2327_v50, %v1899_v58  ;;  %v2386_v7 = vadd.f32 %v2326_v56, %v1898_v62 }
  0xae   : > { %v2042_v51 = vpop.permute.xlu1 %2041  ;;  %v2037_v52 = vpop.permute.xlu0 %2036 }
  0xaf   : > { %2584 = vperm.xlu1 %16575, %v17454_v42   ;;  %2579 = vperm.xlu0 %16574, %v17444_v36   ;;  %v2329_v2 = vmul.f32 %v17449_v37, %v2042_v51  ;;  %v2328_v3 = vmul.f32 %v17449_v37, %v2037_v52 }
  0xb1   : > { %v2389_v14 = vadd.f32 %v2329_v2, %v1901_v10  ;;  %v2388_v15 = vadd.f32 %v2328_v3, %v1900_v11 }
  0xb2   : > { %v2520_v5 = vpop.permute.xlu1 %2519  ;;  %v2515_v6 = vpop.permute.xlu0 %2514 }
  0xb3   : > { %v2815_v8 = vmul.f32 %v17468_v53, %v2520_v5  ;;  %v2814_v9 = vmul.f32 %v17468_v53, %v2515_v6  ;;  %642 = vperm.xlu1 %16575, %v17416_v27   ;;  %637 = vperm.xlu0 %16574, %v17406_v17  }
  0xb5   : > { %v2875_v12 = vadd.f32 %v2815_v8, %v2387_v1  ;;  %v2874_v13 = vadd.f32 %v2814_v9, %v2386_v7 }
  0xb6   : > { %v2530_v16 = vpop.permute.xlu1 %2529  ;;  %v2525_v18 = vpop.permute.xlu0 %2524 }
  0xb7   : > { %v2942_v19 = vadd.f32 %v17482_v4, %v2875_v12  ;;  %v2941_v20 = vadd.f32 %v17482_v4, %v2874_v13  ;;  %v2817_v21 = vmul.f32 %v17468_v53, %v2530_v16  ;;  %v2816_v22 = vmul.f32 %v17468_v53, %v2525_v18  ;;  %1130 = vperm.xlu1 %16575, %v17444_v36  }
  0xb8   : > { %1125 = vperm.xlu0 %16574, %v17416_v27  }
  0xb9   : > { %v3002_v17 = vmax.f32 %v2942_v19, 0.0  ;;  %v3001_v23 = vmax.f32 %v2941_v20, 0.0  ;;  %v2877_v24 = vadd.f32 %v2817_v21, %v2389_v14  ;;  %v2876_v25 = vadd.f32 %v2816_v22, %v2388_v15 }
  0xba   : > { %v588_v26 = vpop.permute.xlu1 %587  ;;  %v583_v29 = vpop.permute.xlu0 %582 }
  0xbb   : > { %3063 = vst.msk [vmem:[#allocation2 + $0x10] sm:$0xff] %vm3060_vm0, %v3002_v17  ;;  %3062 = vst.msk [vmem:[#allocation2 + $0x8] sm:$0xff] %vm3060_vm0, %v3001_v23  ;;  %v2944_v30 = vadd.f32 %v17482_v4, %v2877_v24  ;;  %v2943_v33 = vadd.f32 %v17482_v4, %v2876_v25  ;;  %652 = vperm.xlu1 %16575, %v17454_v42   ;;  %v866_v3 = vmul.f32 %v17434_v32, %v583_v29 }
  0xbc   : > { %647 = vperm.xlu0 %16574, %v17444_v36  }
  0xbd   : > { %v3004_v27 = vmax.f32 %v2944_v30, 0.0  ;;  %v3003_v38 = vmax.f32 %v2943_v33, 0.0 }
  0xbe   : > { %v1076_v39 = vpop.permute.xlu1 %1075  ;;  %v1071_v40 = vpop.permute.xlu0 %1070 }
  0xbf   : > { %3065 = vst.msk [vmem:[#allocation2 + $0x20] sm:$0xff] %vm3060_vm0, %v3004_v27  ;;  %3064 = vst.msk [vmem:[#allocation2 + $0x18] sm:$0xff] %vm3060_vm0, %v3003_v38  ;;  %1140 = vperm.xlu1 %16575, %v17501_v34   ;;  %v1355_v1 = vmul.f32 %v17429_v31, %v1076_v39  ;;  %v1354_v2 = vmul.f32 %v17429_v31, %v1071_v40 }
  0xc0   : > { %1135 = vperm.xlu0 %16574, %v17454_v42  }
  0xc1   : > { %v1414_v12 = vadd.f32 %v1354_v2, %v866_v3 }
  0xc2   : > { %v598_v41 = vpop.permute.xlu1 %597  ;;  %v593_v43 = vpop.permute.xlu0 %592  ;;  %v17507_v44 = vld [vmem:[#allocation2 + $0x8] sm:$0xff]  ;;  %v17509_v45 = vld [vmem:[#allocation2 + $0x10] sm:$0xff] }
  0xc3   : > { %1618 = vperm.xlu1 %16575, %v17454_v42   ;;  %v3208_v46 = vpack.c.bf16 %v17509_v45, %v17507_v44  ;;  %v869_v15 = vmul.f32 %v17434_v32, %v598_v41  ;;  %v868_v16 = vmul.f32 %v17434_v32, %v593_v43 }
  0xc4   : > { %1613 = vperm.xlu0 %16574, %v17444_v36  }
  0xc5   : > { %15131 = vmatprep.mubr.msk.bf16.mxu0 %vm3060_vm0, %v3208_v46 }
  0xc6   : > { %v17519_v48 = vld [vmem:[#allocation2 + $0x18] sm:$0xff]  ;;  %v17521_v49 = vld [vmem:[#allocation2 + $0x20] sm:$0xff]  ;;  %v1086_v50 = vpop.permute.xlu1 %1085  ;;  %v1081_v51 = vpop.permute.xlu0 %1080 }
  0xc7   : > { %v17523_v52 = vld [vmem:[#allocation2 + $0x18] sm:$0xff]  ;;  %v3178_v54 = vpack.c.bf16 %v17519_v48, %v17509_v45  ;;  %v3209_v55 = vpack.c.bf16 %v17521_v49, %v17519_v48  ;;  %1628 = vperm.xlu1 %16575, %v17516_v47   ;;  %v17530_v36 = vld [vmem:[#allocation2 + $0x20] sm:$0xff]  ;;  %v1357_v7 = vmul.f32 %v17429_v31, %v1086_v50  ;;  %v1356_v8 = vmul.f32 %v17429_v31, %v1081_v51 }
  0xc8   : > { %1623 = vperm.xlu0 %16574, %v17501_v34  }
  0xc9   : > { %15132 = vmatmul.mubr.msk.bf16.vlgmr.msra.gmra.mrb[0].mxu0 %vm3060_vm0, %v3209_v55  ;;  %v1417_v22 = vadd.f32 %v1357_v7, %v869_v15  ;;  %v1416_v17 = vadd.f32 %v1356_v8, %v868_v16  ;;  %v17603_v16 = vld [vmem:[%s17367_s23 + $0xc8] sm:$0xff] }
  0xca   : > { %v1564_v57 = vpop.permute.xlu1 %1563  ;;  %v1559_v58 = vpop.permute.xlu0 %1558  ;;  %15188 = vmatpush3.bf16.msra.mxu0 %v17421_v28  ;;  %v17549_v28 = vld [vmem:[%s17367_s23 + $0xb8] sm:$0xff] }
  0xcb   : > { %2106 = vperm.xlu1 %16575, %v17501_v34   ;;  %v1843_v5 = vmul.f32 %v17439_v35, %v1564_v57  ;;  %v1842_v6 = vmul.f32 %v17439_v35, %v1559_v58 }
  0xcc   : > { %2101 = vperm.xlu0 %16574, %v17454_v42   ;;  %v867_v42 = vmul.f32 %v17434_v32, %v588_v26 }
  0xcd   : > { %v1902_v21 = vadd.f32 %v1842_v6, %v1414_v12 }
  0xce   : > { %v1574_v60 = vpop.permute.xlu1 %1573  ;;  %v1569_v61 = vpop.permute.xlu0 %1568  ;;  %v1415_v11 = vadd.f32 %v1355_v1, %v867_v42 }
  0xcf   : > { %2116 = vperm.xlu1 %16575, %v17540_v59   ;;  %v1845_v18 = vmul.f32 %v17439_v35, %v1574_v60  ;;  %v1844_v19 = vmul.f32 %v17439_v35, %v1569_v61 }
  0xd0   : > { %2111 = vperm.xlu0 %16574, %v17516_v47   ;;  %v1903_v20 = vadd.f32 %v1843_v5, %v1415_v11  ;;  %v17584_v5 = vld [vmem:[%s17367_s23 + $0xc0] sm:$0xff] }
  0xd1   : > { %v1905_v38 = vadd.f32 %v1845_v18, %v1417_v22  ;;  %v1904_v39 = vadd.f32 %v1844_v19, %v1416_v17 }
  0xd2   : > { %v2052_v62 = vpop.permute.xlu1 %2051  ;;  %v2047_v63 = vpop.permute.xlu0 %2046 }
  0xd3   : > { %2594 = vperm.xlu1 %16575, %v17516_v47   ;;  %v2331_v13 = vmul.f32 %v17449_v37, %v2052_v62  ;;  %v2330_v14 = vmul.f32 %v17449_v37, %v2047_v63 }
  0xd4   : > { %2589 = vperm.xlu0 %16574, %v17501_v34  }
  0xd5   : > { %v2391_v29 = vadd.f32 %v2331_v13, %v1903_v20  ;;  %v2390_v30 = vadd.f32 %v2330_v14, %v1902_v21 }
  0xd6   : > { %v2062_v9 = vpop.permute.xlu1 %2061  ;;  %v2057_v10 = vpop.permute.xlu0 %2056 }
  0xd7   : > { %2604 = vperm.xlu1 %16575, %v17549_v28   ;;  %v2333_v23 = vmul.f32 %v17449_v37, %v2062_v9  ;;  %v2332_v24 = vmul.f32 %v17449_v37, %v2057_v10 }
  0xd8   : > { %2599 = vperm.xlu0 %16574, %v17540_v59  }
  0xd9   : > { %v2393_v43 = vadd.f32 %v2333_v23, %v1905_v38  ;;  %v2392_v46 = vadd.f32 %v2332_v24, %v1904_v39 }
  0xda   : > { %v2540_v25 = vpop.permute.xlu1 %2539  ;;  %v2535_v26 = vpop.permute.xlu0 %2534 }
  0xdb   : > { %v2819_v33 = vmul.f32 %v17468_v53, %v2540_v25  ;;  %v2818_v27 = vmul.f32 %v17468_v53, %v2535_v26  ;;  %662 = vperm.xlu1 %16575, %v17516_v47  }
  0xdc   : > { %657 = vperm.xlu0 %16574, %v17501_v34  }
  0xdd   : > { %v2879_v40 = vadd.f32 %v2819_v33, %v2391_v29  ;;  %v2878_v41 = vadd.f32 %v2818_v27, %v2390_v30  ;;  %v17626_v29 = vld [vmem:[%s17367_s23 + $0xd0] sm:$0xff] }
  0xde   : > { %v2550_v50 = vpop.permute.xlu1 %2549  ;;  %v2545_v51 = vpop.permute.xlu0 %2544 }
  0xdf   : > { %v2946_v55 = vadd.f32 %v17482_v4, %v2879_v40  ;;  %v2945_v57 = vadd.f32 %v17482_v4, %v2878_v41  ;;  %v2821_v58 = vmul.f32 %v17468_v53, %v2550_v50  ;;  %v2820_v60 = vmul.f32 %v17468_v53, %v2545_v51  ;;  %1150 = vperm.xlu1 %16575, %v17540_v59   ;;  %v17635_v41 = vld [vmem:[%s17367_s23 + $0xd8] sm:$0xff] }
  0xe0   : > { %1145 = vperm.xlu0 %16574, %v17516_v47  }
  0xe1   : > { %v3006_v34 = vmax.f32 %v2946_v55, 0.0  ;;  %v3005_v61 = vmax.f32 %v2945_v57, 0.0  ;;  %v2881_v62 = vadd.f32 %v2821_v58, %v2393_v43  ;;  %v2880_v63 = vadd.f32 %v2820_v60, %v2392_v46 }
  0xe2   : > { %v608_v1 = vpop.permute.xlu1 %607  ;;  %v603_v2 = vpop.permute.xlu0 %602 }
  0xe3   : > { %3067 = vst.msk [vmem:[#allocation2 + $0x30] sm:$0xff] %vm3060_vm0, %v3006_v34  ;;  %3066 = vst.msk [vmem:[#allocation2 + $0x28] sm:$0xff] %vm3060_vm0, %v3005_v61  ;;  %v2948_v42 = vadd.f32 %v17482_v4, %v2881_v62  ;;  %v2947_v3 = vadd.f32 %v17482_v4, %v2880_v63  ;;  %672 = vperm.xlu1 %16575, %v17549_v28   ;;  %v870_v43 = vmul.f32 %v17434_v32, %v603_v2 }
  0xe4   : > { %667 = vperm.xlu0 %16574, %v17540_v59  }
  0xe5   : > { %v3008_v47 = vmax.f32 %v2948_v42, 0.0  ;;  %v3007_v6 = vmax.f32 %v2947_v3, 0.0 }
  0xe6   : > { %v1096_v7 = vpop.permute.xlu1 %1095  ;;  %v1091_v8 = vpop.permute.xlu0 %1090 }
  0xe7   : > { %3069 = vst.msk [vmem:[#allocation2 + $0x40] sm:$0xff] %vm3060_vm0, %v3008_v47  ;;  %3068 = vst.msk [vmem:[#allocation2 + $0x38] sm:$0xff] %vm3060_vm0, %v3007_v6  ;;  %1160 = vperm.xlu1 %16575, %v17584_v5   ;;  %v1359_v39 = vmul.f32 %v17429_v31, %v1096_v7  ;;  %v1358_v40 = vmul.f32 %v17429_v31, %v1091_v8 }
  0xe8   : > { %1155 = vperm.xlu0 %16574, %v17549_v28  }
  0xe9   : > { %v1418_v34 = vadd.f32 %v1358_v40, %v870_v43 }
  0xea   : > { %v618_v9 = vpop.permute.xlu1 %617  ;;  %v613_v10 = vpop.permute.xlu0 %612  ;;  %v17590_v11 = vld [vmem:[#allocation2 + $0x28] sm:$0xff]  ;;  %v17592_v12 = vld [vmem:[#allocation2 + $0x30] sm:$0xff] }
  0xeb   : > { %v17594_v13 = vld [vmem:[#allocation2 + $0x28] sm:$0xff]  ;;  %1638 = vperm.xlu1 %16575, %v17549_v28   ;;  %v3210_v14 = vpack.c.bf16 %v17592_v12, %v17590_v11  ;;  %v17599_v15 = vld [vmem:[#allocation2 + $0x30] sm:$0xff]  ;;  %v873_v63 = vmul.f32 %v17434_v32, %v618_v9 }
  0xec   : > { %1633 = vperm.xlu0 %16574, %v17540_v59  }
  0xed   : > { %15135 = vmatprep.mubr.msk.bf16.mxu0 %vm3060_vm0, %v3210_v14 }
  0xee   : > { %v1106_v19 = vpop.permute.xlu1 %1105  ;;  %v1101_v20 = vpop.permute.xlu0 %1100  ;;  %v17608_v21 = vld [vmem:[#allocation2 + $0x38] sm:$0xff]  ;;  %v17610_v22 = vld [vmem:[#allocation2 + $0x40] sm:$0xff] }
  0xef   : > { %v17612_v17 = vld [vmem:[#allocation2 + $0x38] sm:$0xff]  ;;  %1648 = vperm.xlu1 %16575, %v17603_v16   ;;  %v3211_v59 = vpack.c.bf16 %v17610_v22, %v17608_v21  ;;  %v17617_v23 = vld [vmem:[#allocation2 + $0x40] sm:$0xff]  ;;  %v1361_v51 = vmul.f32 %v17429_v31, %v1106_v19  ;;  %v1360_v55 = vmul.f32 %v17429_v31, %v1101_v20 }
  0xf0   : > { %1643 = vperm.xlu0 %16574, %v17584_v5  }
  0xf1   : > { %15136 = vmatmul.mubr.msk.bf16.gmra.mrb[4].mxu0 %vm3060_vm0, %v3211_v59  ;;  %v1421_v6 = vadd.f32 %v1361_v51, %v873_v63 }
  0xf2   : > { %v1584_v25 = vpop.permute.xlu1 %1583  ;;  %v1579_v26 = vpop.permute.xlu0 %1578 }
  0xf3   : > { %2126 = vperm.xlu1 %16575, %v17584_v5   ;;  %v1847_v46 = vmul.f32 %v17439_v35, %v1584_v25  ;;  %v1846_v50 = vmul.f32 %v17439_v35, %v1579_v26 }
  0xf4   : > { %2121 = vperm.xlu0 %16574, %v17549_v28   ;;  %v871_v28 = vmul.f32 %v17434_v32, %v608_v1  ;;  %v872_v1 = vmul.f32 %v17434_v32, %v613_v10 }
  0xf5   : > { %v1906_v47 = vadd.f32 %v1846_v50, %v1418_v34 }
  0xf6   : > { %v1594_v30 = vpop.permute.xlu1 %1593  ;;  %v1589_v33 = vpop.permute.xlu0 %1588  ;;  %v1419_v60 = vadd.f32 %v1359_v39, %v871_v28  ;;  %v1420_v7 = vadd.f32 %v1360_v55, %v872_v1 }
  0xf7   : > { %2136 = vperm.xlu1 %16575, %v17626_v29   ;;  %v1849_v2 = vmul.f32 %v17439_v35, %v1594_v30  ;;  %v1848_v42 = vmul.f32 %v17439_v35, %v1589_v33 }
  0xf8   : > { %2131 = vperm.xlu0 %16574, %v17603_v16   ;;  %v1907_v3 = vadd.f32 %v1847_v46, %v1419_v60 }
  0xf9   : > { %v1909_v26 = vadd.f32 %v1849_v2, %v1421_v6  ;;  %v1908_v30 = vadd.f32 %v1848_v42, %v1420_v7 }
  0xfa   : > { %v2072_v27 = vpop.permute.xlu1 %2071  ;;  %v2067_v38 = vpop.permute.xlu0 %2066 }
  0xfb   : > { %2614 = vperm.xlu1 %16575, %v17603_v16   ;;  %v2335_v61 = vmul.f32 %v17449_v37, %v2072_v27  ;;  %v2334_v62 = vmul.f32 %v17449_v37, %v2067_v38 }
  0xfc   : > { %2609 = vperm.xlu0 %16574, %v17584_v5  }
  0xfd   : > { %v2395_v59 = vadd.f32 %v2335_v61, %v1907_v3  ;;  %v2394_v9 = vadd.f32 %v2334_v62, %v1906_v47 }
  0xfe   : > { %v2082_v57 = vpop.permute.xlu1 %2081  ;;  %v2077_v58 = vpop.permute.xlu0 %2076 }
  0xff   : > { %2624 = vperm.xlu1 %16575, %v17635_v41   ;;  %v2337_v8 = vmul.f32 %v17449_v37, %v2082_v57  ;;  %v2336_v14 = vmul.f32 %v17449_v37, %v2077_v58 }
 0x100   : > { %2619 = vperm.xlu0 %16574, %v17626_v29  }
 0x101   : > { %v2397_v38 = vadd.f32 %v2337_v8, %v1909_v26  ;;  %v2396_v39 = vadd.f32 %v2336_v14, %v1908_v30 }
 0x102   : > { %v2560_v19 = vpop.permute.xlu1 %2559  ;;  %v2555_v20 = vpop.permute.xlu0 %2554 }
 0x103   : > { %v2823_v10 = vmul.f32 %v17468_v53, %v2560_v19  ;;  %v2822_v25 = vmul.f32 %v17468_v53, %v2555_v20  ;;  %682 = vperm.xlu1 %16575, %v17603_v16  }
 0x104   : > { %677 = vperm.xlu0 %16574, %v17584_v5  }
 0x105   : > { %v2883_v33 = vadd.f32 %v2823_v10, %v2395_v59  ;;  %v2882_v27 = vadd.f32 %v2822_v25, %v2394_v9 }
 0x106   : > { %v2570_v40 = vpop.permute.xlu1 %2569  ;;  %v2565_v28 = vpop.permute.xlu0 %2564 }
 0x107   : > { %v2950_v43 = vadd.f32 %v17482_v4, %v2883_v33  ;;  %v2949_v46 = vadd.f32 %v17482_v4, %v2882_v27  ;;  %v2825_v50 = vmul.f32 %v17468_v53, %v2570_v40  ;;  %v2824_v51 = vmul.f32 %v17468_v53, %v2565_v28  ;;  %1170 = vperm.xlu1 %16575, %v17626_v29   ;;  %v17694_v27 = vld [vmem:[%s17367_s23 + $0xe8] sm:$0xff] }
 0x108   : > { %1165 = vperm.xlu0 %16574, %v17603_v16   ;;  %v17672_v16 = vld [vmem:[%s17367_s23 + $0xe0] sm:$0xff] }
 0x109   : > { %v3010_v5 = vmax.f32 %v2950_v43, 0.0  ;;  %v3009_v55 = vmax.f32 %v2949_v46, 0.0  ;;  %v2885_v57 = vadd.f32 %v2825_v50, %v2397_v38  ;;  %v2884_v58 = vadd.f32 %v2824_v51, %v2396_v39 }
 0x10a   : > { %v1046_v60 = vpop.permute.xlu1 %1045  ;;  %v558_v34 = vpop.permute.xlu0 %557 }
 0x10b   : > { %3071 = vst.msk [vmem:[#allocation2 + $0x50] sm:$0xff] %vm3060_vm0, %v3010_v5  ;;  %3070 = vst.msk [vmem:[#allocation2 + $0x48] sm:$0xff] %vm3060_vm0, %v3009_v55  ;;  %v2952_v61 = vadd.f32 %v17482_v4, %v2885_v57  ;;  %v2951_v62 = vadd.f32 %v17482_v4, %v2884_v58  ;;  %v1349_v63 = vmul.f32 %v17429_v31, %v1046_v60  ;;  %692 = vperm.xlu1 %16575, %v17635_v41  }
 0x10c   : > { %v861_v1 = vmul.f32 %v17434_v32, %v558_v34  ;;  %687 = vperm.xlu0 %16574, %v17626_v29   ;;  %v17719_v34 = vld [vmem:[%s17367_s23 + $0xf0] sm:$0xff] }
 0x10d   : > { %v3012_v2 = vmax.f32 %v2952_v61, 0.0  ;;  %v3011_v42 = vmax.f32 %v2951_v62, 0.0 }
 0x10e   : > { %v2022_v3 = vpop.permute.xlu1 %2021  ;;  %v1534_v47 = vpop.permute.xlu0 %1533  ;;  %v1409_v6 = vadd.f32 %v1349_v63, %v861_v1 }
 0x10f   : > { %3073 = vst.msk [vmem:[#allocation2 + $0x60] sm:$0xff] %vm3060_vm0, %v3012_v2  ;;  %3072 = vst.msk [vmem:[#allocation2 + $0x58] sm:$0xff] %vm3060_vm0, %v3011_v42  ;;  %v1837_v7 = vmul.f32 %v17439_v35, %v1534_v47  ;;  %1180 = vperm.xlu1 %16575, %v17672_v16   ;;  %v2325_v8 = vmul.f32 %v17449_v37, %v2022_v3 }
 0x110   : > { %1175 = vperm.xlu0 %16574, %v17635_v41  }
 0x111   : > { %v1897_v14 = vadd.f32 %v1837_v7, %v1409_v6  ;;  %v3179_v7 = vpack.c.bf16 %v17590_v11, %v17521_v49 }
 0x112   : > { %v623_v19 = vpop.permute.xlu1 %622  ;;  %v2510_v20 = vpop.permute.xlu0 %2509  ;;  %v17680_v59 = vld [vmem:[#allocation2 + $0x48] sm:$0xff]  ;;  %v17682_v9 = vld [vmem:[#allocation2 + $0x50] sm:$0xff] }
 0x113   : > { %v17684_v10 = vld [vmem:[#allocation2 + $0x48] sm:$0xff]  ;;  %v2385_v25 = vadd.f32 %v2325_v8, %v1897_v14  ;;  %v2813_v26 = vmul.f32 %v17468_v53, %v2510_v20  ;;  %1658 = vperm.xlu1 %16575, %v17635_v41   ;;  %v3212_v30 = vpack.c.bf16 %v17682_v9, %v17680_v59  ;;  %v17690_v33 = vld [vmem:[#allocation2 + $0x50] sm:$0xff]  ;;  %v874_v47 = vmul.f32 %v17434_v32, %v623_v19 }
 0x114   : > { %1653 = vperm.xlu0 %16574, %v17626_v29  }
 0x115   : > { %v2873_v39 = vadd.f32 %v2813_v26, %v2385_v25  ;;  %15139 = vmatprep.mubr.msk.bf16.mxu0 %vm3060_vm0, %v3212_v30 }
 0x116   : > { %v628_v40 = vpop.permute.xlu1 %627  ;;  %v1111_v28 = vpop.permute.xlu0 %1110  ;;  %v17699_v43 = vld [vmem:[#allocation2 + $0x58] sm:$0xff]  ;;  %v17701_v46 = vld [vmem:[#allocation2 + $0x60] sm:$0xff] }
 0x117   : > { %v17703_v50 = vld [vmem:[#allocation2 + $0x58] sm:$0xff]  ;;  %v2940_v51 = vadd.f32 %v17482_v4, %v2873_v39  ;;  %1668 = vperm.xlu1 %16575, %v17694_v27   ;;  %v3213_v29 = vpack.c.bf16 %v17701_v46, %v17699_v43  ;;  %v17709_v5 = vld [vmem:[#allocation2 + $0x60] sm:$0xff]  ;;  %v1362_v42 = vmul.f32 %v17429_v31, %v1111_v28  ;;  %v875_v49 = vmul.f32 %v17434_v32, %v628_v40 }
 0x118   : > { %1663 = vperm.xlu0 %16574, %v17672_v16  }
 0x119   : > { %v3000_v57 = vmax.f32 %v2940_v51, 0.0  ;;  %15140 = vmatmul.mubr.msk.bf16.gmra.mrb[8].mxu0 %vm3060_vm0, %v3213_v29  ;;  %v1422_v25 = vadd.f32 %v1362_v42, %v874_v47 }
 0x11a   : > { %v1116_v58 = vpop.permute.xlu1 %1115  ;;  %v633_v60 = vpop.permute.xlu0 %632 }
 0x11b   : > { %3061 = vst.msk [vmem:[#allocation2] sm:$0xff] %vm3060_vm0, %v3000_v57  ;;  %2146 = vperm.xlu1 %16575, %v17672_v16   ;;  %v1363_v8 = vmul.f32 %v17429_v31, %v1116_v58  ;;  %v876_v11 = vmul.f32 %v17434_v32, %v633_v60 }
 0x11c   : > { %2141 = vperm.xlu0 %16574, %v17635_v41   ;;  %v17728_v41 = vld [vmem:[%s17367_s23 + $0xf8] sm:$0xff] }
 0x11d   : > { %v1423_v48 = vadd.f32 %v1363_v8, %v875_v49 }
 0x11e   : > { %v1599_v61 = vpop.permute.xlu1 %1598  ;;  %v1121_v62 = vpop.permute.xlu0 %1120 }
 0x11f   : > { %2156 = vperm.xlu1 %16575, %v17719_v34   ;;  %v1850_v6 = vmul.f32 %v17439_v35, %v1599_v61  ;;  %v1364_v14 = vmul.f32 %v17429_v31, %v1121_v62  ;;  %v3180_v61 = vpack.c.bf16 %v17608_v21, %v17592_v12 }
 0x120   : > { %2151 = vperm.xlu0 %16574, %v17694_v27  }
 0x121   : > { %v1910_v45 = vadd.f32 %v1850_v6, %v1422_v25 }
 0x122   : > { %v1609_v63 = vpop.permute.xlu1 %1608  ;;  %v1604_v1 = vpop.permute.xlu0 %1603  ;;  %v3121_v2 = vld [vmem:[#allocation2] sm:$0xff] }
 0x123   : > { %2634 = vperm.xlu1 %16575, %v17694_v27   ;;  %v3177_v3 = vpack.c.bf16 %v17507_v44, %v3121_v2  ;;  %v1852_v26 = vmul.f32 %v17439_v35, %v1609_v63  ;;  %v1851_v30 = vmul.f32 %v17439_v35, %v1604_v1  ;;  %v3181_v63 = vpack.c.bf16 %v17680_v59, %v17610_v22 }
 0x124   : > { %2629 = vperm.xlu0 %16574, %v17672_v16  }
 0x125   : > { %15189 = vmatprep.mubr.msk.bf16.mxu0 %vm3060_vm0, %v3177_v3  ;;  %v1911_v60 = vadd.f32 %v1851_v30, %v1423_v48  ;;  %v17784_v30 = vld [vmem:[%s17367_s23 + $0x108] sm:$0xff] }
 0x126   : > { %v2092_v20 = vpop.permute.xlu1 %2091  ;;  %15190 = vmatmul.mubr.msk.bf16.vlgmr.msra.gmra.mrb[0].mxu0 %vm3060_vm0, %v3178_v54  ;;  %v2087_v44 = vpop.permute.xlu0 %2086  ;;  %v1424_v54 = vadd.f32 %v1364_v14, %v876_v11 }
 0x127   : > { %v2338_v19 = vmul.f32 %v17449_v37, %v2087_v44  ;;  %2644 = vperm.xlu1 %16575, %v17728_v41   ;;  %15193 = vmatprep.mubr.msk.bf16.mxu0 %vm3060_vm0, %v3179_v7  ;;  %v2339_v39 = vmul.f32 %v17449_v37, %v2092_v20  ;;  %v3182_v20 = vpack.c.bf16 %v17699_v43, %v17682_v9  ;;  %v17773_v44 = vld [vmem:[%s17367_s23 + $0x100] sm:$0xff] }
 0x128   : > { %2639 = vperm.xlu0 %16574, %v17719_v34   ;;  %v1912_v58 = vadd.f32 %v1852_v26, %v1424_v54 }
 0x129   : > { %v2398_v29 = vadd.f32 %v2338_v19, %v1910_v45  ;;  %v2399_v1 = vadd.f32 %v2339_v39, %v1911_v60 }
 0x12a   : > { %v2575_v28 = vpop.permute.xlu1 %2574  ;;  %v2097_v51 = vpop.permute.xlu0 %2096 }
 0x12b   : > { %v2826_v57 = vmul.f32 %v17468_v53, %v2575_v28  ;;  %v2340_v40 = vmul.f32 %v17449_v37, %v2097_v51  ;;  %702 = vperm.xlu1 %16575, %v17694_v27  }
 0x12c   : > { %697 = vperm.xlu0 %16574, %v17672_v16  }
 0x12d   : > { %v2886_v62 = vadd.f32 %v2826_v57, %v2398_v29  ;;  %v2400_v2 = vadd.f32 %v2340_v40, %v1912_v58  ;;  %v17803_v58 = vld [vmem:[%s17367_s23 + $0x110] sm:$0xff] }
 0x12e   : > { %v2585_v42 = vpop.permute.xlu1 %2584  ;;  %15194 = vmatmul.mubr.msk.bf16.gmra.mrb[4].mxu0 %vm3060_vm0, %v3180_v61  ;;  %v2580_v3 = vpop.permute.xlu0 %2579 }
 0x12f   : > { %v2953_v47 = vadd.f32 %v17482_v4, %v2886_v62  ;;  %v2828_v6 = vmul.f32 %v17468_v53, %v2585_v42  ;;  %v2827_v16 = vmul.f32 %v17468_v53, %v2580_v3  ;;  %1190 = vperm.xlu1 %16575, %v17719_v34   ;;  %15197 = vmatprep.mubr.msk.bf16.mxu0 %vm3060_vm0, %v3181_v63  ;;  %v17812_v42 = vld [vmem:[%s17367_s23 + $0x118] sm:$0xff] }
 0x130   : > { %1185 = vperm.xlu0 %16574, %v17694_v27  }
 0x131   : > { %v3013_v12 = vmax.f32 %v2953_v47, 0.0  ;;  %v2888_v21 = vadd.f32 %v2828_v6, %v2400_v2  ;;  %v2887_v22 = vadd.f32 %v2827_v16, %v2399_v1 }
 0x132   : > { %v643_v59 = vpop.permute.xlu1 %642  ;;  %v638_v7 = vpop.permute.xlu0 %637 }
 0x133   : > { %3074 = vst.msk [vmem:[#allocation2 + $0x68] sm:$0xff] %vm3060_vm0, %v3013_v12  ;;  %v2955_v8 = vadd.f32 %v17482_v4, %v2888_v21  ;;  %v2954_v14 = vadd.f32 %v17482_v4, %v2887_v22  ;;  %712 = vperm.xlu1 %16575, %v17728_v41   ;;  %v877_v47 = vmul.f32 %v17434_v32, %v638_v7 }
 0x134   : > { %707 = vperm.xlu0 %16574, %v17719_v34  }
 0x135   : > { %v3015_v27 = vmax.f32 %v2955_v8, 0.0  ;;  %v3014_v25 = vmax.f32 %v2954_v14, 0.0 }
 0x136   : > { %v1131_v19 = vpop.permute.xlu1 %1130  ;;  %15198 = vmatmul.mubr.msk.bf16.gmra.mrb[8].mxu0 %vm3060_vm0, %v3182_v20 }
 0x137   : > { %3076 = vst.msk [vmem:[#allocation2 + $0x78] sm:$0xff] %vm3060_vm0, %v3015_v27  ;;  %3075 = vst.msk [vmem:[#allocation2 + $0x70] sm:$0xff] %vm3060_vm0, %v3014_v25  ;;  %v1126_v49 = vpop.permute.xlu0 %1125  ;;  %1200 = vperm.xlu1 %16575, %v17773_v44   ;;  %v1366_v63 = vmul.f32 %v17429_v31, %v1131_v19 }
 0x138   : > { %1195 = vperm.xlu0 %16574, %v17728_v41   ;;  %v1365_v2 = vmul.f32 %v17429_v31, %v1126_v49 }
 0x13a   : > { %v653_v11 = vpop.permute.xlu1 %652  ;;  %v3134_v26 = vld [vmem:[#allocation2 + $0x68] sm:$0xff]  ;;  %v1425_v14 = vadd.f32 %v1365_v2, %v877_v47 }
 0x13b   : > { %v648_v9 = vpop.permute.xlu0 %647  ;;  %1678 = vperm.xlu1 %16575, %v17728_v41   ;;  %v3183_v43 = vpack.c.bf16 %v3134_v26, %v17701_v46  ;;  %v17787_v45 = vld [vmem:[#allocation2 + $0x68] sm:$0xff] }
 0x13c   : > { %1673 = vperm.xlu0 %16574, %v17719_v34  }
 0x13d   : > { %15201 = vmatprep.mubr.msk.bf16.mxu0 %vm3060_vm0, %v3183_v43 }
 0x13e   : > { %v1141_v48 = vpop.permute.xlu1 %1140  ;;  %v3135_v54 = vld [vmem:[#allocation2 + $0x70] sm:$0xff]  ;;  %v17789_v39 = vld [vmem:[#allocation2 + $0x78] sm:$0xff] }
 0x13f   : > { %v17791_v28 = vld [vmem:[#allocation2 + $0x70] sm:$0xff]  ;;  %v1136_v51 = vpop.permute.xlu0 %1135  ;;  %1688 = vperm.xlu1 %16575, %v17784_v30   ;;  %v3184_v46 = vpack.c.bf16 %v17789_v39, %v3135_v54  ;;  %v3214_v29 = vpack.c.bf16 %v3135_v54, %v3134_v26  ;;  %v1368_v21 = vmul.f32 %v17429_v31, %v1141_v48 }
 0x140   : > { %1683 = vperm.xlu0 %16574, %v17773_v44   ;;  %v1367_v20 = vmul.f32 %v17429_v31, %v1136_v51  ;;  %v17835_v31 = vld [vmem:[%s22159_s1 + $0x2] ss:$0 sm:$0xff] }
 0x141   : > { %15143 = vmatprep.mubr.msk.bf16.mxu1 %vm3060_vm0, %v3214_v29  ;;  %15202 = vmatmul.mubr.msk.bf16.gmra.mrb[12].mxu0 %vm3060_vm0, %v3184_v46  ;;  %v17844_v29 = vld [vmem:[%s22159_s1 + $0x3] ss:$0 sm:$0xff] }
 0x142   : > { %v1619_v57 = vpop.permute.xlu1 %1618 }
 0x143   : > { %v1614_v40 = vpop.permute.xlu0 %1613  ;;  %2166 = vperm.xlu1 %16575, %v17773_v44   ;;  %v1854_v3 = vmul.f32 %v17439_v35, %v1619_v57 }
 0x144   : > { %2161 = vperm.xlu0 %16574, %v17728_v41   ;;  %v878_v41 = vmul.f32 %v17434_v32, %v643_v59  ;;  %v1853_v6 = vmul.f32 %v17439_v35, %v1614_v40  ;;  %v17827_v32 = vld [vmem:[%s22159_s1] ss:$0 sm:$0xff] }
 0x145   : > { %v880_v7 = vmul.f32 %v17827_v32, %v653_v11  ;;  %v879_v19 = vmul.f32 %v17827_v32, %v648_v9 }
 0x146   : > { %v1629_v60 = vpop.permute.xlu1 %1628  ;;  %v1426_v12 = vadd.f32 %v1366_v63, %v878_v41  ;;  %v1913_v49 = vadd.f32 %v1853_v6, %v1425_v14 }
 0x147   : > { %v1624_v61 = vpop.permute.xlu0 %1623  ;;  %2176 = vperm.xlu1 %16575, %v17803_v58   ;;  %v1856_v25 = vmul.f32 %v17439_v35, %v1629_v60  ;;  %v1428_v48 = vadd.f32 %v1368_v21, %v880_v7  ;;  %v1427_v35 = vadd.f32 %v1367_v20, %v879_v19 }
 0x148   : > { %2171 = vperm.xlu0 %16574, %v17784_v30   ;;  %v1914_v27 = vadd.f32 %v1854_v3, %v1426_v12  ;;  %v1855_v26 = vmul.f32 %v17835_v31, %v1624_v61 }
 0x149   : > { %v1916_v60 = vadd.f32 %v1856_v25, %v1428_v48 }
 0x14a   : > { %v2107_v62 = vpop.permute.xlu1 %2106  ;;  %v1915_v61 = vadd.f32 %v1855_v26, %v1427_v35 }
 0x14b   : > { %v2102_v1 = vpop.permute.xlu0 %2101  ;;  %2654 = vperm.xlu1 %16575, %v17784_v30   ;;  %v2342_v22 = vmul.f32 %v17449_v37, %v2107_v62 }
 0x14c   : > { %2649 = vperm.xlu0 %16574, %v17773_v44   ;;  %v2341_v59 = vmul.f32 %v17449_v37, %v2102_v1 }
 0x14d   : > { %v2402_v54 = vadd.f32 %v2342_v22, %v1914_v27 }
 0x14e   : > { %v2117_v16 = vpop.permute.xlu1 %2116  ;;  %v2401_v9 = vadd.f32 %v2341_v59, %v1913_v49 }
 0x14f   : > { %v2112_v8 = vpop.permute.xlu0 %2111  ;;  %2664 = vperm.xlu1 %16575, %v17812_v42   ;;  %v2344_v51 = vmul.f32 %v17449_v37, %v2117_v16 }
 0x150   : > { %2659 = vperm.xlu0 %16574, %v17803_v58   ;;  %v2343_v57 = vmul.f32 %v17844_v29, %v2112_v8 }
 0x151   : > { %v2404_v1 = vadd.f32 %v2344_v51, %v1916_v60  ;;  %v17874_v51 = vld [vmem:[%s17367_s23 + $0x128] sm:$0xff] }
 0x152   : > { %v2595_v43 = vpop.permute.xlu1 %2594  ;;  %v2403_v47 = vadd.f32 %v2343_v57, %v1915_v61 }
 0x153   : > { %v2830_v11 = vmul.f32 %v17468_v53, %v2595_v43  ;;  %v2590_v46 = vpop.permute.xlu0 %2589  ;;  %722 = vperm.xlu1 %16575, %v17784_v30  }
 0x154   : > { %v2829_v40 = vmul.f32 %v17468_v53, %v2590_v46  ;;  %717 = vperm.xlu0 %16574, %v17773_v44  }
 0x155   : > { %v2890_v37 = vadd.f32 %v2830_v11, %v2402_v54  ;;  %v17876_v11 = vld [vmem:[#allocation2 + $0x78] sm:$0xff] }
 0x156   : > { %v2889_v62 = vadd.f32 %v2829_v40, %v2401_v9  ;;  %v2605_v63 = vpop.permute.xlu1 %2604 }
 0x157   : > { %v2957_v2 = vadd.f32 %v17482_v4, %v2890_v37  ;;  %v2832_v41 = vmul.f32 %v17468_v53, %v2605_v63  ;;  %v2600_v3 = vpop.permute.xlu0 %2599  ;;  %1210 = vperm.xlu1 %16575, %v17803_v58  }
 0x158   : > { %v2956_v6 = vadd.f32 %v17482_v4, %v2889_v62  ;;  %v2831_v16 = vmul.f32 %v17468_v53, %v2600_v3  ;;  %1205 = vperm.xlu0 %16574, %v17784_v30   ;;  %v17862_v53 = vld [vmem:[%s17367_s23 + $0x120] sm:$0xff] }
 0x159   : > { %v3017_v44 = vmax.f32 %v2957_v2, 0.0  ;;  %v2892_v12 = vadd.f32 %v2832_v41, %v2404_v1  ;;  %v17898_v1 = vld [vmem:[%s17367_s23 + $0x130] sm:$0xff] }
 0x15a   : > { %v3016_v21 = vmax.f32 %v2956_v6, 0.0  ;;  %v2891_v22 = vadd.f32 %v2831_v16, %v2403_v47  ;;  %v663_v8 = vpop.permute.xlu1 %662  ;;  %v17905_v47 = vld [vmem:[%s22159_s1 + $0x1] ss:$0 sm:$0xff] }
 0x15b   : > { %3078 = vst.msk [vmem:[#allocation2 + $0x88] sm:$0xff] %vm3060_vm0, %v3017_v44  ;;  %v2959_v14 = vadd.f32 %v17482_v4, %v2892_v12  ;;  %v658_v20 = vpop.permute.xlu0 %657  ;;  %732 = vperm.xlu1 %16575, %v17812_v42   ;;  %v17912_v44 = vld [vmem:[%s17367_s23 + $0x138] sm:$0xff]  ;;  %v882_v12 = vmul.f32 %v17827_v32, %v663_v8 }
 0x15c   : > { %3077 = vst.msk [vmem:[#allocation2 + $0x80] sm:$0xff] %vm3060_vm0, %v3016_v21  ;;  %v2958_v59 = vadd.f32 %v17482_v4, %v2891_v22  ;;  %727 = vperm.xlu0 %16574, %v17803_v58   ;;  %v881_v22 = vmul.f32 %v17827_v32, %v658_v20 }
 0x15d   : > { %v3019_v30 = vmax.f32 %v2959_v14, 0.0 }
 0x15e   : > { %v3018_v7 = vmax.f32 %v2958_v59, 0.0  ;;  %v1151_v27 = vpop.permute.xlu1 %1150 }
 0x15f   : > { %3080 = vst.msk [vmem:[#allocation2 + $0x98] sm:$0xff] %vm3060_vm0, %v3019_v30  ;;  %v1146_v25 = vpop.permute.xlu0 %1145  ;;  %1220 = vperm.xlu1 %16575, %v17862_v53   ;;  %v1370_v6 = vmul.f32 %v17905_v47, %v1151_v27 }
 0x160   : > { %3079 = vst.msk [vmem:[#allocation2 + $0x90] sm:$0xff] %vm3060_vm0, %v3018_v7  ;;  %1215 = vperm.xlu0 %16574, %v17812_v42  }
 0x161   : > { %v1430_v30 = vadd.f32 %v1370_v6, %v882_v12 }
 0x162   : > { %v673_v19 = vpop.permute.xlu1 %672  ;;  %v3138_v49 = vld [vmem:[#allocation2 + $0x88] sm:$0xff] }
 0x163   : > { %v668_v4 = vpop.permute.xlu0 %667  ;;  %1698 = vperm.xlu1 %16575, %v17812_v42   ;;  %v3137_v26 = vld [vmem:[#allocation2 + $0x80] sm:$0xff]  ;;  %v17889_v37 = vld [vmem:[#allocation2 + $0x88] sm:$0xff]  ;;  %v884_v20 = vmul.f32 %v17827_v32, %v673_v19 }
 0x164   : > { %v17869_v43 = vld [vmem:[#allocation2 + $0x80] sm:$0xff]  ;;  %1693 = vperm.xlu0 %16574, %v17803_v58   ;;  %v3215_v48 = vpack.c.bf16 %v3137_v26, %v17789_v39  ;;  %v3185_v54 = vpack.c.bf16 %v3138_v49, %v3137_v26 }
 0x166   : > { %15144 = vmatmul.mubr.msk.bf16.vlgmr.msra.gmra.mrb[0].mxu1 %vm3060_vm0, %v3215_v48  ;;  %15205 = vmatprep.mubr.msk.bf16.mxu0 %vm3060_vm0, %v3185_v54  ;;  %v1161_v35 = vpop.permute.xlu1 %1160  ;;  %v17882_v9 = vld [vmem:[#allocation2 + $0x98] sm:$0xff] }
 0x167   : > { %v1156_v57 = vpop.permute.xlu0 %1155  ;;  %1708 = vperm.xlu1 %16575, %v17874_v51   ;;  %v3139_v39 = vld [vmem:[#allocation2 + $0x90] sm:$0xff]  ;;  %v1372_v7 = vmul.f32 %v17905_v47, %v1161_v35 }
 0x168   : > { %v17885_v58 = vld [vmem:[#allocation2 + $0x90] sm:$0xff]  ;;  %1703 = vperm.xlu0 %16574, %v17862_v53   ;;  %v3216_v40 = vpack.c.bf16 %v3139_v39, %v3138_v49  ;;  %v3186_v60 = vpack.c.bf16 %v17882_v9, %v3139_v39  ;;  %v1371_v26 = vmul.f32 %v17905_v47, %v1156_v57  ;;  %v883_v39 = vmul.f32 %v17827_v32, %v668_v4  ;;  %v17932_v57 = vld [vmem:[%s22159_s1 + $0x4] ss:$0 sm:$0xff] }
 0x16a   : > { %15147 = vmatprep.mubr.msk.bf16.mxu1 %vm3060_vm0, %v3216_v40  ;;  %15206 = vmatmul.mubr.msk.bf16.gmra.mrb[16].mxu0 %vm3060_vm0, %v3186_v60  ;;  %v1639_v62 = vpop.permute.xlu1 %1638 }
 0x16b   : > { %v1634_v63 = vpop.permute.xlu0 %1633  ;;  %2186 = vperm.xlu1 %16575, %v17862_v53   ;;  %v1858_v21 = vmul.f32 %v17835_v31, %v1639_v62  ;;  %v1432_v62 = vadd.f32 %v1372_v7, %v884_v20 }
 0x16c   : > { %2181 = vperm.xlu0 %16574, %v17812_v42   ;;  %v1369_v42 = vmul.f32 %v17905_v47, %v1146_v25  ;;  %v1857_v14 = vmul.f32 %v17835_v31, %v1634_v63 }
 0x16d   : > { %v1918_v48 = vadd.f32 %v1858_v21, %v1430_v30  ;;  %v17942_v30 = vld [vmem:[%s22160_s2] ss:$0 sm:$0xff] }
 0x16e   : > { %v1649_v2 = vpop.permute.xlu1 %1648  ;;  %v1429_v25 = vadd.f32 %v1369_v42, %v881_v22 }
 0x16f   : > { %v1644_v41 = vpop.permute.xlu0 %1643  ;;  %2196 = vperm.xlu1 %16575, %v17898_v1   ;;  %v1860_v54 = vmul.f32 %v17835_v31, %v1649_v2  ;;  %v1431_v2 = vadd.f32 %v1371_v26, %v883_v39 }
 0x170   : > { %2191 = vperm.xlu0 %16574, %v17874_v51   ;;  %v1917_v35 = vadd.f32 %v1857_v14, %v1429_v25  ;;  %v1859_v40 = vmul.f32 %v17835_v31, %v1644_v41 }
 0x171   : > { %v1920_v42 = vadd.f32 %v1860_v54, %v1432_v62  ;;  %v17957_v62 = vld [vmem:[%s17367_s23 + $0x140] sm:$0xff] }
 0x172   : > { %v2127_v3 = vpop.permute.xlu1 %2126  ;;  %v1919_v21 = vadd.f32 %v1859_v40, %v1431_v2 }
 0x173   : > { %v2122_v16 = vpop.permute.xlu0 %2121  ;;  %2674 = vperm.xlu1 %16575, %v17874_v51   ;;  %v2346_v27 = vmul.f32 %v17844_v29, %v2127_v3 }
 0x174   : > { %2669 = vperm.xlu0 %16574, %v17862_v53   ;;  %v2345_v8 = vmul.f32 %v17844_v29, %v2122_v16 }
 0x175   : > { %v2406_v63 = vadd.f32 %v2346_v27, %v1918_v48 }
 0x176   : > { %v2137_v59 = vpop.permute.xlu1 %2136  ;;  %v2405_v4 = vadd.f32 %v2345_v8, %v1917_v35 }
 0x177   : > { %v2132_v49 = vpop.permute.xlu0 %2131  ;;  %2684 = vperm.xlu1 %16575, %v17912_v44   ;;  %v2348_v3 = vmul.f32 %v17844_v29, %v2137_v59 }
 0x178   : > { %2679 = vperm.xlu0 %16574, %v17898_v1   ;;  %v2347_v16 = vmul.f32 %v17844_v29, %v2132_v49 }
 0x179   : > { %v2408_v59 = vadd.f32 %v2348_v3, %v1920_v42 }
 0x17a   : > { %v2615_v60 = vpop.permute.xlu1 %2614  ;;  %v2407_v25 = vadd.f32 %v2347_v16, %v1919_v21  ;;  %v17969_v21 = vld [vmem:[%s17367_s23 + $0x148] sm:$0xff] }
 0x17b   : > { %v2834_v19 = vmul.f32 %v17932_v57, %v2615_v60  ;;  %v2610_v6 = vpop.permute.xlu0 %2609  ;;  %742 = vperm.xlu1 %16575, %v17874_v51  }
 0x17c   : > { %v2833_v41 = vmul.f32 %v17932_v57, %v2610_v6  ;;  %737 = vperm.xlu0 %16574, %v17862_v53  }
 0x17d   : > { %v2894_v12 = vadd.f32 %v2834_v19, %v2406_v63 }
 0x17e   : > { %v2893_v22 = vadd.f32 %v2833_v41, %v2405_v4  ;;  %v2625_v14 = vpop.permute.xlu1 %2624 }
 0x17f   : > { %v2961_v7 = vadd.f32 %v17942_v30, %v2894_v12  ;;  %v2836_v27 = vmul.f32 %v17932_v57, %v2625_v14  ;;  %v2620_v49 = vpop.permute.xlu0 %2619  ;;  %1230 = vperm.xlu1 %16575, %v17898_v1  }
 0x180   : > { %v2960_v53 = vadd.f32 %v17942_v30, %v2893_v22  ;;  %v2835_v26 = vmul.f32 %v17932_v57, %v2620_v49  ;;  %1225 = vperm.xlu0 %16574, %v17874_v51   ;;  %v17971_v22 = vld [vmem:[#allocation2 + $0x98] sm:$0xff] }
 0x181   : > { %v3021_v8 = vmax.f32 %v2961_v7, 0.0  ;;  %v2896_v20 = vadd.f32 %v2836_v27, %v2408_v59 }
 0x182   : > { %v3020_v48 = vmax.f32 %v2960_v53, 0.0  ;;  %v2895_v54 = vadd.f32 %v2835_v26, %v2407_v25  ;;  %v683_v39 = vpop.permute.xlu1 %682 }
 0x183   : > { %3082 = vst.msk [vmem:[#allocation2 + $0xa8] sm:$0xff] %vm3060_vm0, %v3021_v8  ;;  %v2963_v35 = vadd.f32 %v17942_v30, %v2896_v20  ;;  %v678_v40 = vpop.permute.xlu0 %677  ;;  %752 = vperm.xlu1 %16575, %v17912_v44  }
 0x184   : > { %3081 = vst.msk [vmem:[#allocation2 + $0xa0] sm:$0xff] %vm3060_vm0, %v3020_v48  ;;  %v2962_v60 = vadd.f32 %v17942_v30, %v2895_v54  ;;  %747 = vperm.xlu0 %16574, %v17898_v1   ;;  %v17993_v48 = vld [vmem:[%s17367_s23 + $0x150] sm:$0xff] }
 0x185   : > { %v3023_v51 = vmax.f32 %v2963_v35, 0.0 }
 0x186   : > { %v3022_v63 = vmax.f32 %v2962_v60, 0.0  ;;  %v1171_v3 = vpop.permute.xlu1 %1170 }
 0x187   : > { %3084 = vst.msk [vmem:[#allocation2 + $0xb8] sm:$0xff] %vm3060_vm0, %v3023_v51  ;;  %v1166_v19 = vpop.permute.xlu0 %1165  ;;  %1240 = vperm.xlu1 %16575, %v17957_v62   ;;  %v1374_v51 = vmul.f32 %v17905_v47, %v1171_v3 }
 0x188   : > { %3083 = vst.msk [vmem:[#allocation2 + $0xb0] sm:$0xff] %vm3060_vm0, %v3022_v63  ;;  %1235 = vperm.xlu0 %16574, %v17912_v44  }
 0x18a   : > { %v693_v6 = vpop.permute.xlu1 %692  ;;  %v3142_v2 = vld [vmem:[#allocation2 + $0xa8] sm:$0xff] }
 0x18b   : > { %v688_v4 = vpop.permute.xlu0 %687  ;;  %1718 = vperm.xlu1 %16575, %v17912_v44   ;;  %v3141_v16 = vld [vmem:[#allocation2 + $0xa0] sm:$0xff]  ;;  %v17984_v53 = vld [vmem:[#allocation2 + $0xa8] sm:$0xff] }
 0x18c   : > { %v17964_v41 = vld [vmem:[#allocation2 + $0xa0] sm:$0xff]  ;;  %1713 = vperm.xlu0 %16574, %v17898_v1   ;;  %v3217_v42 = vpack.c.bf16 %v3141_v16, %v17882_v9  ;;  %v3187_v12 = vpack.c.bf16 %v3142_v2, %v3141_v16  ;;  %22324 = vst [vmem:[#allocation11_spill] sm:$0xff] %v17984_v53  ;;  %v18002_v16 = vld [vmem:[%s17367_s23 + $0x158] sm:$0xff] }
 0x18e   : > { %15148 = vmatmul.mubr.msk.bf16.gmra.mrb[4].mxu1 %vm3060_vm0, %v3217_v42  ;;  %15209 = vmatprep.mubr.msk.bf16.mxu0 %vm3060_vm0, %v3187_v12  ;;  %v1181_v59 = vpop.permute.xlu1 %1180  ;;  %v17977_v7 = vld [vmem:[#allocation2 + $0xb8] sm:$0xff]  ;;  %v885_v12 = vmul.f32 %v17827_v32, %v678_v40  ;;  %v888_v40 = vmul.f32 %v17827_v32, %v693_v6 }
 0x18f   : > { %v1176_v27 = vpop.permute.xlu0 %1175  ;;  %1728 = vperm.xlu1 %16575, %v17969_v21   ;;  %v3143_v9 = vld [vmem:[#allocation2 + $0xb0] sm:$0xff]  ;;  %v1376_v3 = vmul.f32 %v17905_v47, %v1181_v59 }
 0x190   : > { %v17980_v1 = vld [vmem:[#allocation2 + $0xb0] sm:$0xff]  ;;  %1723 = vperm.xlu0 %16574, %v17957_v62   ;;  %v3218_v49 = vpack.c.bf16 %v3143_v9, %v3142_v2  ;;  %v3188_v25 = vpack.c.bf16 %v17977_v7, %v3143_v9  ;;  %v1373_v2 = vmul.f32 %v17905_v47, %v1166_v19  ;;  %v1375_v14 = vmul.f32 %v17905_v47, %v1176_v27 }
 0x191   : > { %22323 = vst [vmem:[#allocation10_spill] sm:$0xff] %v17980_v1  ;;  %v1436_v61 = vadd.f32 %v1376_v3, %v888_v40 }
 0x192   : > { %15151 = vmatprep.mubr.msk.bf16.mxu1 %vm3060_vm0, %v3218_v49  ;;  %15210 = vmatmul.mubr.msk.bf16.gmra.mrb[20].mxu0 %vm3060_vm0, %v3188_v25  ;;  %v1659_v8 = vpop.permute.xlu1 %1658  ;;  %v1433_v19 = vadd.f32 %v1373_v2, %v885_v12 }
 0x193   : > { %v1654_v20 = vpop.permute.xlu0 %1653  ;;  %2206 = vperm.xlu1 %16575, %v17957_v62   ;;  %v1862_v42 = vmul.f32 %v17835_v31, %v1659_v8 }
 0x194   : > { %2201 = vperm.xlu0 %16574, %v17912_v44   ;;  %v886_v44 = vmul.f32 %v17827_v32, %v683_v39  ;;  %v1861_v9 = vmul.f32 %v17835_v31, %v1654_v20 }
 0x196   : > { %v1669_v54 = vpop.permute.xlu1 %1668  ;;  %v1434_v25 = vadd.f32 %v1374_v51, %v886_v44  ;;  %v887_v51 = vmul.f32 %v17827_v32, %v688_v4  ;;  %v1921_v59 = vadd.f32 %v1861_v9, %v1433_v19 }
 0x197   : > { %v1664_v35 = vpop.permute.xlu0 %1663  ;;  %2216 = vperm.xlu1 %16575, %v17993_v48   ;;  %v1864_v20 = vmul.f32 %v17835_v31, %v1669_v54 }
 0x198   : > { %2211 = vperm.xlu0 %16574, %v17969_v21   ;;  %v1922_v8 = vadd.f32 %v1862_v42, %v1434_v25  ;;  %v1435_v12 = vadd.f32 %v1375_v14, %v887_v51 }
 0x199   : > { %v1924_v4 = vadd.f32 %v1864_v20, %v1436_v61 }
 0x19a   : > { %v2147_v60 = vpop.permute.xlu1 %2146 }
 0x19b   : > { %v2142_v63 = vpop.permute.xlu0 %2141  ;;  %2694 = vperm.xlu1 %16575, %v17969_v21   ;;  %v2350_v0 = vmul.f32 %v17844_v29, %v2147_v60  ;;  %v1863_v60 = vmul.f32 %v17835_v31, %v1664_v35 }
 0x19c   : > { %2689 = vperm.xlu0 %16574, %v17957_v62   ;;  %v2349_v39 = vmul.f32 %v17844_v29, %v2142_v63 }
 0x19d   : > { %v2410_v46 = vadd.f32 %v2350_v0, %v1922_v8  ;;  %v1923_v9 = vadd.f32 %v1863_v60, %v1435_v12 }
 0x19e   : > { %v2157_v49 = vpop.permute.xlu1 %2156  ;;  %v2409_v6 = vadd.f32 %v2349_v39, %v1921_v59 }
 0x19f   : > { %v2152_v26 = vpop.permute.xlu0 %2151  ;;  %2704 = vperm.xlu1 %16575, %v18002_v16   ;;  %v2352_v2 = vmul.f32 %v17844_v29, %v2157_v49 }
 0x1a0   : > { %2699 = vperm.xlu0 %16574, %v17993_v48   ;;  %v2351_v42 = vmul.f32 %v17844_v29, %v2152_v26 }
 0x1a1   : > { %v2412_v3 = vadd.f32 %v2352_v2, %v1924_v4 }
 0x1a2   : > { %v2635_v44 = vpop.permute.xlu1 %2634  ;;  %v2411_v14 = vadd.f32 %v2351_v42, %v1923_v9 }
 0x1a3   : > { %v2838_v27 = vmul.f32 %v17932_v57, %v2635_v44  ;;  %v2630_v63 = vpop.permute.xlu0 %2629  ;;  %762 = vperm.xlu1 %16575, %v17969_v21   ;;  %v18037_v44 = vld [vmem:[%s17367_s23 + $0x160] sm:$0xff] }
 0x1a4   : > { %v2837_v54 = vmul.f32 %v17932_v57, %v2630_v63  ;;  %757 = vperm.xlu0 %16574, %v17957_v62  }
 0x1a5   : > { %v2898_v35 = vadd.f32 %v2838_v27, %v2410_v46 }
 0x1a6   : > { %v2897_v25 = vadd.f32 %v2837_v54, %v2409_v6  ;;  %v2645_v0 = vpop.permute.xlu1 %2644 }
 0x1a7   : > { %v2965_v49 = vadd.f32 %v17942_v30, %v2898_v35  ;;  %v2840_v19 = vmul.f32 %v17932_v57, %v2645_v0  ;;  %v2640_v40 = vpop.permute.xlu0 %2639  ;;  %1250 = vperm.xlu1 %16575, %v17993_v48   ;;  %v18051_v0 = vld [vmem:[#allocation2 + $0xb8] sm:$0xff] }
 0x1a8   : > { %v2964_v26 = vadd.f32 %v17942_v30, %v2897_v25  ;;  %v2839_v39 = vmul.f32 %v17932_v57, %v2640_v40  ;;  %1245 = vperm.xlu0 %16574, %v17969_v21   ;;  %v18049_v25 = vld [vmem:[%s17367_s23 + $0x168] sm:$0xff]  ;;  %22326 = vst [vmem:[#allocation13_spill] sm:$0xff] %v18051_v0 }
 0x1a9   : > { %v3025_v46 = vmax.f32 %v2965_v49, 0.0  ;;  %v2900_v61 = vadd.f32 %v2840_v19, %v2412_v3 }
 0x1aa   : > { %v3024_v62 = vmax.f32 %v2964_v26, 0.0  ;;  %v2899_v8 = vadd.f32 %v2839_v39, %v2411_v14  ;;  %v703_v20 = vpop.permute.xlu1 %702 }
 0x1ab   : > { %3086 = vst.msk [vmem:[#allocation2 + $0xc8] sm:$0xff] %vm3060_vm0, %v3025_v46  ;;  %v2967_v51 = vadd.f32 %v17942_v30, %v2900_v61  ;;  %v698_v59 = vpop.permute.xlu0 %697  ;;  %772 = vperm.xlu1 %16575, %v18002_v16  }
 0x1ac   : > { %3085 = vst.msk [vmem:[#allocation2 + $0xc0] sm:$0xff] %vm3060_vm0, %v3024_v62  ;;  %v2966_v60 = vadd.f32 %v17942_v30, %v2899_v8  ;;  %767 = vperm.xlu0 %16574, %v17993_v48   ;;  %v18073_v8 = vld [vmem:[%s17367_s23 + $0x170] sm:$0xff] }
 0x1ad   : > { %v3027_v21 = vmax.f32 %v2967_v51, 0.0 }
 0x1ae   : > { %v3026_v2 = vmax.f32 %v2966_v60, 0.0  ;;  %v1191_v27 = vpop.permute.xlu1 %1190 }
 0x1af   : > { %3088 = vst.msk [vmem:[#allocation2 + $0xd8] sm:$0xff] %vm3060_vm0, %v3027_v21  ;;  %v1186_v63 = vpop.permute.xlu0 %1185  ;;  %1260 = vperm.xlu1 %16575, %v18037_v44  }
 0x1b0   : > { %3087 = vst.msk [vmem:[#allocation2 + $0xd0] sm:$0xff] %vm3060_vm0, %v3026_v2  ;;  %1255 = vperm.xlu0 %16574, %v18002_v16   ;;  %v1378_v2 = vmul.f32 %v17905_v47, %v1191_v27 }
 0x1b2   : > { %v713_v12 = vpop.permute.xlu1 %712  ;;  %v3146_v6 = vld [vmem:[#allocation2 + $0xc8] sm:$0xff] }
 0x1b3   : > { %v708_v42 = vpop.permute.xlu0 %707  ;;  %1738 = vperm.xlu1 %16575, %v18002_v16   ;;  %v3145_v54 = vld [vmem:[#allocation2 + $0xc0] sm:$0xff]  ;;  %v18064_v39 = vld [vmem:[#allocation2 + $0xc8] sm:$0xff] }
 0x1b4   : > { %v18044_v4 = vld [vmem:[#allocation2 + $0xc0] sm:$0xff]  ;;  %1733 = vperm.xlu0 %16574, %v17993_v48   ;;  %v3219_v35 = vpack.c.bf16 %v3145_v54, %v17977_v7  ;;  %v3189_v9 = vpack.c.bf16 %v3146_v6, %v3145_v54  ;;  %22328 = vst [vmem:[#allocation15_spill] sm:$0xff] %v18064_v39  ;;  %v1377_v54 = vmul.f32 %v17905_v47, %v1186_v63 }
 0x1b5   : > { %22325 = vst [vmem:[#allocation12_spill] sm:$0xff] %v18044_v4 }
 0x1b6   : > { %15152 = vmatmul.mubr.msk.bf16.gmra.mrb[8].mxu1 %vm3060_vm0, %v3219_v35  ;;  %15213 = vmatprep.mubr.msk.bf16.mxu0 %vm3060_vm0, %v3189_v9  ;;  %v1201_v49 = vpop.permute.xlu1 %1200  ;;  %v18057_v19 = vld [vmem:[#allocation2 + $0xd8] sm:$0xff] }
 0x1b7   : > { %v1196_v40 = vpop.permute.xlu0 %1195  ;;  %1748 = vperm.xlu1 %16575, %v18049_v25   ;;  %v3147_v7 = vld [vmem:[#allocation2 + $0xd0] sm:$0xff]  ;;  %v18082_v35 = vld [vmem:[%s17367_s23 + $0x178] sm:$0xff]  ;;  %v1380_v27 = vmul.f32 %v17905_v47, %v1201_v49 }
 0x1b8   : > { %v18060_v48 = vld [vmem:[#allocation2 + $0xd0] sm:$0xff]  ;;  %1743 = vperm.xlu0 %16574, %v18037_v44   ;;  %v3220_v14 = vpack.c.bf16 %v3147_v7, %v3146_v6  ;;  %v3190_v26 = vpack.c.bf16 %v18057_v19, %v3147_v7  ;;  %v889_v7 = vmul.f32 %v17827_v32, %v698_v59  ;;  %v1379_v55 = vmul.f32 %v17905_v47, %v1196_v40 }
 0x1b9   : > { %22327 = vst [vmem:[#allocation14_spill] sm:$0xff] %v18060_v48  ;;  %v892_v59 = vmul.f32 %v17827_v32, %v713_v12 }
 0x1ba   : > { %15155 = vmatprep.mubr.msk.bf16.mxu1 %vm3060_vm0, %v3220_v14  ;;  %15214 = vmatmul.mubr.msk.bf16.gmra.mrb[24].mxu0 %vm3060_vm0, %v3190_v26  ;;  %v1679_v61 = vpop.permute.xlu1 %1678  ;;  %v1437_v63 = vadd.f32 %v1377_v54, %v889_v7 }
 0x1bb   : > { %v1674_v62 = vpop.permute.xlu0 %1673  ;;  %2226 = vperm.xlu1 %16575, %v18037_v44   ;;  %v1866_v9 = vmul.f32 %v17835_v31, %v1679_v61  ;;  %v1440_v38 = vadd.f32 %v1380_v27, %v892_v59 }
 0x1bc   : > { %2221 = vperm.xlu0 %16574, %v18002_v16   ;;  %v890_v16 = vmul.f32 %v17827_v32, %v703_v20  ;;  %v1865_v14 = vmul.f32 %v17835_v31, %v1674_v62 }
 0x1be   : > { %v1689_v51 = vpop.permute.xlu1 %1688  ;;  %v1438_v46 = vadd.f32 %v1378_v2, %v890_v16  ;;  %v891_v2 = vmul.f32 %v17827_v32, %v708_v42  ;;  %v1925_v49 = vadd.f32 %v1865_v14, %v1437_v63 }
 0x1bf   : > { %v1684_v60 = vpop.permute.xlu0 %1683  ;;  %2236 = vperm.xlu1 %16575, %v18073_v8   ;;  %v1868_v62 = vmul.f32 %v17835_v31, %v1689_v51 }
 0x1c0   : > { %2231 = vperm.xlu0 %16574, %v18049_v25   ;;  %v1926_v61 = vadd.f32 %v1866_v9, %v1438_v46  ;;  %v1439_v7 = vadd.f32 %v1379_v55, %v891_v2 }
 0x1c1   : > { %v1928_v42 = vadd.f32 %v1868_v62, %v1440_v38 }
 0x1c2   : > { %v2167_v21 = vpop.permute.xlu1 %2166 }
 0x1c3   : > { %v2162_v6 = vpop.permute.xlu0 %2161  ;;  %2714 = vperm.xlu1 %16575, %v18049_v25   ;;  %v2354_v3 = vmul.f32 %v17844_v29, %v2167_v21  ;;  %v1867_v21 = vmul.f32 %v17835_v31, %v1684_v60 }
 0x1c4   : > { %2709 = vperm.xlu0 %16574, %v18037_v44   ;;  %v2353_v20 = vmul.f32 %v17844_v29, %v2162_v6 }
 0x1c5   : > { %v2414_v24 = vadd.f32 %v2354_v3, %v1926_v61  ;;  %v1927_v9 = vadd.f32 %v1867_v21, %v1439_v7 }
 0x1c6   : > { %v2177_v26 = vpop.permute.xlu1 %2176  ;;  %v2413_v12 = vadd.f32 %v2353_v20, %v1925_v49 }
 0x1c7   : > { %v2172_v34 = vpop.permute.xlu0 %2171  ;;  %2724 = vperm.xlu1 %16575, %v18082_v35   ;;  %v2356_v54 = vmul.f32 %v17844_v29, %v2177_v26 }
 0x1c8   : > { %2719 = vperm.xlu0 %16574, %v18073_v8   ;;  %v2355_v46 = vmul.f32 %v17844_v29, %v2172_v34 }
 0x1c9   : > { %v2416_v27 = vadd.f32 %v2356_v54, %v1928_v42 }
 0x1ca   : > { %v2655_v16 = vpop.permute.xlu1 %2654  ;;  %v2415_v55 = vadd.f32 %v2355_v46, %v1927_v9 }
 0x1cb   : > { %v2842_v40 = vmul.f32 %v17932_v57, %v2655_v16  ;;  %v2650_v6 = vpop.permute.xlu0 %2649  ;;  %782 = vperm.xlu1 %16575, %v18049_v25   ;;  %v18117_v16 = vld [vmem:[%s17367_s23 + $0x180] sm:$0xff] }
 0x1cc   : > { %v2841_v51 = vmul.f32 %v17932_v57, %v2650_v6  ;;  %777 = vperm.xlu0 %16574, %v18037_v44  }
 0x1cd   : > { %v2902_v60 = vadd.f32 %v2842_v40, %v2414_v24 }
 0x1ce   : > { %v2901_v14 = vadd.f32 %v2841_v51, %v2413_v12  ;;  %v2665_v3 = vpop.permute.xlu1 %2664 }
 0x1cf   : > { %v2969_v26 = vadd.f32 %v17942_v30, %v2902_v60  ;;  %v2844_v63 = vmul.f32 %v17932_v57, %v2665_v3  ;;  %v2660_v59 = vpop.permute.xlu0 %2659  ;;  %1270 = vperm.xlu1 %16575, %v18073_v8   ;;  %v18131_v3 = vld [vmem:[#allocation2 + $0xd8] sm:$0xff] }
 0x1d0   : > { %v2968_v34 = vadd.f32 %v17942_v30, %v2901_v14  ;;  %v2843_v20 = vmul.f32 %v17932_v57, %v2660_v59  ;;  %1265 = vperm.xlu0 %16574, %v18049_v25   ;;  %v18129_v14 = vld [vmem:[%s17367_s23 + $0x188] sm:$0xff]  ;;  %22330 = vst [vmem:[#allocation17_spill] sm:$0xff] %v18131_v3 }
 0x1d1   : > { %v3029_v24 = vmax.f32 %v2969_v26, 0.0  ;;  %v2904_v38 = vadd.f32 %v2844_v63, %v2416_v27 }
 0x1d2   : > { %v3028_v44 = vmax.f32 %v2968_v34, 0.0  ;;  %v2903_v61 = vadd.f32 %v2843_v20, %v2415_v55  ;;  %v723_v62 = vpop.permute.xlu1 %722 }
 0x1d3   : > { %3090 = vst.msk [vmem:[#allocation2 + $0xe8] sm:$0xff] %vm3060_vm0, %v3029_v24  ;;  %v2971_v2 = vadd.f32 %v17942_v30, %v2904_v38  ;;  %v718_v49 = vpop.permute.xlu0 %717  ;;  %792 = vperm.xlu1 %16575, %v18082_v35  }
 0x1d4   : > { %3089 = vst.msk [vmem:[#allocation2 + $0xe0] sm:$0xff] %vm3060_vm0, %v3028_v44  ;;  %v2970_v21 = vadd.f32 %v17942_v30, %v2903_v61  ;;  %787 = vperm.xlu0 %16574, %v18073_v8   ;;  %v18153_v61 = vld [vmem:[%s17367_s23 + $0x190] sm:$0xff] }
 0x1d5   : > { %v3031_v25 = vmax.f32 %v2971_v2, 0.0 }
 0x1d6   : > { %v3030_v54 = vmax.f32 %v2970_v21, 0.0  ;;  %v1211_v40 = vpop.permute.xlu1 %1210 }
 0x1d7   : > { %3092 = vst.msk [vmem:[#allocation2 + $0xf8] sm:$0xff] %vm3060_vm0, %v3031_v25  ;;  %v1206_v6 = vpop.permute.xlu0 %1205  ;;  %1280 = vperm.xlu1 %16575, %v18117_v16  }
 0x1d8   : > { %3091 = vst.msk [vmem:[#allocation2 + $0xf0] sm:$0xff] %vm3060_vm0, %v3030_v54  ;;  %1275 = vperm.xlu0 %16574, %v18082_v35   ;;  %v16578_v54 = vld [vmem:[%s22161_s3 + $0x10] sm:$0xff]  }
 0x1d9   : > { %15245 = vmatprep.subr.bf16.mxu0 %v16578_v54 }
 0x1da   : > { %v733_v7 = vpop.permute.xlu1 %732  ;;  %v3150_v12 = vld [vmem:[#allocation2 + $0xe8] sm:$0xff]  ;;  %15246 = vmatpush3.bf16.msra.mxu0 %v16578_v54 }
 0x1db   : > { %v728_v46 = vpop.permute.xlu0 %727  ;;  %1758 = vperm.xlu1 %16575, %v18082_v35   ;;  %v3149_v51 = vld [vmem:[#allocation2 + $0xe0] sm:$0xff]  ;;  %v18144_v20 = vld [vmem:[#allocation2 + $0xe8] sm:$0xff] }
 0x1dc   : > { %v18124_v42 = vld [vmem:[#allocation2 + $0xe0] sm:$0xff]  ;;  %1753 = vperm.xlu0 %16574, %v18073_v8   ;;  %v3221_v60 = vpack.c.bf16 %v3149_v51, %v18057_v19  ;;  %v3191_v9 = vpack.c.bf16 %v3150_v12, %v3149_v51  ;;  %22332 = vst [vmem:[#allocation19_spill] sm:$0xff] %v18144_v20  ;;  %v895_v54 = vmul.f32 %v17827_v32, %v728_v46 }
 0x1dd   : > { %22329 = vst [vmem:[#allocation16_spill] sm:$0xff] %v18124_v42 }
 0x1de   : > { %15156 = vmatmul.mubr.msk.bf16.gmra.mrb[12].mxu1 %vm3060_vm0, %v3221_v60  ;;  %15217 = vmatprep.mubr.msk.bf16.mxu0 %vm3060_vm0, %v3191_v9  ;;  %v1221_v26 = vpop.permute.xlu1 %1220  ;;  %v18137_v63 = vld [vmem:[#allocation2 + $0xf8] sm:$0xff]  ;;  %v894_v9 = vmul.f32 %v17827_v32, %v723_v62 }
 0x1df   : > { %v1216_v59 = vpop.permute.xlu0 %1215  ;;  %1768 = vperm.xlu1 %16575, %v18129_v14   ;;  %v3151_v19 = vld [vmem:[#allocation2 + $0xf0] sm:$0xff]  ;;  %v18165_v60 = vld [vmem:[%s17367_s23 + $0x198] sm:$0xff]  ;;  %v1384_v27 = vmul.f32 %v17905_v47, %v1221_v26 }
 0x1e0   : > { %v18140_v8 = vld [vmem:[#allocation2 + $0xf0] sm:$0xff]  ;;  %1763 = vperm.xlu0 %16574, %v18117_v16   ;;  %v3222_v55 = vpack.c.bf16 %v3151_v19, %v3150_v12  ;;  %v3192_v34 = vpack.c.bf16 %v18137_v63, %v3151_v19  ;;  %v1382_v12 = vmul.f32 %v17905_v47, %v1211_v40  ;;  %v1383_v20 = vmul.f32 %v17905_v47, %v1216_v59 }
 0x1e1   : > { %22331 = vst [vmem:[#allocation18_spill] sm:$0xff] %v18140_v8 }
 0x1e2   : > { %15159 = vmatprep.mubr.msk.bf16.mxu1 %vm3060_vm0, %v3222_v55  ;;  %15218 = vmatmul.mubr.msk.bf16.gmra.mrb[28].mxu0 %vm3060_vm0, %v3192_v34  ;;  %v1699_v38 = vpop.permute.xlu1 %1698  ;;  %v893_v55 = vmul.f32 %v17827_v32, %v718_v49  ;;  %v1442_v24 = vadd.f32 %v1382_v12, %v894_v9  ;;  %v896_v49 = vmul.f32 %v17827_v32, %v733_v7 }
 0x1e3   : > { %v1694_v44 = vpop.permute.xlu0 %1693  ;;  %2246 = vperm.xlu1 %16575, %v18117_v16   ;;  %v1870_v19 = vmul.f32 %v17835_v31, %v1699_v38 }
 0x1e4   : > { %2241 = vperm.xlu0 %16574, %v18082_v35   ;;  %v1381_v35 = vmul.f32 %v17905_v47, %v1206_v6  ;;  %v1869_v34 = vmul.f32 %v17835_v31, %v1694_v44  ;;  %v1444_v9 = vadd.f32 %v1384_v27, %v896_v49 }
 0x1e5   : > { %v1930_v38 = vadd.f32 %v1870_v19, %v1442_v24 }
 0x1e6   : > { %v1709_v2 = vpop.permute.xlu1 %1708  ;;  %v1441_v56 = vadd.f32 %v1381_v35, %v893_v55  ;;  %v1443_v55 = vadd.f32 %v1383_v20, %v895_v54 }
 0x1e7   : > { %v1704_v21 = vpop.permute.xlu0 %1703  ;;  %2256 = vperm.xlu1 %16575, %v18153_v61   ;;  %v1872_v44 = vmul.f32 %v17835_v31, %v1709_v2 }
 0x1e8   : > { %2251 = vperm.xlu0 %16574, %v18129_v14   ;;  %v1929_v26 = vadd.f32 %v1869_v34, %v1441_v56 }
 0x1e9   : > { %v1932_v56 = vadd.f32 %v1872_v44, %v1444_v9 }
 0x1ea   : > { %v2187_v25 = vpop.permute.xlu1 %2186 }
 0x1eb   : > { %v2182_v51 = vpop.permute.xlu0 %2181  ;;  %2734 = vperm.xlu1 %16575, %v18129_v14   ;;  %v2358_v6 = vmul.f32 %v17844_v29, %v2187_v25  ;;  %v1871_v25 = vmul.f32 %v17835_v31, %v1704_v21 }
 0x1ec   : > { %2729 = vperm.xlu0 %16574, %v18117_v16   ;;  %v2357_v62 = vmul.f32 %v17844_v29, %v2182_v51 }
 0x1ed   : > { %v2418_v8 = vadd.f32 %v2358_v6, %v1930_v38  ;;  %v1931_v31 = vadd.f32 %v1871_v25, %v1443_v55 }
 0x1ee   : > { %v2197_v40 = vpop.permute.xlu1 %2196  ;;  %v2417_v7 = vadd.f32 %v2357_v62, %v1929_v26  ;;  %v18200_v26 = vld [vmem:[%s17367_s23 + $0x1a0] sm:$0xff] }
 0x1ef   : > { %v2192_v18 = vpop.permute.xlu0 %2191  ;;  %2744 = vperm.xlu1 %16575, %v18165_v60   ;;  %v2360_v35 = vmul.f32 %v17844_v29, %v2197_v40 }
 0x1f0   : > { %2739 = vperm.xlu0 %16574, %v18153_v61   ;;  %v2359_v24 = vmul.f32 %v17844_v29, %v2192_v18 }
 0x1f1   : > { %v2420_v21 = vadd.f32 %v2360_v35, %v1932_v56  ;;  %v18212_v56 = vld [vmem:[%s17367_s23 + $0x1a8] sm:$0xff] }
 0x1f2   : > { %v2675_v12 = vpop.permute.xlu1 %2674  ;;  %v2419_v20 = vadd.f32 %v2359_v24, %v1931_v31 }
 0x1f3   : > { %v2846_v59 = vmul.f32 %v17932_v57, %v2675_v12  ;;  %v2670_v51 = vpop.permute.xlu0 %2669  ;;  %802 = vperm.xlu1 %16575, %v18129_v14  }
 0x1f4   : > { %v2845_v2 = vmul.f32 %v17932_v57, %v2670_v51  ;;  %797 = vperm.xlu0 %16574, %v18117_v16  }
 0x1f5   : > { %v2906_v32 = vadd.f32 %v2846_v59, %v2418_v8 }
 0x1f6   : > { %v2905_v46 = vadd.f32 %v2845_v2, %v2417_v7  ;;  %v2685_v27 = vpop.permute.xlu1 %2684 }
 0x1f7   : > { %v2973_v19 = vadd.f32 %v17942_v30, %v2906_v32  ;;  %v2848_v34 = vmul.f32 %v17932_v57, %v2685_v27  ;;  %v2680_v40 = vpop.permute.xlu0 %2679  ;;  %1290 = vperm.xlu1 %16575, %v18153_v61   ;;  %v18214_v32 = vld [vmem:[#allocation2 + $0xf8] sm:$0xff] }
 0x1f8   : > { %v2972_v18 = vadd.f32 %v17942_v30, %v2905_v46  ;;  %v2847_v29 = vmul.f32 %v17932_v57, %v2680_v40  ;;  %1285 = vperm.xlu0 %16574, %v18129_v14   ;;  %22334 = vst [vmem:[#allocation21_spill] sm:$0xff] %v18214_v32 }
 0x1f9   : > { %v3033_v16 = vmax.f32 %v2973_v19, 0.0  ;;  %v2908_v8 = vadd.f32 %v2848_v34, %v2420_v21 }
 0x1fa   : > { %v3032_v6 = vmax.f32 %v2972_v18, 0.0  ;;  %v2907_v62 = vadd.f32 %v2847_v29, %v2419_v20  ;;  %v743_v49 = vpop.permute.xlu1 %742 }
 0x1fb   : > { %3094 = vst.msk [vmem:[#allocation2 + $0x108] sm:$0xff] %vm3060_vm0, %v3033_v16  ;;  %v2975_v38 = vadd.f32 %v17942_v30, %v2908_v8  ;;  %v738_v44 = vpop.permute.xlu0 %737  ;;  %812 = vperm.xlu1 %16575, %v18165_v60   ;;  %v18236_v16 = vld [vmem:[%s17367_s23 + $0x1b0] sm:$0xff] }
 0x1fc   : > { %3093 = vst.msk [vmem:[#allocation2 + $0x100] sm:$0xff] %vm3060_vm0, %v3032_v6  ;;  %v2974_v54 = vadd.f32 %v17942_v30, %v2907_v62  ;;  %807 = vperm.xlu0 %16574, %v18153_v61  }
 0x1fd   : > { %v3035_v14 = vmax.f32 %v2975_v38, 0.0 }
 0x1fe   : > { %v3034_v25 = vmax.f32 %v2974_v54, 0.0  ;;  %v1231_v12 = vpop.permute.xlu1 %1230 }
 0x1ff   : > { %3096 = vst.msk [vmem:[#allocation2 + $0x118] sm:$0xff] %vm3060_vm0, %v3035_v14  ;;  %v1226_v9 = vpop.permute.xlu0 %1225  ;;  %1300 = vperm.xlu1 %16575, %v18200_v26   ;;  %v1386_v38 = vmul.f32 %v17905_v47, %v1231_v12  ;;  %v18256_v12 = vld [vmem:[%s22159_s1 + $0x2] ss:$0 sm:$0xff] }
 0x200   : > { %3095 = vst.msk [vmem:[#allocation2 + $0x110] sm:$0xff] %vm3060_vm0, %v3034_v25  ;;  %1295 = vperm.xlu0 %16574, %v18165_v60   ;;  %v1385_v14 = vmul.f32 %v17905_v47, %v1226_v9  ;;  %v18245_v25 = vld [vmem:[%s17367_s23 + $0x1b8] sm:$0xff] }
 0x202   : > { %v753_v35 = vpop.permute.xlu1 %752  ;;  %v3154_v59 = vld [vmem:[#allocation2 + $0x108] sm:$0xff] }
 0x203   : > { %v748_v51 = vpop.permute.xlu0 %747  ;;  %1778 = vperm.xlu1 %16575, %v18165_v60   ;;  %v3153_v55 = vld [vmem:[#allocation2 + $0x100] sm:$0xff]  ;;  %v18227_v40 = vld [vmem:[#allocation2 + $0x108] sm:$0xff] }
 0x204   : > { %v18207_v7 = vld [vmem:[#allocation2 + $0x100] sm:$0xff]  ;;  %1773 = vperm.xlu0 %16574, %v18153_v61   ;;  %v3223_v24 = vpack.c.bf16 %v3153_v55, %v18137_v63  ;;  %v3193_v2 = vpack.c.bf16 %v3154_v59, %v3153_v55  ;;  %22336 = vst [vmem:[#allocation23_spill] sm:$0xff] %v18227_v40 }
 0x205   : > { %22333 = vst [vmem:[#allocation20_spill] sm:$0xff] %v18207_v7 }
 0x206   : > { %15160 = vmatmul.mubr.msk.bf16.gmra.mrb[16].mxu1 %vm3060_vm0, %v3223_v24  ;;  %15221 = vmatprep.mubr.msk.bf16.mxu0 %vm3060_vm0, %v3193_v2  ;;  %v1241_v46 = vpop.permute.xlu1 %1240  ;;  %v18220_v27 = vld [vmem:[#allocation2 + $0x118] sm:$0xff] }
 0x207   : > { %v1236_v21 = vpop.permute.xlu0 %1235  ;;  %1788 = vperm.xlu1 %16575, %v18212_v56   ;;  %v3155_v63 = vld [vmem:[#allocation2 + $0x110] sm:$0xff] }
 0x208   : > { %v18223_v61 = vld [vmem:[#allocation2 + $0x110] sm:$0xff]  ;;  %1783 = vperm.xlu0 %16574, %v18200_v26   ;;  %v3224_v19 = vpack.c.bf16 %v3155_v63, %v3154_v59  ;;  %v3194_v34 = vpack.c.bf16 %v18220_v27, %v3155_v63 }
 0x209   : > { %22335 = vst [vmem:[#allocation22_spill] sm:$0xff] %v18223_v61 }
 0x20a   : > { %15163 = vmatprep.mubr.msk.bf16.mxu1 %vm3060_vm0, %v3224_v19  ;;  %15222 = vmatmul.mubr.msk.bf16.gmra.mrb[32].mxu0 %vm3060_vm0, %v3194_v34  ;;  %v1719_v18 = vpop.permute.xlu1 %1718  ;;  %v1388_v19 = vmul.f32 %v17905_v47, %v1241_v46  ;;  %v18265_v34 = vld [vmem:[%s22159_s1 + $0x3] ss:$0 sm:$0xff] }
 0x20b   : > { %v1714_v29 = vpop.permute.xlu0 %1713  ;;  %2266 = vperm.xlu1 %16575, %v18200_v26   ;;  %v1874_v55 = vmul.f32 %v18256_v12, %v1719_v18  ;;  %v1387_v18 = vmul.f32 %v17905_v47, %v1236_v21 }
 0x20c   : > { %2261 = vperm.xlu0 %16574, %v18165_v60   ;;  %v18250_v60 = vld [vmem:[%s22159_s1] ss:$0 sm:$0xff]  ;;  %v1873_v24 = vmul.f32 %v18256_v12, %v1714_v29 }
 0x20d   : > { %v898_v59 = vmul.f32 %v18250_v60, %v743_v49  ;;  %v897_v9 = vmul.f32 %v18250_v60, %v738_v44  ;;  %v900_v29 = vmul.f32 %v18250_v60, %v753_v35 }
 0x20e   : > { %v1729_v8 = vpop.permute.xlu1 %1728 }
 0x20f   : > { %v1724_v6 = vpop.permute.xlu0 %1723  ;;  %2276 = vperm.xlu1 %16575, %v18236_v16   ;;  %v1446_v63 = vadd.f32 %v1386_v38, %v898_v59  ;;  %v1445_v31 = vadd.f32 %v1385_v14, %v897_v9  ;;  %v1876_v38 = vmul.f32 %v18256_v12, %v1729_v8  ;;  %v899_v59 = vmul.f32 %v18250_v60, %v748_v51 }
 0x210   : > { %2271 = vperm.xlu0 %16574, %v18212_v56   ;;  %v1448_v32 = vadd.f32 %v1388_v19, %v900_v29 }
 0x211   : > { %v1934_v46 = vadd.f32 %v1874_v55, %v1446_v63  ;;  %v1933_v40 = vadd.f32 %v1873_v24, %v1445_v31 }
 0x212   : > { %v2207_v62 = vpop.permute.xlu1 %2206  ;;  %v1936_v51 = vadd.f32 %v1876_v38, %v1448_v32 }
 0x213   : > { %v2202_v54 = vpop.permute.xlu0 %2201  ;;  %2754 = vperm.xlu1 %16575, %v18212_v56   ;;  %v2362_v49 = vmul.f32 %v18265_v34, %v2207_v62  ;;  %v1875_v62 = vmul.f32 %v18256_v12, %v1724_v6 }
 0x214   : > { %2749 = vperm.xlu0 %16574, %v18200_v26   ;;  %v2361_v44 = vmul.f32 %v18265_v34, %v2202_v54  ;;  %v1447_v54 = vadd.f32 %v1387_v18, %v899_v59 }
 0x215   : > { %v2422_v7 = vadd.f32 %v2362_v49, %v1934_v46 }
 0x216   : > { %v2217_v2 = vpop.permute.xlu1 %2216  ;;  %v2421_v35 = vadd.f32 %v2361_v44, %v1933_v40  ;;  %v1935_v6 = vadd.f32 %v1875_v62, %v1447_v54 }
 0x217   : > { %v2212_v20 = vpop.permute.xlu0 %2211  ;;  %2764 = vperm.xlu1 %16575, %v18245_v25   ;;  %v2364_v14 = vmul.f32 %v18265_v34, %v2217_v2 }
 0x218   : > { %2759 = vperm.xlu0 %16574, %v18236_v16   ;;  %v2363_v55 = vmul.f32 %v18265_v34, %v2212_v20 }
 0x219   : > { %v2424_v63 = vadd.f32 %v2364_v14, %v1936_v51  ;;  %v18313_v51 = vld [vmem:[%s17367_s23 + $0x1c8] sm:$0xff] }
 0x21a   : > { %v2695_v61 = vpop.permute.xlu1 %2694  ;;  %v2423_v40 = vadd.f32 %v2363_v55, %v1935_v6 }
 0x21b   : > { %v2850_v47 = vmul.f32 %v17932_v57, %v2695_v61  ;;  %v2690_v21 = vpop.permute.xlu0 %2689  ;;  %822 = vperm.xlu1 %16575, %v18212_v56  }
 0x21c   : > { %v2849_v8 = vmul.f32 %v17932_v57, %v2690_v21  ;;  %817 = vperm.xlu0 %16574, %v18200_v26  }
 0x21d   : > { %v2910_v31 = vadd.f32 %v2850_v47, %v2422_v7 }
 0x21e   : > { %v2909_v9 = vadd.f32 %v2849_v8, %v2421_v35  ;;  %v2705_v24 = vpop.permute.xlu1 %2704 }
 0x21f   : > { %v2977_v2 = vadd.f32 %v17942_v30, %v2910_v31  ;;  %v2852_v61 = vmul.f32 %v17932_v57, %v2705_v24  ;;  %v2700_v19 = vpop.permute.xlu0 %2699  ;;  %1310 = vperm.xlu1 %16575, %v18236_v16   ;;  %v18315_v31 = vld [vmem:[#allocation2 + $0x118] sm:$0xff] }
 0x220   : > { %v2976_v20 = vadd.f32 %v17942_v30, %v2909_v9  ;;  %v2851_v49 = vmul.f32 %v17932_v57, %v2700_v19  ;;  %1305 = vperm.xlu0 %16574, %v18212_v56   ;;  %v18299_v56 = vld [vmem:[%s17367_s23 + $0x1c0] sm:$0xff] }
 0x221   : > { %v3037_v26 = vmax.f32 %v2977_v2, 0.0  ;;  %v2912_v7 = vadd.f32 %v2852_v61, %v2424_v63 }
 0x222   : > { %v3036_v32 = vmax.f32 %v2976_v20, 0.0  ;;  %v2911_v18 = vadd.f32 %v2851_v49, %v2423_v40  ;;  %v18288_v44 = vpop.permute.xlu1 %762 }
 0x223   : > { %3098 = vst.msk [vmem:[#allocation2 + $0x128] sm:$0xff] %vm3060_vm0, %v3037_v26  ;;  %v2979_v29 = vadd.f32 %v17942_v30, %v2912_v7  ;;  %v18292_v46 = vpop.permute.xlu0 %757  ;;  %832 = vperm.xlu1 %16575, %v18245_v25   ;;  %v18337_v26 = vld [vmem:[%s17367_s23 + $0x1d0] sm:$0xff] }
 0x224   : > { %3097 = vst.msk [vmem:[#allocation2 + $0x120] sm:$0xff] %vm3060_vm0, %v3036_v32  ;;  %v2978_v57 = vadd.f32 %v17942_v30, %v2911_v18  ;;  %827 = vperm.xlu0 %16574, %v18236_v16  }
 0x225   : > { %v3039_v38 = vmax.f32 %v2979_v29, 0.0 }
 0x226   : > { %v3038_v59 = vmax.f32 %v2978_v57, 0.0  ;;  %v1251_v62 = vpop.permute.xlu1 %1250 }
 0x227   : > { %3100 = vst.msk [vmem:[#allocation2 + $0x138] sm:$0xff] %vm3060_vm0, %v3039_v38  ;;  %v1246_v14 = vpop.permute.xlu0 %1245  ;;  %1320 = vperm.xlu1 %16575, %v18299_v56   ;;  %v18348_v38 = vld [vmem:[%s22159_s1 + $0x1] ss:$0 sm:$0xff] }
 0x228   : > { %3099 = vst.msk [vmem:[#allocation2 + $0x130] sm:$0xff] %vm3060_vm0, %v3038_v59  ;;  %1315 = vperm.xlu0 %16574, %v18245_v25  }
 0x22a   : > { %v773_v47 = vpop.permute.xlu1 %772  ;;  %v3158_v21 = vld [vmem:[#allocation2 + $0x128] sm:$0xff] }
 0x22b   : > { %v18305_v30 = vpop.permute.xlu0 %767  ;;  %1798 = vperm.xlu1 %16575, %v18245_v25   ;;  %v3157_v54 = vld [vmem:[#allocation2 + $0x120] sm:$0xff]  ;;  %v18328_v19 = vld [vmem:[#allocation2 + $0x128] sm:$0xff] }
 0x22c   : > { %v18308_v35 = vld [vmem:[#allocation2 + $0x120] sm:$0xff]  ;;  %1793 = vperm.xlu0 %16574, %v18236_v16   ;;  %v3225_v55 = vpack.c.bf16 %v3157_v54, %v18220_v27  ;;  %v3195_v8 = vpack.c.bf16 %v3158_v21, %v3157_v54  ;;  %v1389_v54 = vmul.f32 %v18348_v38, %v1246_v14 }
 0x22e   : > { %15164 = vmatmul.mubr.msk.bf16.gmra.mrb[20].mxu1 %vm3060_vm0, %v3225_v55  ;;  %15225 = vmatprep.mubr.msk.bf16.mxu0 %vm3060_vm0, %v3195_v8  ;;  %v1261_v9 = vpop.permute.xlu1 %1260  ;;  %v18321_v24 = vld [vmem:[#allocation2 + $0x138] sm:$0xff] }
 0x22f   : > { %v1256_v63 = vpop.permute.xlu0 %1255  ;;  %1808 = vperm.xlu1 %16575, %v18313_v51   ;;  %v3159_v27 = vld [vmem:[#allocation2 + $0x130] sm:$0xff]  ;;  %v18359_v8 = vld [vmem:[%s17367_s23 + $0x1d8] sm:$0xff]  ;;  %v1392_v14 = vmul.f32 %v18348_v38, %v1261_v9  ;;  %v903_v9 = vmul.f32 %v18250_v60, %v18305_v30 }
 0x230   : > { %v18324_v16 = vld [vmem:[#allocation2 + $0x130] sm:$0xff]  ;;  %1803 = vperm.xlu0 %16574, %v18299_v56   ;;  %v3226_v2 = vpack.c.bf16 %v3159_v27, %v3158_v21  ;;  %v3196_v61 = vpack.c.bf16 %v18321_v24, %v3159_v27  ;;  %v902_v27 = vmul.f32 %v18250_v60, %v18288_v44 }
 0x232   : > { %15167 = vmatprep.mubr.msk.bf16.mxu1 %vm3060_vm0, %v3226_v2  ;;  %15226 = vmatmul.mubr.msk.bf16.gmra.mrb[36].mxu0 %vm3060_vm0, %v3196_v61  ;;  %v1739_v20 = vpop.permute.xlu1 %1738 }
 0x233   : > { %v1734_v49 = vpop.permute.xlu0 %1733  ;;  %2286 = vperm.xlu1 %16575, %v18299_v56   ;;  %v1878_v2 = vmul.f32 %v18256_v12, %v1739_v20 }
 0x234   : > { %2281 = vperm.xlu0 %16574, %v18245_v25   ;;  %v1390_v25 = vmul.f32 %v18348_v38, %v1251_v62  ;;  %v901_v62 = vmul.f32 %v18250_v60, %v18292_v46  ;;  %v1877_v61 = vmul.f32 %v18256_v12, %v1734_v49  ;;  %v904_v46 = vmul.f32 %v18250_v60, %v773_v47 }
 0x236   : > { %v1749_v7 = vpop.permute.xlu1 %1748  ;;  %v1450_v6 = vadd.f32 %v1390_v25, %v902_v27  ;;  %v1452_v3 = vadd.f32 %v1392_v14, %v904_v46  ;;  %v18392_v46 = vld [vmem:[%s22160_s2] ss:$0 sm:$0xff] }
 0x237   : > { %v1744_v32 = vpop.permute.xlu0 %1743  ;;  %2296 = vperm.xlu1 %16575, %v18337_v26   ;;  %v1880_v49 = vmul.f32 %v18256_v12, %v1749_v7 }
 0x238   : > { %2291 = vperm.xlu0 %16574, %v18313_v51   ;;  %v1938_v20 = vadd.f32 %v1878_v2, %v1450_v6 }
 0x239   : > { %v18341_v18 = vpop.f32.mrb[0].mxu1 }
 0x23a   : > { %22337 = vst [vmem:[#allocation24_spill] sm:$0xff] %v18341_v18  ;;  %v18343_v29 = vpop.f32.mrb[1].mxu1  ;;  %v2227_v57 = vpop.permute.xlu1 %2226  ;;  %v1391_v18 = vmul.f32 %v18348_v38, %v1256_v63 }
 0x23b   : > { %22338 = vst [vmem:[#allocation25_spill] sm:$0xff] %v18343_v29  ;;  %v18351_v59 = vpop.f32.mrb[2].mxu1  ;;  %v2222_v21 = vpop.permute.xlu0 %2221  ;;  %2774 = vperm.xlu1 %16575, %v18313_v51   ;;  %v1449_v29 = vadd.f32 %v1389_v54, %v901_v62 }
 0x23c   : > { %22339 = vst [vmem:[#allocation26_spill] sm:$0xff] %v18351_v59  ;;  %v18355_v55 = vpop.f32.mrb[3].mxu1  ;;  %2769 = vperm.xlu0 %16574, %v18299_v56   ;;  %v2365_v44 = vmul.f32 %v18265_v34, %v2222_v21  ;;  %v18382_v21 = vld [vmem:[%s22159_s1 + $0x4] ss:$0 sm:$0xff]  ;;  %v1451_v7 = vadd.f32 %v1391_v18, %v903_v9 }
 0x23d   : > { %22340 = vst [vmem:[#allocation27_spill] sm:$0xff] %v18355_v55  ;;  %v2366_v55 = vmul.f32 %v18265_v34, %v2227_v57  ;;  %v1937_v25 = vadd.f32 %v1877_v61, %v1449_v29  ;;  %v1879_v57 = vmul.f32 %v18256_v12, %v1744_v32 }
 0x23e   : > { %v2237_v40 = vpop.permute.xlu1 %2236 }
 0x23f   : > { %v2232_v59 = vpop.permute.xlu0 %2231  ;;  %2784 = vperm.xlu1 %16575, %v18359_v8   ;;  %v2426_v54 = vadd.f32 %v2366_v55, %v1938_v20  ;;  %v2368_v63 = vmul.f32 %v18265_v34, %v2237_v40  ;;  %v2425_v30 = vadd.f32 %v2365_v44, %v1937_v25  ;;  %v1940_v55 = vadd.f32 %v1880_v49, %v1452_v3 }
 0x240   : > { %2779 = vperm.xlu0 %16574, %v18337_v26   ;;  %v2367_v29 = vmul.f32 %v18265_v34, %v2232_v59  ;;  %v1939_v2 = vadd.f32 %v1879_v57, %v1451_v7 }
 0x241   : > { %v2428_v14 = vadd.f32 %v2368_v63, %v1940_v55 }
 0x242   : > { %v2715_v27 = vpop.permute.xlu1 %2714  ;;  %v2427_v20 = vadd.f32 %v2367_v29, %v1939_v2 }
 0x243   : > { %v2854_v47 = vmul.f32 %v18382_v21, %v2715_v27  ;;  %v2710_v6 = vpop.permute.xlu0 %2709  ;;  %842 = vperm.xlu1 %16575, %v18313_v51  }
 0x244   : > { %v2853_v32 = vmul.f32 %v18382_v21, %v2710_v6  ;;  %837 = vperm.xlu0 %16574, %v18299_v56  }
 0x245   : > { %v2914_v40 = vadd.f32 %v2854_v47, %v2426_v54 }
 0x246   : > { %v2913_v62 = vadd.f32 %v2853_v32, %v2425_v30  ;;  %v2725_v61 = vpop.permute.xlu1 %2724  ;;  %v2502_v32 = vld [vmem:[%s17367_s23 + $0x1e8] sm:$0xff] }
 0x247   : > { %v2981_v18 = vadd.f32 %v18392_v46, %v2914_v40  ;;  %v2856_v44 = vmul.f32 %v18382_v21, %v2725_v61  ;;  %v2720_v59 = vpop.permute.xlu0 %2719  ;;  %1330 = vperm.xlu1 %16575, %v18337_v26  }
 0x248   : > { %v2980_v3 = vadd.f32 %v18392_v46, %v2913_v62  ;;  %v2855_v56 = vmul.f32 %v18382_v21, %v2720_v59  ;;  %1325 = vperm.xlu0 %16574, %v18313_v51   ;;  %v2014_v51 = vld [vmem:[%s17367_s23 + $0x1e0] sm:$0xff] }
 0x249   : > { %v3041_v49 = vmax.f32 %v2981_v18, 0.0  ;;  %v2916_v9 = vadd.f32 %v2856_v44, %v2428_v14 }
 0x24a   : > { %v3040_v25 = vmax.f32 %v2980_v3, 0.0  ;;  %v2915_v57 = vadd.f32 %v2855_v56, %v2427_v20  ;;  %v18400_v27 = vpop.permute.xlu1 %782 }
 0x24b   : > { %3102 = vst.msk [vmem:[#allocation2 + $0x148] sm:$0xff] %vm3060_vm0, %v3041_v49  ;;  %v2983_v54 = vadd.f32 %v18392_v46, %v2916_v9  ;;  %v18404_v63 = vpop.permute.xlu0 %777  ;;  %1818 = vperm.xlu1 %16575, %v18359_v8  }
 0x24c   : > { %3101 = vst.msk [vmem:[#allocation2 + $0x140] sm:$0xff] %vm3060_vm0, %v3040_v25  ;;  %v2982_v47 = vadd.f32 %v18392_v46, %v2915_v57  ;;  %1813 = vperm.xlu0 %16574, %v18337_v26  }
 0x24d   : > { %v3043_v6 = vmax.f32 %v2983_v54, 0.0 }
 0x24e   : > { %v3042_v7 = vmax.f32 %v2982_v47, 0.0  ;;  %v1271_v30 = vpop.permute.xlu1 %1270 }
 0x24f   : > { %3104 = vst.msk [vmem:[#allocation2 + $0x158] sm:$0xff] %vm3060_vm0, %v3043_v6  ;;  %v1266_v29 = vpop.permute.xlu0 %1265  ;;  %2306 = vperm.xlu1 %16575, %v2014_v51   ;;  %v1394_v54 = vmul.f32 %v18348_v38, %v1271_v30 }
 0x250   : > { %3103 = vst.msk [vmem:[#allocation2 + $0x150] sm:$0xff] %vm3060_vm0, %v3042_v7  ;;  %2301 = vperm.xlu0 %16574, %v18359_v8   ;;  %v2503_v7 = vld [vmem:[%s17367_s23 + $0x1f0] sm:$0xff] }
 0x252   : > { %v793_v55 = vpop.permute.xlu1 %792  ;;  %v3162_v40 = vld [vmem:[#allocation2 + $0x148] sm:$0xff] }
 0x253   : > { %v18415_v2 = vld [vmem:[#allocation2 + $0x148] sm:$0xff]  ;;  %v788_v62 = vpop.permute.xlu0 %787  ;;  %2794 = vperm.xlu1 %16575, %v2502_v32   ;;  %v3161_v61 = vld [vmem:[#allocation2 + $0x140] sm:$0xff] }
 0x254   : > { %22341 = vst [vmem:[#allocation28_spill] sm:$0xff] %v18415_v2  ;;  %v18417_v14 = vld [vmem:[#allocation2 + $0x140] sm:$0xff]  ;;  %2789 = vperm.xlu0 %16574, %v2014_v51   ;;  %v3227_v18 = vpack.c.bf16 %v3161_v61, %v18321_v24  ;;  %v18420_v44 = vpack.c.bf16 %v3162_v40, %v3161_v61 }
 0x255   : > { %22342 = vst [vmem:[#allocation29_spill] sm:$0xff] %v18417_v14  ;;  %v2504_v14 = vld [vmem:[%s17367_s23 + $0x1f8] sm:$0xff] }
 0x256   : > { %15168 = vmatmul.mubr.msk.bf16.gmra.mrb[24].mxu1 %vm3060_vm0, %v3227_v18  ;;  %15229 = vmatprep.mubr.msk.bf16.mxu0 %vm3060_vm0, %v18420_v44  ;;  %v1281_v20 = vpop.permute.xlu1 %1280  ;;  %v18427_v3 = vld [vmem:[#allocation2 + $0x158] sm:$0xff] }
 0x257   : > { %v18429_v56 = vld [vmem:[#allocation2 + $0x158] sm:$0xff]  ;;  %v1276_v49 = vpop.permute.xlu0 %1275  ;;  %1335 = vperm.xlu1 %16575, %v18359_v8   ;;  %v3163_v24 = vld [vmem:[#allocation2 + $0x150] sm:$0xff] }
 0x258   : > { %22343 = vst [vmem:[#allocation30_spill] sm:$0xff] %v18429_v56  ;;  %v18432_v9 = vld [vmem:[#allocation2 + $0x150] sm:$0xff]  ;;  %847 = vperm.xlu0 %16574, %v18337_v26   ;;  %v3228_v25 = vpack.c.bf16 %v3163_v24, %v3162_v40  ;;  %v18436_v57 = vpack.c.bf16 %v18427_v3, %v3163_v24  ;;  %v18446_v26 = vld [vmem:[%s22161_s3 + $0x18] sm:$0xff]  }
 0x259   : > { %22344 = vst [vmem:[#allocation31_spill] sm:$0xff] %v18432_v9  ;;  %15303 = vmatprep.subr.bf16.mxu0 %v18446_v26  ;;  %v1393_v9 = vmul.f32 %v18348_v38, %v1266_v29 }
 0x25a   : > { %15171 = vmatprep.mubr.msk.bf16.mxu1 %vm3060_vm0, %v3228_v25  ;;  %15230 = vmatmul.mubr.msk.bf16.gmra.mrb[40].mxu0 %vm3060_vm0, %v18436_v57  ;;  %v1759_v47 = vpop.permute.xlu1 %1758 }
 0x25b   : > { %v1754_v6 = vpop.permute.xlu0 %1753  ;;  %2311 = vperm.xlu1 %16575, %v2502_v32  }
 0x25c   : > { %1823 = vperm.xlu0 %16574, %v2014_v51   ;;  %v1881_v30 = vmul.f32 %v18256_v12, %v1754_v6  ;;  %v907_v6 = vmul.f32 %v18250_v60, %v788_v62 }
 0x25e   : > { %v1769_v40 = vpop.permute.xlu1 %1768 }
 0x25f   : > { %v1764_v61 = vpop.permute.xlu0 %1763  ;;  %852 = vperm.xlu1 %16575, %v18359_v8   ;;  %v906_v8 = vmul.f32 %v18250_v60, %v18400_v27 }
 0x260   : > { %2799 = vperm.xlu0 %16574, %v2503_v7  }
 0x261   : > { %v18451_v18 = vpop.f32.mrb[4].mxu1 }
 0x262   : > { %22345 = vst [vmem:[#allocation32_spill] sm:$0xff] %v18451_v18  ;;  %v18453_v24 = vpop.f32.mrb[5].mxu1  ;;  %v2247_v25 = vpop.permute.xlu1 %2246  ;;  %v1882_v18 = vmul.f32 %v18256_v12, %v1759_v47  ;;  %v908_v47 = vmul.f32 %v18250_v60, %v793_v55 }
 0x263   : > { %22346 = vst [vmem:[#allocation33_spill] sm:$0xff] %v18453_v24  ;;  %v18456_v59 = vpop.f32.mrb[6].mxu1  ;;  %v2242_v56 = vpop.permute.xlu0 %2241  ;;  %1828 = vperm.xlu1 %16575, %v2502_v32   ;;  %v905_v24 = vmul.f32 %v18250_v60, %v18404_v63  ;;  %v1396_v32 = vmul.f32 %v18348_v38, %v1281_v20  ;;  %v2370_v29 = vmul.f32 %v18265_v34, %v2247_v25 }
 0x264   : > { %22347 = vst [vmem:[#allocation34_spill] sm:$0xff] %v18456_v59  ;;  %v18459_v2 = vpop.f32.mrb[7].mxu1  ;;  %1340 = vperm.xlu0 %16574, %v2014_v51   ;;  %v1454_v59 = vadd.f32 %v1394_v54, %v906_v8  ;;  %v2369_v27 = vmul.f32 %v18265_v34, %v2242_v56  ;;  %v1884_v63 = vmul.f32 %v18256_v12, %v1769_v40 }
 0x265   : > { %22348 = vst [vmem:[#allocation35_spill] sm:$0xff] %v18459_v2  ;;  %v1453_v51 = vadd.f32 %v1393_v9, %v905_v24  ;;  %v1395_v2 = vmul.f32 %v18348_v38, %v1276_v49  ;;  %v1883_v20 = vmul.f32 %v18256_v12, %v1764_v61  ;;  %v1456_v25 = vadd.f32 %v1396_v32, %v908_v47 }
 0x266   : > { %v2257_v42 = vpop.permute.xlu1 %2256  ;;  %v1942_v48 = vadd.f32 %v1882_v18, %v1454_v59 }
 0x267   : > { %v2252_v39 = vpop.permute.xlu0 %2251  ;;  %2804 = vperm.xlu1 %16575, %v2504_v14   ;;  %v1941_v54 = vadd.f32 %v1881_v30, %v1453_v51  ;;  %v2372_v14 = vmul.f32 %v18265_v34, %v2257_v42  ;;  %v1455_v56 = vadd.f32 %v1395_v2, %v907_v6  ;;  %v1944_v40 = vadd.f32 %v1884_v63, %v1456_v25 }
 0x268   : > { %2316 = vperm.xlu0 %16574, %v2503_v7   ;;  %v2430_v0 = vadd.f32 %v2370_v29, %v1942_v48  ;;  %v2371_v55 = vmul.f32 %v18265_v34, %v2252_v39 }
 0x269   : > { %v2429_v7 = vadd.f32 %v2369_v27, %v1941_v54  ;;  %v1943_v62 = vadd.f32 %v1883_v20, %v1455_v56  ;;  %v2432_v61 = vadd.f32 %v2372_v14, %v1944_v40 }
 0x26a   : > { %v2735_v8 = vpop.permute.xlu1 %2734 }
 0x26b   : > { %v2858_v49 = vmul.f32 %v18382_v21, %v2735_v8  ;;  %v2730_v9 = vpop.permute.xlu0 %2729  ;;  %v2431_v29 = vadd.f32 %v2371_v55, %v1943_v62 }
 0x26c   : > { %v2857_v59 = vmul.f32 %v18382_v21, %v2730_v9 }
 0x26d   : > { %v2918_v18 = vadd.f32 %v2858_v49, %v2430_v0 }
 0x26e   : > { %v2917_v24 = vadd.f32 %v2857_v59, %v2429_v7  ;;  %v2745_v30 = vpop.permute.xlu1 %2744 }
 0x26f   : > { %v2985_v32 = vadd.f32 %v18392_v46, %v2918_v18  ;;  %v2860_v48 = vmul.f32 %v18382_v21, %v2745_v30  ;;  %v2740_v42 = vpop.permute.xlu0 %2739 }
 0x270   : > { %v2984_v51 = vadd.f32 %v18392_v46, %v2917_v24  ;;  %v2859_v2 = vmul.f32 %v18382_v21, %v2740_v42 }
 0x271   : > { %v3045_v27 = vmax.f32 %v2985_v32, 0.0  ;;  %v2920_v39 = vadd.f32 %v2860_v48, %v2432_v61 }
 0x272   : > { %v3044_v47 = vmax.f32 %v2984_v51, 0.0  ;;  %v2919_v6 = vadd.f32 %v2859_v2, %v2431_v29  ;;  %v803_v63 = vpop.permute.xlu1 %802 }
 0x273   : > { %3106 = vst.msk [vmem:[#allocation2 + $0x168] sm:$0xff] %vm3060_vm0, %v3045_v27  ;;  %v2987_v0 = vadd.f32 %v18392_v46, %v2920_v39  ;;  %v798_v54 = vpop.permute.xlu0 %797 }
 0x274   : > { %3105 = vst.msk [vmem:[#allocation2 + $0x160] sm:$0xff] %vm3060_vm0, %v3044_v47  ;;  %v2986_v20 = vadd.f32 %v18392_v46, %v2919_v6 }
 0x275   : > { %v3047_v8 = vmax.f32 %v2987_v0, 0.0 }
 0x276   : > { %v3046_v25 = vmax.f32 %v2986_v20, 0.0  ;;  %v1291_v14 = vpop.permute.xlu1 %1290 }
 0x277   : > { %3108 = vst.msk [vmem:[#allocation2 + $0x178] sm:$0xff] %vm3060_vm0, %v3047_v8  ;;  %v1286_v49 = vpop.permute.xlu0 %1285  ;;  %v1398_v39 = vmul.f32 %v18348_v38, %v1291_v14  ;;  %v910_v8 = vmul.f32 %v18250_v60, %v803_v63 }
 0x278   : > { %3107 = vst.msk [vmem:[#allocation2 + $0x170] sm:$0xff] %vm3060_vm0, %v3046_v25  ;;  %v1397_v0 = vmul.f32 %v18348_v38, %v1286_v49 }
 0x27a   : > { %v813_v9 = vpop.permute.xlu1 %812  ;;  %v3166_v56 = vld [vmem:[#allocation2 + $0x168] sm:$0xff] }
 0x27b   : > { %v808_v7 = vpop.permute.xlu0 %807  ;;  %v18490_v55 = vld [vmem:[#allocation2 + $0x160] sm:$0xff]  ;;  %v912_v63 = vmul.f32 %v18250_v60, %v813_v9 }
 0x27c   : > { %22349 = vst [vmem:[#allocation36_spill] sm:$0xff] %v18490_v55  ;;  %v3229_v59 = vpack.c.bf16 %v18490_v55, %v18427_v3  ;;  %v18495_v40 = vpack.c.bf16 %v3166_v56, %v18490_v55 }
 0x27e   : > { %15172 = vmatmul.mubr.msk.bf16.gmra.mrb[28].mxu1 %vm3060_vm0, %v3229_v59  ;;  %15233 = vmatprep.mubr.msk.bf16.mxu0 %vm3060_vm0, %v18495_v40  ;;  %v1301_v18 = vpop.permute.xlu1 %1300  ;;  %v18500_v62 = vld [vmem:[#allocation2 + $0x178] sm:$0xff] }
 0x27f   : > { %v1296_v24 = vpop.permute.xlu0 %1295  ;;  %v3167_v30 = vld [vmem:[#allocation2 + $0x170] sm:$0xff] }
 0x280   : > { %v18502_v61 = vpack.c.bf16 %v3167_v30, %v3166_v56  ;;  %v18505_v32 = vpack.c.bf16 %v18500_v62, %v3167_v30  ;;  %v909_v56 = vmul.f32 %v18250_v60, %v798_v54  ;;  %v1399_v49 = vmul.f32 %v18348_v38, %v1296_v24 }
 0x281   : > { %v911_v54 = vmul.f32 %v18250_v60, %v808_v7 }
 0x282   : > { %22350 = vst [vmem:[#allocation37_spill] sm:$0xff] %v18502_v61  ;;  %15175 = vmatprep.mubr.msk.bf16.mxu1 %vm3060_vm0, %v18502_v61  ;;  %15234 = vmatmul.mubr.msk.bf16.gmra.mrb[44].mxu0 %vm3060_vm0, %v18505_v32  ;;  %v1779_v3 = vpop.permute.xlu1 %1778  ;;  %v1457_v61 = vadd.f32 %v1397_v0, %v909_v56 }
 0x283   : > { %v1774_v48 = vpop.permute.xlu0 %1773  ;;  %v1886_v25 = vmul.f32 %v18256_v12, %v1779_v3  ;;  %v1459_v56 = vadd.f32 %v1399_v49, %v911_v54 }
 0x284   : > { %v1885_v59 = vmul.f32 %v18256_v12, %v1774_v48 }
 0x286   : > { %v1789_v42 = vpop.permute.xlu1 %1788  ;;  %v1945_v48 = vadd.f32 %v1885_v59, %v1457_v61 }
 0x287   : > { %v1784_v29 = vpop.permute.xlu0 %1783  ;;  %v1888_v3 = vmul.f32 %v18256_v12, %v1789_v42 }
 0x289   : > { %v18511_v51 = vpop.f32.mrb[8].mxu1 }
 0x28a   : > { %22351 = vst [vmem:[#allocation38_spill] sm:$0xff] %v18511_v51  ;;  %v18513_v2 = vpop.f32.mrb[9].mxu1  ;;  %v2267_v27 = vpop.permute.xlu1 %2266  ;;  %v1400_v51 = vmul.f32 %v18348_v38, %v1301_v18 }
 0x28b   : > { %22352 = vst [vmem:[#allocation39_spill] sm:$0xff] %v18513_v2  ;;  %v18516_v47 = vpop.f32.mrb[10].mxu1  ;;  %v2262_v6 = vpop.permute.xlu0 %2261  ;;  %v1458_v2 = vadd.f32 %v1398_v39, %v910_v8  ;;  %v2374_v14 = vmul.f32 %v18265_v34, %v2267_v27  ;;  %v1887_v39 = vmul.f32 %v18256_v12, %v1784_v29 }
 0x28c   : > { %22353 = vst [vmem:[#allocation40_spill] sm:$0xff] %v18516_v47  ;;  %v18519_v20 = vpop.f32.mrb[11].mxu1  ;;  %v1460_v18 = vadd.f32 %v1400_v51, %v912_v63 }
 0x28d   : > { %22354 = vst [vmem:[#allocation41_spill] sm:$0xff] %v18519_v20  ;;  %v2373_v20 = vmul.f32 %v18265_v34, %v2262_v6  ;;  %v1946_v55 = vadd.f32 %v1886_v25, %v1458_v2  ;;  %v1947_v7 = vadd.f32 %v1887_v39, %v1459_v56 }
 0x28e   : > { %v2277_v30 = vpop.permute.xlu1 %2276  ;;  %v1948_v42 = vadd.f32 %v1888_v3, %v1460_v18 }
 0x28f   : > { %v2272_v47 = vpop.permute.xlu0 %2271  ;;  %v2434_v4 = vadd.f32 %v2374_v14, %v1946_v55  ;;  %v2376_v27 = vmul.f32 %v18265_v34, %v2277_v30  ;;  %v2433_v6 = vadd.f32 %v2373_v20, %v1945_v48 }
 0x290   : > { %v2375_v9 = vmul.f32 %v18265_v34, %v2272_v47 }
 0x291   : > { %v2436_v29 = vadd.f32 %v2376_v27, %v1948_v42 }
 0x292   : > { %v2755_v8 = vpop.permute.xlu1 %2754  ;;  %v2435_v14 = vadd.f32 %v2375_v9, %v1947_v7 }
 0x293   : > { %v2862_v0 = vmul.f32 %v18382_v21, %v2755_v8  ;;  %v2750_v24 = vpop.permute.xlu0 %2749 }
 0x294   : > { %v2861_v2 = vmul.f32 %v18382_v21, %v2750_v24 }
 0x295   : > { %v2922_v25 = vadd.f32 %v2862_v0, %v2434_v4 }
 0x296   : > { %v2921_v61 = vadd.f32 %v2861_v2, %v2433_v6  ;;  %v2765_v59 = vpop.permute.xlu1 %2764 }
 0x297   : > { %v2989_v51 = vadd.f32 %v18392_v46, %v2922_v25  ;;  %v2864_v55 = vmul.f32 %v18382_v21, %v2765_v59  ;;  %v2760_v30 = vpop.permute.xlu0 %2759 }
 0x298   : > { %v2988_v63 = vadd.f32 %v18392_v46, %v2921_v61  ;;  %v2863_v20 = vmul.f32 %v18382_v21, %v2760_v30 }
 0x299   : > { %v3049_v49 = vmax.f32 %v2989_v51, 0.0  ;;  %v2924_v47 = vadd.f32 %v2864_v55, %v2436_v29 }
 0x29a   : > { %v3048_v54 = vmax.f32 %v2988_v63, 0.0  ;;  %v2923_v48 = vadd.f32 %v2863_v20, %v2435_v14  ;;  %v823_v3 = vpop.permute.xlu1 %822 }
 0x29b   : > { %3110 = vst.msk [vmem:[#allocation2 + $0x188] sm:$0xff] %vm3060_vm0, %v3049_v49  ;;  %v2991_v4 = vadd.f32 %v18392_v46, %v2924_v47  ;;  %v818_v39 = vpop.permute.xlu0 %817 }
 0x29c   : > { %3109 = vst.msk [vmem:[#allocation2 + $0x180] sm:$0xff] %vm3060_vm0, %v3048_v54  ;;  %v2990_v8 = vadd.f32 %v18392_v46, %v2923_v48 }
 0x29d   : > { %v3051_v18 = vmax.f32 %v2991_v4, 0.0 }
 0x29e   : > { %v3050_v27 = vmax.f32 %v2990_v8, 0.0  ;;  %v1311_v0 = vpop.permute.xlu1 %1310 }
 0x29f   : > { %3112 = vst.msk [vmem:[#allocation2 + $0x198] sm:$0xff] %vm3060_vm0, %v3051_v18  ;;  %v1306_v24 = vpop.permute.xlu0 %1305  ;;  %v1402_v54 = vmul.f32 %v18348_v38, %v1311_v0 }
 0x2a0   : > { %3111 = vst.msk [vmem:[#allocation2 + $0x190] sm:$0xff] %vm3060_vm0, %v3050_v27  ;;  %v1401_v8 = vmul.f32 %v18348_v38, %v1306_v24  ;;  %v914_v27 = vmul.f32 %v18250_v60, %v823_v3 }
 0x2a2   : > { %v833_v56 = vpop.permute.xlu1 %832  ;;  %v3170_v6 = vld [vmem:[#allocation2 + $0x188] sm:$0xff] }
 0x2a3   : > { %v828_v9 = vpop.permute.xlu0 %827  ;;  %v3169_v2 = vld [vmem:[#allocation2 + $0x180] sm:$0xff]  ;;  %v916_v3 = vmul.f32 %v18250_v60, %v833_v56 }
 0x2a4   : > { %v18548_v42 = vpack.c.bf16 %v3169_v2, %v18500_v62  ;;  %v18550_v25 = vpack.c.bf16 %v3170_v6, %v3169_v2  ;;  %v913_v2 = vmul.f32 %v18250_v60, %v818_v39  ;;  %v915_v39 = vmul.f32 %v18250_v60, %v828_v9 }
 0x2a6   : > { %22355 = vst [vmem:[#allocation42_spill] sm:$0xff] %v18548_v42  ;;  %15176 = vmatmul.mubr.msk.bf16.gmra.mrb[32].mxu1 %vm3060_vm0, %v18548_v42  ;;  %15237 = vmatprep.mubr.msk.bf16.mxu0 %vm3060_vm0, %v18550_v25  ;;  %v1321_v7 = vpop.permute.xlu1 %1320  ;;  %v18556_v61 = vld [vmem:[#allocation2 + $0x198] sm:$0xff]  ;;  %v1461_v42 = vadd.f32 %v1401_v8, %v913_v2 }
 0x2a7   : > { %v1316_v59 = vpop.permute.xlu0 %1315  ;;  %v3171_v29 = vld [vmem:[#allocation2 + $0x190] sm:$0xff] }
 0x2a8   : > { %v18558_v51 = vpack.c.bf16 %v3171_v29, %v3170_v6  ;;  %v18561_v55 = vpack.c.bf16 %v18556_v61, %v3171_v29  ;;  %v1403_v24 = vmul.f32 %v18348_v38, %v1316_v59 }
 0x2aa   : > { %22356 = vst [vmem:[#allocation43_spill] sm:$0xff] %v18558_v51  ;;  %15179 = vmatprep.mubr.msk.bf16.mxu1 %vm3060_vm0, %v18558_v51  ;;  %15238 = vmatmul.mubr.msk.bf16.gmra.mrb[48].mxu0 %vm3060_vm0, %v18561_v55  ;;  %v1799_v62 = vpop.permute.xlu1 %1798  ;;  %v1404_v51 = vmul.f32 %v18348_v38, %v1321_v7  ;;  %v1463_v2 = vadd.f32 %v1403_v24, %v915_v39 }
 0x2ab   : > { %v1794_v30 = vpop.permute.xlu0 %1793  ;;  %v1890_v6 = vmul.f32 %v18256_v12, %v1799_v62 }
 0x2ac   : > { %v1889_v29 = vmul.f32 %v18256_v12, %v1794_v30  ;;  %v1464_v7 = vadd.f32 %v1404_v51, %v916_v3 }
 0x2ae   : > { %v1809_v14 = vpop.permute.xlu1 %1808  ;;  %v1949_v30 = vadd.f32 %v1889_v29, %v1461_v42 }
 0x2af   : > { %v1804_v63 = vpop.permute.xlu0 %1803  ;;  %v1892_v62 = vmul.f32 %v18256_v12, %v1809_v14 }
 0x2b1   : > { %v18567_v20 = vpop.f32.mrb[12].mxu1  ;;  %v1952_v14 = vadd.f32 %v1892_v62, %v1464_v7 }
 0x2b2   : > { %22357 = vst [vmem:[#allocation44_spill] sm:$0xff] %v18567_v20  ;;  %v18569_v49 = vpop.f32.mrb[13].mxu1  ;;  %v2287_v47 = vpop.permute.xlu1 %2286 }
 0x2b3   : > { %22358 = vst [vmem:[#allocation45_spill] sm:$0xff] %v18569_v49  ;;  %v18572_v48 = vpop.f32.mrb[14].mxu1  ;;  %v2282_v4 = vpop.permute.xlu0 %2281  ;;  %v1462_v49 = vadd.f32 %v1402_v54, %v914_v27  ;;  %v2378_v0 = vmul.f32 %v18265_v34, %v2287_v47  ;;  %v1891_v54 = vmul.f32 %v18256_v12, %v1804_v63 }
 0x2b4   : > { %22359 = vst [vmem:[#allocation46_spill] sm:$0xff] %v18572_v48  ;;  %v18575_v18 = vpop.f32.mrb[15].mxu1 }
 0x2b5   : > { %22360 = vst [vmem:[#allocation47_spill] sm:$0xff] %v18575_v18  ;;  %v2377_v18 = vmul.f32 %v18265_v34, %v2282_v4  ;;  %v1950_v53 = vadd.f32 %v1890_v6, %v1462_v49  ;;  %v1951_v9 = vadd.f32 %v1891_v54, %v1463_v2 }
 0x2b6   : > { %v2297_v20 = vpop.permute.xlu1 %2296 }
 0x2b7   : > { %v2292_v48 = vpop.permute.xlu0 %2291  ;;  %v2438_v1 = vadd.f32 %v2378_v0, %v1950_v53  ;;  %v2380_v47 = vmul.f32 %v18265_v34, %v2297_v20  ;;  %v2437_v4 = vadd.f32 %v2377_v18, %v1949_v30 }
 0x2b8   : > { %v2379_v56 = vmul.f32 %v18265_v34, %v2292_v48 }
 0x2b9   : > { %v2440_v63 = vadd.f32 %v2380_v47, %v1952_v14 }
 0x2ba   : > { %v2775_v27 = vpop.permute.xlu1 %2774  ;;  %v2439_v0 = vadd.f32 %v2379_v56, %v1951_v9 }
 0x2bb   : > { %v2866_v8 = vmul.f32 %v18382_v21, %v2775_v27  ;;  %v2770_v59 = vpop.permute.xlu0 %2769 }
 0x2bc   : > { %v2865_v49 = vmul.f32 %v18382_v21, %v2770_v59 }
 0x2bd   : > { %v2926_v6 = vadd.f32 %v2866_v8, %v2438_v1 }
 0x2be   : > { %v2925_v42 = vadd.f32 %v2865_v49, %v2437_v4  ;;  %v2785_v29 = vpop.permute.xlu1 %2784 }
 0x2bf   : > { %v2993_v51 = vadd.f32 %v18392_v46, %v2926_v6  ;;  %v2868_v53 = vmul.f32 %v18382_v21, %v2785_v29  ;;  %v2780_v20 = vpop.permute.xlu0 %2779 }
 0x2c0   : > { %v2992_v3 = vadd.f32 %v18392_v46, %v2925_v42  ;;  %v2867_v18 = vmul.f32 %v18382_v21, %v2780_v20 }
 0x2c1   : > { %v3053_v24 = vmax.f32 %v2993_v51, 0.0  ;;  %v2928_v48 = vadd.f32 %v2868_v53, %v2440_v63 }
 0x2c2   : > { %v3052_v39 = vmax.f32 %v2992_v3, 0.0  ;;  %v2927_v30 = vadd.f32 %v2867_v18, %v2439_v0  ;;  %v843_v62 = vpop.permute.xlu1 %842 }
 0x2c3   : > { %3114 = vst.msk [vmem:[#allocation2 + $0x1a8] sm:$0xff] %vm3060_vm0, %v3053_v24  ;;  %v2995_v1 = vadd.f32 %v18392_v46, %v2928_v48  ;;  %v838_v54 = vpop.permute.xlu0 %837  ;;  %v918_v29 = vmul.f32 %v18250_v60, %v843_v62  ;;  %v3933_v62 = vld [vmem:[#allocation2 + $0x10] sm:$0xff] }
 0x2c4   : > { %3113 = vst.msk [vmem:[#allocation2 + $0x1a0] sm:$0xff] %vm3060_vm0, %v3052_v39  ;;  %v2994_v27 = vadd.f32 %v18392_v46, %v2927_v30  ;;  %v917_v51 = vmul.f32 %v18250_v60, %v838_v54  ;;  %v17227_v54 = vld [vmem:[#allocation2 + $0x18] sm:$0xff] }
 0x2c5   : > { %v3055_v7 = vmax.f32 %v2995_v1, 0.0 }
 0x2c6   : > { %v3054_v47 = vmax.f32 %v2994_v27, 0.0  ;;  %v1331_v8 = vpop.permute.xlu1 %1330  ;;  %v3989_v27 = vpack.c.bf16 %v17227_v54, %v3933_v62  ;;  %v17231_v62 = vld [vmem:[#allocation2 + $0x38] sm:$0xff] }
 0x2c7   : > { %3116 = vst.msk [vmem:[#allocation2 + $0x1b8] sm:$0xff] %vm3060_vm0, %v3055_v7  ;;  %v1326_v59 = vpop.permute.xlu0 %1325  ;;  %v1406_v56 = vmul.f32 %v18348_v38, %v1331_v8 }
 0x2c8   : > { %3115 = vst.msk [vmem:[#allocation2 + $0x1b0] sm:$0xff] %vm3060_vm0, %v3054_v47  ;;  %v1405_v6 = vmul.f32 %v18348_v38, %v1326_v59 }
 0x2ca   : > { %v1819_v2 = vpop.permute.xlu1 %1818  ;;  %v3174_v4 = vld [vmem:[#allocation2 + $0x1a8] sm:$0xff]  ;;  %v1465_v48 = vadd.f32 %v1405_v6, %v917_v51 }
 0x2cb   : > { %v1814_v49 = vpop.permute.xlu0 %1813  ;;  %v3173_v14 = vld [vmem:[#allocation2 + $0x1a0] sm:$0xff]  ;;  %v1894_v63 = vmul.f32 %v18256_v12, %v1819_v2 }
 0x2cc   : > { %v18606_v9 = vpack.c.bf16 %v3173_v14, %v18556_v61  ;;  %v18608_v42 = vpack.c.bf16 %v3174_v4, %v3173_v14  ;;  %v1893_v53 = vmul.f32 %v18256_v12, %v1814_v49  ;;  %v1466_v61 = vadd.f32 %v1406_v56, %v918_v29 }
 0x2ce   : > { %15180 = vmatmul.mubr.msk.bf16.gmra.mrb[36].mxu1 %vm3060_vm0, %v18606_v9  ;;  %15241 = vmatprep.mubr.msk.bf16.mxu0 %vm3060_vm0, %v18608_v42  ;;  %v2307_v20 = vpop.permute.xlu1 %2306  ;;  %v18618_v0 = vld [vmem:[#allocation2 + $0x1b8] sm:$0xff]  ;;  %v1954_v1 = vadd.f32 %v1894_v63, %v1466_v61  ;;  %v1953_v7 = vadd.f32 %v1893_v53, %v1465_v48  ;;  %v17229_v61 = vld [vmem:[#allocation2 + $0x28] sm:$0xff] }
 0x2cf   : > { %v2382_v3 = vmul.f32 %v18265_v34, %v2307_v20  ;;  %v2302_v18 = vpop.permute.xlu0 %2301  ;;  %v3175_v24 = vld [vmem:[#allocation2 + $0x1b0] sm:$0xff]  ;;  %v17228_v20 = vld [vmem:[#allocation2 + $0x20] sm:$0xff] }
 0x2d0   : > { %v2381_v39 = vmul.f32 %v18265_v34, %v2302_v18  ;;  %v18622_v30 = vpack.c.bf16 %v3175_v24, %v3174_v4  ;;  %v18625_v12 = vpack.c.bf16 %v18618_v0, %v3175_v24  ;;  %v18643_v18 = vld [vmem:[%s22161_s3 + $0x20] sm:$0xff]  }
 0x2d1   : > { %v2442_v8 = vadd.f32 %v2382_v3, %v1954_v1  ;;  %v18638_v3 = vpack.c.bf16 %v17229_v61, %v17228_v20  ;;  %v17236_v20 = vld [vmem:[#allocation2 + $0x50] sm:$0xff]  ;;  %v17237_v61 = vld [vmem:[#allocation2 + $0x58] sm:$0xff] }
 0x2d2   : > { %15183 = vmatprep.mubr.msk.bf16.mxu1 %vm3060_vm0, %v18622_v30  ;;  %15242 = vmatmul.mubr.msk.bf16.gmra.mrb[52].mxu0 %vm3060_vm0, %v18625_v12  ;;  %v2795_v47 = vpop.permute.xlu1 %2794  ;;  %v2441_v2 = vadd.f32 %v2381_v39, %v1953_v7  ;;  %v17230_v39 = vld [vmem:[#allocation2 + $0x30] sm:$0xff] }
 0x2d3   : > { %v2870_v34 = vmul.f32 %v18382_v21, %v2795_v47  ;;  %15247 = vmatprep.mubr.msk.bf16.mxu0 %vm3060_vm0, %v3989_v27  ;;  %v2790_v59 = vpop.permute.xlu0 %2789  ;;  %v18647_v1 = vpack.c.bf16 %v17231_v62, %v17230_v39 }
 0x2d4   : > { %v2869_v4 = vmul.f32 %v18382_v21, %v2790_v59 }
 0x2d5   : > { %v2930_v56 = vadd.f32 %v2870_v34, %v2442_v8  ;;  %v17232_v34 = vld [vmem:[%s22159_s1 + $0x2] ss:$0 sm:$0xff] }
 0x2d6   : > { %v2929_v49 = vadd.f32 %v2869_v4, %v2441_v2  ;;  %v1336_v14 = vpop.permute.xlu1 %1335 }
 0x2d7   : > { %v2997_v6 = vadd.f32 %v18392_v46, %v2930_v56  ;;  %v848_v29 = vpop.permute.xlu0 %847  ;;  %v1407_v51 = vmul.f32 %v18348_v38, %v1336_v14 }
 0x2d8   : > { %v2996_v63 = vadd.f32 %v18392_v46, %v2929_v49  ;;  %v919_v53 = vmul.f32 %v18250_v60, %v848_v29 }
 0x2d9   : > { %v3057_v24 = vmax.f32 %v2997_v6, 0.0  ;;  %v18645_v48 = vpop.f32.mrb[16].mxu1 }
 0x2da   : > { %v3056_v54 = vmax.f32 %v2996_v63, 0.0  ;;  %v18649_v27 = vpop.f32.mrb[17].mxu1  ;;  %15248 = vmatmul.mubr.msk.bf16.vlgmr.msra.gmra.mrb[0].mxu0 %vm3060_vm0, %v18638_v3  ;;  %v2312_v60 = vpop.permute.xlu1 %2311  ;;  %v1467_v8 = vadd.f32 %v1407_v51, %v919_v53  ;;  %v17234_v63 = vld [vmem:[#allocation2 + $0x40] sm:$0xff]  ;;  %v17235_v51 = vld [vmem:[#allocation2 + $0x48] sm:$0xff] }
 0x2db   : > { %3118 = vst.msk [vmem:[#allocation2 + $0x1c8] sm:$0xff] %vm3060_vm0, %v3057_v24  ;;  %15304 = vmatpush3.bf16.msra.mxu0 %v18446_v26  ;;  %v18655_v7 = vpop.f32.mrb[18].mxu1  ;;  %15251 = vmatprep.mubr.msk.bf16.mxu0 %vm3060_vm0, %v18647_v1  ;;  %v1824_v47 = vpop.permute.xlu0 %1823  ;;  %v17233_v26 = vld [vmem:[%s22159_s1 + $0x3] ss:$0 sm:$0xff]  ;;  %v18670_v53 = vpack.c.bf16 %v17235_v51, %v17234_v63  ;;  %v18672_v24 = vpack.c.bf16 %v17237_v61, %v17236_v20 }
 0x2dc   : > { %3117 = vst.msk [vmem:[#allocation2 + $0x1c0] sm:$0xff] %vm3060_vm0, %v3056_v54  ;;  %v1895_v59 = vmul.f32 %v17232_v34, %v1824_v47  ;;  %v18663_v2 = vpop.f32.mrb[19].mxu1  ;;  %15361 = vmatprep.subr.bf16.mxu0 %v18643_v18  ;;  %v2383_v4 = vmul.f32 %v17233_v26, %v2312_v60  ;;  %v17238_v47 = vld [vmem:[%s22159_s1] ss:$0 sm:$0xff] }
 0x2dd   : > { %v17239_v61 = vld [vmem:[#allocation2 + $0x60] sm:$0xff] }
 0x2de   : > { %v1955_v56 = vadd.f32 %v1895_v59, %v1467_v8  ;;  %v853_v49 = vpop.permute.xlu1 %852 }
 0x2df   : > { %v2800_v14 = vpop.permute.xlu0 %2799  ;;  %v920_v8 = vmul.f32 %v17238_v47, %v853_v49 }
 0x2e0   : > { %v2443_v6 = vadd.f32 %v2383_v4, %v1955_v56  ;;  %v2871_v29 = vmul.f32 %v18382_v21, %v2800_v14 }
 0x2e2   : > { %v2931_v39 = vadd.f32 %v2871_v29, %v2443_v6  ;;  %15252 = vmatmul.mubr.msk.bf16.gmra.mrb[4].mxu0 %vm3060_vm0, %v18670_v53  ;;  %v1829_v62 = vpop.permute.xlu1 %1828 }
 0x2e3   : > { %15255 = vmatprep.mubr.msk.bf16.mxu0 %vm3060_vm0, %v18672_v24  ;;  %v1341_v54 = vpop.permute.xlu0 %1340  ;;  %v18678_v60 = vld [vmem:[#allocation2 + $0x1c0] sm:$0xff]  ;;  %v1896_v6 = vmul.f32 %v17232_v34, %v1829_v62 }
 0x2e4   : > { %v2998_v59 = vadd.f32 %v18392_v46, %v2931_v39  ;;  %v1408_v4 = vmul.f32 %v18348_v38, %v1341_v54  ;;  %v18687_v56 = vpack.c.bf16 %v18678_v60, %v18618_v0  ;;  %v17240_v39 = vld [vmem:[#allocation2 + $0x68] sm:$0xff]  ;;  %v17241_v38 = vld [vmem:[#allocation2 + $0x70] sm:$0xff]  ;;  %v17242_v54 = vld [vmem:[#allocation2 + $0x78] sm:$0xff] }
 0x2e5   : > { %v18692_v47 = vpack.c.bf16 %v17240_v39, %v17239_v61  ;;  %v18694_v0 = vpack.c.bf16 %v17242_v54, %v17241_v38  ;;  %v17251_v38 = vld [vmem:[#allocation2 + $0xc0] sm:$0xff]  ;;  %v17252_v54 = vld [vmem:[#allocation2 + $0xc8] sm:$0xff] }
 0x2e6   : > { %v3058_v14 = vmax.f32 %v2998_v59, 0.0  ;;  %v1468_v29 = vadd.f32 %v1408_v4, %v920_v8  ;;  %15184 = vmatmul.mubr.msk.bf16.gmra.mrb[40].mxu1 %vm3060_vm0, %v18687_v56  ;;  %v2805_v63 = vpop.permute.xlu1 %2804  ;;  %v17243_v4 = vld [vmem:[#allocation2 + $0x80] sm:$0xff] }
 0x2e7   : > { %v2317_v51 = vpop.permute.xlu0 %2316  ;;  %v2872_v34 = vmul.f32 %v18382_v21, %v2805_v63  ;;  %v17247_v21 = vld [vmem:[#allocation2 + $0xa0] sm:$0xff]  ;;  %v17248_v63 = vld [vmem:[#allocation2 + $0xa8] sm:$0xff] }
 0x2e8   : > { %3119 = vst.msk [vmem:[#allocation2 + $0x1d0] sm:$0xff] %vm3060_vm0, %v3058_v14  ;;  %v1956_v20 = vadd.f32 %v1896_v6, %v1468_v29  ;;  %v2384_v49 = vmul.f32 %v17233_v26, %v2317_v51  ;;  %v17244_v14 = vld [vmem:[#allocation2 + $0x88] sm:$0xff]  ;;  %v17245_v29 = vld [vmem:[#allocation2 + $0x90] sm:$0xff]  ;;  %v17246_v51 = vld [vmem:[#allocation2 + $0x98] sm:$0xff] }
 0x2e9   : > { %v18702_v6 = vpack.c.bf16 %v17244_v14, %v17243_v4  ;;  %v18704_v61 = vpack.c.bf16 %v17246_v51, %v17245_v29  ;;  %v17255_v51 = vld [vmem:[#allocation2 + $0xe0] sm:$0xff] }
 0x2ea   : > { %v2444_v62 = vadd.f32 %v2384_v49, %v1956_v20  ;;  %15256 = vmatmul.mubr.msk.bf16.gmra.mrb[8].mxu0 %vm3060_vm0, %v18692_v47  ;;  %v17249_v20 = vld [vmem:[#allocation2 + $0xb0] sm:$0xff]  ;;  %v17250_v49 = vld [vmem:[#allocation2 + $0xb8] sm:$0xff] }
 0x2eb   : > { %15259 = vmatprep.mubr.msk.bf16.mxu0 %vm3060_vm0, %v18694_v0  ;;  %v18713_v39 = vpack.c.bf16 %v17250_v49, %v17249_v20  ;;  %v17257_v20 = vld [vmem:[#allocation2 + $0xf0] sm:$0xff]  ;;  %v17258_v49 = vld [vmem:[#allocation2 + $0xf8] sm:$0xff] }
 0x2ec   : > { %v2932_v8 = vadd.f32 %v2872_v34, %v2444_v62  ;;  %v18719_v34 = vpack.c.bf16 %v17252_v54, %v17251_v38  ;;  %v18737_v38 = vpack.c.bf16 %v17258_v49, %v17257_v20  ;;  %v17259_v54 = vld [vmem:[#allocation2 + $0x100] sm:$0xff] }
 0x2ee   : > { %v2999_v26 = vadd.f32 %v18392_v46, %v2932_v8  ;;  %v18711_v46 = vpack.c.bf16 %v17248_v63, %v17247_v21  ;;  %v17253_v8 = vld [vmem:[#allocation2 + $0xd0] sm:$0xff]  ;;  %v17256_v21 = vld [vmem:[#allocation2 + $0xe8] sm:$0xff] }
 0x2ef   : > { %v18735_v63 = vpack.c.bf16 %v17256_v21, %v17255_v51  ;;  %v3970_v51 = vld [vmem:[#allocation2 + $0x138] sm:$0xff]  ;;  %v18754_v21 = vpack.c.bf16 %v18328_v19, %v18308_v35 }
 0x2f0   : > { %v3059_v59 = vmax.f32 %v2999_v26, 0.0  ;;  %v17254_v26 = vld [vmem:[#allocation2 + $0xd8] sm:$0xff]  ;;  %v18757_v20 = vpack.c.bf16 %v3970_v51, %v18324_v16 }
 0x2f2   : > { %3120 = vst.msk [vmem:[#allocation2 + $0x1d8] sm:$0xff] %vm3060_vm0, %v3059_v59  ;;  %15260 = vmatmul.mubr.msk.bf16.gmra.mrb[12].mxu0 %vm3060_vm0, %v18702_v6  ;;  %v18723_v59 = vpack.c.bf16 %v17254_v26, %v17253_v8  ;;  %v17260_v8 = vld [vmem:[#allocation2 + $0x108] sm:$0xff] }
 0x2f3   : > { %15263 = vmatprep.mubr.msk.bf16.mxu0 %vm3060_vm0, %v18704_v61  ;;  %v18743_v26 = vpack.c.bf16 %v17260_v8, %v17259_v54 }
 0x2fa   : > { %15264 = vmatmul.mubr.msk.bf16.gmra.mrb[16].mxu0 %vm3060_vm0, %v18711_v46 }
 0x2fb   : > { %15267 = vmatprep.mubr.msk.bf16.mxu0 %vm3060_vm0, %v18713_v39 }
 0x301   : > { %v18721_v62 = vpop.f32.mrb[20].mxu1 }
 0x302   : > { %v18725_v4 = vpop.f32.mrb[21].mxu1  ;;  %15268 = vmatmul.mubr.msk.bf16.gmra.mrb[20].mxu0 %vm3060_vm0, %v18719_v34 }
 0x303   : > { %v18729_v14 = vpop.f32.mrb[22].mxu1  ;;  %15271 = vmatprep.mubr.msk.bf16.mxu0 %vm3060_vm0, %v18723_v59 }
 0x304   : > { %22361 = vst [vmem:[#allocation48_spill] sm:$0xff] %v18729_v14  ;;  %v18733_v29 = vpop.f32.mrb[23].mxu1  ;;  %v17261_v14 = vld [vmem:[#allocation2 + $0x110] sm:$0xff] }
 0x305   : > { %22362 = vst [vmem:[#allocation49_spill] sm:$0xff] %v18733_v29  ;;  %v18746_v29 = vpack.c.bf16 %v18315_v31, %v17261_v14 }
 0x30a   : > { %15272 = vmatmul.mubr.msk.bf16.gmra.mrb[24].mxu0 %vm3060_vm0, %v18735_v63 }
 0x30b   : > { %15275 = vmatprep.mubr.msk.bf16.mxu0 %vm3060_vm0, %v18737_v38 }
 0x312   : > { %15276 = vmatmul.mubr.msk.bf16.gmra.mrb[28].mxu0 %vm3060_vm0, %v18743_v26 }
 0x313   : > { %15279 = vmatprep.mubr.msk.bf16.mxu0 %vm3060_vm0, %v18746_v29 }
 0x31a   : > { %15280 = vmatmul.mubr.msk.bf16.gmra.mrb[32].mxu0 %vm3060_vm0, %v18754_v21 }
 0x31b   : > { %15283 = vmatprep.mubr.msk.bf16.mxu0 %vm3060_vm0, %v18757_v20 }
 0x322   : > { %15284 = vmatmul.mubr.msk.bf16.gmra.mrb[36].mxu0 %vm3060_vm0, %v18420_v44  ;;  %v3988_v44 = vld [vmem:[#allocation2 + $0x1c8] sm:$0xff] }
 0x323   : > { %15287 = vmatprep.mubr.msk.bf16.mxu0 %vm3060_vm0, %v18436_v57  ;;  %v18788_v57 = vpack.c.bf16 %v3988_v44, %v18678_v60 }
 0x329   : > { %v18767_v14 = vpop.f32.mrb[24].mxu1 }
 0x32a   : > { %v18769_v49 = vpop.f32.mrb[25].mxu1  ;;  %15288 = vmatmul.mubr.msk.bf16.gmra.mrb[40].mxu0 %vm3060_vm0, %v18495_v40  ;;  %v22365_v40 = vpack.c.bf16 %v17530_v36, %v17523_v52  ;;  %v22368_v52 = vpack.c.bf16 %v17690_v33, %v17684_v10  ;;  %v22372_v10 = vpack.c.bf16 %v17885_v58, %v17889_v37  ;;  %v22373_v33 = vpack.c.bf16 %v17964_v41, %v17971_v22  ;;  %v22383_v37 = vld [vmem:[#allocation16_spill] sm:$0xff] }
 0x32b   : > { %v18773_v54 = vpop.f32.mrb[26].mxu1  ;;  %15291 = vmatprep.mubr.msk.bf16.mxu0 %vm3060_vm0, %v18505_v32  ;;  %v22366_v32 = vpack.c.bf16 %v17599_v15, %v17594_v13  ;;  %v22369_v13 = vpack.c.bf16 %v17709_v5, %v17703_v50  ;;  %v22374_v50 = vld [vmem:[#allocation10_spill] sm:$0xff]  ;;  %v22375_v5 = vld [vmem:[#allocation11_spill] sm:$0xff] }
 0x32c   : > { %22363 = vst [vmem:[#allocation50_spill] sm:$0xff] %v18773_v54  ;;  %v18777_v8 = vpop.f32.mrb[27].mxu1 }
 0x32d   : > { %22364 = vst [vmem:[#allocation51_spill] sm:$0xff] %v18777_v8  ;;  %v22367_v8 = vpack.c.bf16 %v17617_v23, %v17612_v17  ;;  %v22370_v17 = vpack.c.bf16 %v17791_v28, %v17787_v45  ;;  %v22371_v23 = vpack.c.bf16 %v17869_v43, %v17876_v11  ;;  %v22376_v45 = vpack.c.bf16 %v22374_v50, %v22375_v5  ;;  %v22377_v28 = vld [vmem:[#allocation12_spill] sm:$0xff]  ;;  %v22380_v11 = vld [vmem:[#allocation14_spill] sm:$0xff] }
 0x332   : > { %15292 = vmatmul.mubr.msk.bf16.gmra.mrb[44].mxu0 %vm3060_vm0, %v18550_v25 }
 0x333   : > { %15295 = vmatprep.mubr.msk.bf16.mxu0 %vm3060_vm0, %v18561_v55 }
 0x33a   : > { %15296 = vmatmul.mubr.msk.bf16.gmra.mrb[48].mxu0 %vm3060_vm0, %v18608_v42 }
 0x33b   : > { %15299 = vmatprep.mubr.msk.bf16.mxu0 %vm3060_vm0, %v18625_v12 }
 0x342   : > { %15300 = vmatmul.mubr.msk.bf16.gmra.mrb[52].mxu0 %vm3060_vm0, %v18788_v57 }
 0x343   : > { %15305 = vmatprep.mubr.msk.bf16.mxu0 %vm3060_vm0, %v22365_v40  ;;  %v22384_v40 = vld [vmem:[#allocation17_spill] sm:$0xff] }
 0x344   : > { %v22385_v41 = vpack.c.bf16 %v22383_v37, %v22384_v40  ;;  %v22398_v37 = vld [vmem:[#allocation28_spill] sm:$0xff]  ;;  %v22399_v40 = vld [vmem:[#allocation31_spill] sm:$0xff] }
 0x34a   : > { %15306 = vmatmul.mubr.msk.bf16.vlgmr.msra.gmra.mrb[0].mxu0 %vm3060_vm0, %v22366_v32 }
 0x34b   : > { %15362 = vmatpush3.bf16.msra.mxu0 %v18643_v18  ;;  %15309 = vmatprep.mubr.msk.bf16.mxu0 %vm3060_vm0, %v22367_v8  ;;  %v22378_v18 = vld [vmem:[#allocation13_spill] sm:$0xff]  ;;  %v22381_v8 = vld [vmem:[#allocation15_spill] sm:$0xff] }
 0x34c   : > { %v22379_v43 = vpack.c.bf16 %v22377_v28, %v22378_v18  ;;  %v22382_v58 = vpack.c.bf16 %v22380_v11, %v22381_v8  ;;  %v22393_v28 = vld [vmem:[#allocation23_spill] sm:$0xff]  ;;  %v22396_v11 = vld [vmem:[#allocation29_spill] sm:$0xff] }
 0x34d   : > { %v4497_v8 = vpack.c.bf16 %v22396_v11, %v3970_v51  ;;  %v22404_v51 = vld [vmem:[#allocation43_spill] sm:$0xff] }
 0x351   : > { %v18805_v60 = vpop.f32.mrb[28].mxu1 }
 0x352   : > { %v18807_v54 = vpop.f32.mrb[29].mxu1  ;;  %15310 = vmatmul.mubr.msk.bf16.gmra.mrb[4].mxu0 %vm3060_vm0, %v22368_v52  ;;  %v22386_v52 = vld [vmem:[#allocation18_spill] sm:$0xff] }
 0x353   : > { %v18813_v36 = vpop.f32.mrb[30].mxu1  ;;  %15313 = vmatprep.mubr.msk.bf16.mxu0 %vm3060_vm0, %v22369_v13  ;;  %v22387_v13 = vld [vmem:[#allocation19_spill] sm:$0xff] }
 0x354   : > { %v18819_v15 = vpop.f32.mrb[31].mxu1 }
 0x35a   : > { %15314 = vmatmul.mubr.msk.bf16.gmra.mrb[8].mxu0 %vm3060_vm0, %v22370_v17  ;;  %v22388_v17 = vpack.c.bf16 %v22386_v52, %v22387_v13  ;;  %v22400_v52 = vld [vmem:[#allocation30_spill] sm:$0xff]  ;;  %v22401_v13 = vld [vmem:[#allocation36_spill] sm:$0xff] }
 0x35b   : > { %15317 = vmatprep.mubr.msk.bf16.mxu0 %vm3060_vm0, %v22371_v23 }
 0x362   : > { %15318 = vmatmul.mubr.msk.bf16.gmra.mrb[12].mxu0 %vm3060_vm0, %v22372_v10  ;;  %v22389_v10 = vld [vmem:[#allocation20_spill] sm:$0xff] }
 0x363   : > { %15321 = vmatprep.mubr.msk.bf16.mxu0 %vm3060_vm0, %v22373_v33  ;;  %v22390_v33 = vld [vmem:[#allocation21_spill] sm:$0xff] }
 0x364   : > { %v22391_v50 = vpack.c.bf16 %v22389_v10, %v22390_v33  ;;  %v16581_v10 = vld [vmem:[%s22163_s5 + $0x10] sm:$0xff]  }
 0x365   : > { %15419 = vmatprep.subr.bf16.mxu1 %v16581_v10 }
 0x366   : > { %15420 = vmatpush3.bf16.msra.mxu1 %v16581_v10 }
 0x36a   : > { %15322 = vmatmul.mubr.msk.bf16.gmra.mrb[16].mxu0 %vm3060_vm0, %v22376_v45  ;;  %v22392_v45 = vld [vmem:[#allocation22_spill] sm:$0xff] }
 0x36b   : > { %15325 = vmatprep.mubr.msk.bf16.mxu0 %vm3060_vm0, %v22379_v43  ;;  %v22394_v18 = vpack.c.bf16 %v22392_v45, %v22393_v28  ;;  %v22395_v43 = vpack.c.bf16 %v18308_v35, %v18315_v31  ;;  %v22402_v35 = vld [vmem:[#allocation37_spill] sm:$0xff]  ;;  %v22403_v31 = vld [vmem:[#allocation42_spill] sm:$0xff]  ;;  %v4478_v45 = vld [vmem:[#allocation2 + $0x1d0] sm:$0xff] }
 0x36c   : > { %v4506_v28 = vpack.c.bf16 %v4478_v45, %v3988_v44 }
 0x372   : > { %15326 = vmatmul.mubr.msk.bf16.gmra.mrb[20].mxu0 %vm3060_vm0, %v22382_v58  ;;  %v22397_v58 = vpack.c.bf16 %v18324_v16, %v18328_v19 }
 0x373   : > { %15329 = vmatprep.mubr.msk.bf16.mxu0 %vm3060_vm0, %v22385_v41  ;;  %v4498_v41 = vpack.c.bf16 %v22399_v40, %v22398_v37 }
 0x379   : > { %v18853_v22 = vpop.f32.mrb[32].mxu1 }
 0x37a   : > { %v18855_v32 = vpop.f32.mrb[33].mxu1  ;;  %15330 = vmatmul.mubr.msk.bf16.gmra.mrb[24].mxu0 %vm3060_vm0, %v22388_v17  ;;  %v4499_v17 = vpack.c.bf16 %v22401_v13, %v22400_v52 }
 0x37b   : > { %v18861_v23 = vpop.f32.mrb[34].mxu1  ;;  %15333 = vmatprep.mubr.msk.bf16.mxu0 %vm3060_vm0, %v22391_v50 }
 0x37c   : > { %v18867_v5 = vpop.f32.mrb[35].mxu1 }
 0x382   : > { %15334 = vmatmul.mubr.msk.bf16.gmra.mrb[28].mxu0 %vm3060_vm0, %v22394_v18 }
 0x383   : > { %15337 = vmatprep.mubr.msk.bf16.mxu0 %vm3060_vm0, %v22395_v43 }
 0x38a   : > { %15338 = vmatmul.mubr.msk.bf16.gmra.mrb[32].mxu0 %vm3060_vm0, %v22397_v58 }
 0x38b   : > { %15341 = vmatprep.mubr.msk.bf16.mxu0 %vm3060_vm0, %v4497_v8 }
 0x392   : > { %15342 = vmatmul.mubr.msk.bf16.gmra.mrb[36].mxu0 %vm3060_vm0, %v4498_v41 }
 0x393   : > { %15345 = vmatprep.mubr.msk.bf16.mxu0 %vm3060_vm0, %v4499_v17 }
 0x39a   : > { %15346 = vmatmul.mubr.msk.bf16.gmra.mrb[40].mxu0 %vm3060_vm0, %v22402_v35 }
 0x39b   : > { %15349 = vmatprep.mubr.msk.bf16.mxu0 %vm3060_vm0, %v22403_v31 }
 0x3a1   : > { %v18893_v16 = vpop.f32.mrb[36].mxu1 }
 0x3a2   : > { %v18895_v19 = vpop.f32.mrb[37].mxu1  ;;  %15350 = vmatmul.mubr.msk.bf16.gmra.mrb[44].mxu0 %vm3060_vm0, %v22404_v51 }
 0x3a3   : > { %v18902_v33 = vpop.f32.mrb[38].mxu1  ;;  %15353 = vmatprep.mubr.msk.bf16.mxu0 %vm3060_vm0, %v18606_v9 }
 0x3a4   : > { %v18906_v50 = vpop.f32.mrb[39].mxu1 }
 0x3aa   : > { %15354 = vmatmul.mubr.msk.bf16.gmra.mrb[48].mxu0 %vm3060_vm0, %v18622_v30 }
 0x3ab   : > { %15357 = vmatprep.mubr.msk.bf16.mxu0 %vm3060_vm0, %v18687_v56  ;;  %v22406_v56 = vpack.c.bf16 %v22400_v52, %v22399_v40 }
 0x3b2   : > { %15358 = vmatmul.mubr.msk.bf16.gmra.mrb[52].mxu0 %vm3060_vm0, %v4506_v28 }
 0x3b3   : > { %15363 = vmatprep.mubr.msk.bf16.mxu0 %vm3060_vm0, %v18638_v3  ;;  %v22405_v3 = vpack.c.bf16 %v22398_v37, %v22396_v11 }
 0x3b9   : > { %v18915_v18 = vpop.f32.mrb[40].mxu1 }
 0x3ba   : > { %v18917_v9 = vpop.f32.mrb[41].mxu1  ;;  %15364 = vmatmul.mubr.msk.bf16.vlgmr.msra.gmra.mrb[0].mxu0 %vm3060_vm0, %v18647_v1  ;;  %v4953_v1 = vld [vmem:[#allocation2 + $0x160] sm:$0xff] }
 0x3bb   : > { %v18921_v43 = vpop.f32.mrb[42].mxu1  ;;  %15367 = vmatprep.mubr.msk.bf16.mxu0 %vm3060_vm0, %v18670_v53  ;;  %v4954_v53 = vld [vmem:[#allocation2 + $0x168] sm:$0xff] }
 0x3bc   : > { %v18925_v30 = vpop.f32.mrb[43].mxu1 }
 0x3c2   : > { %15368 = vmatmul.mubr.msk.bf16.gmra.mrb[4].mxu0 %vm3060_vm0, %v18672_v24  ;;  %v4989_v24 = vpack.c.bf16 %v4954_v53, %v4953_v1 }
 0x3c3   : > { %15371 = vmatprep.mubr.msk.bf16.mxu0 %vm3060_vm0, %v18692_v47  ;;  %v4955_v47 = vld [vmem:[#allocation2 + $0x170] sm:$0xff] }
 0x3ca   : > { %15372 = vmatmul.mubr.msk.bf16.gmra.mrb[8].mxu0 %vm3060_vm0, %v18694_v0  ;;  %v4956_v0 = vld [vmem:[#allocation2 + $0x178] sm:$0xff] }
 0x3cb   : > { %15375 = vmatprep.mubr.msk.bf16.mxu0 %vm3060_vm0, %v18702_v6  ;;  %v4990_v6 = vpack.c.bf16 %v4956_v0, %v4955_v47 }
 0x3d2   : > { %15376 = vmatmul.mubr.msk.bf16.gmra.mrb[12].mxu0 %vm3060_vm0, %v18704_v61  ;;  %v4968_v61 = vld [vmem:[#allocation2 + $0x1d8] sm:$0xff] }
 0x3d3   : > { %15379 = vmatprep.mubr.msk.bf16.mxu0 %vm3060_vm0, %v18711_v46  ;;  %v4996_v46 = vpack.c.bf16 %v4968_v61, %v4478_v45 }
 0x3da   : > { %15380 = vmatmul.mubr.msk.bf16.gmra.mrb[16].mxu0 %vm3060_vm0, %v18713_v39 }
 0x3db   : > { %15383 = vmatprep.mubr.msk.bf16.mxu0 %vm3060_vm0, %v18719_v34 }
 0x3e2   : > { %15384 = vmatmul.mubr.msk.bf16.gmra.mrb[20].mxu0 %vm3060_vm0, %v18723_v59 }
 0x3e3   : > { %15387 = vmatprep.mubr.msk.bf16.mxu0 %vm3060_vm0, %v18735_v63 }
 0x3ea   : > { %15388 = vmatmul.mubr.msk.bf16.gmra.mrb[24].mxu0 %vm3060_vm0, %v18737_v38 }
 0x3eb   : > { %15391 = vmatprep.mubr.msk.bf16.mxu0 %vm3060_vm0, %v18743_v26 }
 0x3f2   : > { %15392 = vmatmul.mubr.msk.bf16.gmra.mrb[28].mxu0 %vm3060_vm0, %v18746_v29 }
 0x3f3   : > { %15395 = vmatprep.mubr.msk.bf16.mxu0 %vm3060_vm0, %v18754_v21 }
 0x3fa   : > { %15396 = vmatmul.mubr.msk.bf16.gmra.mrb[32].mxu0 %vm3060_vm0, %v18757_v20 }
 0x3fb   : > { %15399 = vmatprep.mubr.msk.bf16.mxu0 %vm3060_vm0, %v22405_v3 }
 0x402   : > { %15400 = vmatmul.mubr.msk.bf16.gmra.mrb[36].mxu0 %vm3060_vm0, %v22406_v56 }
 0x403   : > { %15403 = vmatprep.mubr.msk.bf16.mxu0 %vm3060_vm0, %v4989_v24 }
 0x40a   : > { %15404 = vmatmul.mubr.msk.bf16.gmra.mrb[40].mxu0 %vm3060_vm0, %v4990_v6 }
 0x40b   : > { %15407 = vmatprep.mubr.msk.bf16.mxu0 %vm3060_vm0, %v18550_v25  ;;  %v16582_v25 = vld [vmem:[%s22163_s5 + $0x18] sm:$0xff]  }
 0x40c   : > { %15421 = vmatprep.subr.bf16.mxu1 %v16582_v25 }
 0x40d   : > { %15422 = vmatpush3.bf16.msra.mxu1 %v16582_v25 }
 0x412   : > { %15408 = vmatmul.mubr.msk.bf16.gmra.mrb[44].mxu0 %vm3060_vm0, %v18561_v55  ;;  %v18984_v55 = vld [vmem:[%s22163_s5] sm:$0xff]  }
 0x413   : > { %15411 = vmatprep.mubr.msk.bf16.mxu0 %vm3060_vm0, %v18608_v42  ;;  %15447 = vmatprep.subr.bf16.mxu1 %v18984_v55  ;;  %v18990_v42 = vld [vmem:[%s22162_s4] ss:$0 sm:$0xff] }
 0x41a   : > { %15412 = vmatmul.mubr.msk.bf16.gmra.mrb[48].mxu0 %vm3060_vm0, %v18625_v12 }
 0x41b   : > { %15415 = vmatprep.mubr.msk.bf16.mxu0 %vm3060_vm0, %v18788_v57 }
 0x422   : > { %15416 = vmatmul.mubr.msk.bf16.gmra.mrb[52].mxu0 %vm3060_vm0, %v4996_v46 }
 0x48d   : > { %v15365_v12 = vpop.f32.mrb[0].mxu0 }
 0x48e   : > { %v5412_v39 = vadd.f32 %v15365_v12, %v18990_v42  ;;  %v5124_v34 = vpop.f32.mrb[1].mxu0 }
 0x48f   : > { %v5410_v59 = vadd.f32 %v18990_v42, %v5124_v34  ;;  %v15366_v29 = vpop.f32.mrb[2].mxu0 }
 0x490   : > { %v5468_v63 = vmax.f32 %v5412_v39, 0.0  ;;  %v5413_v38 = vadd.f32 %v15366_v29, %v18990_v42  ;;  %v5127_v26 = vpop.f32.mrb[3].mxu0 }
 0x491   : > { %v5466_v21 = vmax.f32 %v5410_v59, 0.0  ;;  %v5411_v20 = vadd.f32 %v18990_v42, %v5127_v26 }
 0x492   : > { %5525 = vst.msk [vmem:[#allocation3 + $0x10] sm:$0xff] %vm5522_vm1, %v5468_v63  ;;  %v5469_v44 = vmax.f32 %v5413_v38, 0.0 }
 0x493   : > { %5523 = vst.msk [vmem:[#allocation3] sm:$0xff] %vm5522_vm1, %v5466_v21  ;;  %v5467_v57 = vmax.f32 %v5411_v20, 0.0 }
 0x494   : > { %5526 = vst.msk [vmem:[#allocation3 + $0x18] sm:$0xff] %vm5522_vm1, %v5469_v44 }
 0x495   : > { %5524 = vst.msk [vmem:[#allocation3 + $0x8] sm:$0xff] %vm5522_vm1, %v5467_v57  ;;  %v15369_v11 = vpop.f32.mrb[4].mxu0  ;;  %v22407_v57 = vld [vmem:[#allocation24_spill] sm:$0xff] }
 0x496   : > { %v5416_v8 = vadd.f32 %v15369_v11, %v18990_v42  ;;  %v5140_v58 = vpop.f32.mrb[5].mxu0 }
 0x497   : > { %v5414_v37 = vadd.f32 %v18990_v42, %v5140_v58  ;;  %v15370_v40 = vpop.f32.mrb[6].mxu0  ;;  %v22408_v58 = vld [vmem:[#allocation25_spill] sm:$0xff] }
 0x498   : > { %v5472_v41 = vmax.f32 %v5416_v8, 0.0  ;;  %v5417_v52 = vadd.f32 %v15370_v40, %v18990_v42  ;;  %v5143_v13 = vpop.f32.mrb[7].mxu0 }
 0x499   : > { %v5470_v17 = vmax.f32 %v5414_v37, 0.0  ;;  %v5415_v35 = vadd.f32 %v18990_v42, %v5143_v13  ;;  %v5583_v51 = vld [vmem:[#allocation3 + $0x10] sm:$0xff] }
 0x49a   : > { %5529 = vst.msk [vmem:[#allocation3 + $0x30] sm:$0xff] %vm5522_vm1, %v5472_v41  ;;  %v5473_v31 = vmax.f32 %v5417_v52, 0.0  ;;  %v5579_v28 = vld [vmem:[#allocation3] sm:$0xff] }
 0x49b   : > { %v5584_v10 = vld [vmem:[#allocation3 + $0x18] sm:$0xff]  ;;  %5527 = vst.msk [vmem:[#allocation3 + $0x20] sm:$0xff] %vm5522_vm1, %v5470_v17  ;;  %v5471_v45 = vmax.f32 %v5415_v35, 0.0  ;;  %v22409_v52 = vld [vmem:[#allocation26_spill] sm:$0xff] }
 0x49c   : > { %v5585_v3 = vmax.f32 %v5583_v51, %v5584_v10  ;;  %v5580_v1 = vld [vmem:[#allocation3 + $0x8] sm:$0xff]  ;;  %5530 = vst.msk [vmem:[#allocation3 + $0x38] sm:$0xff] %vm5522_vm1, %v5473_v31 }
 0x49d   : > { %v5581_v53 = vmax.f32 %v5579_v28, %v5580_v1  ;;  %5528 = vst.msk [vmem:[#allocation3 + $0x28] sm:$0xff] %vm5522_vm1, %v5471_v45  ;;  %v15373_v24 = vpop.f32.mrb[8].mxu0  ;;  %v22410_v31 = vld [vmem:[#allocation27_spill] sm:$0xff] }
 0x49e   : > { %5586 = vst.msk [vmem:[#allocation4 + $0x8] sm:$0xff] %vm5522_vm1, %v5585_v3  ;;  %v5420_v56 = vadd.f32 %v15373_v24, %v18990_v42  ;;  %v5156_v47 = vpop.f32.mrb[9].mxu0 }
 0x49f   : > { %5582 = vst.msk [vmem:[#allocation4] sm:$0xff] %vm5522_vm1, %v5581_v53  ;;  %v5418_v0 = vadd.f32 %v18990_v42, %v5156_v47  ;;  %v15374_v6 = vpop.f32.mrb[10].mxu0 }
 0x4a0   : > { %v5476_v61 = vmax.f32 %v5420_v56, 0.0  ;;  %v5421_v46 = vadd.f32 %v15374_v6, %v18990_v42  ;;  %v5159_v25 = vpop.f32.mrb[11].mxu0 }
 0x4a1   : > { %v5474_v12 = vmax.f32 %v5418_v0, 0.0  ;;  %v5419_v39 = vadd.f32 %v18990_v42, %v5159_v25  ;;  %v5591_v59 = vld [vmem:[#allocation3 + $0x30] sm:$0xff] }
 0x4a2   : > { %5533 = vst.msk [vmem:[#allocation3 + $0x50] sm:$0xff] %vm5522_vm1, %v5476_v61  ;;  %v5477_v34 = vmax.f32 %v5421_v46, 0.0  ;;  %v5587_v38 = vld [vmem:[#allocation3 + $0x20] sm:$0xff] }
 0x4a3   : > { %v5592_v29 = vld [vmem:[#allocation3 + $0x38] sm:$0xff]  ;;  %5531 = vst.msk [vmem:[#allocation3 + $0x40] sm:$0xff] %vm5522_vm1, %v5474_v12  ;;  %v5475_v63 = vmax.f32 %v5419_v39, 0.0  ;;  %v22411_v12 = vld [vmem:[#allocation32_spill] sm:$0xff] }
 0x4a4   : > { %v5593_v26 = vmax.f32 %v5591_v59, %v5592_v29  ;;  %v5588_v21 = vld [vmem:[#allocation3 + $0x28] sm:$0xff]  ;;  %5534 = vst.msk [vmem:[#allocation3 + $0x58] sm:$0xff] %vm5522_vm1, %v5477_v34 }
 0x4a5   : > { %v5589_v20 = vmax.f32 %v5587_v38, %v5588_v21  ;;  %5532 = vst.msk [vmem:[#allocation3 + $0x48] sm:$0xff] %vm5522_vm1, %v5475_v63  ;;  %v15377_v44 = vpop.f32.mrb[12].mxu0  ;;  %v19033_v59 = vld [vmem:[#allocation4 + $0x8] sm:$0xff]  ;;  %v22412_v63 = vld [vmem:[#allocation33_spill] sm:$0xff] }
 0x4a6   : > { %5594 = vst.msk [vmem:[#allocation4 + $0x18] sm:$0xff] %vm5522_vm1, %v5593_v26  ;;  %v16085_v11 = vadd.f32 %v15377_v44, %v22407_v57  ;;  %v5172_v8 = vpop.f32.mrb[13].mxu0  ;;  %v22413_v57 = vld [vmem:[#allocation34_spill] sm:$0xff] }
 0x4a7   : > { %5590 = vst.msk [vmem:[#allocation4 + $0x10] sm:$0xff] %vm5522_vm1, %v5589_v20  ;;  %v16086_v37 = vadd.f32 %v5172_v8, %v22408_v58  ;;  %v15378_v40 = vpop.f32.mrb[14].mxu0 }
 0x4a8   : > { %v5424_v41 = vadd.f32 %v16085_v11, %v18990_v42  ;;  %v16087_v13 = vadd.f32 %v15378_v40, %v22409_v52  ;;  %v5175_v17 = vpop.f32.mrb[15].mxu0 }
 0x4a9   : > { %v5422_v35 = vadd.f32 %v16086_v37, %v18990_v42  ;;  %v16088_v51 = vadd.f32 %v5175_v17, %v22410_v31  ;;  %v5599_v28 = vld [vmem:[#allocation3 + $0x50] sm:$0xff]  ;;  %v22414_v37 = vld [vmem:[#allocation35_spill] sm:$0xff] }
 0x4aa   : > { %v5480_v10 = vmax.f32 %v5424_v41, 0.0  ;;  %v5425_v45 = vadd.f32 %v16087_v13, %v18990_v42  ;;  %v5595_v24 = vld [vmem:[#allocation3 + $0x40] sm:$0xff] }
 0x4ab   : > { %v5600_v3 = vld [vmem:[#allocation3 + $0x58] sm:$0xff]  ;;  %v5478_v1 = vmax.f32 %v5422_v35, 0.0  ;;  %v5423_v53 = vadd.f32 %v16088_v51, %v18990_v42 }
 0x4ac   : > { %v5601_v56 = vmax.f32 %v5599_v28, %v5600_v3  ;;  %v5596_v47 = vld [vmem:[#allocation3 + $0x48] sm:$0xff]  ;;  %5537 = vst.msk [vmem:[#allocation3 + $0x70] sm:$0xff] %vm5522_vm1, %v5480_v10  ;;  %v5481_v0 = vmax.f32 %v5425_v45, 0.0 }
 0x4ad   : > { %v5597_v6 = vmax.f32 %v5595_v24, %v5596_v47  ;;  %5535 = vst.msk [vmem:[#allocation3 + $0x60] sm:$0xff] %vm5522_vm1, %v5478_v1  ;;  %v5479_v61 = vmax.f32 %v5423_v53, 0.0  ;;  %v15381_v46 = vpop.f32.mrb[16].mxu0  ;;  %v5694_v25 = vld [vmem:[#allocation4 + $0x18] sm:$0xff] }
 0x4ae   : > { %5602 = vst.msk [vmem:[#allocation4 + $0x28] sm:$0xff] %vm5522_vm1, %v5601_v56  ;;  %5538 = vst.msk [vmem:[#allocation3 + $0x78] sm:$0xff] %vm5522_vm1, %v5481_v0  ;;  %v16089_v39 = vadd.f32 %v15381_v46, %v22411_v12  ;;  %v5188_v34 = vpop.f32.mrb[17].mxu0  ;;  %v5693_v29 = vld [vmem:[#allocation4 + $0x10] sm:$0xff]  ;;  %v22415_v56 = vld [vmem:[#allocation38_spill] sm:$0xff] }
 0x4af   : > { %5598 = vst.msk [vmem:[#allocation4 + $0x20] sm:$0xff] %vm5522_vm1, %v5597_v6  ;;  %5536 = vst.msk [vmem:[#allocation3 + $0x68] sm:$0xff] %vm5522_vm1, %v5479_v61  ;;  %v16090_v38 = vadd.f32 %v5188_v34, %v22412_v63  ;;  %v15382_v26 = vpop.f32.mrb[18].mxu0  ;;  %v19038_v21 = vpack.c.bf16 %v5694_v25, %v5693_v29  ;;  %v5732_v20 = vpack.c.bf16 %v5693_v29, %v19033_v59  ;;  %v22416_v46 = vld [vmem:[#allocation39_spill] sm:$0xff] }
 0x4b0   : > { %v5428_v44 = vadd.f32 %v16089_v39, %v18990_v42  ;;  %v16091_v11 = vadd.f32 %v15382_v26, %v22413_v57  ;;  %v5191_v8 = vpop.f32.mrb[19].mxu0  ;;  %v16584_v34 = vld [vmem:[%s22163_s5 + $0x8] sm:$0xff]  }
 0x4b1   : > { %v5426_v58 = vadd.f32 %v16090_v38, %v18990_v42  ;;  %v16092_v40 = vadd.f32 %v5191_v8, %v22414_v37  ;;  %15423 = vmatprep.mubr.msk.bf16.mxu1 %vm5522_vm1, %v5732_v20  ;;  %v22417_v38 = vld [vmem:[#allocation40_spill] sm:$0xff] }
 0x4b2   : > { %v5484_v41 = vmax.f32 %v5428_v44, 0.0  ;;  %v5429_v52 = vadd.f32 %v16091_v11, %v18990_v42  ;;  %v22418_v44 = vld [vmem:[#allocation41_spill] sm:$0xff] }
 0x4b3   : > { %v5482_v13 = vmax.f32 %v5426_v58, 0.0  ;;  %v5427_v17 = vadd.f32 %v16092_v40, %v18990_v42  ;;  %v5607_v31 = vld [vmem:[#allocation3 + $0x70] sm:$0xff]  ;;  %v19075_v40 = vld [vmem:[%s22163_s5 + $0x20] sm:$0xff]  }
 0x4b4   : > { %5541 = vst.msk [vmem:[#allocation3 + $0x90] sm:$0xff] %vm5522_vm1, %v5484_v41  ;;  %v5485_v35 = vmax.f32 %v5429_v52, 0.0  ;;  %v5603_v3 = vld [vmem:[#allocation3 + $0x60] sm:$0xff] }
 0x4b5   : > { %v5608_v51 = vld [vmem:[#allocation3 + $0x78] sm:$0xff]  ;;  %5539 = vst.msk [vmem:[#allocation3 + $0x80] sm:$0xff] %vm5522_vm1, %v5482_v13  ;;  %v5483_v10 = vmax.f32 %v5427_v17, 0.0  ;;  %v15385_v45 = vpop.f32.mrb[20].mxu0  ;;  %v5696_v28 = vld [vmem:[#allocation4 + $0x28] sm:$0xff] }
 0x4b6   : > { %v5609_v1 = vmax.f32 %v5607_v31, %v5608_v51  ;;  %v5604_v53 = vld [vmem:[#allocation3 + $0x68] sm:$0xff]  ;;  %5542 = vst.msk [vmem:[#allocation3 + $0x98] sm:$0xff] %vm5522_vm1, %v5485_v35  ;;  %v5695_v24 = vld [vmem:[#allocation4 + $0x20] sm:$0xff]  ;;  %v16093_v47 = vadd.f32 %v15385_v45, %v22415_v56  ;;  %v5204_v0 = vpop.f32.mrb[21].mxu0 }
 0x4b7   : > { %v5605_v6 = vmax.f32 %v5603_v3, %v5604_v53  ;;  %5540 = vst.msk [vmem:[#allocation3 + $0x88] sm:$0xff] %vm5522_vm1, %v5483_v10  ;;  %v19053_v61 = vpack.c.bf16 %v5695_v24, %v5694_v25  ;;  %v16094_v12 = vadd.f32 %v5204_v0, %v22416_v46  ;;  %v15386_v39 = vpop.f32.mrb[22].mxu0  ;;  %v19059_v29 = vpack.c.bf16 %v5696_v28, %v5695_v24  ;;  %v22419_v10 = vld [vmem:[#allocation44_spill] sm:$0xff]  ;;  %v22420_v53 = vld [vmem:[#allocation45_spill] sm:$0xff] }
 0x4b8   : > { %5610 = vst.msk [vmem:[#allocation4 + $0x38] sm:$0xff] %vm5522_vm1, %v5609_v1  ;;  %v5432_v63 = vadd.f32 %v16093_v47, %v18990_v42  ;;  %v16095_v26 = vadd.f32 %v15386_v39, %v22417_v38  ;;  %v5207_v20 = vpop.f32.mrb[23].mxu0 }
 0x4b9   : > { %5606 = vst.msk [vmem:[#allocation4 + $0x30] sm:$0xff] %vm5522_vm1, %v5605_v6  ;;  %v5430_v25 = vadd.f32 %v16094_v12, %v18990_v42  ;;  %v16096_v57 = vadd.f32 %v5207_v20, %v22418_v44  ;;  %15424 = vmatmul.mubr.msk.bf16.vlgmr.msra.gmra.mrb[44].mxu1 %vm5522_vm1, %v19053_v61  ;;  %v22421_v6 = vld [vmem:[#allocation46_spill] sm:$0xff] }
 0x4ba   : > { %v5488_v11 = vmax.f32 %v5432_v63, 0.0  ;;  %v5433_v8 = vadd.f32 %v16095_v26, %v18990_v42  ;;  %15448 = vmatpush3.bf16.msra.mxu1 %v18984_v55  ;;  %v22422_v63 = vld [vmem:[#allocation47_spill] sm:$0xff] }
 0x4bb   : > { %v5486_v58 = vmax.f32 %v5430_v25, 0.0  ;;  %v5431_v37 = vadd.f32 %v16096_v57, %v18990_v42  ;;  %15449 = vmatprep.subr.bf16.mxu1 %v16584_v34  ;;  %v5615_v52 = vld [vmem:[#allocation3 + $0x90] sm:$0xff] }
 0x4bc   : > { %5545 = vst.msk [vmem:[#allocation3 + $0xb0] sm:$0xff] %vm5522_vm1, %v5488_v11  ;;  %v5489_v41 = vmax.f32 %v5433_v8, 0.0  ;;  %v5611_v31 = vld [vmem:[#allocation3 + $0x80] sm:$0xff] }
 0x4bd   : > { %v5616_v13 = vld [vmem:[#allocation3 + $0x98] sm:$0xff]  ;;  %5543 = vst.msk [vmem:[#allocation3 + $0xa0] sm:$0xff] %vm5522_vm1, %v5486_v58  ;;  %v5487_v17 = vmax.f32 %v5431_v37, 0.0  ;;  %v15389_v35 = vpop.f32.mrb[24].mxu0 }
 0x4be   : > { %v5617_v55 = vmax.f32 %v5615_v52, %v5616_v13  ;;  %v5612_v51 = vld [vmem:[#allocation3 + $0x88] sm:$0xff]  ;;  %5546 = vst.msk [vmem:[#allocation3 + $0xb8] sm:$0xff] %vm5522_vm1, %v5489_v41  ;;  %v16097_v45 = vadd.f32 %v15389_v35, %v22419_v10  ;;  %v5220_v3 = vpop.f32.mrb[25].mxu0  ;;  %15450 = vmatpush3.bf16.msra.mxu1 %v16584_v34 }
 0x4bf   : > { %v5613_v1 = vmax.f32 %v5611_v31, %v5612_v51  ;;  %5544 = vst.msk [vmem:[#allocation3 + $0xa8] sm:$0xff] %vm5522_vm1, %v5487_v17  ;;  %v16098_v24 = vadd.f32 %v5220_v3, %v22420_v53  ;;  %v15390_v56 = vpop.f32.mrb[26].mxu0  ;;  %v5698_v47 = vld [vmem:[#allocation4 + $0x38] sm:$0xff]  ;;  %15475 = vmatprep.subr.bf16.mxu1 %v19075_v40 }
 0x4c0   : > { %5618 = vst.msk [vmem:[#allocation4 + $0x48] sm:$0xff] %vm5522_vm1, %v5617_v55  ;;  %v5436_v0 = vadd.f32 %v16097_v45, %v18990_v42  ;;  %v16099_v46 = vadd.f32 %v15390_v56, %v22421_v6  ;;  %v5223_v12 = vpop.f32.mrb[27].mxu0  ;;  %v5697_v39 = vld [vmem:[#allocation4 + $0x30] sm:$0xff] }
 0x4c1   : > { %5614 = vst.msk [vmem:[#allocation4 + $0x40] sm:$0xff] %vm5522_vm1, %v5613_v1  ;;  %v5434_v34 = vadd.f32 %v16098_v24, %v18990_v42  ;;  %v16100_v38 = vadd.f32 %v5223_v12, %v22422_v63  ;;  %v19090_v26 = vpack.c.bf16 %v5697_v39, %v5696_v28  ;;  %v19092_v20 = vpack.c.bf16 %v5698_v47, %v5697_v39 }
 0x4c2   : > { %v5492_v25 = vmax.f32 %v5436_v0, 0.0  ;;  %v5437_v44 = vadd.f32 %v16099_v46, %v18990_v42 }
 0x4c3   : > { %v5490_v57 = vmax.f32 %v5434_v34, 0.0  ;;  %v5435_v11 = vadd.f32 %v16100_v38, %v18990_v42  ;;  %15427 = vmatprep.mubr.msk.bf16.mxu1 %vm5522_vm1, %v19090_v26  ;;  %v5623_v58 = vld [vmem:[#allocation3 + $0xb0] sm:$0xff] }
 0x4c4   : > { %5549 = vst.msk [vmem:[#allocation3 + $0xd0] sm:$0xff] %vm5522_vm1, %v5492_v25  ;;  %v5493_v8 = vmax.f32 %v5437_v44, 0.0  ;;  %v5619_v52 = vld [vmem:[#allocation3 + $0xa0] sm:$0xff] }
 0x4c5   : > { %v5624_v37 = vld [vmem:[#allocation3 + $0xb8] sm:$0xff]  ;;  %5547 = vst.msk [vmem:[#allocation3 + $0xc0] sm:$0xff] %vm5522_vm1, %v5490_v57  ;;  %v5491_v28 = vmax.f32 %v5435_v11, 0.0  ;;  %v15393_v41 = vpop.f32.mrb[28].mxu0 }
 0x4c6   : > { %v5625_v13 = vmax.f32 %v5623_v58, %v5624_v37  ;;  %v5620_v17 = vld [vmem:[#allocation3 + $0xa8] sm:$0xff]  ;;  %5550 = vst.msk [vmem:[#allocation3 + $0xd8] sm:$0xff] %vm5522_vm1, %v5493_v8  ;;  %v16101_v35 = vadd.f32 %v15393_v41, %v18645_v48  ;;  %v5236_v31 = vpop.f32.mrb[29].mxu0 }
 0x4c7   : > { %v5621_v55 = vmax.f32 %v5619_v52, %v5620_v17  ;;  %5548 = vst.msk [vmem:[#allocation3 + $0xc8] sm:$0xff] %vm5522_vm1, %v5491_v28  ;;  %v16102_v51 = vadd.f32 %v5236_v31, %v18649_v27  ;;  %v15394_v10 = vpop.f32.mrb[30].mxu0  ;;  %v5700_v45 = vld [vmem:[#allocation4 + $0x48] sm:$0xff]  ;;  %v22423_v52 = vld [vmem:[#allocation48_spill] sm:$0xff]  ;;  %v22424_v31 = vld [vmem:[#allocation49_spill] sm:$0xff] }
 0x4c8   : > { %5626 = vst.msk [vmem:[#allocation4 + $0x58] sm:$0xff] %vm5522_vm1, %v5625_v13  ;;  %v5440_v3 = vadd.f32 %v16101_v35, %v18990_v42  ;;  %v16103_v1 = vadd.f32 %v15394_v10, %v18655_v7  ;;  %v5239_v53 = vpop.f32.mrb[31].mxu0  ;;  %v5699_v24 = vld [vmem:[#allocation4 + $0x40] sm:$0xff] }
 0x4c9   : > { %5622 = vst.msk [vmem:[#allocation4 + $0x50] sm:$0xff] %vm5522_vm1, %v5621_v55  ;;  %v5438_v48 = vadd.f32 %v16102_v51, %v18990_v42  ;;  %v16104_v56 = vadd.f32 %v5239_v53, %v18663_v2  ;;  %v19110_v0 = vpack.c.bf16 %v5699_v24, %v5698_v47  ;;  %v19112_v6 = vpack.c.bf16 %v5700_v45, %v5699_v24 }
 0x4ca   : > { %v5496_v27 = vmax.f32 %v5440_v3, 0.0  ;;  %v5441_v46 = vadd.f32 %v16103_v1, %v18990_v42 }
 0x4cb   : > { %v5494_v12 = vmax.f32 %v5438_v48, 0.0  ;;  %v5439_v39 = vadd.f32 %v16104_v56, %v18990_v42  ;;  %15428 = vmatmul.mubr.msk.bf16.gmra.mrb[48].mxu1 %vm5522_vm1, %v19110_v0  ;;  %v5631_v34 = vld [vmem:[#allocation3 + $0xd0] sm:$0xff] }
 0x4cc   : > { %5553 = vst.msk [vmem:[#allocation3 + $0xf0] sm:$0xff] %vm5522_vm1, %v5496_v27  ;;  %v5497_v7 = vmax.f32 %v5441_v46, 0.0  ;;  %v5627_v38 = vld [vmem:[#allocation3 + $0xc0] sm:$0xff] }
 0x4cd   : > { %v5632_v63 = vld [vmem:[#allocation3 + $0xd8] sm:$0xff]  ;;  %5551 = vst.msk [vmem:[#allocation3 + $0xe0] sm:$0xff] %vm5522_vm1, %v5494_v12  ;;  %v5495_v2 = vmax.f32 %v5439_v39, 0.0  ;;  %v15397_v47 = vpop.f32.mrb[32].mxu0 }
 0x4ce   : > { %v5633_v25 = vmax.f32 %v5631_v34, %v5632_v63  ;;  %v5628_v44 = vld [vmem:[#allocation3 + $0xc8] sm:$0xff]  ;;  %5554 = vst.msk [vmem:[#allocation3 + $0xf8] sm:$0xff] %vm5522_vm1, %v5497_v7  ;;  %v16105_v57 = vadd.f32 %v15397_v47, %v18721_v62  ;;  %v5252_v11 = vpop.f32.mrb[33].mxu0 }
 0x4cf   : > { %v5629_v8 = vmax.f32 %v5627_v38, %v5628_v44  ;;  %5552 = vst.msk [vmem:[#allocation3 + $0xe8] sm:$0xff] %vm5522_vm1, %v5495_v2  ;;  %v16106_v58 = vadd.f32 %v5252_v11, %v18725_v4  ;;  %v15398_v37 = vpop.f32.mrb[34].mxu0  ;;  %v5702_v28 = vld [vmem:[#allocation4 + $0x58] sm:$0xff]  ;;  %v22425_v44 = vld [vmem:[#allocation50_spill] sm:$0xff] }
 0x4d0   : > { %5634 = vst.msk [vmem:[#allocation4 + $0x68] sm:$0xff] %vm5522_vm1, %v5633_v25  ;;  %v5444_v41 = vadd.f32 %v16105_v57, %v18990_v42  ;;  %v16107_v13 = vadd.f32 %v15398_v37, %v22423_v52  ;;  %v5255_v17 = vpop.f32.mrb[35].mxu0  ;;  %v5701_v35 = vld [vmem:[#allocation4 + $0x50] sm:$0xff] }
 0x4d1   : > { %5630 = vst.msk [vmem:[#allocation4 + $0x60] sm:$0xff] %vm5522_vm1, %v5629_v8  ;;  %v5442_v62 = vadd.f32 %v16106_v58, %v18990_v42  ;;  %v16108_v55 = vadd.f32 %v5255_v17, %v22424_v31  ;;  %v19130_v51 = vpack.c.bf16 %v5701_v35, %v5700_v45  ;;  %v19132_v10 = vpack.c.bf16 %v5702_v28, %v5701_v35  ;;  %v22426_v58 = vld [vmem:[#allocation51_spill] sm:$0xff] }
 0x4d2   : > { %v5500_v4 = vmax.f32 %v5444_v41, 0.0  ;;  %v5445_v3 = vadd.f32 %v16107_v13, %v18990_v42 }
 0x4d3   : > { %v5498_v1 = vmax.f32 %v5442_v62, 0.0  ;;  %v5443_v53 = vadd.f32 %v16108_v55, %v18990_v42  ;;  %15431 = vmatprep.mubr.msk.bf16.mxu1 %vm5522_vm1, %v19130_v51  ;;  %v5639_v48 = vld [vmem:[#allocation3 + $0xf0] sm:$0xff] }
 0x4d4   : > { %5557 = vst.msk [vmem:[#allocation3 + $0x110] sm:$0xff] %vm5522_vm1, %v5500_v4  ;;  %v5501_v24 = vmax.f32 %v5445_v3, 0.0  ;;  %v5635_v46 = vld [vmem:[#allocation3 + $0xe0] sm:$0xff] }
 0x4d5   : > { %v5640_v56 = vld [vmem:[#allocation3 + $0xf8] sm:$0xff]  ;;  %5555 = vst.msk [vmem:[#allocation3 + $0x100] sm:$0xff] %vm5522_vm1, %v5498_v1  ;;  %v5499_v45 = vmax.f32 %v5443_v53, 0.0  ;;  %v15401_v27 = vpop.f32.mrb[36].mxu0 }
 0x4d6   : > { %v5641_v12 = vmax.f32 %v5639_v48, %v5640_v56  ;;  %v5636_v39 = vld [vmem:[#allocation3 + $0xe8] sm:$0xff]  ;;  %5558 = vst.msk [vmem:[#allocation3 + $0x118] sm:$0xff] %vm5522_vm1, %v5501_v24  ;;  %v16109_v7 = vadd.f32 %v15401_v27, %v18767_v14  ;;  %v5268_v34 = vpop.f32.mrb[37].mxu0 }
 0x4d7   : > { %v5637_v63 = vmax.f32 %v5635_v46, %v5636_v39  ;;  %5556 = vst.msk [vmem:[#allocation3 + $0x108] sm:$0xff] %vm5522_vm1, %v5499_v45  ;;  %v16110_v2 = vadd.f32 %v5268_v34, %v18769_v49  ;;  %v15402_v47 = vpop.f32.mrb[38].mxu0  ;;  %v5704_v38 = vld [vmem:[#allocation4 + $0x68] sm:$0xff] }
 0x4d8   : > { %5642 = vst.msk [vmem:[#allocation4 + $0x78] sm:$0xff] %vm5522_vm1, %v5641_v12  ;;  %v5448_v25 = vadd.f32 %v16109_v7, %v18990_v42  ;;  %v16111_v57 = vadd.f32 %v15402_v47, %v22425_v44  ;;  %v5271_v11 = vpop.f32.mrb[39].mxu0  ;;  %v5703_v8 = vld [vmem:[#allocation4 + $0x60] sm:$0xff] }
 0x4d9   : > { %5638 = vst.msk [vmem:[#allocation4 + $0x70] sm:$0xff] %vm5522_vm1, %v5637_v63  ;;  %v5446_v14 = vadd.f32 %v16110_v2, %v18990_v42  ;;  %v16112_v37 = vadd.f32 %v5271_v11, %v22426_v58  ;;  %v19150_v41 = vpack.c.bf16 %v5703_v8, %v5702_v28  ;;  %v19152_v52 = vpack.c.bf16 %v5704_v38, %v5703_v8 }
 0x4da   : > { %v5504_v49 = vmax.f32 %v5448_v25, 0.0  ;;  %v5449_v13 = vadd.f32 %v16111_v57, %v18990_v42 }
 0x4db   : > { %v5502_v17 = vmax.f32 %v5446_v14, 0.0  ;;  %v5447_v35 = vadd.f32 %v16112_v37, %v18990_v42  ;;  %15432 = vmatmul.mubr.msk.bf16.gmra.mrb[52].mxu1 %vm5522_vm1, %v19150_v41  ;;  %v5647_v31 = vld [vmem:[#allocation3 + $0x110] sm:$0xff] }
 0x4dc   : > { %5561 = vst.msk [vmem:[#allocation3 + $0x130] sm:$0xff] %vm5522_vm1, %v5504_v49  ;;  %v5505_v62 = vmax.f32 %v5449_v13, 0.0  ;;  %v5643_v3 = vld [vmem:[#allocation3 + $0x100] sm:$0xff] }
 0x4dd   : > { %v5648_v55 = vld [vmem:[#allocation3 + $0x118] sm:$0xff]  ;;  %5559 = vst.msk [vmem:[#allocation3 + $0x120] sm:$0xff] %vm5522_vm1, %v5502_v17  ;;  %v5503_v28 = vmax.f32 %v5447_v35, 0.0  ;;  %v15405_v4 = vpop.f32.mrb[40].mxu0 }
 0x4de   : > { %v5649_v1 = vmax.f32 %v5647_v31, %v5648_v55  ;;  %v5644_v53 = vld [vmem:[#allocation3 + $0x108] sm:$0xff]  ;;  %5562 = vst.msk [vmem:[#allocation3 + $0x138] sm:$0xff] %vm5522_vm1, %v5505_v62  ;;  %v16113_v24 = vadd.f32 %v15405_v4, %v18805_v60  ;;  %v5284_v48 = vpop.f32.mrb[41].mxu0 }
 0x4df   : > { %v5645_v56 = vmax.f32 %v5643_v3, %v5644_v53  ;;  %5560 = vst.msk [vmem:[#allocation3 + $0x128] sm:$0xff] %vm5522_vm1, %v5503_v28  ;;  %v16114_v45 = vadd.f32 %v5284_v48, %v18807_v54  ;;  %v15406_v27 = vpop.f32.mrb[42].mxu0  ;;  %v5706_v46 = vld [vmem:[#allocation4 + $0x78] sm:$0xff] }
 0x4e0   : > { %5650 = vst.msk [vmem:[#allocation4 + $0x88] sm:$0xff] %vm5522_vm1, %v5649_v1  ;;  %v5452_v12 = vadd.f32 %v16113_v24, %v18990_v42  ;;  %v16115_v39 = vadd.f32 %v15406_v27, %v18813_v36  ;;  %v5287_v7 = vpop.f32.mrb[43].mxu0  ;;  %v5705_v34 = vld [vmem:[#allocation4 + $0x70] sm:$0xff] }
 0x4e1   : > { %5646 = vst.msk [vmem:[#allocation4 + $0x80] sm:$0xff] %vm5522_vm1, %v5645_v56  ;;  %v5450_v60 = vadd.f32 %v16114_v45, %v18990_v42  ;;  %v16116_v63 = vadd.f32 %v5287_v7, %v18819_v15  ;;  %v19170_v2 = vpack.c.bf16 %v5705_v34, %v5704_v38  ;;  %v19172_v47 = vpack.c.bf16 %v5706_v46, %v5705_v34 }
 0x4e2   : > { %v5508_v54 = vmax.f32 %v5452_v12, 0.0  ;;  %v5453_v25 = vadd.f32 %v16115_v39, %v18990_v42 }
 0x4e3   : > { %v5506_v44 = vmax.f32 %v5450_v60, 0.0  ;;  %v5451_v57 = vadd.f32 %v16116_v63, %v18990_v42  ;;  %15435 = vmatprep.mubr.msk.bf16.mxu1 %vm5522_vm1, %v19170_v2  ;;  %v5655_v11 = vld [vmem:[#allocation3 + $0x130] sm:$0xff] }
 0x4e4   : > { %5565 = vst.msk [vmem:[#allocation3 + $0x150] sm:$0xff] %vm5522_vm1, %v5508_v54  ;;  %v5509_v36 = vmax.f32 %v5453_v25, 0.0  ;;  %v5651_v14 = vld [vmem:[#allocation3 + $0x120] sm:$0xff] }
 0x4e5   : > { %v5656_v8 = vld [vmem:[#allocation3 + $0x138] sm:$0xff]  ;;  %5563 = vst.msk [vmem:[#allocation3 + $0x140] sm:$0xff] %vm5522_vm1, %v5506_v44  ;;  %v5507_v15 = vmax.f32 %v5451_v57, 0.0  ;;  %v15409_v38 = vpop.f32.mrb[44].mxu0 }
 0x4e6   : > { %v5657_v58 = vmax.f32 %v5655_v11, %v5656_v8  ;;  %v5652_v37 = vld [vmem:[#allocation3 + $0x128] sm:$0xff]  ;;  %5566 = vst.msk [vmem:[#allocation3 + $0x158] sm:$0xff] %vm5522_vm1, %v5509_v36  ;;  %v16117_v49 = vadd.f32 %v15409_v38, %v18853_v22  ;;  %v5300_v13 = vpop.f32.mrb[45].mxu0 }
 0x4e7   : > { %v5653_v17 = vmax.f32 %v5651_v14, %v5652_v37  ;;  %5564 = vst.msk [vmem:[#allocation3 + $0x148] sm:$0xff] %vm5522_vm1, %v5507_v15  ;;  %v16118_v35 = vadd.f32 %v5300_v13, %v18855_v32  ;;  %v15410_v62 = vpop.f32.mrb[46].mxu0  ;;  %v19208_v36 = vld [vmem:[#allocation4 + $0x88] sm:$0xff] }
 0x4e8   : > { %5658 = vst.msk [vmem:[#allocation4 + $0x98] sm:$0xff] %vm5522_vm1, %v5657_v58  ;;  %v5456_v31 = vadd.f32 %v16117_v49, %v18990_v42  ;;  %v16119_v55 = vadd.f32 %v15410_v62, %v18861_v23  ;;  %v5303_v28 = vpop.f32.mrb[47].mxu0  ;;  %v19187_v4 = vld [vmem:[#allocation4 + $0x80] sm:$0xff] }
 0x4e9   : > { %5654 = vst.msk [vmem:[#allocation4 + $0x90] sm:$0xff] %vm5522_vm1, %v5653_v17  ;;  %v5454_v22 = vadd.f32 %v16118_v35, %v18990_v42  ;;  %v16120_v3 = vadd.f32 %v5303_v28, %v18867_v5  ;;  %v19193_v1 = vpack.c.bf16 %v19187_v4, %v5706_v46 }
 0x4ea   : > { %v5512_v32 = vmax.f32 %v5456_v31, 0.0  ;;  %v5457_v53 = vadd.f32 %v16119_v55, %v18990_v42 }
 0x4eb   : > { %v5510_v24 = vmax.f32 %v5454_v22, 0.0  ;;  %v5455_v48 = vadd.f32 %v16120_v3, %v18990_v42  ;;  %15436 = vmatmul.mubr.msk.bf16.gmra.mrb[56].mxu1 %vm5522_vm1, %v19193_v1  ;;  %v5663_v56 = vld [vmem:[#allocation3 + $0x150] sm:$0xff] }
 0x4ec   : > { %5569 = vst.msk [vmem:[#allocation3 + $0x170] sm:$0xff] %vm5522_vm1, %v5512_v32  ;;  %v5513_v23 = vmax.f32 %v5457_v53, 0.0  ;;  %v5659_v46 = vld [vmem:[#allocation3 + $0x140] sm:$0xff] }
 0x4ed   : > { %v5664_v45 = vld [vmem:[#allocation3 + $0x158] sm:$0xff]  ;;  %5567 = vst.msk [vmem:[#allocation3 + $0x160] sm:$0xff] %vm5522_vm1, %v5510_v24  ;;  %v5511_v5 = vmax.f32 %v5455_v48, 0.0  ;;  %v15413_v27 = vpop.f32.mrb[48].mxu0 }
 0x4ee   : > { %v5665_v12 = vmax.f32 %v5663_v56, %v5664_v45  ;;  %v5660_v39 = vld [vmem:[#allocation3 + $0x148] sm:$0xff]  ;;  %5570 = vst.msk [vmem:[#allocation3 + $0x178] sm:$0xff] %vm5522_vm1, %v5513_v23  ;;  %v16121_v7 = vadd.f32 %v15413_v27, %v18893_v16  ;;  %v5316_v34 = vpop.f32.mrb[49].mxu0 }
 0x4ef   : > { %v5661_v60 = vmax.f32 %v5659_v46, %v5660_v39  ;;  %5568 = vst.msk [vmem:[#allocation3 + $0x168] sm:$0xff] %vm5522_vm1, %v5511_v5  ;;  %v16122_v63 = vadd.f32 %v5316_v34, %v18895_v19  ;;  %v15414_v54 = vpop.f32.mrb[50].mxu0  ;;  %v5710_v48 = vld [vmem:[#allocation4 + $0x98] sm:$0xff] }
 0x4f0   : > { %5666 = vst.msk [vmem:[#allocation4 + $0xa8] sm:$0xff] %vm5522_vm1, %v5665_v12  ;;  %v5460_v25 = vadd.f32 %v16121_v7, %v18990_v42  ;;  %v16123_v44 = vadd.f32 %v15414_v54, %v18902_v33  ;;  %v5319_v57 = vpop.f32.mrb[51].mxu0  ;;  %v19210_v11 = vld [vmem:[#allocation4 + $0x90] sm:$0xff] }
 0x4f1   : > { %5662 = vst.msk [vmem:[#allocation4 + $0xa0] sm:$0xff] %vm5522_vm1, %v5661_v60  ;;  %v5458_v16 = vadd.f32 %v16122_v63, %v18990_v42  ;;  %v16124_v8 = vadd.f32 %v5319_v57, %v18906_v50  ;;  %v19217_v19 = vpack.c.bf16 %v19210_v11, %v19208_v36 }
 0x4f2   : > { %v5516_v15 = vmax.f32 %v5460_v25, 0.0  ;;  %v5461_v38 = vadd.f32 %v16123_v44, %v18990_v42 }
 0x4f3   : > { %v5514_v14 = vmax.f32 %v5458_v16, 0.0  ;;  %v5459_v33 = vadd.f32 %v16124_v8, %v18990_v42  ;;  %15439 = vmatprep.mubr.msk.bf16.mxu1 %vm5522_vm1, %v19217_v19  ;;  %v5671_v37 = vld [vmem:[#allocation3 + $0x170] sm:$0xff] }
 0x4f4   : > { %5573 = vst.msk [vmem:[#allocation3 + $0x190] sm:$0xff] %vm5522_vm1, %v5516_v15  ;;  %v5517_v58 = vmax.f32 %v5461_v38, 0.0  ;;  %v5667_v17 = vld [vmem:[#allocation3 + $0x160] sm:$0xff] }
 0x4f5   : > { %v5672_v49 = vld [vmem:[#allocation3 + $0x178] sm:$0xff]  ;;  %5571 = vst.msk [vmem:[#allocation3 + $0x180] sm:$0xff] %vm5522_vm1, %v5514_v14  ;;  %v5515_v50 = vmax.f32 %v5459_v33, 0.0  ;;  %v15417_v13 = vpop.f32.mrb[52].mxu0  ;;  %v5691_v14 = vld [vmem:[#allocation4] sm:$0xff] }
 0x4f6   : > { %v5673_v35 = vmax.f32 %v5671_v37, %v5672_v49  ;;  %v5668_v62 = vld [vmem:[#allocation3 + $0x168] sm:$0xff]  ;;  %5574 = vst.msk [vmem:[#allocation3 + $0x198] sm:$0xff] %vm5522_vm1, %v5517_v58  ;;  %v16125_v31 = vadd.f32 %v15417_v13, %v18915_v18  ;;  %v5332_v55 = vpop.f32.mrb[53].mxu0  ;;  %v5715_v49 = vpack.c.bf16 %v19033_v59, %v5691_v14  ;;  %v16587_v59 = vld [vmem:[%s22163_s5 + $0x30] sm:$0xff]   ;;  %v5724_v13 = vpack.c.bf16 %v5710_v48, %v19210_v11 }
 0x4f7   : > { %v5669_v28 = vmax.f32 %v5667_v17, %v5668_v62  ;;  %5572 = vst.msk [vmem:[#allocation3 + $0x188] sm:$0xff] %vm5522_vm1, %v5515_v50  ;;  %v16126_v22 = vadd.f32 %v5332_v55, %v18917_v9  ;;  %v15418_v3 = vpop.f32.mrb[54].mxu0  ;;  %v16586_v50 = vld [vmem:[%s22163_s5 + $0x28] sm:$0xff]  }
 0x4f8   : > { %5674 = vst.msk [vmem:[#allocation4 + $0xb8] sm:$0xff] %vm5522_vm1, %v5673_v35  ;;  %v5464_v32 = vadd.f32 %v16125_v31, %v18990_v42  ;;  %v16127_v53 = vadd.f32 %v15418_v3, %v18921_v43  ;;  %v5335_v24 = vpop.f32.mrb[55].mxu0  ;;  %v5711_v23 = vld [vmem:[#allocation4 + $0xa0] sm:$0xff]  ;;  %v16590_v62 = vld [vmem:[%s22163_s5 + $0x48] sm:$0xff]  }
 0x4f9   : > { %5670 = vst.msk [vmem:[#allocation4 + $0xb0] sm:$0xff] %vm5522_vm1, %v5669_v28  ;;  %v5462_v18 = vadd.f32 %v16126_v22, %v18990_v42  ;;  %v16128_v56 = vadd.f32 %v5335_v24, %v18925_v30  ;;  %v19235_v45 = vpack.c.bf16 %v5711_v23, %v5710_v48  ;;  %v16591_v31 = vld [vmem:[%s22165_s7 + $0x20] sm:$0xff]  }
 0x4fa   : > { %v5520_v5 = vmax.f32 %v5464_v32, 0.0  ;;  %v5465_v9 = vadd.f32 %v16127_v53, %v18990_v42 }
 0x4fb   : > { %v5518_v27 = vmax.f32 %v5462_v18, 0.0  ;;  %v5463_v46 = vadd.f32 %v16128_v56, %v18990_v42  ;;  %15440 = vmatmul.mubr.msk.bf16.gmra.mrb[60].mxu1 %vm5522_vm1, %v19235_v45  ;;  %v5679_v12 = vld [vmem:[#allocation3 + $0x190] sm:$0xff]  ;;  %v5712_v42 = vld [vmem:[#allocation4 + $0xa8] sm:$0xff] }
 0x4fc   : > { %5577 = vst.msk [vmem:[#allocation3 + $0x1b0] sm:$0xff] %vm5522_vm1, %v5520_v5  ;;  %v5521_v43 = vmax.f32 %v5465_v9, 0.0  ;;  %v5675_v30 = vld [vmem:[#allocation3 + $0x180] sm:$0xff]  ;;  %v5725_v17 = vpack.c.bf16 %v5712_v42, %v5711_v23 }
 0x4fd   : > { %v5680_v39 = vld [vmem:[#allocation3 + $0x198] sm:$0xff]  ;;  %5575 = vst.msk [vmem:[#allocation3 + $0x1a0] sm:$0xff] %vm5522_vm1, %v5518_v27  ;;  %v5519_v7 = vmax.f32 %v5463_v46, 0.0 }
 0x4fe   : > { %v5681_v34 = vmax.f32 %v5679_v12, %v5680_v39  ;;  %v5676_v60 = vld [vmem:[#allocation3 + $0x188] sm:$0xff]  ;;  %5578 = vst.msk [vmem:[#allocation3 + $0x1b8] sm:$0xff] %vm5522_vm1, %v5521_v43 }
 0x4ff   : > { %v5677_v63 = vmax.f32 %v5675_v30, %v5676_v60  ;;  %5576 = vst.msk [vmem:[#allocation3 + $0x1a8] sm:$0xff] %vm5522_vm1, %v5519_v7  ;;  %v5714_v33 = vld [vmem:[#allocation4 + $0xb8] sm:$0xff] }
 0x500   : > { %5682 = vst.msk [vmem:[#allocation4 + $0xc8] sm:$0xff] %vm5522_vm1, %v5681_v34  ;;  %v5713_v54 = vld [vmem:[#allocation4 + $0xb0] sm:$0xff] }
 0x501   : > { %5678 = vst.msk [vmem:[#allocation4 + $0xc0] sm:$0xff] %vm5522_vm1, %v5677_v63  ;;  %v19247_v25 = vpack.c.bf16 %v5713_v54, %v5712_v42  ;;  %v5726_v35 = vpack.c.bf16 %v5714_v33, %v5713_v54 }
 0x503   : > { %15443 = vmatprep.mubr.msk.bf16.mxu1 %vm5522_vm1, %v19247_v25  ;;  %v5687_v44 = vld [vmem:[#allocation3 + $0x1b0] sm:$0xff] }
 0x504   : > { %v5683_v16 = vld [vmem:[#allocation3 + $0x1a0] sm:$0xff] }
 0x505   : > { %v5688_v57 = vld [vmem:[#allocation3 + $0x1b8] sm:$0xff] }
 0x506   : > { %v5689_v8 = vmax.f32 %v5687_v44, %v5688_v57  ;;  %v5684_v15 = vld [vmem:[#allocation3 + $0x1a8] sm:$0xff] }
 0x507   : > { %v5685_v38 = vmax.f32 %v5683_v16, %v5684_v15 }
 0x508   : > { %5690 = vst.msk [vmem:[#allocation4 + $0xd8] sm:$0xff] %vm5522_vm1, %v5689_v8  ;;  %v5731_v58 = vld [vmem:[#allocation4 + $0xc0] sm:$0xff] }
 0x509   : > { %5686 = vst.msk [vmem:[#allocation4 + $0xd0] sm:$0xff] %vm5522_vm1, %v5685_v38  ;;  %v5743_v37 = vpack.c.bf16 %v5731_v58, %v5714_v33 }
 0x50b   : > { %15444 = vmatmul.mubr.msk.bf16.gmra.mrb[64].mxu1 %vm5522_vm1, %v5743_v37 }
 0x50c   : > { %15451 = vmatprep.mubr.msk.bf16.mxu1 %vm5522_vm1, %v5715_v49  ;;  %v16596_v49 = vld [vmem:[%s22165_s7 + $0x8] sm:$0xff]  }
 0x513   : > { %15452 = vmatmul.mubr.msk.bf16.vlgmr.msra.gmra.mrb[44].mxu1 %vm5522_vm1, %v19038_v21 }
 0x514   : > { %15476 = vmatpush3.bf16.msra.mxu1 %v19075_v40  ;;  %15455 = vmatprep.mubr.msk.bf16.mxu1 %vm5522_vm1, %v19059_v29  ;;  %v5723_v40 = vpack.c.bf16 %v19208_v36, %v19187_v4  ;;  %v16588_v4 = vld [vmem:[%s22163_s5 + $0x38] sm:$0xff]   ;;  %v16589_v36 = vld [vmem:[%s22163_s5 + $0x40] sm:$0xff]  }
 0x515   : > { %15477 = vmatprep.subr.bf16.mxu1 %v16586_v50 }
 0x518   : > { %15478 = vmatpush3.bf16.msra.mxu1 %v16586_v50 }
 0x519   : > { %15503 = vmatprep.subr.bf16.mxu1 %v16587_v59 }
 0x51b   : > { %15456 = vmatmul.mubr.msk.bf16.gmra.mrb[48].mxu1 %vm5522_vm1, %v19092_v20 }
 0x51c   : > { %15459 = vmatprep.mubr.msk.bf16.mxu1 %vm5522_vm1, %v19112_v6 }
 0x523   : > { %15460 = vmatmul.mubr.msk.bf16.gmra.mrb[52].mxu1 %vm5522_vm1, %v19132_v10 }
 0x524   : > { %15463 = vmatprep.mubr.msk.bf16.mxu1 %vm5522_vm1, %v19152_v52 }
 0x52b   : > { %15464 = vmatmul.mubr.msk.bf16.gmra.mrb[56].mxu1 %vm5522_vm1, %v19172_v47 }
 0x52c   : > { %15467 = vmatprep.mubr.msk.bf16.mxu1 %vm5522_vm1, %v5723_v40 }
 0x533   : > { %15468 = vmatmul.mubr.msk.bf16.gmra.mrb[60].mxu1 %vm5522_vm1, %v5724_v13 }
 0x534   : > { %15471 = vmatprep.mubr.msk.bf16.mxu1 %vm5522_vm1, %v5725_v17 }
 0x53b   : > { %15472 = vmatmul.mubr.msk.bf16.gmra.mrb[64].mxu1 %vm5522_vm1, %v5726_v35 }
 0x53c   : > { %15479 = vmatprep.mubr.msk.bf16.mxu1 %vm5522_vm1, %v19038_v21  ;;  %v6126_v21 = vld [vmem:[#allocation4 + $0xc8] sm:$0xff] }
 0x53d   : > { %v6138_v11 = vpack.c.bf16 %v6126_v21, %v5731_v58 }
 0x543   : > { %15480 = vmatmul.mubr.msk.bf16.vlgmr.msra.gmra.mrb[44].mxu1 %vm5522_vm1, %v19059_v29 }
 0x544   : > { %15504 = vmatpush3.bf16.msra.mxu1 %v16587_v59  ;;  %15483 = vmatprep.mubr.msk.bf16.mxu1 %vm5522_vm1, %v19092_v20 }
 0x545   : > { %15505 = vmatprep.subr.bf16.mxu1 %v16588_v4 }
 0x548   : > { %15506 = vmatpush3.bf16.msra.mxu1 %v16588_v4 }
 0x549   : > { %15531 = vmatprep.subr.bf16.mxu1 %v16589_v36 }
 0x54b   : > { %15484 = vmatmul.mubr.msk.bf16.gmra.mrb[48].mxu1 %vm5522_vm1, %v19112_v6 }
 0x54c   : > { %15487 = vmatprep.mubr.msk.bf16.mxu1 %vm5522_vm1, %v19132_v10 }
 0x553   : > { %15488 = vmatmul.mubr.msk.bf16.gmra.mrb[52].mxu1 %vm5522_vm1, %v19152_v52 }
 0x554   : > { %15491 = vmatprep.mubr.msk.bf16.mxu1 %vm5522_vm1, %v19172_v47 }
 0x55b   : > { %15492 = vmatmul.mubr.msk.bf16.gmra.mrb[56].mxu1 %vm5522_vm1, %v5723_v40 }
 0x55c   : > { %15495 = vmatprep.mubr.msk.bf16.mxu1 %vm5522_vm1, %v5724_v13 }
 0x563   : > { %15496 = vmatmul.mubr.msk.bf16.gmra.mrb[60].mxu1 %vm5522_vm1, %v5725_v17 }
 0x564   : > { %15499 = vmatprep.mubr.msk.bf16.mxu1 %vm5522_vm1, %v5726_v35 }
 0x56b   : > { %15500 = vmatmul.mubr.msk.bf16.gmra.mrb[64].mxu1 %vm5522_vm1, %v6138_v11 }
 0x56c   : > { %15507 = vmatprep.mubr.msk.bf16.mxu1 %vm5522_vm1, %v19053_v61  ;;  %v6368_v61 = vld [vmem:[#allocation4 + $0xd0] sm:$0xff] }
 0x573   : > { %15508 = vmatmul.mubr.msk.bf16.vlgmr.msra.gmra.mrb[44].mxu1 %vm5522_vm1, %v19090_v26  ;;  %v6380_v26 = vpack.c.bf16 %v6368_v61, %v6126_v21  ;;  %v16597_v21 = vld [vmem:[%s22165_s7 + $0x10] sm:$0xff]  }
 0x574   : > { %15532 = vmatpush3.bf16.msra.mxu1 %v16589_v36  ;;  %15511 = vmatprep.mubr.msk.bf16.mxu1 %vm5522_vm1, %v19110_v0  ;;  %v16592_v0 = vld [vmem:[%s22165_s7 + $0x28] sm:$0xff]  }
 0x575   : > { %15533 = vmatprep.subr.bf16.mxu1 %v16590_v62 }
 0x578   : > { %15534 = vmatpush3.bf16.msra.mxu1 %v16590_v62 }
 0x579   : > { %15559 = vmatprep.subr.bf16.mxu1 %v16591_v31 }
 0x57b   : > { %15512 = vmatmul.mubr.msk.bf16.gmra.mrb[48].mxu1 %vm5522_vm1, %v19130_v51  ;;  %v16593_v51 = vld [vmem:[%s22165_s7 + $0x30] sm:$0xff]  }
 0x57c   : > { %15515 = vmatprep.mubr.msk.bf16.mxu1 %vm5522_vm1, %v19150_v41  ;;  %v19373_v41 = vld [vmem:[%s22164_s6] ss:$0 sm:$0xff] }
 0x583   : > { %15516 = vmatmul.mubr.msk.bf16.gmra.mrb[52].mxu1 %vm5522_vm1, %v19170_v2 }
 0x584   : > { %15519 = vmatprep.mubr.msk.bf16.mxu1 %vm5522_vm1, %v19193_v1 }
 0x58b   : > { %15520 = vmatmul.mubr.msk.bf16.gmra.mrb[56].mxu1 %vm5522_vm1, %v19217_v19 }
 0x58c   : > { %15523 = vmatprep.mubr.msk.bf16.mxu1 %vm5522_vm1, %v19235_v45 }
 0x593   : > { %15524 = vmatmul.mubr.msk.bf16.gmra.mrb[60].mxu1 %vm5522_vm1, %v19247_v25 }
 0x594   : > { %15527 = vmatprep.mubr.msk.bf16.mxu1 %vm5522_vm1, %v5743_v37 }
 0x59b   : > { %15528 = vmatmul.mubr.msk.bf16.gmra.mrb[64].mxu1 %vm5522_vm1, %v6380_v26 }
 0x59c   : > { %15535 = vmatprep.mubr.msk.bf16.mxu1 %vm5522_vm1, %v19059_v29  ;;  %v6610_v29 = vld [vmem:[#allocation4 + $0xd8] sm:$0xff] }
 0x5a3   : > { %15536 = vmatmul.mubr.msk.bf16.vlgmr.msra.gmra.mrb[44].mxu1 %vm5522_vm1, %v19092_v20  ;;  %v6622_v20 = vpack.c.bf16 %v6610_v29, %v6368_v61 }
 0x5a4   : > { %15539 = vmatprep.mubr.msk.bf16.mxu1 %vm5522_vm1, %v19112_v6  ;;  %15560 = vmatpush3.bf16.msra.mxu1 %v16591_v31  ;;  %v16594_v6 = vld [vmem:[%s22165_s7 + $0x38] sm:$0xff]  }
 0x5a5   : > { %15561 = vmatprep.subr.bf16.mxu1 %v16592_v0 }
 0x5a8   : > { %15562 = vmatpush3.bf16.msra.mxu1 %v16592_v0 }
 0x5a9   : > { %15563 = vmatprep.subr.bf16.mxu1 %v16593_v51 }
 0x5ab   : > { %15540 = vmatmul.mubr.msk.bf16.gmra.mrb[48].mxu1 %vm5522_vm1, %v19132_v10  ;;  %v19367_v10 = vld [vmem:[%s22165_s7] sm:$0xff]  }
 0x5ac   : > { %15543 = vmatprep.mubr.msk.bf16.mxu1 %vm5522_vm1, %v19152_v52  ;;  %15564 = vmatpush3.bf16.msra.mxu1 %v16593_v51 }
 0x5ad   : > { %15565 = vmatprep.subr.bf16.mxu1 %v16594_v6 }
 0x5b0   : > { %15566 = vmatpush3.bf16.msra.mxu1 %v16594_v6 }
 0x5b1   : > { %15587 = vmatprep.subr.bf16.mxu1 %v19367_v10 }
 0x5b3   : > { %15544 = vmatmul.mubr.msk.bf16.gmra.mrb[52].mxu1 %vm5522_vm1, %v19172_v47 }
 0x5b4   : > { %15547 = vmatprep.mubr.msk.bf16.mxu1 %vm5522_vm1, %v5723_v40 }
 0x5bb   : > { %15548 = vmatmul.mubr.msk.bf16.gmra.mrb[56].mxu1 %vm5522_vm1, %v5724_v13 }
 0x5bc   : > { %15551 = vmatprep.mubr.msk.bf16.mxu1 %vm5522_vm1, %v5725_v17 }
 0x5c3   : > { %15552 = vmatmul.mubr.msk.bf16.gmra.mrb[60].mxu1 %vm5522_vm1, %v5726_v35 }
 0x5c4   : > { %15555 = vmatprep.mubr.msk.bf16.mxu1 %vm5522_vm1, %v6138_v11 }
 0x5cb   : > { %15556 = vmatmul.mubr.msk.bf16.gmra.mrb[64].mxu1 %vm5522_vm1, %v6622_v20 }
 0x676   : > { %v15537_v52 = vpop.f32.mrb[44].mxu1 }
 0x677   : > { %v6838_v2 = vadd.f32 %v15537_v52, %v19373_v41  ;;  %v6710_v47 = vpop.f32.mrb[45].mxu1 }
 0x678   : > { %v6836_v1 = vadd.f32 %v19373_v41, %v6710_v47  ;;  %v15538_v19 = vpop.f32.mrb[46].mxu1 }
 0x679   : > { %v6862_v55 = vmax.f32 %v6838_v2, 0.0  ;;  %v6839_v28 = vadd.f32 %v15538_v19, %v19373_v41  ;;  %v6713_v22 = vpop.f32.mrb[47].mxu1 }
 0x67a   : > { %v6860_v3 = vmax.f32 %v6836_v1, 0.0  ;;  %v6837_v32 = vadd.f32 %v19373_v41, %v6713_v22 }
 0x67b   : > { %6887 = vst.msk [vmem:[#allocation5 + $0x10] sm:$0xff] %vm6884_vm2, %v6862_v55  ;;  %v6863_v53 = vmax.f32 %v6839_v28, 0.0 }
 0x67c   : > { %6885 = vst.msk [vmem:[#allocation5] sm:$0xff] %vm6884_vm2, %v6860_v3  ;;  %v6861_v24 = vmax.f32 %v6837_v32, 0.0  ;;  %v16599_v3 = vld [vmem:[%s22165_s7 + $0x40] sm:$0xff]  }
 0x67d   : > { %6888 = vst.msk [vmem:[#allocation5 + $0x18] sm:$0xff] %vm6884_vm2, %v6863_v53 }
 0x67e   : > { %6886 = vst.msk [vmem:[#allocation5 + $0x8] sm:$0xff] %vm6884_vm2, %v6861_v24  ;;  %v15541_v48 = vpop.f32.mrb[48].mxu1 }
 0x67f   : > { %v6842_v23 = vadd.f32 %v15541_v48, %v19373_v41  ;;  %v6726_v18 = vpop.f32.mrb[49].mxu1 }
 0x680   : > { %v6840_v56 = vadd.f32 %v19373_v41, %v6726_v18  ;;  %v15542_v45 = vpop.f32.mrb[50].mxu1 }
 0x681   : > { %v6866_v5 = vmax.f32 %v6842_v23, 0.0  ;;  %v6843_v9 = vadd.f32 %v15542_v45, %v19373_v41  ;;  %v6729_v27 = vpop.f32.mrb[51].mxu1 }
 0x682   : > { %v6864_v46 = vmax.f32 %v6840_v56, 0.0  ;;  %v6841_v43 = vadd.f32 %v19373_v41, %v6729_v27  ;;  %v19392_v30 = vld [vmem:[#allocation5 + $0x10] sm:$0xff] }
 0x683   : > { %6891 = vst.msk [vmem:[#allocation5 + $0x30] sm:$0xff] %vm6884_vm2, %v6866_v5  ;;  %v6867_v12 = vmax.f32 %v6843_v9, 0.0 }
 0x684   : > { %6889 = vst.msk [vmem:[#allocation5 + $0x20] sm:$0xff] %vm6884_vm2, %v6864_v46  ;;  %v6865_v39 = vmax.f32 %v6841_v43, 0.0  ;;  %v19403_v14 = vld [vmem:[#allocation5 + $0x18] sm:$0xff] }
 0x685   : > { %6892 = vst.msk [vmem:[#allocation5 + $0x38] sm:$0xff] %vm6884_vm2, %v6867_v12  ;;  %v19390_v7 = vld [vmem:[#allocation5 + $0x8] sm:$0xff] }
 0x686   : > { %6890 = vst.msk [vmem:[#allocation5 + $0x28] sm:$0xff] %vm6884_vm2, %v6865_v39  ;;  %v15545_v34 = vpop.f32.mrb[52].mxu1  ;;  %v6948_v60 = vpack.c.bf16 %v19392_v30, %v19390_v7 }
 0x687   : > { %v6846_v63 = vadd.f32 %v15545_v34, %v19373_v41  ;;  %v6742_v42 = vpop.f32.mrb[53].mxu1 }
 0x688   : > { %v6844_v54 = vadd.f32 %v19373_v41, %v6742_v42  ;;  %v15546_v25 = vpop.f32.mrb[54].mxu1  ;;  %15567 = vmatprep.mubr.msk.bf16.mxu1 %vm6884_vm2, %v6948_v60 }
 0x689   : > { %v6870_v44 = vmax.f32 %v6846_v63, 0.0  ;;  %v6847_v57 = vadd.f32 %v15546_v25, %v19373_v41  ;;  %v6745_v16 = vpop.f32.mrb[55].mxu1 }
 0x68a   : > { %v6868_v8 = vmax.f32 %v6844_v54, 0.0  ;;  %v6845_v15 = vadd.f32 %v19373_v41, %v6745_v16  ;;  %v19418_v59 = vld [vmem:[#allocation5 + $0x30] sm:$0xff] }
 0x68b   : > { %6895 = vst.msk [vmem:[#allocation5 + $0x50] sm:$0xff] %vm6884_vm2, %v6870_v44  ;;  %v6871_v38 = vmax.f32 %v6847_v57, 0.0  ;;  %v19405_v33 = vld [vmem:[#allocation5 + $0x20] sm:$0xff] }
 0x68c   : > { %6893 = vst.msk [vmem:[#allocation5 + $0x40] sm:$0xff] %vm6884_vm2, %v6868_v8  ;;  %v19410_v58 = vpack.c.bf16 %v19405_v33, %v19403_v14  ;;  %v6869_v37 = vmax.f32 %v6845_v15, 0.0  ;;  %v19438_v51 = vld [vmem:[#allocation5 + $0x38] sm:$0xff] }
 0x68d   : > { %6896 = vst.msk [vmem:[#allocation5 + $0x58] sm:$0xff] %vm6884_vm2, %v6871_v38  ;;  %v19416_v50 = vld [vmem:[#allocation5 + $0x28] sm:$0xff] }
 0x68e   : > { %6894 = vst.msk [vmem:[#allocation5 + $0x48] sm:$0xff] %vm6884_vm2, %v6869_v37  ;;  %v15549_v40 = vpop.f32.mrb[56].mxu1  ;;  %15568 = vmatmul.mubr.msk.bf16.vlgmr.msra.gmra.mrb[68].mxu1 %vm6884_vm2, %v19410_v58  ;;  %v19425_v13 = vpack.c.bf16 %v19418_v59, %v19416_v50 }
 0x68f   : > { %v6850_v17 = vadd.f32 %v15549_v40, %v19373_v41  ;;  %15588 = vmatpush3.bf16.msra.mxu1 %v19367_v10  ;;  %v6758_v35 = vpop.f32.mrb[57].mxu1  ;;  %v16598_v10 = vld [vmem:[%s22165_s7 + $0x18] sm:$0xff]  }
 0x690   : > { %v6848_v4 = vadd.f32 %v19373_v41, %v6758_v35  ;;  %v15550_v36 = vpop.f32.mrb[58].mxu1  ;;  %15571 = vmatprep.mubr.msk.bf16.mxu1 %vm6884_vm2, %v19425_v13  ;;  %15589 = vmatprep.subr.bf16.mxu1 %v16596_v49 }
 0x691   : > { %v6874_v11 = vmax.f32 %v6850_v17, 0.0  ;;  %v6851_v62 = vadd.f32 %v15550_v36, %v19373_v41  ;;  %v6761_v31 = vpop.f32.mrb[59].mxu1  ;;  %v6909_v36 = vld [vmem:[#allocation5] sm:$0xff] }
 0x692   : > { %v6872_v61 = vmax.f32 %v6848_v4, 0.0  ;;  %v6849_v26 = vadd.f32 %v19373_v41, %v6761_v31  ;;  %v19453_v2 = vld [vmem:[#allocation5 + $0x50] sm:$0xff]  ;;  %v19518_v31 = vpack.c.bf16 %v19416_v50, %v19405_v33  ;;  %v16603_v50 = vld [vmem:[%s22165_s7 + $0x60] sm:$0xff]  }
 0x693   : > { %6899 = vst.msk [vmem:[#allocation5 + $0x70] sm:$0xff] %vm6884_vm2, %v6874_v11  ;;  %v6875_v0 = vmax.f32 %v6851_v62, 0.0  ;;  %v19440_v29 = vld [vmem:[#allocation5 + $0x40] sm:$0xff]  ;;  %15590 = vmatpush3.bf16.msra.mxu1 %v16596_v49  ;;  %v6930_v11 = vpack.c.bf16 %v19403_v14, %v19392_v30  ;;  %v16600_v62 = vld [vmem:[%s22165_s7 + $0x48] sm:$0xff]   ;;  %v19528_v30 = vpack.c.bf16 %v19438_v51, %v19418_v59  ;;  %v16602_v14 = vld [vmem:[%s22165_s7 + $0x58] sm:$0xff]  }
 0x694   : > { %6897 = vst.msk [vmem:[#allocation5 + $0x60] sm:$0xff] %vm6884_vm2, %v6872_v61  ;;  %v6873_v20 = vmax.f32 %v6849_v26, 0.0  ;;  %v19445_v6 = vpack.c.bf16 %v19440_v29, %v19438_v51  ;;  %15591 = vmatprep.subr.bf16.mxu1 %v16597_v21  ;;  %v19472_v56 = vld [vmem:[#allocation5 + $0x58] sm:$0xff] }
 0x695   : > { %6900 = vst.msk [vmem:[#allocation5 + $0x78] sm:$0xff] %vm6884_vm2, %v6875_v0  ;;  %v19451_v52 = vld [vmem:[#allocation5 + $0x48] sm:$0xff]  ;;  %v19546_v59 = vpack.c.bf16 %v19472_v56, %v19453_v2 }
 0x696   : > { %6898 = vst.msk [vmem:[#allocation5 + $0x68] sm:$0xff] %vm6884_vm2, %v6873_v20  ;;  %v15553_v47 = vpop.f32.mrb[60].mxu1  ;;  %15572 = vmatmul.mubr.msk.bf16.gmra.mrb[72].mxu1 %vm6884_vm2, %v19445_v6  ;;  %v19460_v1 = vpack.c.bf16 %v19453_v2, %v19451_v52  ;;  %v19535_v33 = vpack.c.bf16 %v19451_v52, %v19440_v29  ;;  %v16604_v29 = vld [vmem:[%s22165_s7 + $0x68] sm:$0xff]   ;;  %v16605_v20 = vld [vmem:[%s22165_s7 + $0x70] sm:$0xff]   ;;  %v16607_v52 = vld [vmem:[%s22165_s7 + $0x80] sm:$0xff]  }
 0x697   : > { %v6854_v19 = vadd.f32 %v15553_v47, %v19373_v41  ;;  %v6774_v55 = vpop.f32.mrb[61].mxu1  ;;  %15592 = vmatpush3.bf16.msra.mxu1 %v16597_v21  ;;  %v6929_v21 = vpack.c.bf16 %v19390_v7, %v6909_v36  ;;  %v16601_v7 = vld [vmem:[%s22165_s7 + $0x50] sm:$0xff]  }
 0x698   : > { %v6852_v28 = vadd.f32 %v19373_v41, %v6774_v55  ;;  %v15554_v22 = vpop.f32.mrb[62].mxu1  ;;  %15575 = vmatprep.mubr.msk.bf16.mxu1 %vm6884_vm2, %v19460_v1  ;;  %15593 = vmatprep.subr.bf16.mxu1 %v16598_v10  ;;  %v16609_v55 = vld [vmem:[%s22165_s7 + $0x90] sm:$0xff]  }
 0x699   : > { %v6878_v32 = vmax.f32 %v6854_v19, 0.0  ;;  %v6855_v53 = vadd.f32 %v15554_v22, %v19373_v41  ;;  %v6777_v24 = vpop.f32.mrb[63].mxu1  ;;  %v16608_v19 = vld [vmem:[%s22165_s7 + $0x88] sm:$0xff]   ;;  %v16616_v22 = vld [vmem:[%s22167_s9 + $0x94] ss:$8 sps:$4 sm:$0xff]  }
 0x69a   : > { %v6876_v48 = vmax.f32 %v6852_v28, 0.0  ;;  %v6853_v23 = vadd.f32 %v19373_v41, %v6777_v24  ;;  %v6923_v46 = vld [vmem:[#allocation5 + $0x70] sm:$0xff]  ;;  %v16611_v28 = vld [vmem:[%s22167_s9 + $0x80] ss:$8 sps:$4 sm:$0xff]  }
 0x69b   : > { %6903 = vst.msk [vmem:[#allocation5 + $0x90] sm:$0xff] %vm6884_vm2, %v6878_v32  ;;  %v6879_v18 = vmax.f32 %v6855_v53, 0.0  ;;  %v19474_v45 = vld [vmem:[#allocation5 + $0x60] sm:$0xff]  ;;  %15594 = vmatpush3.bf16.msra.mxu1 %v16598_v10  ;;  %v16606_v10 = vld [vmem:[%s22165_s7 + $0x78] sm:$0xff]  }
 0x69c   : > { %6901 = vst.msk [vmem:[#allocation5 + $0x80] sm:$0xff] %vm6884_vm2, %v6876_v48  ;;  %v6877_v5 = vmax.f32 %v6853_v23, 0.0  ;;  %v19479_v9 = vpack.c.bf16 %v19474_v45, %v19472_v56  ;;  %15615 = vmatprep.subr.bf16.mxu1 %v16599_v3  ;;  %v6924_v8 = vld [vmem:[#allocation5 + $0x78] sm:$0xff]  ;;  %v16619_v32 = vld [vmem:[%s22167_s9 + $0xa4] ss:$8 sps:$4 sm:$0xff]  }
 0x69d   : > { %6904 = vst.msk [vmem:[#allocation5 + $0x98] sm:$0xff] %vm6884_vm2, %v6879_v18  ;;  %v6922_v27 = vld [vmem:[#allocation5 + $0x68] sm:$0xff]  ;;  %v19555_v26 = vpack.c.bf16 %v6924_v8, %v6923_v46  ;;  %v16622_v24 = vld [vmem:[%s22167_s9 + $0xb4] ss:$8 sps:$4 sm:$0xff]   ;;  %v16620_v48 = vld [vmem:[%s22167_s9 + $0xb0] ss:$8 sps:$4 sm:$0xff]  }
 0x69e   : > { %6902 = vst.msk [vmem:[#allocation5 + $0x88] sm:$0xff] %vm6884_vm2, %v6877_v5  ;;  %v15557_v43 = vpop.f32.mrb[64].mxu1  ;;  %15576 = vmatmul.mubr.msk.bf16.gmra.mrb[76].mxu1 %vm6884_vm2, %v19479_v9  ;;  %v19485_v12 = vpack.c.bf16 %v6923_v46, %v6922_v27  ;;  %v19549_v61 = vpack.c.bf16 %v6922_v27, %v19474_v45  ;;  %v16617_v53 = vld [vmem:[%s22167_s9 + $0xa0] ss:$8 sps:$4 sm:$0xff]   ;;  %v16625_v23 = vld [vmem:[%s22167_s9 + $0xc4] ss:$8 sps:$4 sm:$0xff]  }
 0x69f   : > { %v6858_v39 = vadd.f32 %v15557_v43, %v19373_v41  ;;  %v6790_v34 = vpop.f32.mrb[65].mxu1  ;;  %v16623_v18 = vld [vmem:[%s22167_s9 + $0xc0] ss:$8 sps:$4 sm:$0xff]   ;;  %v22427_v5 = vmov 0   ;;  %v16626_v27 = vld [vmem:[%s22167_s9 + $0xd0] ss:$8 sps:$4 sm:$0xff]  }
 0x6a0   : > { %v6856_v60 = vadd.f32 %v19373_v41, %v6790_v34  ;;  %v15558_v63 = vpop.f32.mrb[66].mxu1  ;;  %15579 = vmatprep.mubr.msk.bf16.mxu1 %vm6884_vm2, %v19485_v12  ;;  %v16631_v46 = vld [vmem:[%s22167_s9 + $0xe4] ss:$8 sps:$4 sm:$0xff]   ;;  %v16629_v43 = vld [vmem:[%s22167_s9 + $0xe0] ss:$8 sps:$4 sm:$0xff]  }
 0x6a1   : > { %v6882_v42 = vmax.f32 %v6858_v39, 0.0  ;;  %v6859_v54 = vadd.f32 %v15558_v63, %v19373_v41  ;;  %v6793_v25 = vpop.f32.mrb[67].mxu1  ;;  %v16632_v39 = vld [vmem:[%s22167_s9 + $0xf0] ss:$8 sps:$4 sm:$0xff]   ;;  %v16637_v34 = vld [vmem:[%s22167_s9 + $0x4] ss:$8 sps:$4 sm:$0xff]  }
 0x6a2   : > { %v6880_v44 = vmax.f32 %v6856_v60, 0.0  ;;  %v6857_v57 = vadd.f32 %v19373_v41, %v6793_v25  ;;  %v6927_v40 = vld [vmem:[#allocation5 + $0x90] sm:$0xff]  ;;  %v19698_v60 = vld [vmem:[%s22166_s8] ss:$0 sm:$0xff] }
 0x6a3   : > { %6907 = vst.msk [vmem:[#allocation5 + $0xb0] sm:$0xff] %vm6884_vm2, %v6882_v42  ;;  %v6883_v16 = vmax.f32 %v6859_v54, 0.0  ;;  %v6925_v15 = vld [vmem:[#allocation5 + $0x80] sm:$0xff] }
 0x6a4   : > { %6905 = vst.msk [vmem:[#allocation5 + $0xa0] sm:$0xff] %vm6884_vm2, %v6880_v44  ;;  %v6881_v38 = vmax.f32 %v6857_v57, 0.0  ;;  %v19495_v37 = vpack.c.bf16 %v6925_v15, %v6924_v8  ;;  %v6928_v17 = vld [vmem:[#allocation5 + $0x98] sm:$0xff] }
 0x6a5   : > { %6908 = vst.msk [vmem:[#allocation5 + $0xb8] sm:$0xff] %vm6884_vm2, %v6883_v16  ;;  %v6926_v49 = vld [vmem:[#allocation5 + $0x88] sm:$0xff]  ;;  %v19563_v51 = vpack.c.bf16 %v6928_v17, %v6927_v40 }
 0x6a6   : > { %6906 = vst.msk [vmem:[#allocation5 + $0xa8] sm:$0xff] %vm6884_vm2, %v6881_v38  ;;  %15580 = vmatmul.mubr.msk.bf16.gmra.mrb[80].mxu1 %vm6884_vm2, %v19495_v37  ;;  %v19501_v41 = vpack.c.bf16 %v6927_v40, %v6926_v49  ;;  %v19557_v0 = vpack.c.bf16 %v6926_v49, %v6925_v15 }
 0x6a8   : > { %15583 = vmatprep.mubr.msk.bf16.mxu1 %vm6884_vm2, %v19501_v41 }
 0x6ab   : > { %v6947_v35 = vld [vmem:[#allocation5 + $0xa0] sm:$0xff] }
 0x6ac   : > { %v19505_v4 = vpack.c.bf16 %v6947_v35, %v6928_v17  ;;  %v7772_v56 = vld [vmem:[#allocation5 + $0xb8] sm:$0xff] }
 0x6ad   : > { %v7320_v2 = vld [vmem:[#allocation5 + $0xa8] sm:$0xff] }
 0x6ae   : > { %15584 = vmatmul.mubr.msk.bf16.gmra.mrb[84].mxu1 %vm6884_vm2, %v19505_v4  ;;  %v7330_v47 = vpack.c.bf16 %v7320_v2, %v6947_v35 }
 0x6af   : > { %15595 = vmatprep.mubr.msk.bf16.mxu1 %vm6884_vm2, %v6929_v21 }
 0x6b6   : > { %15596 = vmatmul.mubr.msk.bf16.vlgmr.msra.gmra.mrb[68].mxu1 %vm6884_vm2, %v6930_v11 }
 0x6b7   : > { %15616 = vmatpush3.bf16.msra.mxu1 %v16599_v3  ;;  %15599 = vmatprep.mubr.msk.bf16.mxu1 %vm6884_vm2, %v19518_v31  ;;  %v16614_v3 = vld [vmem:[%s22167_s9 + $0x90] ss:$8 sps:$4 sm:$0xff]  }
 0x6b8   : > { %15617 = vmatprep.subr.bf16.mxu1 %v16600_v62 }
 0x6bb   : > { %15618 = vmatpush3.bf16.msra.mxu1 %v16600_v62 }
 0x6bc   : > { %15619 = vmatprep.subr.bf16.mxu1 %v16601_v7 }
 0x6be   : > { %15600 = vmatmul.mubr.msk.bf16.gmra.mrb[72].mxu1 %vm6884_vm2, %v19528_v30 }
 0x6bf   : > { %15603 = vmatprep.mubr.msk.bf16.mxu1 %vm6884_vm2, %v19535_v33  ;;  %15620 = vmatpush3.bf16.msra.mxu1 %v16601_v7 }
 0x6c0   : > { %15621 = vmatprep.subr.bf16.mxu1 %v16602_v14 }
 0x6c3   : > { %15622 = vmatpush3.bf16.msra.mxu1 %v16602_v14 }
 0x6c4   : > { %15643 = vmatprep.subr.bf16.mxu1 %v16603_v50 }
 0x6c6   : > { %15604 = vmatmul.mubr.msk.bf16.gmra.mrb[76].mxu1 %vm6884_vm2, %v19546_v59 }
 0x6c7   : > { %15607 = vmatprep.mubr.msk.bf16.mxu1 %vm6884_vm2, %v19549_v61 }
 0x6ce   : > { %15608 = vmatmul.mubr.msk.bf16.gmra.mrb[80].mxu1 %vm6884_vm2, %v19555_v26 }
 0x6cf   : > { %15611 = vmatprep.mubr.msk.bf16.mxu1 %vm6884_vm2, %v19557_v0 }
 0x6d6   : > { %15612 = vmatmul.mubr.msk.bf16.gmra.mrb[84].mxu1 %vm6884_vm2, %v19563_v51 }
 0x6d7   : > { %15623 = vmatprep.mubr.msk.bf16.mxu1 %vm6884_vm2, %v6930_v11 }
 0x6de   : > { %15624 = vmatmul.mubr.msk.bf16.vlgmr.msra.gmra.mrb[68].mxu1 %vm6884_vm2, %v19518_v31 }
 0x6df   : > { %15644 = vmatpush3.bf16.msra.mxu1 %v16603_v50  ;;  %15627 = vmatprep.mubr.msk.bf16.mxu1 %vm6884_vm2, %v19528_v30 }
 0x6e0   : > { %15645 = vmatprep.subr.bf16.mxu1 %v16604_v29 }
 0x6e3   : > { %15646 = vmatpush3.bf16.msra.mxu1 %v16604_v29  ;;  %v16635_v29 = vld [vmem:[%s22167_s9] ss:$8 sps:$4 sm:$0xff]  }
 0x6e4   : > { %15647 = vmatprep.subr.bf16.mxu1 %v16605_v20 }
 0x6e6   : > { %15628 = vmatmul.mubr.msk.bf16.gmra.mrb[72].mxu1 %vm6884_vm2, %v19535_v33 }
 0x6e7   : > { %15631 = vmatprep.mubr.msk.bf16.mxu1 %vm6884_vm2, %v19546_v59  ;;  %15648 = vmatpush3.bf16.msra.mxu1 %v16605_v20 }
 0x6e8   : > { %15649 = vmatprep.subr.bf16.mxu1 %v16606_v10 }
 0x6eb   : > { %15650 = vmatpush3.bf16.msra.mxu1 %v16606_v10 }
 0x6ec   : > { %15671 = vmatprep.subr.bf16.mxu1 %v16607_v52 }
 0x6ee   : > { %15632 = vmatmul.mubr.msk.bf16.gmra.mrb[76].mxu1 %vm6884_vm2, %v19549_v61 }
 0x6ef   : > { %15635 = vmatprep.mubr.msk.bf16.mxu1 %vm6884_vm2, %v19555_v26 }
 0x6f6   : > { %15636 = vmatmul.mubr.msk.bf16.gmra.mrb[80].mxu1 %vm6884_vm2, %v19557_v0 }
 0x6f7   : > { %15639 = vmatprep.mubr.msk.bf16.mxu1 %vm6884_vm2, %v19563_v51 }
 0x6fe   : > { %15640 = vmatmul.mubr.msk.bf16.gmra.mrb[84].mxu1 %vm6884_vm2, %v7330_v47 }
 0x6ff   : > { %15651 = vmatprep.mubr.msk.bf16.mxu1 %vm6884_vm2, %v19410_v58  ;;  %v16610_v58 = vld [vmem:[%s22165_s7 + $0x98] sm:$0xff]  }
 0x706   : > { %15652 = vmatmul.mubr.msk.bf16.vlgmr.msra.gmra.mrb[68].mxu1 %vm6884_vm2, %v19425_v13  ;;  %v16613_v13 = vld [vmem:[%s22167_s9 + $0x84] ss:$8 sps:$4 sm:$0xff]  }
 0x707   : > { %15672 = vmatpush3.bf16.msra.mxu1 %v16607_v52  ;;  %15655 = vmatprep.mubr.msk.bf16.mxu1 %vm6884_vm2, %v19445_v6  ;;  %v7546_v6 = vld [vmem:[#allocation5 + $0xb0] sm:$0xff] }
 0x708   : > { %15673 = vmatprep.subr.bf16.mxu1 %v16608_v19  ;;  %v7782_v45 = vpack.c.bf16 %v7772_v56, %v7546_v6 }
 0x70b   : > { %15674 = vmatpush3.bf16.msra.mxu1 %v16608_v19 }
 0x70c   : > { %15675 = vmatprep.subr.bf16.mxu1 %v16609_v55 }
 0x70e   : > { %15656 = vmatmul.mubr.msk.bf16.gmra.mrb[72].mxu1 %vm6884_vm2, %v19460_v1  ;;  %v7556_v1 = vpack.c.bf16 %v7546_v6, %v7320_v2  ;;  %v16640_v2 = vld [vmem:[%s22167_s9 + $0x14] ss:$8 sps:$4 sm:$0xff]  }
 0x70f   : > { %15659 = vmatprep.mubr.msk.bf16.mxu1 %vm6884_vm2, %v19479_v9  ;;  %15676 = vmatpush3.bf16.msra.mxu1 %v16609_v55  ;;  %v16628_v9 = vld [vmem:[%s22167_s9 + $0xd4] ss:$8 sps:$4 sm:$0xff]  }
 0x710   : > { %15677 = vmatprep.subr.bf16.mxu1 %v16610_v58 }
 0x713   : > { %15678 = vmatpush3.bf16.msra.mxu1 %v16610_v58 }
 0x714   : > { %8212 = vmatprep.subr.bf16.mxu1 %v16613_v13 }
 0x716   : > { %15660 = vmatmul.mubr.msk.bf16.gmra.mrb[76].mxu1 %vm6884_vm2, %v19485_v12  ;;  %v16634_v12 = vld [vmem:[%s22167_s9 + $0xf4] ss:$8 sps:$4 sm:$0xff]  }
 0x717   : > { %15663 = vmatprep.mubr.msk.bf16.mxu1 %vm6884_vm2, %v19495_v37 }
 0x71e   : > { %15664 = vmatmul.mubr.msk.bf16.gmra.mrb[80].mxu1 %vm6884_vm2, %v19501_v41 }
 0x71f   : > { %15667 = vmatprep.mubr.msk.bf16.mxu1 %vm6884_vm2, %v19505_v4 }
 0x726   : > { %15668 = vmatmul.mubr.msk.bf16.gmra.mrb[84].mxu1 %vm6884_vm2, %v7556_v1  ;;  %v16638_v1 = vld [vmem:[%s22167_s9 + $0x10] ss:$8 sps:$4 sm:$0xff]  }
 0x727   : > { %15679 = vmatprep.mubr.msk.bf16.mxu1 %vm6884_vm2, %v19518_v31 }
 0x72e   : > { %15680 = vmatmul.mubr.msk.bf16.vlgmr.msra.gmra.mrb[68].mxu1 %vm6884_vm2, %v19528_v30 }
 0x72f   : > { %15683 = vmatprep.mubr.msk.bf16.mxu1 %vm6884_vm2, %v19535_v33  ;;  %8213 = vmatpush1.bf16.msra.mxu1 %v16611_v28 }
 0x730   : > { %8214 = vmatprep.subr.bf16.mxu1 %v16616_v22 }
 0x733   : > { %8215 = vmatpush1.bf16.msra.mxu1 %v16614_v3  ;;  %v16643_v3 = vld [vmem:[%s22167_s9 + $0x24] ss:$8 sps:$4 sm:$0xff]  }
 0x734   : > { %8216 = vmatprep.subr.bf16.mxu1 %v16619_v32 }
 0x736   : > { %15684 = vmatmul.mubr.msk.bf16.gmra.mrb[72].mxu1 %vm6884_vm2, %v19546_v59 }
 0x737   : > { %15687 = vmatprep.mubr.msk.bf16.mxu1 %vm6884_vm2, %v19549_v61  ;;  %8217 = vmatpush1.bf16.msra.mxu1 %v16617_v53 }
 0x738   : > { %8218 = vmatprep.subr.bf16.mxu1 %v16622_v24 }
 0x73b   : > { %8219 = vmatpush1.bf16.msra.mxu1 %v16620_v48 }
 0x73c   : > { %8220 = vmatprep.subr.bf16.mxu1 %v16625_v23 }
 0x73e   : > { %15688 = vmatmul.mubr.msk.bf16.gmra.mrb[76].mxu1 %vm6884_vm2, %v19555_v26 }
 0x73f   : > { %15691 = vmatprep.mubr.msk.bf16.mxu1 %vm6884_vm2, %v19557_v0  ;;  %8221 = vmatpush1.bf16.msra.mxu1 %v16623_v18  ;;  %v16641_v18 = vld [vmem:[%s22167_s9 + $0x20] ss:$8 sps:$4 sm:$0xff]  }
 0x740   : > { %8222 = vmatprep.subr.bf16.mxu1 %v16628_v9 }
 0x743   : > { %8223 = vmatpush1.bf16.msra.mxu1 %v16626_v27  ;;  %v16646_v27 = vld [vmem:[%s22167_s9 + $0x34] ss:$8 sps:$4 sm:$0xff]  }
 0x744   : > { %8224 = vmatprep.subr.bf16.mxu1 %v16631_v46 }
 0x746   : > { %15692 = vmatmul.mubr.msk.bf16.gmra.mrb[80].mxu1 %vm6884_vm2, %v19563_v51 }
 0x747   : > { %15695 = vmatprep.mubr.msk.bf16.mxu1 %vm6884_vm2, %v7330_v47  ;;  %8225 = vmatpush1.bf16.msra.mxu1 %v16629_v43 }
 0x748   : > { %8226 = vmatprep.subr.bf16.mxu1 %v16634_v12 }
 0x74b   : > { %8227 = vmatpush1.bf16.msra.mxu1 %v16632_v39 }
 0x74c   : > { %8355 = vmatprep.subr.bf16.mxu1 %v16637_v34 }
 0x74e   : > { %15696 = vmatmul.mubr.msk.bf16.gmra.mrb[84].mxu1 %vm6884_vm2, %v7782_v45 }
 0x74f   : > { %8244 = vmatprep.mubr.bf16.mxu1 %v22427_v5 }
 0x801   : > { %v15681_v63 = vpop.f32.mrb[68].mxu1 }
 0x802   : > { %v7988_v42 = vadd.f32 %v15681_v63, %v19698_v60  ;;  %v7880_v54 = vpop.f32.mrb[69].mxu1 }
 0x803   : > { %v7986_v25 = vadd.f32 %v19698_v60, %v7880_v54  ;;  %v15682_v44 = vpop.f32.mrb[70].mxu1 }
 0x804   : > { %v7989_v57 = vadd.f32 %v15682_v44, %v19698_v60  ;;  %v7883_v16 = vpop.f32.mrb[71].mxu1  ;;  %v8008_v15 = vmax.f32 %v7988_v42, 0.0  ;;  %v16644_v42 = vld [vmem:[%s22167_s9 + $0x30] ss:$8 sps:$4 sm:$0xff]   ;;  %v16649_v44 = vld [vmem:[%s22167_s9 + $0x44] ss:$8 sps:$4 sm:$0xff]  }
 0x805   : > { %v7987_v8 = vadd.f32 %v19698_v60, %v7883_v16  ;;  %v8006_v37 = vmax.f32 %v7986_v25, 0.0 }
 0x806   : > { %v8009_v38 = vmax.f32 %v7989_v57, 0.0 }
 0x807   : > { %v8007_v49 = vmax.f32 %v7987_v8, 0.0 }
 0x808   : > { %v19704_v40 = vmax.f32 %v8008_v15, %v8009_v38 }
 0x809   : > { %v19706_v41 = vmax.f32 %v8006_v37, %v8007_v49  ;;  %v15685_v17 = vpop.f32.mrb[72].mxu1  ;;  %v16647_v37 = vld [vmem:[%s22167_s9 + $0x40] ss:$8 sps:$4 sm:$0xff]  }
 0x80a   : > { %v7992_v35 = vadd.f32 %v15685_v17, %v19698_v60  ;;  %v7896_v4 = vpop.f32.mrb[73].mxu1 }
 0x80b   : > { %v8092_v36 = vpack.c.bf16 %v19704_v40, %v19706_v41  ;;  %v7990_v21 = vadd.f32 %v19698_v60, %v7896_v4  ;;  %v15686_v11 = vpop.f32.mrb[74].mxu1  ;;  %v16652_v4 = vld [vmem:[%s22167_s9 + $0x54] ss:$8 sps:$4 sm:$0xff]  }
 0x80c   : > { %v7993_v62 = vadd.f32 %v15686_v11, %v19698_v60  ;;  %v7899_v31 = vpop.f32.mrb[75].mxu1  ;;  %v8012_v30 = vmax.f32 %v7992_v35, 0.0  ;;  %v16751_v41 = vld [vmem:[%s22169_s11 + $0x2c4] ss:$16 sps:$4 sm:$0xff]  }
 0x80d   : > { %v7991_v7 = vadd.f32 %v19698_v60, %v7899_v31  ;;  %v8010_v33 = vmax.f32 %v7990_v21, 0.0 }
 0x80e   : > { %v8013_v14 = vmax.f32 %v7993_v62, 0.0 }
 0x80f   : > { %v8011_v50 = vmax.f32 %v7991_v7, 0.0  ;;  %v16731_v7 = vld [vmem:[%s22169_s11 + $0x200] ss:$16 sps:$4 sm:$0xff]  }
 0x810   : > { %v8060_v59 = vmax.f32 %v8012_v30, %v8013_v14  ;;  %v16733_v30 = vld [vmem:[%s22169_s11 + $0x204] ss:$16 sps:$4 sm:$0xff]  }
 0x811   : > { %v8056_v61 = vmax.f32 %v8010_v33, %v8011_v50  ;;  %v15689_v26 = vpop.f32.mrb[76].mxu1  ;;  %v16650_v50 = vld [vmem:[%s22167_s9 + $0x50] ss:$8 sps:$4 sm:$0xff]   ;;  %9468 = vmatprep.subr.bf16.mxu0 %v16733_v30  ;;  %v16772_v30 = vld [vmem:[%s22169_s11 + $0x3a4] ss:$16 sps:$4 sm:$0xff]  }
 0x812   : > { %v7996_v0 = vadd.f32 %v15689_v26, %v19698_v60  ;;  %v7912_v51 = vpop.f32.mrb[77].mxu1  ;;  %v16655_v26 = vld [vmem:[%s22167_s9 + $0x64] ss:$8 sps:$4 sm:$0xff]   ;;  %9469 = vmatpush1.bf16.msra.mxu0 %v16731_v7  ;;  %v16767_v7 = vld [vmem:[%s22169_s11 + $0x380] ss:$16 sps:$4 sm:$0xff]  }
 0x813   : > { %v8112_v20 = vpack.c.bf16 %v8056_v61, %v19704_v40  ;;  %v7994_v10 = vadd.f32 %v19698_v60, %v7912_v51  ;;  %v15690_v52 = vpop.f32.mrb[78].mxu1  ;;  %v19723_v47 = vpack.c.bf16 %v8060_v59, %v8056_v61  ;;  %v16734_v51 = vld [vmem:[%s22169_s11 + $0x220] ss:$16 sps:$4 sm:$0xff]  }
 0x814   : > { %v7997_v19 = vadd.f32 %v15690_v52, %v19698_v60  ;;  %v7915_v55 = vpop.f32.mrb[79].mxu1  ;;  %v8016_v13 = vmax.f32 %v7996_v0, 0.0  ;;  %v16658_v52 = vld [vmem:[%s22167_s9 + $0x74] ss:$8 sps:$4 sm:$0xff]   ;;  %v16746_v40 = vld [vmem:[%s22169_s11 + $0x2a0] ss:$16 sps:$4 sm:$0xff]  }
 0x815   : > { %v7995_v58 = vadd.f32 %v19698_v60, %v7915_v55  ;;  %8245 = vmatmul.mubr.bf16.vlgmr.msra.gmra.mrb[88].mxu1 %v8112_v20  ;;  %v8014_v28 = vmax.f32 %v7994_v10, 0.0  ;;  %v16739_v20 = vld [vmem:[%s22169_s11 + $0x244] ss:$16 sps:$4 sm:$0xff]   ;;  %v16653_v10 = vld [vmem:[%s22167_s9 + $0x60] ss:$8 sps:$4 sm:$0xff]  }
 0x816   : > { %v8017_v6 = vmax.f32 %v7997_v19, 0.0  ;;  %8356 = vmatpush1.bf16.msra.mxu1 %v16635_v29  ;;  %8254 = vmatprep.mubr.bf16.mxu1 %v22427_v5  ;;  %v16737_v55 = vld [vmem:[%s22169_s11 + $0x240] ss:$16 sps:$4 sm:$0xff]  }
 0x817   : > { %v8015_v22 = vmax.f32 %v7995_v58, 0.0  ;;  %8357 = vmatprep.subr.bf16.mxu1 %v16640_v2  ;;  %v16742_v58 = vld [vmem:[%s22169_s11 + $0x264] ss:$16 sps:$4 sm:$0xff]  }
 0x818   : > { %v8068_v32 = vmax.f32 %v8016_v13, %v8017_v6  ;;  %v16656_v13 = vld [vmem:[%s22167_s9 + $0x70] ss:$8 sps:$4 sm:$0xff]   ;;  %v16661_v6 = vld [vmem:[%s22167_s9 + $0x104] ss:$8 sps:$4 sm:$0xff]  }
 0x819   : > { %v8064_v53 = vmax.f32 %v8014_v28, %v8015_v22  ;;  %v15693_v24 = vpop.f32.mrb[80].mxu1  ;;  %v16745_v28 = vld [vmem:[%s22169_s11 + $0x284] ss:$16 sps:$4 sm:$0xff]   ;;  %v16659_v22 = vld [vmem:[%s22167_s9 + $0x100] ss:$8 sps:$4 sm:$0xff]  }
 0x81a   : > { %v8000_v48 = vadd.f32 %v15693_v24, %v19698_v60  ;;  %8358 = vmatpush1.bf16.msra.mxu1 %v16638_v1  ;;  %v7928_v23 = vpop.f32.mrb[81].mxu1  ;;  %v16740_v1 = vld [vmem:[%s22169_s11 + $0x260] ss:$16 sps:$4 sm:$0xff]  }
 0x81b   : > { %v7998_v56 = vadd.f32 %v19698_v60, %v7928_v23  ;;  %v15694_v45 = vpop.f32.mrb[82].mxu1  ;;  %8359 = vmatprep.subr.bf16.mxu1 %v16643_v3  ;;  %v19739_v9 = vpack.c.bf16 %v8064_v53, %v8060_v59  ;;  %v19744_v46 = vpack.c.bf16 %v8068_v32, %v8064_v53  ;;  %v16664_v3 = vld [vmem:[%s22167_s9 + $0x114] ss:$8 sps:$4 sm:$0xff]   ;;  %v16662_v24 = vld [vmem:[%s22167_s9 + $0x110] ss:$8 sps:$4 sm:$0xff]  }
 0x81c   : > { %v8001_v43 = vadd.f32 %v15694_v45, %v19698_v60  ;;  %v7931_v12 = vpop.f32.mrb[83].mxu1  ;;  %v8020_v34 = vmax.f32 %v8000_v48, 0.0  ;;  %v16748_v53 = vld [vmem:[%s22169_s11 + $0x2a4] ss:$16 sps:$4 sm:$0xff]   ;;  %v16668_v45 = vld [vmem:[%s22167_s9 + $0x130] ss:$8 sps:$4 sm:$0xff]  }
 0x81d   : > { %v7999_v39 = vadd.f32 %v19698_v60, %v7931_v12  ;;  %8255 = vmatmul.mubr.bf16.gmra.mrb[92].mxu1 %v19739_v9  ;;  %v8018_v54 = vmax.f32 %v7998_v56, 0.0  ;;  %v16667_v48 = vld [vmem:[%s22167_s9 + $0x124] ss:$8 sps:$4 sm:$0xff]   ;;  %v16670_v23 = vld [vmem:[%s22167_s9 + $0x134] ss:$8 sps:$4 sm:$0xff]  }
 0x81e   : > { %v8021_v63 = vmax.f32 %v8001_v43, 0.0  ;;  %8360 = vmatpush1.bf16.msra.mxu1 %v16641_v18  ;;  %8264 = vmatprep.mubr.bf16.mxu1 %v22427_v5  ;;  %v16749_v18 = vld [vmem:[%s22169_s11 + $0x2c0] ss:$16 sps:$4 sm:$0xff]   ;;  %v16754_v56 = vld [vmem:[%s22169_s11 + $0x2e4] ss:$16 sps:$4 sm:$0xff]  }
 0x81f   : > { %v8019_v25 = vmax.f32 %v7999_v39, 0.0  ;;  %8361 = vmatprep.subr.bf16.mxu1 %v16646_v27  ;;  %v16673_v27 = vld [vmem:[%s22167_s9 + $0x144] ss:$8 sps:$4 sm:$0xff]   ;;  %v16752_v43 = vld [vmem:[%s22169_s11 + $0x2e0] ss:$16 sps:$4 sm:$0xff]  }
 0x820   : > { %v19756_v57 = vmax.f32 %v8020_v34, %v8021_v63  ;;  %v16757_v12 = vld [vmem:[%s22169_s11 + $0x304] ss:$16 sps:$4 sm:$0xff]   ;;  %v16671_v39 = vld [vmem:[%s22167_s9 + $0x140] ss:$8 sps:$4 sm:$0xff]  }
 0x821   : > { %v8072_v16 = vmax.f32 %v8018_v54, %v8019_v25  ;;  %v15697_v8 = vpop.f32.mrb[84].mxu1  ;;  %v16676_v34 = vld [vmem:[%s22167_s9 + $0x154] ss:$8 sps:$4 sm:$0xff]   ;;  %v16755_v63 = vld [vmem:[%s22169_s11 + $0x300] ss:$16 sps:$4 sm:$0xff]  }
 0x822   : > { %v8004_v15 = vadd.f32 %v15697_v8, %v19698_v60  ;;  %8362 = vmatpush1.bf16.msra.mxu1 %v16644_v42  ;;  %v7944_v38 = vpop.f32.mrb[85].mxu1  ;;  %v16760_v42 = vld [vmem:[%s22169_s11 + $0x324] ss:$16 sps:$4 sm:$0xff]   ;;  %v16674_v54 = vld [vmem:[%s22167_s9 + $0x150] ss:$8 sps:$4 sm:$0xff]  }
 0x823   : > { %v8002_v49 = vadd.f32 %v19698_v60, %v7944_v38  ;;  %v15698_v17 = vpop.f32.mrb[86].mxu1  ;;  %8363 = vmatprep.subr.bf16.mxu1 %v16649_v44  ;;  %v19763_v35 = vpack.c.bf16 %v8072_v16, %v8068_v32  ;;  %v19769_v21 = vpack.c.bf16 %v19756_v57, %v8072_v16  ;;  %v16743_v32 = vld [vmem:[%s22169_s11 + $0x280] ss:$16 sps:$4 sm:$0xff]   ;;  %v16679_v25 = vld [vmem:[%s22167_s9 + $0x164] ss:$8 sps:$4 sm:$0xff]  }
 0x824   : > { %v8005_v11 = vadd.f32 %v15698_v17, %v19698_v60  ;;  %v7947_v62 = vpop.f32.mrb[87].mxu1  ;;  %v8024_v14 = vmax.f32 %v8004_v15, 0.0  ;;  %v16758_v44 = vld [vmem:[%s22169_s11 + $0x320] ss:$16 sps:$4 sm:$0xff]   ;;  %v16763_v16 = vld [vmem:[%s22169_s11 + $0x344] ss:$16 sps:$4 sm:$0xff]  }
 0x825   : > { %v8003_v31 = vadd.f32 %v19698_v60, %v7947_v62  ;;  %8265 = vmatmul.mubr.bf16.gmra.mrb[96].mxu1 %v19763_v35  ;;  %v16736_v60 = vld [vmem:[%s22169_s11 + $0x224] ss:$16 sps:$4 sm:$0xff]   ;;  %v8022_v59 = vmax.f32 %v8002_v49, 0.0  ;;  %v16677_v8 = vld [vmem:[%s22167_s9 + $0x160] ss:$8 sps:$4 sm:$0xff]  }
 0x826   : > { %v8025_v33 = vmax.f32 %v8005_v11, 0.0  ;;  %8364 = vmatpush1.bf16.msra.mxu1 %v16647_v37  ;;  %8387 = vmatprep.mubr.bf16.mxu1 %v22427_v5  ;;  %v16682_v15 = vld [vmem:[%s22167_s9 + $0x174] ss:$8 sps:$4 sm:$0xff]   ;;  %v16761_v38 = vld [vmem:[%s22169_s11 + $0x340] ss:$16 sps:$4 sm:$0xff]  }
 0x827   : > { %v8023_v61 = vmax.f32 %v8003_v31, 0.0  ;;  %8365 = vmatprep.subr.bf16.mxu1 %v16652_v4  ;;  %9470 = vmatprep.subr.bf16.mxu0 %v16736_v60  ;;  %v16766_v37 = vld [vmem:[%s22169_s11 + $0x364] ss:$16 sps:$4 sm:$0xff]   ;;  %v16680_v49 = vld [vmem:[%s22167_s9 + $0x170] ss:$8 sps:$4 sm:$0xff]  }
 0x828   : > { %v19790_v0 = vmax.f32 %v8024_v14, %v8025_v33  ;;  %9471 = vmatpush1.bf16.msra.mxu0 %v16734_v51  ;;  %v16685_v17 = vld [vmem:[%s22167_s9 + $0x184] ss:$8 sps:$4 sm:$0xff]   ;;  %v16764_v4 = vld [vmem:[%s22169_s11 + $0x360] ss:$16 sps:$4 sm:$0xff]   ;;  %v16688_v31 = vld [vmem:[%s22167_s9 + $0x194] ss:$8 sps:$4 sm:$0xff]  }
 0x829   : > { %v19795_v29 = vmax.f32 %v8022_v59, %v8023_v61  ;;  %9472 = vmatprep.subr.bf16.mxu0 %v16739_v20  ;;  %v16769_v11 = vld [vmem:[%s22169_s11 + $0x384] ss:$16 sps:$4 sm:$0xff]   ;;  %v16683_v62 = vld [vmem:[%s22167_s9 + $0x180] ss:$8 sps:$4 sm:$0xff]   ;;  %v16686_v14 = vld [vmem:[%s22167_s9 + $0x190] ss:$8 sps:$4 sm:$0xff]  }
 0x82a   : > { %8366 = vmatpush1.bf16.msra.mxu1 %v16650_v50  ;;  %v16691_v33 = vld [vmem:[%s22167_s9 + $0x1a4] ss:$8 sps:$4 sm:$0xff]   ;;  %v16689_v50 = vld [vmem:[%s22167_s9 + $0x1a0] ss:$8 sps:$4 sm:$0xff]   ;;  %v16694_v60 = vld [vmem:[%s22167_s9 + $0x1b4] ss:$8 sps:$4 sm:$0xff]  }
 0x82b   : > { %8367 = vmatprep.subr.bf16.mxu1 %v16655_v26  ;;  %v8607_v2 = vpack.c.bf16 %v19795_v29, %v19756_v57  ;;  %v8788_v19 = vpack.c.bf16 %v19790_v0, %v19795_v29  ;;  %v16692_v59 = vld [vmem:[%s22167_s9 + $0x1b0] ss:$8 sps:$4 sm:$0xff]   ;;  %v16697_v61 = vld [vmem:[%s22167_s9 + $0x1c4] ss:$8 sps:$4 sm:$0xff]   ;;  %v16695_v26 = vld [vmem:[%s22167_s9 + $0x1c0] ss:$8 sps:$4 sm:$0xff]   ;;  %v8963_v0 = vlaneseq }
 0x82c   : > { %9473 = vmatpush1.bf16.msra.mxu0 %v16737_v55  ;;  %v16700_v51 = vld [vmem:[%s22167_s9 + $0x1d4] ss:$8 sps:$4 sm:$0xff]   ;;  %v16698_v20 = vld [vmem:[%s22167_s9 + $0x1d0] ss:$8 sps:$4 sm:$0xff]  }
 0x82d   : > { %9474 = vmatprep.subr.bf16.mxu0 %v16742_v58  ;;  %v16706_v55 = vld [vmem:[%s22167_s9 + $0x1f4] ss:$8 sps:$4 sm:$0xff]   ;;  %v16704_v58 = vld [vmem:[%s22167_s9 + $0x1f0] ss:$8 sps:$4 sm:$0xff]   ;;  %v20070_v29 = vshrl.u32 %v8963_v0, 7 }
 0x82e   : > { %8368 = vmatpush1.bf16.msra.mxu1 %v16653_v10  ;;  %v16703_v10 = vld [vmem:[%s22167_s9 + $0x1e4] ss:$8 sps:$4 sm:$0xff]   ;;  %v16730_v57 = vld [vmem:[%s22167_s9 + $0x274] ss:$8 sps:$4 sm:$0xff]  }
 0x82f   : > { %8369 = vmatprep.subr.bf16.mxu1 %v16658_v52  ;;  %v16701_v52 = vld [vmem:[%s22167_s9 + $0x1e0] ss:$8 sps:$4 sm:$0xff]   ;;  %v16799_v0 = vld [vmem:[%s22169_s11 + $0x2cc] ss:$16 sps:$4 sm:$0xff]  }
 0x830   : > { %9475 = vmatpush1.bf16.msra.mxu0 %v16740_v1  ;;  %v16712_v1 = vld [vmem:[%s22167_s9 + $0x214] ss:$8 sps:$4 sm:$0xff]  }
 0x831   : > { %9476 = vmatprep.subr.bf16.mxu0 %v16745_v28  ;;  %v16710_v28 = vld [vmem:[%s22167_s9 + $0x210] ss:$8 sps:$4 sm:$0xff]  }
 0x832   : > { %8370 = vmatpush1.bf16.msra.mxu1 %v16656_v13  ;;  %v16709_v13 = vld [vmem:[%s22167_s9 + $0x204] ss:$8 sps:$4 sm:$0xff]  }
 0x833   : > { %8524 = vmatprep.subr.bf16.mxu1 %v16661_v6  ;;  %v16707_v6 = vld [vmem:[%s22167_s9 + $0x200] ss:$8 sps:$4 sm:$0xff]  }
 0x834   : > { %9477 = vmatpush1.bf16.msra.mxu0 %v16743_v32  ;;  %v16716_v32 = vld [vmem:[%s22167_s9 + $0x230] ss:$8 sps:$4 sm:$0xff]  }
 0x835   : > { %8388 = vmatmul.mubr.bf16.vlgmr.msra.gmra.mrb[88].mxu1 %v8092_v36  ;;  %9478 = vmatprep.subr.bf16.mxu0 %v16748_v53  ;;  %v16665_v36 = vld [vmem:[%s22167_s9 + $0x120] ss:$8 sps:$4 sm:$0xff]   ;;  %v16721_v53 = vld [vmem:[%s22167_s9 + $0x244] ss:$8 sps:$4 sm:$0xff]  }
 0x836   : > { %8525 = vmatpush1.bf16.msra.mxu1 %v16659_v22  ;;  %8397 = vmatprep.mubr.bf16.mxu1 %v22427_v5  ;;  %v16715_v22 = vld [vmem:[%s22167_s9 + $0x224] ss:$8 sps:$4 sm:$0xff]  }
 0x837   : > { %8526 = vmatprep.subr.bf16.mxu1 %v16664_v3  ;;  %v16713_v3 = vld [vmem:[%s22167_s9 + $0x220] ss:$8 sps:$4 sm:$0xff]  }
 0x838   : > { %9479 = vmatpush1.bf16.msra.mxu0 %v16746_v40  ;;  %v16727_v40 = vld [vmem:[%s22167_s9 + $0x264] ss:$8 sps:$4 sm:$0xff]  }
 0x839   : > { %9480 = vmatprep.subr.bf16.mxu0 %v16751_v41  ;;  %v16725_v41 = vld [vmem:[%s22167_s9 + $0x260] ss:$8 sps:$4 sm:$0xff]  }
 0x83a   : > { %8527 = vmatpush1.bf16.msra.mxu1 %v16662_v24  ;;  %v16719_v24 = vld [vmem:[%s22167_s9 + $0x240] ss:$8 sps:$4 sm:$0xff]  }
 0x83b   : > { %8528 = vmatprep.subr.bf16.mxu1 %v16667_v48  ;;  %v16722_v48 = vld [vmem:[%s22167_s9 + $0x250] ss:$8 sps:$4 sm:$0xff]  }
 0x83c   : > { %9481 = vmatpush1.bf16.msra.mxu0 %v16749_v18  ;;  %v8961_v18 = vld [vmem:[%s22168_s10] sm:$0x3] }
 0x83d   : > { %8398 = vmatmul.mubr.bf16.gmra.mrb[92].mxu1 %v19723_v47  ;;  %9482 = vmatprep.subr.bf16.mxu0 %v16754_v56  ;;  %v22202_v56 = vsub.s32 1, %v20070_v29 }
 0x83e   : > { %8529 = vmatpush1.bf16.msra.mxu1 %v16665_v36  ;;  %8407 = vmatprep.mubr.bf16.mxu1 %v22427_v5  ;;  %v16775_v36 = vld [vmem:[%s22169_s11 + $0x3c4] ss:$16 sps:$4 sm:$0xff]  }
 0x83f   : > { %8530 = vmatprep.subr.bf16.mxu1 %v16670_v23  ;;  %v16773_v23 = vld [vmem:[%s22169_s11 + $0x3c0] ss:$16 sps:$4 sm:$0xff]  }
 0x840   : > { %9483 = vmatpush1.bf16.msra.mxu0 %v16752_v43 }
 0x841   : > { %9484 = vmatprep.subr.bf16.mxu0 %v16757_v12 }
 0x842   : > { %8531 = vmatpush1.bf16.msra.mxu1 %v16668_v45 }
 0x843   : > { %8532 = vmatprep.subr.bf16.mxu1 %v16673_v27  ;;  %v8970_v27 = vrot.slane %v8961_v18, %v22202_v56 }
 0x844   : > { %9485 = vmatpush1.bf16.msra.mxu0 %v16755_v63 }
 0x845   : > { %8408 = vmatmul.mubr.bf16.gmra.mrb[96].mxu1 %v19744_v46  ;;  %9486 = vmatprep.subr.bf16.mxu0 %v16760_v42 }
 0x846   : > { %8533 = vmatpush1.bf16.msra.mxu1 %v16671_v39  ;;  %8556 = vmatprep.mubr.bf16.mxu1 %v22427_v5 }
 0x847   : > { %8534 = vmatprep.subr.bf16.mxu1 %v16676_v34 }
 0x848   : > { %9487 = vmatpush1.bf16.msra.mxu0 %v16758_v44 }
 0x849   : > { %9488 = vmatprep.subr.bf16.mxu0 %v16763_v16 }
 0x84a   : > { %8535 = vmatpush1.bf16.msra.mxu1 %v16674_v54 }
 0x84b   : > { %8536 = vmatprep.subr.bf16.mxu1 %v16679_v25 }
 0x84c   : > { %9489 = vmatpush1.bf16.msra.mxu0 %v16761_v38 }
 0x84d   : > { %9490 = vmatprep.subr.bf16.mxu0 %v16766_v37 }
 0x84e   : > { %8537 = vmatpush1.bf16.msra.mxu1 %v16677_v8 }
 0x84f   : > { %8538 = vmatprep.subr.bf16.mxu1 %v16682_v15 }
 0x850   : > { %9491 = vmatpush1.bf16.msra.mxu0 %v16764_v4 }
 0x851   : > { %9492 = vmatprep.subr.bf16.mxu0 %v16769_v11 }
 0x852   : > { %8539 = vmatpush1.bf16.msra.mxu1 %v16680_v49 }
 0x853   : > { %8705 = vmatprep.subr.bf16.mxu1 %v16685_v17 }
 0x854   : > { %9493 = vmatpush1.bf16.msra.mxu0 %v16767_v7 }
 0x855   : > { %8557 = vmatmul.mubr.bf16.vlgmr.msra.gmra.mrb[88].mxu1 %v19723_v47  ;;  %v16770_v47 = vld [vmem:[%s22169_s11 + $0x3a0] ss:$16 sps:$4 sm:$0xff]   ;;  %9494 = vmatprep.subr.bf16.mxu0 %v16772_v30 }
 0x856   : > { %8706 = vmatpush1.bf16.msra.mxu1 %v16683_v62  ;;  %8566 = vmatprep.mubr.bf16.mxu1 %v22427_v5 }
 0x857   : > { %8707 = vmatprep.subr.bf16.mxu1 %v16688_v31 }
 0x858   : > { %9495 = vmatpush1.bf16.msra.mxu0 %v16770_v47 }
 0x859   : > { %9496 = vmatprep.subr.bf16.mxu0 %v16775_v36  ;;  %v16788_v36 = vld [vmem:[%s22169_s11 + $0x268] ss:$16 sps:$4 sm:$0xff]  }
 0x85a   : > { %8708 = vmatpush1.bf16.msra.mxu1 %v16686_v14 }
 0x85b   : > { %8709 = vmatprep.subr.bf16.mxu1 %v16691_v33 }
 0x85c   : > { %9497 = vmatpush1.bf16.msra.mxu0 %v16773_v23  ;;  %v16793_v23 = vld [vmem:[%s22169_s11 + $0x28c] ss:$16 sps:$4 sm:$0xff]  }
 0x85d   : > { %8567 = vmatmul.mubr.bf16.gmra.mrb[92].mxu1 %v19744_v46 }
 0x85e   : > { %8710 = vmatpush1.bf16.msra.mxu1 %v16689_v50  ;;  %8576 = vmatprep.mubr.bf16.mxu1 %v22427_v5 }
 0x85f   : > { %8711 = vmatprep.subr.bf16.mxu1 %v16694_v60 }
 0x862   : > { %8712 = vmatpush1.bf16.msra.mxu1 %v16692_v59 }
 0x863   : > { %8713 = vmatprep.subr.bf16.mxu1 %v16697_v61  ;;  %v16779_v61 = vld [vmem:[%s22169_s11 + $0x208] ss:$16 sps:$4 sm:$0xff]  }
 0x865   : > { %8577 = vmatmul.mubr.bf16.gmra.mrb[96].mxu1 %v19769_v21 }
 0x866   : > { %8714 = vmatpush1.bf16.msra.mxu1 %v16695_v26  ;;  %8737 = vmatprep.mubr.bf16.mxu1 %v22427_v5 }
 0x867   : > { %8715 = vmatprep.subr.bf16.mxu1 %v16700_v51  ;;  %v16784_v51 = vld [vmem:[%s22169_s11 + $0x22c] ss:$16 sps:$4 sm:$0xff]  }
 0x86a   : > { %8716 = vmatpush1.bf16.msra.mxu1 %v16698_v20 }
 0x86b   : > { %8717 = vmatprep.subr.bf16.mxu1 %v16703_v10 }
 0x86e   : > { %8718 = vmatpush1.bf16.msra.mxu1 %v16701_v52 }
 0x86f   : > { %8719 = vmatprep.subr.bf16.mxu1 %v16706_v55 }
 0x872   : > { %8720 = vmatpush1.bf16.msra.mxu1 %v16704_v58 }
 0x873   : > { %8886 = vmatprep.subr.bf16.mxu1 %v16709_v13 }
 0x875   : > { %8738 = vmatmul.mubr.bf16.vlgmr.msra.gmra.mrb[88].mxu1 %v19739_v9  ;;  %v16718_v9 = vld [vmem:[%s22167_s9 + $0x234] ss:$8 sps:$4 sm:$0xff]  }
 0x876   : > { %8887 = vmatpush1.bf16.msra.mxu1 %v16707_v6  ;;  %8747 = vmatprep.mubr.bf16.mxu1 %v22427_v5  ;;  %v16782_v6 = vld [vmem:[%s22169_s11 + $0x228] ss:$16 sps:$4 sm:$0xff]  }
 0x877   : > { %8888 = vmatprep.subr.bf16.mxu1 %v16712_v1 }
 0x87a   : > { %8889 = vmatpush1.bf16.msra.mxu1 %v16710_v28 }
 0x87b   : > { %8890 = vmatprep.subr.bf16.mxu1 %v16715_v22 }
 0x87d   : > { %8748 = vmatmul.mubr.bf16.gmra.mrb[92].mxu1 %v19763_v35  ;;  %v16724_v35 = vld [vmem:[%s22167_s9 + $0x254] ss:$8 sps:$4 sm:$0xff]  }
 0x87e   : > { %8891 = vmatpush1.bf16.msra.mxu1 %v16713_v3  ;;  %8757 = vmatprep.mubr.bf16.mxu1 %v22427_v5  ;;  %v16787_v3 = vld [vmem:[%s22169_s11 + $0x24c] ss:$16 sps:$4 sm:$0xff]  }
 0x87f   : > { %8892 = vmatprep.subr.bf16.mxu1 %v16718_v9 }
 0x882   : > { %8893 = vmatpush1.bf16.msra.mxu1 %v16716_v32 }
 0x883   : > { %8894 = vmatprep.subr.bf16.mxu1 %v16721_v53 }
 0x885   : > { %8758 = vmatmul.mubr.bf16.gmra.mrb[96].mxu1 %v8607_v2  ;;  %v16728_v2 = vld [vmem:[%s22167_s9 + $0x270] ss:$8 sps:$4 sm:$0xff]  }
 0x886   : > { %8895 = vmatpush1.bf16.msra.mxu1 %v16719_v24  ;;  %8918 = vmatprep.mubr.bf16.mxu1 %v22427_v5 }
 0x887   : > { %8896 = vmatprep.subr.bf16.mxu1 %v16724_v35 }
 0x88a   : > { %8897 = vmatpush1.bf16.msra.mxu1 %v16722_v48 }
 0x88b   : > { %8898 = vmatprep.subr.bf16.mxu1 %v16727_v40  ;;  %v16785_v40 = vld [vmem:[%s22169_s11 + $0x248] ss:$16 sps:$4 sm:$0xff]  }
 0x88e   : > { %8899 = vmatpush1.bf16.msra.mxu1 %v16725_v41 }
 0x88f   : > { %8900 = vmatprep.subr.bf16.mxu1 %v16730_v57  ;;  %v16790_v57 = vld [vmem:[%s22169_s11 + $0x26c] ss:$16 sps:$4 sm:$0xff]  }
 0x892   : > { %8901 = vmatpush1.bf16.msra.mxu1 %v16728_v2 }
 0x895   : > { %8919 = vmatmul.mubr.bf16.vlgmr.msra.gmra.mrb[88].mxu1 %v19744_v46  ;;  %v16778_v46 = vld [vmem:[%s22169_s11 + $0x3e4] ss:$16 sps:$4 sm:$0xff]  }
 0x896   : > { %8928 = vmatprep.mubr.bf16.mxu1 %v22427_v5  ;;  %9498 = vmatprep.subr.bf16.mxu0 %v16778_v46  ;;  %v16791_v46 = vld [vmem:[%s22169_s11 + $0x288] ss:$16 sps:$4 sm:$0xff]  }
 0x89d   : > { %8929 = vmatmul.mubr.bf16.gmra.mrb[92].mxu1 %v19769_v21  ;;  %v16781_v21 = vld [vmem:[%s22169_s11 + $0x20c] ss:$16 sps:$4 sm:$0xff]  }
 0x89e   : > { %8938 = vmatprep.mubr.bf16.mxu1 %v22427_v5  ;;  %v16776_v5 = vld [vmem:[%s22169_s11 + $0x3e0] ss:$16 sps:$4 sm:$0xff]  }
 0x89f   : > { %9499 = vmatpush1.bf16.msra.mxu0 %v16776_v5  ;;  %v16796_v5 = vld [vmem:[%s22169_s11 + $0x2ac] ss:$16 sps:$4 sm:$0xff]  }
 0x8a0   : > { %9511 = vmatprep.subr.bf16.mxu0 %v16781_v21  ;;  %v16794_v21 = vld [vmem:[%s22169_s11 + $0x2a8] ss:$16 sps:$4 sm:$0xff]  }
 0x8a5   : > { %8939 = vmatmul.mubr.bf16.gmra.mrb[96].mxu1 %v8788_v19  ;;  %v22203_v19 = vsub.s32 0, %v20070_v29 }
 0x8a7   : > { %v8966_v45 = vrot.slane %v8961_v18, %v22203_v19  ;;  %v16797_v18 = vld [vmem:[%s22169_s11 + $0x2c8] ss:$16 sps:$4 sm:$0xff]   ;;  %v11491_v19 = vld [vmem:[%s22171_s13 + $0x70] sm:$0xff] }
 0x968   : > { %v8920_v43 = vpop.f32.mrb[88].mxu1 }
 0x969   : > { %v8973_v12 = vadd.f32 %v8966_v45, %v8920_v43  ;;  %v8922_v39 = vpop.f32.mrb[89].mxu1  ;;  %v16805_v43 = vld [vmem:[%s22169_s11 + $0x30c] ss:$16 sps:$4 sm:$0xff]  }
 0x96a   : > { %v8974_v34 = vadd.f32 %v8970_v27, %v8922_v39  ;;  %v8924_v63 = vpop.f32.mrb[90].mxu1  ;;  %v16808_v39 = vld [vmem:[%s22169_s11 + $0x32c] ss:$16 sps:$4 sm:$0xff]  }
 0x96b   : > { %v8975_v42 = vadd.f32 %v8966_v45, %v8924_v63  ;;  %v8926_v54 = vpop.f32.mrb[91].mxu1  ;;  %v8985_v44 = vmax.f32 %v8973_v12, 0.0  ;;  %v16803_v12 = vld [vmem:[%s22169_s11 + $0x308] ss:$16 sps:$4 sm:$0xff]   ;;  %v16811_v63 = vld [vmem:[%s22169_s11 + $0x34c] ss:$16 sps:$4 sm:$0xff]  }
 0x96c   : > { %v8976_v25 = vadd.f32 %v8970_v27, %v8926_v54  ;;  %v8986_v8 = vmax.f32 %v8974_v34, 0.0  ;;  %v16806_v34 = vld [vmem:[%s22169_s11 + $0x328] ss:$16 sps:$4 sm:$0xff]   ;;  %v16814_v54 = vld [vmem:[%s22169_s11 + $0x36c] ss:$16 sps:$4 sm:$0xff]  }
 0x96d   : > { %v8987_v16 = vmax.f32 %v8975_v42, 0.0  ;;  %v16809_v42 = vld [vmem:[%s22169_s11 + $0x348] ss:$16 sps:$4 sm:$0xff]  }
 0x96e   : > { %v8988_v15 = vmax.f32 %v8976_v25, 0.0  ;;  %v16812_v25 = vld [vmem:[%s22169_s11 + $0x368] ss:$16 sps:$4 sm:$0xff]  }
 0x96f   : > { %v20081_v38 = vpack.c.bf16 %v8987_v16, %v8985_v44  ;;  %v16817_v44 = vld [vmem:[%s22169_s11 + $0x38c] ss:$16 sps:$4 sm:$0xff]  }
 0x970   : > { %v20083_v37 = vpack.c.bf16 %v8988_v15, %v8986_v8  ;;  %v8930_v49 = vpop.f32.mrb[92].mxu1  ;;  %v16820_v8 = vld [vmem:[%s22169_s11 + $0x3ac] ss:$16 sps:$4 sm:$0xff]  }
 0x971   : > { %v8977_v17 = vadd.f32 %v8966_v45, %v8930_v49  ;;  %v8932_v4 = vpop.f32.mrb[93].mxu1  ;;  %v16823_v49 = vld [vmem:[%s22169_s11 + $0x3cc] ss:$16 sps:$4 sm:$0xff]  }
 0x972   : > { %v8978_v11 = vadd.f32 %v8970_v27, %v8932_v4  ;;  %v8934_v62 = vpop.f32.mrb[94].mxu1  ;;  %v16826_v4 = vld [vmem:[%s22169_s11 + $0x3ec] ss:$16 sps:$4 sm:$0xff]  }
 0x973   : > { %v8989_v31 = vmax.f32 %v8977_v17, 0.0  ;;  %v8979_v7 = vadd.f32 %v8966_v45, %v8934_v62  ;;  %v8936_v30 = vpop.f32.mrb[95].mxu1  ;;  %v16821_v17 = vld [vmem:[%s22169_s11 + $0x3c8] ss:$16 sps:$4 sm:$0xff]   ;;  %v16829_v62 = vld [vmem:[%s22169_s11 + $0x4] ss:$16 sps:$4 sm:$0xff]  }
 0x974   : > { %v8990_v14 = vmax.f32 %v8978_v11, 0.0  ;;  %v8980_v33 = vadd.f32 %v8970_v27, %v8936_v30  ;;  %v16824_v11 = vld [vmem:[%s22169_s11 + $0x3e8] ss:$16 sps:$4 sm:$0xff]   ;;  %v16830_v30 = vld [vmem:[%s22169_s11 + $0x20] ss:$16 sps:$4 sm:$0xff]  }
 0x975   : > { %v20085_v47 = vpack.c.bf16 %v8989_v31, %v8987_v16  ;;  %v8991_v50 = vmax.f32 %v8979_v7, 0.0  ;;  %v16815_v16 = vld [vmem:[%s22169_s11 + $0x388] ss:$16 sps:$4 sm:$0xff]   ;;  %v16832_v7 = vld [vmem:[%s22169_s11 + $0x24] ss:$16 sps:$4 sm:$0xff]  }
 0x976   : > { %v9082_v60 = vpack.c.bf16 %v8990_v14, %v8988_v15  ;;  %v8992_v59 = vmax.f32 %v8980_v33, 0.0  ;;  %v16818_v15 = vld [vmem:[%s22169_s11 + $0x3a8] ss:$16 sps:$4 sm:$0xff]   ;;  %v16833_v33 = vld [vmem:[%s22169_s11 + $0x40] ss:$16 sps:$4 sm:$0xff]  }
 0x977   : > { %v20090_v26 = vpack.c.bf16 %v8991_v50, %v8989_v31  ;;  %v16827_v31 = vld [vmem:[%s22169_s11] ss:$16 sps:$4 sm:$0xff]  }
 0x978   : > { %v20095_v20 = vpack.c.bf16 %v8992_v59, %v8990_v14  ;;  %v8940_v10 = vpop.f32.mrb[96].mxu1  ;;  %9500 = vmatprep.mubr.bf16.mxu0 %v9082_v60  ;;  %v16835_v14 = vld [vmem:[%s22169_s11 + $0x44] ss:$16 sps:$4 sm:$0xff]  }
 0x979   : > { %v8981_v52 = vadd.f32 %v8966_v45, %v8940_v10  ;;  %v8942_v55 = vpop.f32.mrb[97].mxu1  ;;  %9501 = vmatmul.mubr.bf16.vlgmr.msra.gmra.mrb[56].mxu0 %v20085_v47  ;;  %v16847_v10 = vld [vmem:[%s22169_s11 + $0xc4] ss:$16 sps:$4 sm:$0xff]  }
 0x97a   : > { %v8982_v58 = vadd.f32 %v8970_v27, %v8942_v55  ;;  %9512 = vmatpush1.bf16.msra.mxu0 %v16779_v61  ;;  %v8944_v13 = vpop.f32.mrb[98].mxu1  ;;  %9543 = vmatprep.mubr.bf16.mxu0 %v9082_v60  ;;  %v16841_v60 = vld [vmem:[%s22169_s11 + $0x84] ss:$16 sps:$4 sm:$0xff]  }
 0x97b   : > { %v8993_v1 = vmax.f32 %v8981_v52, 0.0  ;;  %v8983_v28 = vadd.f32 %v8966_v45, %v8944_v13  ;;  %v8946_v22 = vpop.f32.mrb[99].mxu1  ;;  %9513 = vmatprep.subr.bf16.mxu0 %v16784_v51  ;;  %v16802_v45 = vld [vmem:[%s22169_s11 + $0x2ec] ss:$16 sps:$4 sm:$0xff]   ;;  %v16844_v61 = vld [vmem:[%s22169_s11 + $0xa4] ss:$16 sps:$4 sm:$0xff]  }
 0x97c   : > { %v8994_v9 = vmax.f32 %v8982_v58, 0.0  ;;  %v8984_v32 = vadd.f32 %v8970_v27, %v8946_v22  ;;  %v16800_v27 = vld [vmem:[%s22169_s11 + $0x2e8] ss:$16 sps:$4 sm:$0xff]   ;;  %v16842_v51 = vld [vmem:[%s22169_s11 + $0xa0] ss:$16 sps:$4 sm:$0xff]  }
 0x97d   : > { %v20104_v53 = vpack.c.bf16 %v8993_v1, %v8991_v50  ;;  %v8995_v24 = vmax.f32 %v8983_v28, 0.0  ;;  %v16836_v50 = vld [vmem:[%s22169_s11 + $0x60] ss:$16 sps:$4 sm:$0xff]   ;;  %v16850_v55 = vld [vmem:[%s22169_s11 + $0xe4] ss:$16 sps:$4 sm:$0xff]  }
 0x97e   : > { %v20106_v35 = vpack.c.bf16 %v8994_v9, %v8992_v59  ;;  %v8996_v48 = vmax.f32 %v8984_v32, 0.0  ;;  %9514 = vmatpush1.bf16.msra.mxu0 %v16782_v6  ;;  %v16839_v59 = vld [vmem:[%s22169_s11 + $0x80] ss:$16 sps:$4 sm:$0xff]   ;;  %v16853_v13 = vld [vmem:[%s22169_s11 + $0x104] ss:$16 sps:$4 sm:$0xff]  }
 0x97f   : > { %v20111_v41 = vpack.c.bf16 %v8995_v24, %v8993_v1  ;;  %9515 = vmatprep.subr.bf16.mxu0 %v16787_v3  ;;  %v16845_v52 = vld [vmem:[%s22169_s11 + $0xc0] ss:$16 sps:$4 sm:$0xff]   ;;  %v16856_v1 = vld [vmem:[%s22169_s11 + $0x124] ss:$16 sps:$4 sm:$0xff]  }
 0x980   : > { %v20116_v2 = vpack.c.bf16 %v8996_v48, %v8994_v9  ;;  %v16848_v58 = vld [vmem:[%s22169_s11 + $0xe0] ss:$16 sps:$4 sm:$0xff]   ;;  %v16859_v22 = vld [vmem:[%s22169_s11 + $0x144] ss:$16 sps:$4 sm:$0xff]  }
 0x981   : > { %v16851_v6 = vld [vmem:[%s22169_s11 + $0x100] ss:$16 sps:$4 sm:$0xff]   ;;  %v16862_v9 = vld [vmem:[%s22169_s11 + $0x164] ss:$16 sps:$4 sm:$0xff]  }
 0x982   : > { %9516 = vmatpush1.bf16.msra.mxu0 %v16785_v40  ;;  %v16854_v28 = vld [vmem:[%s22169_s11 + $0x120] ss:$16 sps:$4 sm:$0xff]   ;;  %v16865_v24 = vld [vmem:[%s22169_s11 + $0x184] ss:$16 sps:$4 sm:$0xff]  }
 0x983   : > { %9517 = vmatprep.subr.bf16.mxu0 %v16790_v57  ;;  %v16857_v3 = vld [vmem:[%s22169_s11 + $0x140] ss:$16 sps:$4 sm:$0xff]   ;;  %v16868_v40 = vld [vmem:[%s22169_s11 + $0x1a4] ss:$16 sps:$4 sm:$0xff]  }
 0x984   : > { %v16860_v32 = vld [vmem:[%s22169_s11 + $0x160] ss:$16 sps:$4 sm:$0xff]  }
 0x985   : > { %v16863_v48 = vld [vmem:[%s22169_s11 + $0x180] ss:$16 sps:$4 sm:$0xff]  }
 0x986   : > { %9518 = vmatpush1.bf16.msra.mxu0 %v16788_v36  ;;  %v16866_v57 = vld [vmem:[%s22169_s11 + $0x1a0] ss:$16 sps:$4 sm:$0xff]   ;;  %v16871_v36 = vld [vmem:[%s22169_s11 + $0x1c4] ss:$16 sps:$4 sm:$0xff]  }
 0x987   : > { %9519 = vmatprep.subr.bf16.mxu0 %v16793_v23  ;;  %v16869_v23 = vld [vmem:[%s22169_s11 + $0x1c0] ss:$16 sps:$4 sm:$0xff]  }
 0x98a   : > { %9520 = vmatpush1.bf16.msra.mxu0 %v16791_v46  ;;  %v16874_v46 = vld [vmem:[%s22169_s11 + $0x1e4] ss:$16 sps:$4 sm:$0xff]  }
 0x98b   : > { %9521 = vmatprep.subr.bf16.mxu0 %v16796_v5  ;;  %v16872_v5 = vld [vmem:[%s22169_s11 + $0x1e0] ss:$16 sps:$4 sm:$0xff]  }
 0x98e   : > { %9522 = vmatpush1.bf16.msra.mxu0 %v16794_v21  ;;  %v16877_v21 = vld [vmem:[%s22169_s11 + $0xc] ss:$16 sps:$4 sm:$0xff]  }
 0x98f   : > { %9523 = vmatprep.subr.bf16.mxu0 %v16799_v0  ;;  %v16875_v0 = vld [vmem:[%s22169_s11 + $0x8] ss:$16 sps:$4 sm:$0xff]  }
 0x992   : > { %9524 = vmatpush1.bf16.msra.mxu0 %v16797_v18  ;;  %v16880_v18 = vld [vmem:[%s22169_s11 + $0x2c] ss:$16 sps:$4 sm:$0xff]  }
 0x993   : > { %9525 = vmatprep.subr.bf16.mxu0 %v16802_v45  ;;  %v16878_v45 = vld [vmem:[%s22169_s11 + $0x28] ss:$16 sps:$4 sm:$0xff]  }
 0x996   : > { %9526 = vmatpush1.bf16.msra.mxu0 %v16800_v27  ;;  %v16883_v27 = vld [vmem:[%s22169_s11 + $0x4c] ss:$16 sps:$4 sm:$0xff]  }
 0x997   : > { %9527 = vmatprep.subr.bf16.mxu0 %v16805_v43  ;;  %v16881_v43 = vld [vmem:[%s22169_s11 + $0x48] ss:$16 sps:$4 sm:$0xff]  }
 0x99a   : > { %9528 = vmatpush1.bf16.msra.mxu0 %v16803_v12  ;;  %v16886_v12 = vld [vmem:[%s22169_s11 + $0x6c] ss:$16 sps:$4 sm:$0xff]  }
 0x99b   : > { %9529 = vmatprep.subr.bf16.mxu0 %v16808_v39  ;;  %v16889_v39 = vld [vmem:[%s22169_s11 + $0x8c] ss:$16 sps:$4 sm:$0xff]  }
 0x99e   : > { %9530 = vmatpush1.bf16.msra.mxu0 %v16806_v34  ;;  %v16887_v34 = vld [vmem:[%s22169_s11 + $0x88] ss:$16 sps:$4 sm:$0xff]  }
 0x99f   : > { %9531 = vmatprep.subr.bf16.mxu0 %v16811_v63  ;;  %v16892_v63 = vld [vmem:[%s22169_s11 + $0xac] ss:$16 sps:$4 sm:$0xff]  }
 0x9a2   : > { %9532 = vmatpush1.bf16.msra.mxu0 %v16809_v42  ;;  %v16890_v42 = vld [vmem:[%s22169_s11 + $0xa8] ss:$16 sps:$4 sm:$0xff]  }
 0x9a3   : > { %9533 = vmatprep.subr.bf16.mxu0 %v16814_v54  ;;  %v16895_v54 = vld [vmem:[%s22169_s11 + $0xcc] ss:$16 sps:$4 sm:$0xff]  }
 0x9a6   : > { %9534 = vmatpush1.bf16.msra.mxu0 %v16812_v25  ;;  %v16893_v25 = vld [vmem:[%s22169_s11 + $0xc8] ss:$16 sps:$4 sm:$0xff]  }
 0x9a7   : > { %9535 = vmatprep.subr.bf16.mxu0 %v16817_v44  ;;  %v16898_v44 = vld [vmem:[%s22169_s11 + $0xec] ss:$16 sps:$4 sm:$0xff]  }
 0x9aa   : > { %9536 = vmatpush1.bf16.msra.mxu0 %v16815_v16  ;;  %v16896_v16 = vld [vmem:[%s22169_s11 + $0xe8] ss:$16 sps:$4 sm:$0xff]  }
 0x9ab   : > { %9537 = vmatprep.subr.bf16.mxu0 %v16820_v8  ;;  %v16901_v8 = vld [vmem:[%s22169_s11 + $0x10c] ss:$16 sps:$4 sm:$0xff]  }
 0x9ae   : > { %9538 = vmatpush1.bf16.msra.mxu0 %v16818_v15  ;;  %v16899_v15 = vld [vmem:[%s22169_s11 + $0x108] ss:$16 sps:$4 sm:$0xff]  }
 0x9af   : > { %9539 = vmatprep.subr.bf16.mxu0 %v16823_v49  ;;  %v16904_v49 = vld [vmem:[%s22169_s11 + $0x12c] ss:$16 sps:$4 sm:$0xff]  }
 0x9b2   : > { %9540 = vmatpush1.bf16.msra.mxu0 %v16821_v17  ;;  %v16902_v17 = vld [vmem:[%s22169_s11 + $0x128] ss:$16 sps:$4 sm:$0xff]  }
 0x9b3   : > { %9541 = vmatprep.subr.bf16.mxu0 %v16826_v4  ;;  %v16907_v4 = vld [vmem:[%s22169_s11 + $0x14c] ss:$16 sps:$4 sm:$0xff]  }
 0x9b6   : > { %9542 = vmatpush1.bf16.msra.mxu0 %v16824_v11  ;;  %v16905_v11 = vld [vmem:[%s22169_s11 + $0x148] ss:$16 sps:$4 sm:$0xff]  }
 0x9b7   : > { %9874 = vmatprep.subr.bf16.mxu0 %v16829_v62  ;;  %v16910_v62 = vld [vmem:[%s22169_s11 + $0x16c] ss:$16 sps:$4 sm:$0xff]  }
 0x9b9   : > { %9544 = vmatmul.mubr.bf16.vlgmr.msra.gmra.mrb[60].mxu0 %v20085_v47  ;;  %v16838_v47 = vld [vmem:[%s22169_s11 + $0x64] ss:$16 sps:$4 sm:$0xff]  }
 0x9ba   : > { %9875 = vmatpush1.bf16.msra.mxu0 %v16827_v31  ;;  %9906 = vmatprep.mubr.bf16.mxu0 %v20083_v37  ;;  %v16908_v31 = vld [vmem:[%s22169_s11 + $0x168] ss:$16 sps:$4 sm:$0xff]  }
 0x9bb   : > { %9876 = vmatprep.subr.bf16.mxu0 %v16832_v7  ;;  %v16913_v7 = vld [vmem:[%s22169_s11 + $0x18c] ss:$16 sps:$4 sm:$0xff]  }
 0x9be   : > { %9877 = vmatpush1.bf16.msra.mxu0 %v16830_v30  ;;  %v16911_v30 = vld [vmem:[%s22169_s11 + $0x188] ss:$16 sps:$4 sm:$0xff]  }
 0x9bf   : > { %9878 = vmatprep.subr.bf16.mxu0 %v16835_v14  ;;  %v16916_v14 = vld [vmem:[%s22169_s11 + $0x1ac] ss:$16 sps:$4 sm:$0xff]  }
 0x9c2   : > { %9879 = vmatpush1.bf16.msra.mxu0 %v16833_v33  ;;  %v16914_v33 = vld [vmem:[%s22169_s11 + $0x1a8] ss:$16 sps:$4 sm:$0xff]  }
 0x9c3   : > { %9880 = vmatprep.subr.bf16.mxu0 %v16838_v47  ;;  %v16919_v47 = vld [vmem:[%s22169_s11 + $0x1cc] ss:$16 sps:$4 sm:$0xff]  }
 0x9c6   : > { %9881 = vmatpush1.bf16.msra.mxu0 %v16836_v50  ;;  %v16917_v50 = vld [vmem:[%s22169_s11 + $0x1c8] ss:$16 sps:$4 sm:$0xff]  }
 0x9c7   : > { %9882 = vmatprep.subr.bf16.mxu0 %v16841_v60  ;;  %v16922_v60 = vld [vmem:[%s22169_s11 + $0x1ec] ss:$16 sps:$4 sm:$0xff]  }
 0x9ca   : > { %9883 = vmatpush1.bf16.msra.mxu0 %v16839_v59  ;;  %v16920_v59 = vld [vmem:[%s22169_s11 + $0x1e8] ss:$16 sps:$4 sm:$0xff]  }
 0x9cb   : > { %9884 = vmatprep.subr.bf16.mxu0 %v16844_v61  ;;  %v16925_v61 = vld [vmem:[%s22169_s11 + $0x404] ss:$16 sps:$4 sm:$0xff]  }
 0x9ce   : > { %9885 = vmatpush1.bf16.msra.mxu0 %v16842_v51  ;;  %v16923_v51 = vld [vmem:[%s22169_s11 + $0x400] ss:$16 sps:$4 sm:$0xff]  }
 0x9cf   : > { %9886 = vmatprep.subr.bf16.mxu0 %v16847_v10  ;;  %v16928_v10 = vld [vmem:[%s22169_s11 + $0x424] ss:$16 sps:$4 sm:$0xff]  }
 0x9d2   : > { %9887 = vmatpush1.bf16.msra.mxu0 %v16845_v52  ;;  %v16926_v52 = vld [vmem:[%s22169_s11 + $0x420] ss:$16 sps:$4 sm:$0xff]  }
 0x9d3   : > { %9888 = vmatprep.subr.bf16.mxu0 %v16850_v55  ;;  %v16931_v55 = vld [vmem:[%s22169_s11 + $0x444] ss:$16 sps:$4 sm:$0xff]  }
 0x9d6   : > { %9889 = vmatpush1.bf16.msra.mxu0 %v16848_v58  ;;  %v16929_v58 = vld [vmem:[%s22169_s11 + $0x440] ss:$16 sps:$4 sm:$0xff]  }
 0x9d7   : > { %9890 = vmatprep.subr.bf16.mxu0 %v16853_v13  ;;  %v16932_v13 = vld [vmem:[%s22169_s11 + $0x460] ss:$16 sps:$4 sm:$0xff]  }
 0x9da   : > { %9891 = vmatpush1.bf16.msra.mxu0 %v16851_v6  ;;  %v16937_v6 = vld [vmem:[%s22169_s11 + $0x484] ss:$16 sps:$4 sm:$0xff]  }
 0x9db   : > { %9892 = vmatprep.subr.bf16.mxu0 %v16856_v1  ;;  %v16935_v1 = vld [vmem:[%s22169_s11 + $0x480] ss:$16 sps:$4 sm:$0xff]  }
 0x9de   : > { %9893 = vmatpush1.bf16.msra.mxu0 %v16854_v28  ;;  %v16940_v28 = vld [vmem:[%s22169_s11 + $0x4a4] ss:$16 sps:$4 sm:$0xff]  }
 0x9df   : > { %9894 = vmatprep.subr.bf16.mxu0 %v16859_v22  ;;  %v16938_v22 = vld [vmem:[%s22169_s11 + $0x4a0] ss:$16 sps:$4 sm:$0xff]  }
 0x9e2   : > { %9895 = vmatpush1.bf16.msra.mxu0 %v16857_v3  ;;  %v16943_v3 = vld [vmem:[%s22169_s11 + $0x4c4] ss:$16 sps:$4 sm:$0xff]  }
 0x9e3   : > { %9896 = vmatprep.subr.bf16.mxu0 %v16862_v9  ;;  %v16941_v9 = vld [vmem:[%s22169_s11 + $0x4c0] ss:$16 sps:$4 sm:$0xff]  }
 0x9e6   : > { %9897 = vmatpush1.bf16.msra.mxu0 %v16860_v32  ;;  %v16946_v32 = vld [vmem:[%s22169_s11 + $0x4e4] ss:$16 sps:$4 sm:$0xff]  }
 0x9e7   : > { %9898 = vmatprep.subr.bf16.mxu0 %v16865_v24  ;;  %v16944_v24 = vld [vmem:[%s22169_s11 + $0x4e0] ss:$16 sps:$4 sm:$0xff]  }
 0x9ea   : > { %9899 = vmatpush1.bf16.msra.mxu0 %v16863_v48  ;;  %v16949_v48 = vld [vmem:[%s22169_s11 + $0x504] ss:$16 sps:$4 sm:$0xff]  }
 0x9eb   : > { %9900 = vmatprep.subr.bf16.mxu0 %v16868_v40  ;;  %v16947_v40 = vld [vmem:[%s22169_s11 + $0x500] ss:$16 sps:$4 sm:$0xff]  }
 0x9ee   : > { %9901 = vmatpush1.bf16.msra.mxu0 %v16866_v57  ;;  %v16952_v57 = vld [vmem:[%s22169_s11 + $0x524] ss:$16 sps:$4 sm:$0xff]  }
 0x9ef   : > { %9902 = vmatprep.subr.bf16.mxu0 %v16871_v36  ;;  %v16950_v36 = vld [vmem:[%s22169_s11 + $0x520] ss:$16 sps:$4 sm:$0xff]  }
 0x9f2   : > { %9903 = vmatpush1.bf16.msra.mxu0 %v16869_v23  ;;  %v16955_v23 = vld [vmem:[%s22169_s11 + $0x544] ss:$16 sps:$4 sm:$0xff]  }
 0x9f3   : > { %9904 = vmatprep.subr.bf16.mxu0 %v16874_v46  ;;  %v16953_v46 = vld [vmem:[%s22169_s11 + $0x540] ss:$16 sps:$4 sm:$0xff]  }
 0x9f6   : > { %9905 = vmatpush1.bf16.msra.mxu0 %v16872_v5  ;;  %v16958_v5 = vld [vmem:[%s22169_s11 + $0x564] ss:$16 sps:$4 sm:$0xff]  }
 0x9f7   : > { %9917 = vmatprep.subr.bf16.mxu0 %v16877_v21  ;;  %v16956_v21 = vld [vmem:[%s22169_s11 + $0x560] ss:$16 sps:$4 sm:$0xff]  }
 0x9f9   : > { %9907 = vmatmul.mubr.bf16.vlgmr.msra.gmra.mrb[56].mxu0 %v20081_v38 }
 0x9fa   : > { %9918 = vmatpush1.bf16.msra.mxu0 %v16875_v0  ;;  %9949 = vmatprep.mubr.bf16.mxu0 %v20083_v37  ;;  %v16884_v37 = vld [vmem:[%s22169_s11 + $0x68] ss:$16 sps:$4 sm:$0xff]   ;;  %v16961_v0 = vld [vmem:[%s22169_s11 + $0x584] ss:$16 sps:$4 sm:$0xff]  }
 0x9fb   : > { %9919 = vmatprep.subr.bf16.mxu0 %v16880_v18  ;;  %v16959_v18 = vld [vmem:[%s22169_s11 + $0x580] ss:$16 sps:$4 sm:$0xff]  }
 0x9fe   : > { %9920 = vmatpush1.bf16.msra.mxu0 %v16878_v45  ;;  %v16964_v45 = vld [vmem:[%s22169_s11 + $0x5a4] ss:$16 sps:$4 sm:$0xff]  }
 0x9ff   : > { %9921 = vmatprep.subr.bf16.mxu0 %v16883_v27  ;;  %v16962_v27 = vld [vmem:[%s22169_s11 + $0x5a0] ss:$16 sps:$4 sm:$0xff]  }
 0xa02   : > { %9922 = vmatpush1.bf16.msra.mxu0 %v16881_v43  ;;  %v16967_v43 = vld [vmem:[%s22169_s11 + $0x5c4] ss:$16 sps:$4 sm:$0xff]  }
 0xa03   : > { %9923 = vmatprep.subr.bf16.mxu0 %v16886_v12  ;;  %v16965_v12 = vld [vmem:[%s22169_s11 + $0x5c0] ss:$16 sps:$4 sm:$0xff]  }
 0xa06   : > { %9924 = vmatpush1.bf16.msra.mxu0 %v16884_v37  ;;  %v16970_v37 = vld [vmem:[%s22169_s11 + $0x5e4] ss:$16 sps:$4 sm:$0xff]  }
 0xa07   : > { %9925 = vmatprep.subr.bf16.mxu0 %v16889_v39  ;;  %v16968_v39 = vld [vmem:[%s22169_s11 + $0x5e0] ss:$16 sps:$4 sm:$0xff]  }
 0xa0a   : > { %9926 = vmatpush1.bf16.msra.mxu0 %v16887_v34  ;;  %v16973_v34 = vld [vmem:[%s22169_s11 + $0x40c] ss:$16 sps:$4 sm:$0xff]  }
 0xa0b   : > { %9927 = vmatprep.subr.bf16.mxu0 %v16892_v63  ;;  %v16971_v63 = vld [vmem:[%s22169_s11 + $0x408] ss:$16 sps:$4 sm:$0xff]  }
 0xa0e   : > { %9928 = vmatpush1.bf16.msra.mxu0 %v16890_v42  ;;  %v16976_v42 = vld [vmem:[%s22169_s11 + $0x42c] ss:$16 sps:$4 sm:$0xff]  }
 0xa0f   : > { %9929 = vmatprep.subr.bf16.mxu0 %v16895_v54  ;;  %v16974_v54 = vld [vmem:[%s22169_s11 + $0x428] ss:$16 sps:$4 sm:$0xff]  }
 0xa12   : > { %9930 = vmatpush1.bf16.msra.mxu0 %v16893_v25  ;;  %v16979_v25 = vld [vmem:[%s22169_s11 + $0x44c] ss:$16 sps:$4 sm:$0xff]  }
 0xa13   : > { %9931 = vmatprep.subr.bf16.mxu0 %v16898_v44  ;;  %v16977_v44 = vld [vmem:[%s22169_s11 + $0x448] ss:$16 sps:$4 sm:$0xff]  }
 0xa16   : > { %9932 = vmatpush1.bf16.msra.mxu0 %v16896_v16  ;;  %v16982_v16 = vld [vmem:[%s22169_s11 + $0x46c] ss:$16 sps:$4 sm:$0xff]  }
 0xa17   : > { %9933 = vmatprep.subr.bf16.mxu0 %v16901_v8  ;;  %v16985_v8 = vld [vmem:[%s22169_s11 + $0x48c] ss:$16 sps:$4 sm:$0xff]  }
 0xa1a   : > { %9934 = vmatpush1.bf16.msra.mxu0 %v16899_v15  ;;  %v16983_v15 = vld [vmem:[%s22169_s11 + $0x488] ss:$16 sps:$4 sm:$0xff]  }
 0xa1b   : > { %9935 = vmatprep.subr.bf16.mxu0 %v16904_v49  ;;  %v16988_v49 = vld [vmem:[%s22169_s11 + $0x4ac] ss:$16 sps:$4 sm:$0xff]  }
 0xa1e   : > { %9936 = vmatpush1.bf16.msra.mxu0 %v16902_v17  ;;  %v16986_v17 = vld [vmem:[%s22169_s11 + $0x4a8] ss:$16 sps:$4 sm:$0xff]  }
 0xa1f   : > { %9937 = vmatprep.subr.bf16.mxu0 %v16907_v4  ;;  %v16991_v4 = vld [vmem:[%s22169_s11 + $0x4cc] ss:$16 sps:$4 sm:$0xff]  }
 0xa22   : > { %9938 = vmatpush1.bf16.msra.mxu0 %v16905_v11  ;;  %v16989_v11 = vld [vmem:[%s22169_s11 + $0x4c8] ss:$16 sps:$4 sm:$0xff]  }
 0xa23   : > { %9939 = vmatprep.subr.bf16.mxu0 %v16910_v62  ;;  %v16994_v62 = vld [vmem:[%s22169_s11 + $0x4ec] ss:$16 sps:$4 sm:$0xff]  }
 0xa26   : > { %9940 = vmatpush1.bf16.msra.mxu0 %v16908_v31  ;;  %v16992_v31 = vld [vmem:[%s22169_s11 + $0x4e8] ss:$16 sps:$4 sm:$0xff]  }
 0xa27   : > { %9941 = vmatprep.subr.bf16.mxu0 %v16913_v7  ;;  %v16997_v7 = vld [vmem:[%s22169_s11 + $0x50c] ss:$16 sps:$4 sm:$0xff]  }
 0xa2a   : > { %9942 = vmatpush1.bf16.msra.mxu0 %v16911_v30  ;;  %v16995_v30 = vld [vmem:[%s22169_s11 + $0x508] ss:$16 sps:$4 sm:$0xff]  }
 0xa2b   : > { %9943 = vmatprep.subr.bf16.mxu0 %v16916_v14  ;;  %v17000_v14 = vld [vmem:[%s22169_s11 + $0x52c] ss:$16 sps:$4 sm:$0xff]  }
 0xa2e   : > { %9944 = vmatpush1.bf16.msra.mxu0 %v16914_v33  ;;  %v16998_v33 = vld [vmem:[%s22169_s11 + $0x528] ss:$16 sps:$4 sm:$0xff]  }
 0xa2f   : > { %9945 = vmatprep.subr.bf16.mxu0 %v16919_v47  ;;  %v17003_v47 = vld [vmem:[%s22169_s11 + $0x54c] ss:$16 sps:$4 sm:$0xff]  }
 0xa32   : > { %9946 = vmatpush1.bf16.msra.mxu0 %v16917_v50  ;;  %v17001_v50 = vld [vmem:[%s22169_s11 + $0x548] ss:$16 sps:$4 sm:$0xff]  }
 0xa33   : > { %9947 = vmatprep.subr.bf16.mxu0 %v16922_v60  ;;  %v17006_v60 = vld [vmem:[%s22169_s11 + $0x56c] ss:$16 sps:$4 sm:$0xff]  }
 0xa36   : > { %9948 = vmatpush1.bf16.msra.mxu0 %v16920_v59  ;;  %v17004_v59 = vld [vmem:[%s22169_s11 + $0x568] ss:$16 sps:$4 sm:$0xff]  }
 0xa37   : > { %10351 = vmatprep.subr.bf16.mxu0 %v16925_v61  ;;  %v17009_v61 = vld [vmem:[%s22169_s11 + $0x58c] ss:$16 sps:$4 sm:$0xff]  }
 0xa39   : > { %9950 = vmatmul.mubr.bf16.vlgmr.msra.gmra.mrb[60].mxu0 %v20081_v38  ;;  %v16934_v38 = vld [vmem:[%s22169_s11 + $0x464] ss:$16 sps:$4 sm:$0xff]  }
 0xa3a   : > { %10352 = vmatpush1.bf16.msra.mxu0 %v16923_v51  ;;  %10383 = vmatprep.mubr.bf16.mxu0 %v20095_v20  ;;  %v17007_v51 = vld [vmem:[%s22169_s11 + $0x588] ss:$16 sps:$4 sm:$0xff]  }
 0xa3b   : > { %10353 = vmatprep.subr.bf16.mxu0 %v16928_v10  ;;  %v17012_v10 = vld [vmem:[%s22169_s11 + $0x5ac] ss:$16 sps:$4 sm:$0xff]  }
 0xa3e   : > { %10354 = vmatpush1.bf16.msra.mxu0 %v16926_v52  ;;  %v17010_v52 = vld [vmem:[%s22169_s11 + $0x5a8] ss:$16 sps:$4 sm:$0xff]  }
 0xa3f   : > { %10355 = vmatprep.subr.bf16.mxu0 %v16931_v55  ;;  %v17015_v55 = vld [vmem:[%s22169_s11 + $0x5cc] ss:$16 sps:$4 sm:$0xff]  }
 0xa42   : > { %10356 = vmatpush1.bf16.msra.mxu0 %v16929_v58  ;;  %v17013_v58 = vld [vmem:[%s22169_s11 + $0x5c8] ss:$16 sps:$4 sm:$0xff]  }
 0xa43   : > { %10357 = vmatprep.subr.bf16.mxu0 %v16934_v38  ;;  %v17018_v38 = vld [vmem:[%s22169_s11 + $0x5ec] ss:$16 sps:$4 sm:$0xff]  }
 0xa46   : > { %10358 = vmatpush1.bf16.msra.mxu0 %v16932_v13  ;;  %v17016_v13 = vld [vmem:[%s22169_s11 + $0x5e8] ss:$16 sps:$4 sm:$0xff]  }
 0xa47   : > { %10359 = vmatprep.subr.bf16.mxu0 %v16937_v6  ;;  %v17021_v6 = vld [vmem:[%s22169_s11 + $0x604] ss:$16 sps:$4 sm:$0xff]  }
 0xa4a   : > { %10360 = vmatpush1.bf16.msra.mxu0 %v16935_v1  ;;  %v17019_v1 = vld [vmem:[%s22169_s11 + $0x600] ss:$16 sps:$4 sm:$0xff]  }
 0xa4b   : > { %10361 = vmatprep.subr.bf16.mxu0 %v16940_v28  ;;  %v17024_v28 = vld [vmem:[%s22169_s11 + $0x624] ss:$16 sps:$4 sm:$0xff]  }
 0xa4e   : > { %10362 = vmatpush1.bf16.msra.mxu0 %v16938_v22  ;;  %v17022_v22 = vld [vmem:[%s22169_s11 + $0x620] ss:$16 sps:$4 sm:$0xff]  }
 0xa4f   : > { %10363 = vmatprep.subr.bf16.mxu0 %v16943_v3  ;;  %v17027_v3 = vld [vmem:[%s22169_s11 + $0x644] ss:$16 sps:$4 sm:$0xff]  }
 0xa52   : > { %10364 = vmatpush1.bf16.msra.mxu0 %v16941_v9  ;;  %v17025_v9 = vld [vmem:[%s22169_s11 + $0x640] ss:$16 sps:$4 sm:$0xff]  }
 0xa53   : > { %10365 = vmatprep.subr.bf16.mxu0 %v16946_v32  ;;  %v17028_v32 = vld [vmem:[%s22169_s11 + $0x660] ss:$16 sps:$4 sm:$0xff]  }
 0xa56   : > { %10366 = vmatpush1.bf16.msra.mxu0 %v16944_v24  ;;  %v17033_v24 = vld [vmem:[%s22169_s11 + $0x684] ss:$16 sps:$4 sm:$0xff]  }
 0xa57   : > { %10367 = vmatprep.subr.bf16.mxu0 %v16949_v48  ;;  %v17031_v48 = vld [vmem:[%s22169_s11 + $0x680] ss:$16 sps:$4 sm:$0xff]  }
 0xa5a   : > { %10368 = vmatpush1.bf16.msra.mxu0 %v16947_v40  ;;  %v17036_v40 = vld [vmem:[%s22169_s11 + $0x6a4] ss:$16 sps:$4 sm:$0xff]  }
 0xa5b   : > { %10369 = vmatprep.subr.bf16.mxu0 %v16952_v57  ;;  %v17034_v57 = vld [vmem:[%s22169_s11 + $0x6a0] ss:$16 sps:$4 sm:$0xff]  }
 0xa5e   : > { %10370 = vmatpush1.bf16.msra.mxu0 %v16950_v36  ;;  %v17039_v36 = vld [vmem:[%s22169_s11 + $0x6c4] ss:$16 sps:$4 sm:$0xff]  }
 0xa5f   : > { %10371 = vmatprep.subr.bf16.mxu0 %v16955_v23  ;;  %v17037_v23 = vld [vmem:[%s22169_s11 + $0x6c0] ss:$16 sps:$4 sm:$0xff]  }
 0xa62   : > { %10372 = vmatpush1.bf16.msra.mxu0 %v16953_v46  ;;  %v17042_v46 = vld [vmem:[%s22169_s11 + $0x6e4] ss:$16 sps:$4 sm:$0xff]  }
 0xa63   : > { %10373 = vmatprep.subr.bf16.mxu0 %v16958_v5  ;;  %v17040_v5 = vld [vmem:[%s22169_s11 + $0x6e0] ss:$16 sps:$4 sm:$0xff]  }
 0xa66   : > { %10374 = vmatpush1.bf16.msra.mxu0 %v16956_v21  ;;  %v17045_v21 = vld [vmem:[%s22169_s11 + $0x704] ss:$16 sps:$4 sm:$0xff]  }
 0xa67   : > { %10375 = vmatprep.subr.bf16.mxu0 %v16961_v0  ;;  %v17043_v0 = vld [vmem:[%s22169_s11 + $0x700] ss:$16 sps:$4 sm:$0xff]  }
 0xa6a   : > { %10376 = vmatpush1.bf16.msra.mxu0 %v16959_v18  ;;  %v17048_v18 = vld [vmem:[%s22169_s11 + $0x724] ss:$16 sps:$4 sm:$0xff]  }
 0xa6b   : > { %10377 = vmatprep.subr.bf16.mxu0 %v16964_v45  ;;  %v17046_v45 = vld [vmem:[%s22169_s11 + $0x720] ss:$16 sps:$4 sm:$0xff]  }
 0xa6e   : > { %10378 = vmatpush1.bf16.msra.mxu0 %v16962_v27  ;;  %v17051_v27 = vld [vmem:[%s22169_s11 + $0x744] ss:$16 sps:$4 sm:$0xff]  }
 0xa6f   : > { %10379 = vmatprep.subr.bf16.mxu0 %v16967_v43  ;;  %v17049_v43 = vld [vmem:[%s22169_s11 + $0x740] ss:$16 sps:$4 sm:$0xff]  }
 0xa72   : > { %10380 = vmatpush1.bf16.msra.mxu0 %v16965_v12  ;;  %v17054_v12 = vld [vmem:[%s22169_s11 + $0x764] ss:$16 sps:$4 sm:$0xff]  }
 0xa73   : > { %10381 = vmatprep.subr.bf16.mxu0 %v16970_v37  ;;  %v17052_v37 = vld [vmem:[%s22169_s11 + $0x760] ss:$16 sps:$4 sm:$0xff]  }
 0xa76   : > { %10382 = vmatpush1.bf16.msra.mxu0 %v16968_v39  ;;  %v17057_v39 = vld [vmem:[%s22169_s11 + $0x784] ss:$16 sps:$4 sm:$0xff]  }
 0xa77   : > { %10394 = vmatprep.subr.bf16.mxu0 %v16973_v34  ;;  %v17055_v34 = vld [vmem:[%s22169_s11 + $0x780] ss:$16 sps:$4 sm:$0xff]  }
 0xa79   : > { %10384 = vmatmul.mubr.bf16.vlgmr.msra.gmra.mrb[56].mxu0 %v20090_v26 }
 0xa7a   : > { %10395 = vmatpush1.bf16.msra.mxu0 %v16971_v63  ;;  %10426 = vmatprep.mubr.bf16.mxu0 %v20095_v20  ;;  %v16980_v20 = vld [vmem:[%s22169_s11 + $0x468] ss:$16 sps:$4 sm:$0xff]   ;;  %v17060_v63 = vld [vmem:[%s22169_s11 + $0x7a4] ss:$16 sps:$4 sm:$0xff]  }
 0xa7b   : > { %10396 = vmatprep.subr.bf16.mxu0 %v16976_v42  ;;  %v17058_v42 = vld [vmem:[%s22169_s11 + $0x7a0] ss:$16 sps:$4 sm:$0xff]  }
 0xa7e   : > { %10397 = vmatpush1.bf16.msra.mxu0 %v16974_v54  ;;  %v17063_v54 = vld [vmem:[%s22169_s11 + $0x7c4] ss:$16 sps:$4 sm:$0xff]  }
 0xa7f   : > { %10398 = vmatprep.subr.bf16.mxu0 %v16979_v25  ;;  %v17061_v25 = vld [vmem:[%s22169_s11 + $0x7c0] ss:$16 sps:$4 sm:$0xff]  }
 0xa82   : > { %10399 = vmatpush1.bf16.msra.mxu0 %v16977_v44  ;;  %v17066_v44 = vld [vmem:[%s22169_s11 + $0x7e4] ss:$16 sps:$4 sm:$0xff]  }
 0xa83   : > { %10400 = vmatprep.subr.bf16.mxu0 %v16982_v16  ;;  %v17064_v16 = vld [vmem:[%s22169_s11 + $0x7e0] ss:$16 sps:$4 sm:$0xff]  }
 0xa86   : > { %10401 = vmatpush1.bf16.msra.mxu0 %v16980_v20  ;;  %v17069_v20 = vld [vmem:[%s22169_s11 + $0x60c] ss:$16 sps:$4 sm:$0xff]  }
 0xa87   : > { %10402 = vmatprep.subr.bf16.mxu0 %v16985_v8  ;;  %v17067_v8 = vld [vmem:[%s22169_s11 + $0x608] ss:$16 sps:$4 sm:$0xff]  }
 0xa8a   : > { %10403 = vmatpush1.bf16.msra.mxu0 %v16983_v15  ;;  %v17072_v15 = vld [vmem:[%s22169_s11 + $0x62c] ss:$16 sps:$4 sm:$0xff]  }
 0xa8b   : > { %10404 = vmatprep.subr.bf16.mxu0 %v16988_v49  ;;  %v17070_v49 = vld [vmem:[%s22169_s11 + $0x628] ss:$16 sps:$4 sm:$0xff]  }
 0xa8e   : > { %10405 = vmatpush1.bf16.msra.mxu0 %v16986_v17  ;;  %v17075_v17 = vld [vmem:[%s22169_s11 + $0x64c] ss:$16 sps:$4 sm:$0xff]  }
 0xa8f   : > { %10406 = vmatprep.subr.bf16.mxu0 %v16991_v4  ;;  %v17073_v4 = vld [vmem:[%s22169_s11 + $0x648] ss:$16 sps:$4 sm:$0xff]  }
 0xa92   : > { %10407 = vmatpush1.bf16.msra.mxu0 %v16989_v11  ;;  %v17078_v11 = vld [vmem:[%s22169_s11 + $0x66c] ss:$16 sps:$4 sm:$0xff]  }
 0xa93   : > { %10408 = vmatprep.subr.bf16.mxu0 %v16994_v62  ;;  %v17081_v62 = vld [vmem:[%s22169_s11 + $0x68c] ss:$16 sps:$4 sm:$0xff]  }
 0xa96   : > { %10409 = vmatpush1.bf16.msra.mxu0 %v16992_v31  ;;  %v17079_v31 = vld [vmem:[%s22169_s11 + $0x688] ss:$16 sps:$4 sm:$0xff]  }
 0xa97   : > { %10410 = vmatprep.subr.bf16.mxu0 %v16997_v7  ;;  %v17084_v7 = vld [vmem:[%s22169_s11 + $0x6ac] ss:$16 sps:$4 sm:$0xff]  }
 0xa9a   : > { %10411 = vmatpush1.bf16.msra.mxu0 %v16995_v30  ;;  %v17082_v30 = vld [vmem:[%s22169_s11 + $0x6a8] ss:$16 sps:$4 sm:$0xff]  }
 0xa9b   : > { %10412 = vmatprep.subr.bf16.mxu0 %v17000_v14  ;;  %v17087_v14 = vld [vmem:[%s22169_s11 + $0x6cc] ss:$16 sps:$4 sm:$0xff]  }
 0xa9e   : > { %10413 = vmatpush1.bf16.msra.mxu0 %v16998_v33  ;;  %v17085_v33 = vld [vmem:[%s22169_s11 + $0x6c8] ss:$16 sps:$4 sm:$0xff]  }
 0xa9f   : > { %10414 = vmatprep.subr.bf16.mxu0 %v17003_v47  ;;  %v17090_v47 = vld [vmem:[%s22169_s11 + $0x6ec] ss:$16 sps:$4 sm:$0xff]  }
 0xaa2   : > { %10415 = vmatpush1.bf16.msra.mxu0 %v17001_v50  ;;  %v17088_v50 = vld [vmem:[%s22169_s11 + $0x6e8] ss:$16 sps:$4 sm:$0xff]  }
 0xaa3   : > { %10416 = vmatprep.subr.bf16.mxu0 %v17006_v60  ;;  %v17093_v60 = vld [vmem:[%s22169_s11 + $0x70c] ss:$16 sps:$4 sm:$0xff]  }
 0xaa6   : > { %10417 = vmatpush1.bf16.msra.mxu0 %v17004_v59  ;;  %v17091_v59 = vld [vmem:[%s22169_s11 + $0x708] ss:$16 sps:$4 sm:$0xff]  }
 0xaa7   : > { %10418 = vmatprep.subr.bf16.mxu0 %v17009_v61  ;;  %v17096_v61 = vld [vmem:[%s22169_s11 + $0x72c] ss:$16 sps:$4 sm:$0xff]  }
 0xaaa   : > { %10419 = vmatpush1.bf16.msra.mxu0 %v17007_v51  ;;  %v17094_v51 = vld [vmem:[%s22169_s11 + $0x728] ss:$16 sps:$4 sm:$0xff]  }
 0xaab   : > { %10420 = vmatprep.subr.bf16.mxu0 %v17012_v10  ;;  %v17099_v10 = vld [vmem:[%s22169_s11 + $0x74c] ss:$16 sps:$4 sm:$0xff]  }
 0xaae   : > { %10421 = vmatpush1.bf16.msra.mxu0 %v17010_v52  ;;  %v17097_v52 = vld [vmem:[%s22169_s11 + $0x748] ss:$16 sps:$4 sm:$0xff]  }
 0xaaf   : > { %10422 = vmatprep.subr.bf16.mxu0 %v17015_v55  ;;  %v17102_v55 = vld [vmem:[%s22169_s11 + $0x76c] ss:$16 sps:$4 sm:$0xff]  }
 0xab2   : > { %10423 = vmatpush1.bf16.msra.mxu0 %v17013_v58  ;;  %v17100_v58 = vld [vmem:[%s22169_s11 + $0x768] ss:$16 sps:$4 sm:$0xff]  }
 0xab3   : > { %10424 = vmatprep.subr.bf16.mxu0 %v17018_v38  ;;  %v17105_v38 = vld [vmem:[%s22169_s11 + $0x78c] ss:$16 sps:$4 sm:$0xff]  }
 0xab6   : > { %10425 = vmatpush1.bf16.msra.mxu0 %v17016_v13  ;;  %v17103_v13 = vld [vmem:[%s22169_s11 + $0x788] ss:$16 sps:$4 sm:$0xff]  }
 0xab7   : > { %10836 = vmatprep.subr.bf16.mxu0 %v17021_v6  ;;  %v17108_v6 = vld [vmem:[%s22169_s11 + $0x7ac] ss:$16 sps:$4 sm:$0xff]  }
 0xab9   : > { %10427 = vmatmul.mubr.bf16.vlgmr.msra.gmra.mrb[60].mxu0 %v20090_v26  ;;  %v17030_v26 = vld [vmem:[%s22169_s11 + $0x664] ss:$16 sps:$4 sm:$0xff]  }
 0xaba   : > { %10837 = vmatpush1.bf16.msra.mxu0 %v17019_v1  ;;  %10868 = vmatprep.mubr.bf16.mxu0 %v20106_v35  ;;  %v17106_v1 = vld [vmem:[%s22169_s11 + $0x7a8] ss:$16 sps:$4 sm:$0xff]  }
 0xabb   : > { %10838 = vmatprep.subr.bf16.mxu0 %v17024_v28  ;;  %v17111_v28 = vld [vmem:[%s22169_s11 + $0x7cc] ss:$16 sps:$4 sm:$0xff]  }
 0xabe   : > { %10839 = vmatpush1.bf16.msra.mxu0 %v17022_v22  ;;  %v17109_v22 = vld [vmem:[%s22169_s11 + $0x7c8] ss:$16 sps:$4 sm:$0xff]  }
 0xabf   : > { %10840 = vmatprep.subr.bf16.mxu0 %v17027_v3  ;;  %v17114_v3 = vld [vmem:[%s22169_s11 + $0x7ec] ss:$16 sps:$4 sm:$0xff]  }
 0xac2   : > { %10841 = vmatpush1.bf16.msra.mxu0 %v17025_v9  ;;  %v17112_v9 = vld [vmem:[%s22169_s11 + $0x7e8] ss:$16 sps:$4 sm:$0xff]  }
 0xac3   : > { %10842 = vmatprep.subr.bf16.mxu0 %v17030_v26  ;;  %v17117_v26 = vld [vmem:[%s22169_s11 + $0x804] ss:$16 sps:$4 sm:$0xff]  }
 0xac6   : > { %10843 = vmatpush1.bf16.msra.mxu0 %v17028_v32  ;;  %v17115_v32 = vld [vmem:[%s22169_s11 + $0x800] ss:$16 sps:$4 sm:$0xff]  }
 0xac7   : > { %10844 = vmatprep.subr.bf16.mxu0 %v17033_v24  ;;  %v17120_v24 = vld [vmem:[%s22169_s11 + $0x824] ss:$16 sps:$4 sm:$0xff]  }
 0xaca   : > { %10845 = vmatpush1.bf16.msra.mxu0 %v17031_v48  ;;  %v17118_v48 = vld [vmem:[%s22169_s11 + $0x820] ss:$16 sps:$4 sm:$0xff]  }
 0xacb   : > { %10846 = vmatprep.subr.bf16.mxu0 %v17036_v40  ;;  %v17123_v40 = vld [vmem:[%s22169_s11 + $0x844] ss:$16 sps:$4 sm:$0xff]  }
 0xace   : > { %10847 = vmatpush1.bf16.msra.mxu0 %v17034_v57  ;;  %v11493_v57 = vld [vmem:[%s22171_s13 + $0x80] sm:$0xff] }
 0xacf   : > { %10848 = vmatprep.subr.bf16.mxu0 %v17039_v36  ;;  %v11494_v36 = vld [vmem:[%s22171_s13 + $0x88] sm:$0xff] }
 0xad2   : > { %10849 = vmatpush1.bf16.msra.mxu0 %v17037_v23  ;;  %v11477_v23 = vld [vmem:[%s22171_s13] sm:$0xff] }
 0xad3   : > { %10850 = vmatprep.subr.bf16.mxu0 %v17042_v46  ;;  %v11600_v46 = vand.u32 4294901760, %v11494_v36 }
 0xad6   : > { %10851 = vmatpush1.bf16.msra.mxu0 %v17040_v5  ;;  %v11478_v5 = vld [vmem:[%s22171_s13 + $0x8] sm:$0xff] }
 0xad7   : > { %10852 = vmatprep.subr.bf16.mxu0 %v17045_v21  ;;  %v11549_v21 = vand.u32 4294901760, %v11477_v23 }
 0xada   : > { %10853 = vmatpush1.bf16.msra.mxu0 %v17043_v0  ;;  %v11495_v0 = vld [vmem:[%s22171_s13 + $0x90] sm:$0xff] }
 0xadb   : > { %10854 = vmatprep.subr.bf16.mxu0 %v17048_v18  ;;  %v11496_v18 = vld [vmem:[%s22171_s13 + $0x98] sm:$0xff] }
 0xade   : > { %10855 = vmatpush1.bf16.msra.mxu0 %v17046_v45  ;;  %v11552_v45 = vand.u32 4294901760, %v11478_v5 }
 0xadf   : > { %10856 = vmatprep.subr.bf16.mxu0 %v17051_v27  ;;  %v11603_v27 = vand.u32 4294901760, %v11495_v0 }
 0xae2   : > { %10857 = vmatpush1.bf16.msra.mxu0 %v17049_v43  ;;  %v11606_v43 = vand.u32 4294901760, %v11496_v18 }
 0xae3   : > { %10858 = vmatprep.subr.bf16.mxu0 %v17054_v12  ;;  %v11479_v12 = vld [vmem:[%s22171_s13 + $0x10] sm:$0xff] }
 0xae6   : > { %10859 = vmatpush1.bf16.msra.mxu0 %v17052_v37  ;;  %v11480_v37 = vld [vmem:[%s22171_s13 + $0x18] sm:$0xff] }
 0xae7   : > { %10860 = vmatprep.subr.bf16.mxu0 %v17057_v39  ;;  %v11497_v39 = vld [vmem:[%s22171_s13 + $0xa0] sm:$0xff] }
 0xaea   : > { %10861 = vmatpush1.bf16.msra.mxu0 %v17055_v34 }
 0xaeb   : > { %10862 = vmatprep.subr.bf16.mxu0 %v17060_v63 }
 0xaee   : > { %10863 = vmatpush1.bf16.msra.mxu0 %v17058_v42  ;;  %v20829_v42 = vsub.f32 %v11494_v36, %v11600_v46  ;;  %v17148_v36 = vld [vmem:[%s22169_s11 + $0x960] ss:$16 sps:$4 sm:$0xff]  }
 0xaef   : > { %10864 = vmatprep.subr.bf16.mxu0 %v17063_v54  ;;  %v20831_v54 = vsub.f32 %v11477_v23, %v11549_v21  ;;  %v17153_v23 = vld [vmem:[%s22169_s11 + $0x984] ss:$16 sps:$4 sm:$0xff]  }
 0xaf0   : > { %22430 = vst [vmem:[#allocation12_spill] sm:$0xff] %v20829_v42 }
 0xaf2   : > { %10865 = vmatpush1.bf16.msra.mxu0 %v17061_v25  ;;  %v11498_v25 = vld [vmem:[%s22171_s13 + $0xa8] sm:$0xff] }
 0xaf3   : > { %10866 = vmatprep.subr.bf16.mxu0 %v17066_v44  ;;  %v11481_v44 = vld [vmem:[%s22171_s13 + $0x20] sm:$0xff] }
 0xaf6   : > { %10867 = vmatpush1.bf16.msra.mxu0 %v17064_v16  ;;  %v11482_v16 = vld [vmem:[%s22171_s13 + $0x28] sm:$0xff] }
 0xaf7   : > { %10879 = vmatprep.subr.bf16.mxu0 %v17069_v20  ;;  %v20842_v20 = vpack.c.bf16 %v11552_v45, %v11549_v21  ;;  %v17159_v21 = vld [vmem:[%s22169_s11 + $0x9c4] ss:$16 sps:$4 sm:$0xff]  }
 0xaf9   : > { %10869 = vmatmul.mubr.bf16.vlgmr.msra.gmra.mrb[56].mxu0 %v20104_v53  ;;  %22431 = vst [vmem:[#allocation13_spill] sm:$0xff] %v20842_v20 }
 0xafa   : > { %10880 = vmatpush1.bf16.msra.mxu0 %v17067_v8  ;;  %10911 = vmatprep.mubr.bf16.mxu0 %v20106_v35  ;;  %v17076_v35 = vld [vmem:[%s22169_s11 + $0x668] ss:$16 sps:$4 sm:$0xff]   ;;  %v20844_v8 = vsub.f32 %v11478_v5, %v11552_v45  ;;  %v17154_v5 = vld [vmem:[%s22169_s11 + $0x9a0] ss:$16 sps:$4 sm:$0xff]  }
 0xafb   : > { %10881 = vmatprep.subr.bf16.mxu0 %v17072_v15  ;;  %v20846_v15 = vpack.c.bf16 %v11606_v43, %v11603_v27  ;;  %v17160_v45 = vld [vmem:[%s22169_s11 + $0x9e0] ss:$16 sps:$4 sm:$0xff]  }
 0xafd   : > { %22432 = vst [vmem:[#allocation14_spill] sm:$0xff] %v20846_v15 }
 0xafe   : > { %10882 = vmatpush1.bf16.msra.mxu0 %v17070_v49  ;;  %v20848_v49 = vsub.f32 %v11495_v0, %v11603_v27  ;;  %v17157_v0 = vld [vmem:[%s22169_s11 + $0x9c0] ss:$16 sps:$4 sm:$0xff]   ;;  %v17165_v27 = vld [vmem:[%s22169_s11 + $0x80c] ss:$16 sps:$4 sm:$0xff]  }
 0xaff   : > { %10883 = vmatprep.subr.bf16.mxu0 %v17075_v17  ;;  %v17121_v17 = vld [vmem:[%s22169_s11 + $0x840] ss:$16 sps:$4 sm:$0xff]  }
 0xb02   : > { %10884 = vmatpush1.bf16.msra.mxu0 %v17073_v4  ;;  %v20854_v4 = vsub.f32 %v11496_v18, %v11606_v43  ;;  %v17162_v18 = vld [vmem:[%s22169_s11 + $0x9e4] ss:$16 sps:$4 sm:$0xff]   ;;  %v17163_v43 = vld [vmem:[%s22169_s11 + $0x808] ss:$16 sps:$4 sm:$0xff]  }
 0xb03   : > { %10885 = vmatprep.subr.bf16.mxu0 %v17078_v11  ;;  %v11555_v11 = vand.u32 4294901760, %v11479_v12 }
 0xb06   : > { %10886 = vmatpush1.bf16.msra.mxu0 %v17076_v35  ;;  %v11558_v35 = vand.u32 4294901760, %v11480_v37 }
 0xb07   : > { %10887 = vmatprep.subr.bf16.mxu0 %v17081_v62  ;;  %v11609_v62 = vand.u32 4294901760, %v11497_v39 }
 0xb0a   : > { %10888 = vmatpush1.bf16.msra.mxu0 %v17079_v31  ;;  %v17126_v31 = vld [vmem:[%s22169_s11 + $0x864] ss:$16 sps:$4 sm:$0xff]  }
 0xb0b   : > { %10889 = vmatprep.subr.bf16.mxu0 %v17084_v7  ;;  %v11612_v7 = vand.u32 4294901760, %v11498_v25 }
 0xb0e   : > { %10890 = vmatpush1.bf16.msra.mxu0 %v17082_v30  ;;  %v11561_v30 = vand.u32 4294901760, %v11481_v44 }
 0xb0f   : > { %10891 = vmatprep.subr.bf16.mxu0 %v17087_v14  ;;  %v11564_v14 = vand.u32 4294901760, %v11482_v16 }
 0xb12   : > { %10892 = vmatpush1.bf16.msra.mxu0 %v17085_v33  ;;  %v20861_v33 = vpack.c.bf16 %v11558_v35, %v11555_v11 }
 0xb13   : > { %10893 = vmatprep.subr.bf16.mxu0 %v17090_v47  ;;  %v20863_v47 = vsub.f32 %v11479_v12, %v11555_v11  ;;  %v17168_v12 = vld [vmem:[%s22169_s11 + $0x82c] ss:$16 sps:$4 sm:$0xff]  }
 0xb14   : > { %22433 = vst [vmem:[#allocation15_spill] sm:$0xff] %v20861_v33  ;;  %v17180_v11 = vld [vmem:[%s22169_s11 + $0x8ac] ss:$16 sps:$4 sm:$0xff]  }
 0xb16   : > { %10894 = vmatpush1.bf16.msra.mxu0 %v17088_v50  ;;  %v20865_v50 = vsub.f32 %v11480_v37, %v11558_v35  ;;  %v17166_v37 = vld [vmem:[%s22169_s11 + $0x828] ss:$16 sps:$4 sm:$0xff]  }
 0xb17   : > { %10895 = vmatprep.subr.bf16.mxu0 %v17093_v60  ;;  %v20867_v60 = vsub.f32 %v11497_v39, %v11609_v62  ;;  %v17171_v39 = vld [vmem:[%s22169_s11 + $0x84c] ss:$16 sps:$4 sm:$0xff]   ;;  %v17178_v35 = vld [vmem:[%s22169_s11 + $0x8a8] ss:$16 sps:$4 sm:$0xff]  }
 0xb1a   : > { %10896 = vmatpush1.bf16.msra.mxu0 %v17091_v59  ;;  %v20869_v59 = vpack.c.bf16 %v11612_v7, %v11609_v62  ;;  %v17183_v62 = vld [vmem:[%s22169_s11 + $0x8cc] ss:$16 sps:$4 sm:$0xff]  }
 0xb1b   : > { %10897 = vmatprep.subr.bf16.mxu0 %v17096_v61  ;;  %v20871_v61 = vsub.f32 %v11498_v25, %v11612_v7  ;;  %v17169_v25 = vld [vmem:[%s22169_s11 + $0x848] ss:$16 sps:$4 sm:$0xff]   ;;  %v17186_v7 = vld [vmem:[%s22169_s11 + $0x8ec] ss:$16 sps:$4 sm:$0xff]  }
 0xb1c   : > { %22434 = vst [vmem:[#allocation16_spill] sm:$0xff] %v20869_v59 }
 0xb1e   : > { %10898 = vmatpush1.bf16.msra.mxu0 %v17094_v51  ;;  %v20873_v51 = vsub.f32 %v11481_v44, %v11561_v30  ;;  %v17174_v44 = vld [vmem:[%s22169_s11 + $0x86c] ss:$16 sps:$4 sm:$0xff]  }
 0xb1f   : > { %10899 = vmatprep.subr.bf16.mxu0 %v17099_v10  ;;  %v17124_v10 = vld [vmem:[%s22169_s11 + $0x860] ss:$16 sps:$4 sm:$0xff]  }
 0xb22   : > { %10900 = vmatpush1.bf16.msra.mxu0 %v17097_v52  ;;  %v20878_v52 = vsub.f32 %v11482_v16, %v11564_v14  ;;  %v17177_v16 = vld [vmem:[%s22169_s11 + $0x88c] ss:$16 sps:$4 sm:$0xff]  }
 0xb23   : > { %10901 = vmatprep.subr.bf16.mxu0 %v17102_v55  ;;  %v17129_v55 = vld [vmem:[%s22169_s11 + $0x884] ss:$16 sps:$4 sm:$0xff]  }
 0xb26   : > { %10902 = vmatpush1.bf16.msra.mxu0 %v17100_v58  ;;  %v20884_v58 = vpack.c.bf16 %v11564_v14, %v11561_v30  ;;  %v17184_v30 = vld [vmem:[%s22169_s11 + $0x8e8] ss:$16 sps:$4 sm:$0xff]   ;;  %v17189_v14 = vld [vmem:[%s22169_s11 + $0x90c] ss:$16 sps:$4 sm:$0xff]  }
 0xb27   : > { %10903 = vmatprep.subr.bf16.mxu0 %v17105_v38  ;;  %v17127_v38 = vld [vmem:[%s22169_s11 + $0x880] ss:$16 sps:$4 sm:$0xff]  }
 0xb28   : > { %22435 = vst [vmem:[#allocation17_spill] sm:$0xff] %v20884_v58 }
 0xb2a   : > { %10904 = vmatpush1.bf16.msra.mxu0 %v17103_v13  ;;  %v17132_v13 = vld [vmem:[%s22169_s11 + $0x8a4] ss:$16 sps:$4 sm:$0xff]  }
 0xb2b   : > { %10905 = vmatprep.subr.bf16.mxu0 %v17108_v6  ;;  %v17130_v6 = vld [vmem:[%s22169_s11 + $0x8a0] ss:$16 sps:$4 sm:$0xff]  }
 0xb2e   : > { %10906 = vmatpush1.bf16.msra.mxu0 %v17106_v1  ;;  %v17135_v1 = vld [vmem:[%s22169_s11 + $0x8c4] ss:$16 sps:$4 sm:$0xff]  }
 0xb2f   : > { %10907 = vmatprep.subr.bf16.mxu0 %v17111_v28  ;;  %v17133_v28 = vld [vmem:[%s22169_s11 + $0x8c0] ss:$16 sps:$4 sm:$0xff]  }
 0xb32   : > { %10908 = vmatpush1.bf16.msra.mxu0 %v17109_v22  ;;  %v17138_v22 = vld [vmem:[%s22169_s11 + $0x8e4] ss:$16 sps:$4 sm:$0xff]  }
 0xb33   : > { %10909 = vmatprep.subr.bf16.mxu0 %v17114_v3  ;;  %v17136_v3 = vld [vmem:[%s22169_s11 + $0x8e0] ss:$16 sps:$4 sm:$0xff]  }
 0xb36   : > { %10910 = vmatpush1.bf16.msra.mxu0 %v17112_v9  ;;  %v17141_v9 = vld [vmem:[%s22169_s11 + $0x904] ss:$16 sps:$4 sm:$0xff]  }
 0xb37   : > { %11321 = vmatprep.subr.bf16.mxu0 %v17117_v26  ;;  %v17139_v26 = vld [vmem:[%s22169_s11 + $0x900] ss:$16 sps:$4 sm:$0xff]  }
 0xb39   : > { %10912 = vmatmul.mubr.bf16.vlgmr.msra.gmra.mrb[60].mxu0 %v20104_v53  ;;  %v11597_v53 = vand.u32 4294901760, %v11493_v57 }
 0xb3a   : > { %11322 = vmatpush1.bf16.msra.mxu0 %v17115_v32  ;;  %11353 = vmatprep.mubr.bf16.mxu0 %v20116_v2  ;;  %v17144_v32 = vld [vmem:[%s22169_s11 + $0x924] ss:$16 sps:$4 sm:$0xff]  }
 0xb3b   : > { %11323 = vmatprep.subr.bf16.mxu0 %v17120_v24  ;;  %v20825_v34 = vpack.c.bf16 %v11600_v46, %v11597_v53  ;;  %v20827_v63 = vsub.f32 %v11493_v57, %v11597_v53  ;;  %v17142_v24 = vld [vmem:[%s22169_s11 + $0x920] ss:$16 sps:$4 sm:$0xff]   ;;  %v17150_v57 = vld [vmem:[%s22169_s11 + $0x964] ss:$16 sps:$4 sm:$0xff]  }
 0xb3c   : > { %v17151_v53 = vld [vmem:[%s22169_s11 + $0x980] ss:$16 sps:$4 sm:$0xff]   ;;  %v17156_v46 = vld [vmem:[%s22169_s11 + $0x9a4] ss:$16 sps:$4 sm:$0xff]  }
 0xb3d   : > { %22428 = vst [vmem:[#allocation10_spill] sm:$0xff] %v20825_v34  ;;  %22429 = vst [vmem:[#allocation11_spill] sm:$0xff] %v20827_v63  ;;  %15700 = vmatprep.subr.bf16.mxu1 %v20825_v34 }
 0xb3e   : > { %11324 = vmatpush1.bf16.msra.mxu0 %v17118_v48  ;;  %15702 = vmatpush3.bf16.msra.mxu1 %v20842_v20  ;;  %v17147_v48 = vld [vmem:[%s22169_s11 + $0x944] ss:$16 sps:$4 sm:$0xff]  }
 0xb3f   : > { %11325 = vmatprep.subr.bf16.mxu0 %v17123_v40  ;;  %15704 = vmatprep.subr.bf16.mxu1 %v20846_v15  ;;  %v17145_v40 = vld [vmem:[%s22169_s11 + $0x940] ss:$16 sps:$4 sm:$0xff]  }
 0xb42   : > { %11326 = vmatpush1.bf16.msra.mxu0 %v17121_v17  ;;  %15706 = vmatpush3.bf16.msra.mxu1 %v20861_v33  ;;  %v17175_v17 = vld [vmem:[%s22169_s11 + $0x888] ss:$16 sps:$4 sm:$0xff]  }
 0xb43   : > { %11327 = vmatprep.subr.bf16.mxu0 %v17126_v31  ;;  %15708 = vmatprep.subr.bf16.mxu1 %v20869_v59  ;;  %v17181_v31 = vld [vmem:[%s22169_s11 + $0x8c8] ss:$16 sps:$4 sm:$0xff]   ;;  %v22446_v59 = vand.u32 4294901760, %v20844_v8 }
 0xb45   : > { %v11671_v33 = vsub.f32 %v20844_v8, %v22446_v59 }
 0xb46   : > { %11328 = vmatpush1.bf16.msra.mxu0 %v17124_v10  ;;  %15710 = vmatpush3.bf16.msra.mxu1 %v20884_v58  ;;  %v17187_v10 = vld [vmem:[%s22169_s11 + $0x908] ss:$16 sps:$4 sm:$0xff]  }
 0xb47   : > { %11329 = vmatprep.subr.bf16.mxu0 %v17129_v55  ;;  %v17192_v55 = vld [vmem:[%s22169_s11 + $0x92c] ss:$16 sps:$4 sm:$0xff]  }
 0xb4a   : > { %11330 = vmatpush1.bf16.msra.mxu0 %v17127_v38  ;;  %v17190_v38 = vld [vmem:[%s22169_s11 + $0x928] ss:$16 sps:$4 sm:$0xff]  }
 0xb4b   : > { %11331 = vmatprep.subr.bf16.mxu0 %v17132_v13  ;;  %v17195_v13 = vld [vmem:[%s22169_s11 + $0x94c] ss:$16 sps:$4 sm:$0xff]  }
 0xb4e   : > { %11332 = vmatpush1.bf16.msra.mxu0 %v17130_v6  ;;  %v17193_v6 = vld [vmem:[%s22169_s11 + $0x948] ss:$16 sps:$4 sm:$0xff]  }
 0xb4f   : > { %11333 = vmatprep.subr.bf16.mxu0 %v17135_v1  ;;  %v17198_v1 = vld [vmem:[%s22169_s11 + $0x96c] ss:$16 sps:$4 sm:$0xff]  }
 0xb52   : > { %11334 = vmatpush1.bf16.msra.mxu0 %v17133_v28  ;;  %v17196_v28 = vld [vmem:[%s22169_s11 + $0x968] ss:$16 sps:$4 sm:$0xff]  }
 0xb53   : > { %11335 = vmatprep.subr.bf16.mxu0 %v17138_v22  ;;  %v17201_v22 = vld [vmem:[%s22169_s11 + $0x98c] ss:$16 sps:$4 sm:$0xff]  }
 0xb56   : > { %11336 = vmatpush1.bf16.msra.mxu0 %v17136_v3  ;;  %v17199_v3 = vld [vmem:[%s22169_s11 + $0x988] ss:$16 sps:$4 sm:$0xff]  }
 0xb57   : > { %11337 = vmatprep.subr.bf16.mxu0 %v17141_v9  ;;  %v17204_v9 = vld [vmem:[%s22169_s11 + $0x9ac] ss:$16 sps:$4 sm:$0xff]  }
 0xb5a   : > { %11338 = vmatpush1.bf16.msra.mxu0 %v17139_v26  ;;  %v17202_v26 = vld [vmem:[%s22169_s11 + $0x9a8] ss:$16 sps:$4 sm:$0xff]  }
 0xb5b   : > { %11339 = vmatprep.subr.bf16.mxu0 %v17144_v32  ;;  %v17207_v32 = vld [vmem:[%s22169_s11 + $0x9cc] ss:$16 sps:$4 sm:$0xff]  }
 0xb5e   : > { %11340 = vmatpush1.bf16.msra.mxu0 %v17142_v24  ;;  %v17205_v24 = vld [vmem:[%s22169_s11 + $0x9c8] ss:$16 sps:$4 sm:$0xff]  }
 0xb5f   : > { %11341 = vmatprep.subr.bf16.mxu0 %v17147_v48  ;;  %v17210_v48 = vld [vmem:[%s22169_s11 + $0x9ec] ss:$16 sps:$4 sm:$0xff]  }
 0xb62   : > { %11342 = vmatpush1.bf16.msra.mxu0 %v17145_v40  ;;  %v17208_v40 = vld [vmem:[%s22169_s11 + $0x9e8] ss:$16 sps:$4 sm:$0xff]  }
 0xb63   : > { %11343 = vmatprep.subr.bf16.mxu0 %v17150_v57  ;;  %v21059_v57 = vld [vmem:[%s22171_s13 + $0xb0] sm:$0xff] }
 0xb66   : > { %11344 = vmatpush1.bf16.msra.mxu0 %v17148_v36  ;;  %v21064_v36 = vld [vmem:[%s22171_s13 + $0xb8] sm:$0xff] }
 0xb67   : > { %11345 = vmatprep.subr.bf16.mxu0 %v17153_v23  ;;  %v22207_v23 = vand.u32 4294901760, %v21059_v57 }
 0xb6a   : > { %11346 = vmatpush1.bf16.msra.mxu0 %v17151_v53  ;;  %v22206_v53 = vand.u32 4294901760, %v21064_v36 }
 0xb6b   : > { %11347 = vmatprep.subr.bf16.mxu0 %v17156_v46  ;;  %v21071_v46 = vld [vmem:[%s22171_s13 + $0x30] sm:$0xff] }
 0xb6e   : > { %11348 = vmatpush1.bf16.msra.mxu0 %v17154_v5  ;;  %v22205_v5 = vand.u32 4294901760, %v21071_v46 }
 0xb6f   : > { %11349 = vmatprep.subr.bf16.mxu0 %v17159_v21 }
 0xb72   : > { %11350 = vmatpush1.bf16.msra.mxu0 %v17157_v0  ;;  %v21084_v0 = vpack.c.bf16 %v22206_v53, %v22207_v23  ;;  %v22233_v53 = vand.u32 4294901760, %v20829_v42  ;;  %v11591_v23 = vand.u32 4294901760, %v11491_v19 }
 0xb73   : > { %11351 = vmatprep.subr.bf16.mxu0 %v17162_v18 }
 0xb74   : > { %22436 = vst [vmem:[#allocation18_spill] sm:$0xff] %v21084_v0  ;;  %15712 = vmatprep.subr.bf16.mxu1 %v21084_v0 }
 0xb76   : > { %11352 = vmatpush1.bf16.msra.mxu0 %v17160_v45  ;;  %v21095_v45 = vld [vmem:[%s22171_s13 + $0xc0] sm:$0xff] }
 0xb77   : > { %11364 = vmatprep.subr.bf16.mxu0 %v17165_v27  ;;  %v21100_v27 = vld [vmem:[%s22171_s13 + $0xc8] sm:$0xff] }
 0xb79   : > { %11354 = vmatmul.mubr.bf16.vlgmr.msra.gmra.mrb[56].mxu0 %v20111_v41 }
 0xb7a   : > { %11365 = vmatpush1.bf16.msra.mxu0 %v17163_v43  ;;  %11396 = vmatprep.mubr.bf16.mxu0 %v20116_v2  ;;  %v17172_v2 = vld [vmem:[%s22169_s11 + $0x868] ss:$16 sps:$4 sm:$0xff]   ;;  %v11621_v43 = vand.u32 4294901760, %v21095_v45 }
 0xb7b   : > { %11366 = vmatprep.subr.bf16.mxu0 %v17168_v12  ;;  %v11624_v12 = vand.u32 4294901760, %v21100_v27 }
 0xb7c   : > { %v21209_v59 = vsub.f32 %v21095_v45, %v11621_v43 }
 0xb7e   : > { %11367 = vmatpush1.bf16.msra.mxu0 %v17166_v37  ;;  %v11485_v37 = vld [vmem:[%s22171_s13 + $0x40] sm:$0xff] }
 0xb7f   : > { %11368 = vmatprep.subr.bf16.mxu0 %v17171_v39  ;;  %v11486_v39 = vld [vmem:[%s22171_s13 + $0x48] sm:$0xff] }
 0xb82   : > { %11369 = vmatpush1.bf16.msra.mxu0 %v17169_v25  ;;  %v11573_v25 = vand.u32 4294901760, %v11485_v37 }
 0xb83   : > { %11370 = vmatprep.subr.bf16.mxu0 %v17174_v44  ;;  %v11576_v44 = vand.u32 4294901760, %v11486_v39 }
 0xb86   : > { %11371 = vmatpush1.bf16.msra.mxu0 %v17172_v2  ;;  %v21112_v2 = vpack.c.bf16 %v11624_v12, %v11621_v43 }
 0xb87   : > { %11372 = vmatprep.subr.bf16.mxu0 %v17177_v16  ;;  %v21114_v16 = vpack.c.bf16 %v11576_v44, %v11573_v25 }
 0xb88   : > { %22438 = vst [vmem:[#allocation20_spill] sm:$0xff] %v21112_v2 }
 0xb89   : > { %22439 = vst [vmem:[#allocation21_spill] sm:$0xff] %v21114_v16 }
 0xb8a   : > { %11373 = vmatpush1.bf16.msra.mxu0 %v17175_v17  ;;  %v11503_v17 = vld [vmem:[%s22171_s13 + $0xd0] sm:$0xff] }
 0xb8b   : > { %11374 = vmatprep.subr.bf16.mxu0 %v17180_v11  ;;  %v11504_v11 = vld [vmem:[%s22171_s13 + $0xd8] sm:$0xff] }
 0xb8e   : > { %11375 = vmatpush1.bf16.msra.mxu0 %v17178_v35  ;;  %v11627_v35 = vand.u32 4294901760, %v11503_v17 }
 0xb8f   : > { %11376 = vmatprep.subr.bf16.mxu0 %v17183_v62  ;;  %v11630_v62 = vand.u32 4294901760, %v11504_v11 }
 0xb92   : > { %11377 = vmatpush1.bf16.msra.mxu0 %v17181_v31  ;;  %v11487_v31 = vld [vmem:[%s22171_s13 + $0x50] sm:$0xff] }
 0xb93   : > { %11378 = vmatprep.subr.bf16.mxu0 %v17186_v7  ;;  %v11488_v7 = vld [vmem:[%s22171_s13 + $0x58] sm:$0xff] }
 0xb96   : > { %11379 = vmatpush1.bf16.msra.mxu0 %v17184_v30  ;;  %v11579_v30 = vand.u32 4294901760, %v11487_v31 }
 0xb97   : > { %11380 = vmatprep.subr.bf16.mxu0 %v17189_v14  ;;  %v11582_v14 = vand.u32 4294901760, %v11488_v7 }
 0xb9a   : > { %11381 = vmatpush1.bf16.msra.mxu0 %v17187_v10  ;;  %v21130_v10 = vpack.c.bf16 %v11630_v62, %v11627_v35 }
 0xb9b   : > { %11382 = vmatprep.subr.bf16.mxu0 %v17192_v55  ;;  %v21132_v55 = vpack.c.bf16 %v11582_v14, %v11579_v30 }
 0xb9c   : > { %22440 = vst [vmem:[#allocation22_spill] sm:$0xff] %v21130_v10 }
 0xb9d   : > { %22441 = vst [vmem:[#allocation23_spill] sm:$0xff] %v21132_v55 }
 0xb9e   : > { %11383 = vmatpush1.bf16.msra.mxu0 %v17190_v38  ;;  %v11505_v38 = vld [vmem:[%s22171_s13 + $0xe0] sm:$0xff] }
 0xb9f   : > { %11384 = vmatprep.subr.bf16.mxu0 %v17195_v13  ;;  %v11506_v13 = vld [vmem:[%s22171_s13 + $0xe8] sm:$0xff] }
 0xba2   : > { %11385 = vmatpush1.bf16.msra.mxu0 %v17193_v6  ;;  %v11633_v6 = vand.u32 4294901760, %v11505_v38 }
 0xba3   : > { %11386 = vmatprep.subr.bf16.mxu0 %v17198_v1  ;;  %v11636_v1 = vand.u32 4294901760, %v11506_v13 }
 0xba6   : > { %11387 = vmatpush1.bf16.msra.mxu0 %v17196_v28  ;;  %v11489_v28 = vld [vmem:[%s22171_s13 + $0x60] sm:$0xff] }
 0xba7   : > { %11388 = vmatprep.subr.bf16.mxu0 %v17201_v22  ;;  %v11490_v22 = vld [vmem:[%s22171_s13 + $0x68] sm:$0xff] }
 0xbaa   : > { %11389 = vmatpush1.bf16.msra.mxu0 %v17199_v3  ;;  %v11585_v3 = vand.u32 4294901760, %v11489_v28 }
 0xbab   : > { %11390 = vmatprep.subr.bf16.mxu0 %v17204_v9  ;;  %v11588_v9 = vand.u32 4294901760, %v11490_v22 }
 0xbac   : > { %v21230_v45 = vsub.f32 %v11489_v28, %v11585_v3 }
 0xbae   : > { %11391 = vmatpush1.bf16.msra.mxu0 %v17202_v26  ;;  %v21148_v26 = vpack.c.bf16 %v11636_v1, %v11633_v6  ;;  %22451 = vst [vmem:[#allocation36_spill] sm:$0xff] %v21230_v45 }
 0xbaf   : > { %11392 = vmatprep.subr.bf16.mxu0 %v17207_v32  ;;  %v21150_v32 = vpack.c.bf16 %v11588_v9, %v11585_v3 }
 0xbb0   : > { %22442 = vst [vmem:[#allocation29_spill] sm:$0xff] %v21148_v26 }
 0xbb1   : > { %22443 = vst [vmem:[#allocation28_spill] sm:$0xff] %v21150_v32 }
 0xbb2   : > { %11393 = vmatpush1.bf16.msra.mxu0 %v17205_v24  ;;  %v11507_v24 = vld [vmem:[%s22171_s13 + $0xf0] sm:$0xff] }
 0xbb3   : > { %11394 = vmatprep.subr.bf16.mxu0 %v17210_v48  ;;  %v11508_v48 = vld [vmem:[%s22171_s13 + $0xf8] sm:$0xff] }
 0xbb4   : > { %v11642_v56 = vand.u32 4294901760, %v11508_v48 }
 0xbb6   : > { %11395 = vmatpush1.bf16.msra.mxu0 %v17208_v40  ;;  %v11639_v40 = vand.u32 4294901760, %v11507_v24 }
 0xbb8   : > { %v21234_v43 = vsub.f32 %v11507_v24, %v11639_v40 }
 0xbb9   : > { %11397 = vmatmul.mubr.bf16.vlgmr.msra.gmra.mrb[60].mxu0 %v20111_v41  ;;  %v21076_v41 = vld [vmem:[%s22171_s13 + $0x38] sm:$0xff] }
 0xbba   : > { %v22204_v21 = vand.u32 4294901760, %v21076_v41  ;;  %22452 = vst [vmem:[#allocation37_spill] sm:$0xff] %v21234_v43 }
 0xbbc   : > { %v21090_v18 = vpack.c.bf16 %v22204_v21, %v22205_v5  ;;  %v11492_v21 = vld [vmem:[%s22171_s13 + $0x78] sm:$0xff]  ;;  %v22230_v5 = vand.u32 4294901760, %v20827_v63 }
 0xbbe   : > { %22437 = vst [vmem:[#allocation19_spill] sm:$0xff] %v21090_v18  ;;  %15714 = vmatpush3.bf16.msra.mxu1 %v21090_v18  ;;  %v11783_v18 = vsub.f32 %v20829_v42, %v22233_v53  ;;  %v22448_v53 = vand.u32 4294901760, %v21064_v36 }
 0xbbf   : > { %15716 = vmatprep.subr.bf16.mxu1 %v21112_v2  ;;  %v11776_v2 = vsub.f32 %v20827_v63, %v22230_v5  ;;  %v22447_v5 = vand.u32 4294901760, %v21059_v57 }
 0xbc0   : > { %v11784_v58 = vand.u32 4294901760, %v11783_v18  ;;  %v21195_v20 = vsub.f32 %v21064_v36, %v22448_v53  ;;  %v22449_v18 = vand.u32 4294901760, %v21071_v46  ;;  %v21214_v36 = vsub.f32 %v11485_v37, %v11573_v25 }
 0xbc1   : > { %v21190_v15 = vsub.f32 %v21059_v57, %v22447_v5  ;;  %v21212_v57 = vsub.f32 %v21100_v27, %v11624_v12  ;;  %v21216_v53 = vsub.f32 %v11486_v39, %v11576_v44  ;;  %v21218_v5 = vsub.f32 %v11503_v17, %v11627_v35 }
 0xbc2   : > { %15718 = vmatpush3.bf16.msra.mxu1 %v21114_v16  ;;  %v21170_v16 = vpack.c.bf16 %v11642_v56, %v11639_v40  ;;  %v21232_v27 = vsub.f32 %v11490_v22, %v11588_v9  ;;  %v21236_v12 = vsub.f32 %v11508_v48, %v11642_v56  ;;  %v21238_v37 = vsub.f32 %v11491_v19, %v11591_v23 }
 0xbc3   : > { %15720 = vmatprep.subr.bf16.mxu1 %v21130_v10  ;;  %v11672_v17 = vand.u32 4294901760, %v11671_v33  ;;  %v22264_v35 = vand.u32 4294901760, %v20854_v4  ;;  %v22252_v33 = vand.u32 4294901760, %v20873_v51  ;;  %v22244_v24 = vand.u32 4294901760, %v21190_v15 }
 0xbc4   : > { %22444 = vst [vmem:[#allocation31_spill] sm:$0xff] %v21170_v16  ;;  %22453 = vst [vmem:[#allocation42_spill] sm:$0xff] %v21236_v12 }
 0xbc5   : > { %22454 = vst [vmem:[#allocation43_spill] sm:$0xff] %v21238_v37 }
 0xbc6   : > { %15722 = vmatpush3.bf16.msra.mxu1 %v21132_v55  ;;  %v11594_v55 = vand.u32 4294901760, %v11492_v21 }
 0xbc7   : > { %15724 = vmatprep.subr.bf16.mxu1 %v21148_v26  ;;  %v22236_v26 = vand.u32 4294901760, %v20831_v54 }
 0xbc8   : > { %v21178_v0 = vpack.c.bf16 %v11594_v55, %v11591_v23  ;;  %v21240_v39 = vsub.f32 %v11492_v21, %v11594_v55  ;;  %v11797_v23 = vsub.f32 %v20854_v4, %v22264_v35  ;;  %v15763_v35 = vpack.c.bf16 %v20829_v42, %v20827_v63 }
 0xbc9   : > { %v11664_v10 = vsub.f32 %v20831_v54, %v22236_v26  ;;  %v22450_v26 = vand.u32 4294901760, %v21076_v41 }
 0xbca   : > { %15726 = vmatpush3.bf16.msra.mxu1 %v21150_v32  ;;  %22445 = vst [vmem:[#allocation30_spill] sm:$0xff] %v21178_v0  ;;  %v11777_v32 = vand.u32 4294901760, %v11776_v2  ;;  %v21200_v2 = vsub.f32 %v21071_v46, %v22449_v18  ;;  %v21220_v46 = vsub.f32 %v11504_v11, %v11630_v62  ;;  %v21222_v18 = vsub.f32 %v11487_v31, %v11579_v30 }
 0xbcb   : > { %15728 = vmatprep.subr.bf16.mxu1 %v21170_v16  ;;  %v21205_v16 = vsub.f32 %v21076_v41, %v22450_v26  ;;  %v21224_v41 = vsub.f32 %v11488_v7, %v11582_v14  ;;  %v21226_v26 = vsub.f32 %v11505_v38, %v11633_v6  ;;  %22455 = vst [vmem:[#allocation24_spill] sm:$0xff] %v21240_v39  ;;  %v11665_v44 = vand.u32 4294901760, %v11664_v10 }
 0xbcc   : > { %v15731_v25 = vpack.c.bf16 %v11784_v58, %v11777_v32  ;;  %v22268_v11 = vand.u32 4294901760, %v20848_v49  ;;  %v22263_v62 = vand.u32 4294901760, %v20863_v47  ;;  %v22258_v31 = vand.u32 4294901760, %v20865_v50 }
 0xbcd   : > { %v22257_v7 = vand.u32 4294901760, %v20867_v60  ;;  %v21247_v56 = vpack.c.bf16 %v11672_v17, %v11665_v44  ;;  %v22254_v58 = vand.u32 4294901760, %v20871_v61  ;;  %v11692_v38 = vsub.f32 %v20873_v51, %v22252_v33 }
 0xbce   : > { %15730 = vmatpush3.bf16.msra.mxu1 %v21178_v0  ;;  %v21228_v0 = vsub.f32 %v11506_v13, %v11636_v1  ;;  %v11790_v19 = vsub.f32 %v20848_v49, %v22268_v11  ;;  %v11678_v21 = vsub.f32 %v20863_v47, %v22263_v62  ;;  %v11685_v30 = vsub.f32 %v20865_v50, %v22258_v31 }
 0xbcf   : > { %15732 = vmatprep.subr.bf16.mxu1 %v15731_v25  ;;  %v11804_v14 = vsub.f32 %v20867_v60, %v22257_v7  ;;  %v11811_v55 = vsub.f32 %v20871_v61, %v22254_v58  ;;  %v22246_v13 = vand.u32 4294901760, %v20878_v52  ;;  %v11798_v6 = vand.u32 4294901760, %v11797_v23 }
 0xbd0   : > { %v11791_v10 = vand.u32 4294901760, %v11790_v19  ;;  %v11679_v1 = vand.u32 4294901760, %v11678_v21  ;;  %v11686_v28 = vand.u32 4294901760, %v11685_v30  ;;  %v11693_v9 = vand.u32 4294901760, %v11692_v38 }
 0xbd1   : > { %v11805_v22 = vand.u32 4294901760, %v11804_v14  ;;  %v11812_v3 = vand.u32 4294901760, %v11811_v55  ;;  %v11699_v32 = vsub.f32 %v20878_v52, %v22246_v13  ;;  %v22242_v25 = vand.u32 4294901760, %v21195_v20 }
 0xbd2   : > { %v21277_v48 = vpack.c.bf16 %v11798_v6, %v11791_v10  ;;  %v21279_v40 = vpack.c.bf16 %v11686_v28, %v11679_v1  ;;  %v22241_v44 = vand.u32 4294901760, %v21200_v2  ;;  %v11818_v23 = vsub.f32 %v21190_v15, %v22244_v24 }
 0xbd3   : > { %v21283_v17 = vpack.c.bf16 %v11812_v3, %v11805_v22  ;;  %v11700_v19 = vand.u32 4294901760, %v11699_v32  ;;  %v22243_v21 = vand.u32 4294901760, %v21205_v16  ;;  %v11825_v30 = vsub.f32 %v21195_v20, %v22242_v25 }
 0xbd4   : > { %v11706_v14 = vsub.f32 %v21200_v2, %v22241_v44  ;;  %v22245_v10 = vand.u32 4294901760, %v21209_v59  ;;  %v22248_v55 = vand.u32 4294901760, %v21212_v57  ;;  %v11819_v6 = vand.u32 4294901760, %v11818_v23 }
 0xbd5   : > { %v21297_v38 = vpack.c.bf16 %v11700_v19, %v11693_v9  ;;  %v11713_v1 = vsub.f32 %v21205_v16, %v22243_v21  ;;  %v22247_v28 = vand.u32 4294901760, %v21214_v36  ;;  %v11826_v22 = vand.u32 4294901760, %v11825_v30 }
 0xbd6   : > { %v11707_v3 = vand.u32 4294901760, %v11706_v14  ;;  %v11832_v32 = vsub.f32 %v21209_v59, %v22245_v10  ;;  %v11839_v44 = vsub.f32 %v21212_v57, %v22248_v55  ;;  %v22249_v19 = vand.u32 4294901760, %v21216_v53 }
 0xbd7   : > { %v11714_v25 = vand.u32 4294901760, %v11713_v1  ;;  %v11720_v9 = vsub.f32 %v21214_v36, %v22247_v28  ;;  %v22251_v23 = vand.u32 4294901760, %v21218_v5  ;;  %v21314_v21 = vpack.c.bf16 %v11826_v22, %v11819_v6 }
 0xbd8   : > { %v11833_v30 = vand.u32 4294901760, %v11832_v32  ;;  %v11840_v14 = vand.u32 4294901760, %v11839_v44  ;;  %v22250_v24 = vand.u32 4294901760, %v21220_v46  ;;  %v11727_v1 = vsub.f32 %v21216_v53, %v22249_v19 }
 0xbd9   : > { %v21317_v10 = vpack.c.bf16 %v11714_v25, %v11707_v3  ;;  %v11721_v13 = vand.u32 4294901760, %v11720_v9  ;;  %v11846_v28 = vsub.f32 %v21218_v5, %v22251_v23  ;;  %v22253_v44 = vand.u32 4294901760, %v21222_v18 }
 0xbda   : > { %v21325_v55 = vpack.c.bf16 %v11840_v14, %v11833_v30  ;;  %v11853_v6 = vsub.f32 %v21220_v46, %v22250_v24  ;;  %v22255_v25 = vand.u32 4294901760, %v21224_v41  ;;  %v11728_v22 = vand.u32 4294901760, %v11727_v1 }
 0xbdb   : > { %v11847_v3 = vand.u32 4294901760, %v11846_v28  ;;  %v22256_v32 = vand.u32 4294901760, %v21226_v26  ;;  %v22259_v9 = vand.u32 4294901760, %v21228_v0  ;;  %v11734_v30 = vsub.f32 %v21222_v18, %v22253_v44 }
 0xbdc   : > { %v11854_v19 = vand.u32 4294901760, %v11853_v6  ;;  %v11741_v14 = vsub.f32 %v21224_v41, %v22255_v25  ;;  %v22262_v24 = vand.u32 4294901760, %v21230_v45  ;;  %v21341_v23 = vpack.c.bf16 %v11728_v22, %v11721_v13 }
 0xbdd   : > { %v11860_v28 = vsub.f32 %v21226_v26, %v22256_v32  ;;  %v11867_v1 = vsub.f32 %v21228_v0, %v22259_v9  ;;  %v22260_v6 = vand.u32 4294901760, %v21232_v27  ;;  %v11735_v44 = vand.u32 4294901760, %v11734_v30 }
 0xbde   : > { %v21350_v33 = vpack.c.bf16 %v11854_v19, %v11847_v3  ;;  %v11742_v58 = vand.u32 4294901760, %v11741_v14  ;;  %v11748_v25 = vsub.f32 %v21230_v45, %v22262_v24  ;;  %v22261_v7 = vand.u32 4294901760, %v21234_v43 }
 0xbdf   : > { %v11861_v13 = vand.u32 4294901760, %v11860_v28  ;;  %v11868_v22 = vand.u32 4294901760, %v11867_v1  ;;  %v11755_v32 = vsub.f32 %v21232_v27, %v22260_v6  ;;  %v22265_v19 = vand.u32 4294901760, %v21236_v12 }
 0xbe0   : > { %v21359_v31 = vpack.c.bf16 %v11742_v58, %v11735_v44  ;;  %v11749_v9 = vand.u32 4294901760, %v11748_v25  ;;  %v22267_v3 = vand.u32 4294901760, %v21238_v37  ;;  %v11874_v28 = vsub.f32 %v21234_v43, %v22261_v7 }
 0xbe1   : > { %v21363_v30 = vpack.c.bf16 %v11868_v22, %v11861_v13  ;;  %v11756_v14 = vand.u32 4294901760, %v11755_v32  ;;  %v22266_v1 = vand.u32 4294901760, %v21240_v39  ;;  %v11881_v6 = vsub.f32 %v21236_v12, %v22265_v19 }
 0xbe2   : > { %v11762_v58 = vsub.f32 %v21238_v37, %v22267_v3  ;;  %v11875_v25 = vand.u32 4294901760, %v11874_v28 }
 0xbe3   : > { %v21375_v44 = vpack.c.bf16 %v11756_v14, %v11749_v9  ;;  %v11769_v32 = vsub.f32 %v21240_v39, %v22266_v1  ;;  %v11882_v13 = vand.u32 4294901760, %v11881_v6 }
 0xbe4   : > { %v11763_v22 = vand.u32 4294901760, %v11762_v58 }
 0xbe5   : > { %v11770_v7 = vand.u32 4294901760, %v11769_v32  ;;  %v15759_v24 = vpack.c.bf16 %v11882_v13, %v11875_v25  ;;  %v11415_v32 = vld [vmem:[%s22170_s12] sm:$0xf]  ;;  %v22456_v13 = vsub.s32 0, %v20070_v29 }
 0xbe7   : > { %v15761_v62 = vpack.c.bf16 %v11770_v7, %v11763_v22  ;;  %v11420_v58 = vrot.slane %v11415_v32, %v22456_v13  ;;  %v22457_v22 = vsub.s32 1, %v20070_v29 }
 0xbe9   : > { %v11424_v7 = vrot.slane %v11415_v32, %v22457_v22  ;;  %v22468_v22 = vpack.c.bf16 %v21224_v41, %v21222_v18 }
 0xc4c   : > { %v11355_v1 = vpop.f32.mrb[56].mxu0 }
 0xc4d   : > { %v11437_v6 = vadd.f32 %v11420_v58, %v11355_v1  ;;  %v11357_v28 = vpop.f32.mrb[57].mxu0 }
 0xc4e   : > { %v11438_v3 = vadd.f32 %v11424_v7, %v11357_v28  ;;  %v11359_v14 = vpop.f32.mrb[58].mxu0 }
 0xc4f   : > { %v11441_v9 = vadd.f32 %v11420_v58, %v11359_v14  ;;  %v11361_v11 = vpop.f32.mrb[59].mxu0  ;;  %v11445_v42 = vmax.f32 %v11437_v6, 0.0 }
 0xc50   : > { %v11442_v19 = vadd.f32 %v11424_v7, %v11361_v11  ;;  %v11446_v63 = vmax.f32 %v11438_v3, 0.0 }
 0xc51   : > { %v11449_v25 = vmax.f32 %v11441_v9, 0.0 }
 0xc52   : > { %v11450_v34 = vmax.f32 %v11442_v19, 0.0  ;;  %v22464_v19 = vpack.c.bf16 %v21205_v16, %v21200_v2 }
 0xc53   : > { %v11469_v37 = vadd.f32 %v11449_v25, %v11445_v42  ;;  %v22466_v25 = vpack.c.bf16 %v21216_v53, %v21214_v36 }
 0xc54   : > { %v11470_v39 = vadd.f32 %v11450_v34, %v11446_v63 }
 0xc55   : > { %v11473_v43 = vmul.f32 0.5, %v11469_v37 }
 0xc56   : > { %v11474_v12 = vmul.f32 0.5, %v11470_v39  ;;  %v11427_v39 = vsub.s32 2, %v20070_v29 }
 0xc57   : > { %v21419_v13 = vand.u32 4294901760, %v11473_v43 }
 0xc58   : > { %v21421_v45 = vand.u32 4294901760, %v11474_v12 }
 0xc59   : > { %v21424_v1 = vsub.f32 %v11473_v43, %v21419_v13  ;;  %v22458_v43 = vpack.c.bf16 %v20844_v8, %v20831_v54 }
 0xc5a   : > { %v21427_v28 = vsub.f32 %v11474_v12, %v21421_v45  ;;  %v22459_v12 = vpack.c.bf16 %v20854_v4, %v20848_v49 }
 0xc5b   : > { %v11652_v11 = vand.u32 4294901760, %v21424_v1 }
 0xc5c   : > { %v11646_v9 = vand.u32 4294901760, %v21427_v28 }
 0xc5d   : > { %v11653_v34 = vsub.f32 %v21424_v1, %v11652_v11 }
 0xc5e   : > { %v11647_v63 = vsub.f32 %v21427_v28, %v11646_v9 }
 0xc5f   : > { %v11654_v37 = vand.u32 4294901760, %v11653_v34  ;;  %v22470_v34 = vld [vmem:[#allocation36_spill] sm:$0xff] }
 0xc60   : > { %v11648_v42 = vand.u32 4294901760, %v11647_v63  ;;  %v22471_v63 = vpack.c.bf16 %v21232_v27, %v22470_v34 }
 0xc62   : > { %11649 = vmatprep.mubr.f32.mxu1 %v11648_v42  ;;  %v22472_v42 = vld [vmem:[#allocation42_spill] sm:$0xff] }
 0xc63   : > { %11655 = vmatmul.mubr.f32.vlgmr.msra.gmra.mrb[100].mxu1 %v11654_v37  ;;  %v22473_v37 = vld [vmem:[#allocation37_spill] sm:$0xff] }
 0xc64   : > { %15734 = vmatpush3.bf16.msra.mxu1 %v21247_v56  ;;  %11885 = vmatprep.mubr.f32.mxu1 %v21421_v45  ;;  %v11428_v56 = vrot.slane %v11415_v32, %v11427_v39  ;;  %v22476_v39 = vld [vmem:[#allocation43_spill] sm:$0xff] }
 0xc65   : > { %15736 = vmatprep.subr.bf16.mxu1 %v21277_v48 }
 0xc68   : > { %15738 = vmatpush3.bf16.msra.mxu1 %v21279_v40 }
 0xc69   : > { %15740 = vmatprep.subr.bf16.mxu1 %v21283_v17 }
 0xc6c   : > { %15742 = vmatpush3.bf16.msra.mxu1 %v21297_v38 }
 0xc6d   : > { %15744 = vmatprep.subr.bf16.mxu1 %v21314_v21 }
 0xc70   : > { %15746 = vmatpush3.bf16.msra.mxu1 %v21317_v10 }
 0xc71   : > { %15748 = vmatprep.subr.bf16.mxu1 %v21325_v55 }
 0xc74   : > { %15750 = vmatpush3.bf16.msra.mxu1 %v21341_v23 }
 0xc75   : > { %15752 = vmatprep.subr.bf16.mxu1 %v21350_v33 }
 0xc78   : > { %15754 = vmatpush3.bf16.msra.mxu1 %v21359_v31  ;;  %v11431_v31 = vsub.s32 3, %v20070_v29  ;;  %v22463_v29 = vpack.c.bf16 %v21195_v20, %v21190_v15 }
 0xc79   : > { %15756 = vmatprep.subr.bf16.mxu1 %v21363_v30 }
 0xc7a   : > { %v11432_v33 = vrot.slane %v11415_v32, %v11431_v31  ;;  %v22467_v32 = vpack.c.bf16 %v21220_v46, %v21218_v5 }
 0xc7c   : > { %15758 = vmatpush3.bf16.msra.mxu1 %v21375_v44  ;;  %v22465_v44 = vpack.c.bf16 %v21212_v57, %v21209_v59 }
 0xc7d   : > { %15760 = vmatprep.subr.bf16.mxu1 %v15759_v24  ;;  %v22462_v24 = vpack.c.bf16 %v20878_v52, %v20873_v51 }
 0xc80   : > { %15762 = vmatpush3.bf16.msra.mxu1 %v15761_v62  ;;  %v22460_v62 = vpack.c.bf16 %v20865_v50, %v20863_v47 }
 0xc81   : > { %15764 = vmatprep.subr.bf16.mxu1 %v15763_v35  ;;  %v22461_v35 = vpack.c.bf16 %v20871_v61, %v20867_v60 }
 0xc83   : > { %11887 = vmatmul.mubr.f32.vlgmr.msra.gmra.mrb[102].mxu1 %v21419_v13 }
 0xc84   : > { %15766 = vmatpush3.bf16.msra.mxu1 %v22458_v43  ;;  %12022 = vmatprep.mubr.f32.mxu1 %v21427_v28  ;;  %v22469_v28 = vpack.c.bf16 %v21228_v0, %v21226_v26  ;;  %v22474_v43 = vpack.c.bf16 %v22472_v42, %v22473_v37 }
 0xc85   : > { %15768 = vmatprep.subr.bf16.mxu1 %v22459_v12  ;;  %v22475_v12 = vld [vmem:[#allocation24_spill] sm:$0xff] }
 0xc86   : > { %v22477_v31 = vpack.c.bf16 %v22475_v12, %v22476_v39 }
 0xc88   : > { %15770 = vmatpush3.bf16.msra.mxu1 %v22460_v62  ;;  %v22478_v62 = vld [vmem:[#allocation10_spill] sm:$0xff] }
 0xc89   : > { %15772 = vmatprep.subr.bf16.mxu1 %v22461_v35  ;;  %v22479_v35 = vld [vmem:[#allocation13_spill] sm:$0xff] }
 0xc8c   : > { %15774 = vmatpush3.bf16.msra.mxu1 %v22462_v24  ;;  %v11398_v48 = vpop.f32.mrb[60].mxu0  ;;  %v22482_v24 = vld [vmem:[#allocation16_spill] sm:$0xff] }
 0xc8d   : > { %v11439_v40 = vadd.f32 %v11428_v56, %v11398_v48  ;;  %v11400_v17 = vpop.f32.mrb[61].mxu0  ;;  %15776 = vmatprep.subr.bf16.mxu1 %v22463_v29  ;;  %v22483_v48 = vld [vmem:[#allocation17_spill] sm:$0xff]  ;;  %v22486_v29 = vld [vmem:[#allocation20_spill] sm:$0xff] }
 0xc8e   : > { %v11440_v21 = vadd.f32 %v11432_v33, %v11400_v17  ;;  %v11402_v10 = vpop.f32.mrb[62].mxu0  ;;  %v22485_v17 = vld [vmem:[#allocation19_spill] sm:$0xff] }
 0xc8f   : > { %v11443_v55 = vadd.f32 %v11428_v56, %v11402_v10  ;;  %v11404_v38 = vpop.f32.mrb[63].mxu0  ;;  %v11447_v3 = vmax.f32 %v11439_v40, 0.0  ;;  %v22480_v56 = vld [vmem:[#allocation14_spill] sm:$0xff] }
 0xc90   : > { %v11444_v23 = vadd.f32 %v11432_v33, %v11404_v38  ;;  %15778 = vmatpush3.bf16.msra.mxu1 %v22464_v19  ;;  %v11448_v14 = vmax.f32 %v11440_v21, 0.0  ;;  %v22481_v33 = vld [vmem:[#allocation15_spill] sm:$0xff]  ;;  %v22484_v40 = vld [vmem:[#allocation18_spill] sm:$0xff]  ;;  %v22487_v21 = vld [vmem:[#allocation21_spill] sm:$0xff] }
 0xc91   : > { %v11451_v30 = vmax.f32 %v11443_v55, 0.0  ;;  %15780 = vmatprep.subr.bf16.mxu1 %v22465_v44  ;;  %v22488_v10 = vld [vmem:[#allocation22_spill] sm:$0xff]  ;;  %v22489_v55 = vld [vmem:[#allocation23_spill] sm:$0xff]  ;;  %v22491_v38 = vld [vmem:[#allocation28_spill] sm:$0xff] }
 0xc92   : > { %v11452_v6 = vmax.f32 %v11444_v23, 0.0  ;;  %v22492_v23 = vld [vmem:[#allocation31_spill] sm:$0xff] }
 0xc93   : > { %v21477_v7 = vadd.f32 %v11451_v30, %v11447_v3  ;;  %v22493_v19 = vld [vmem:[#allocation11_spill] sm:$0xff]  ;;  %v22495_v30 = vld [vmem:[#allocation12_spill] sm:$0xff] }
 0xc94   : > { %v21479_v58 = vadd.f32 %v11452_v6, %v11448_v14  ;;  %15782 = vmatpush3.bf16.msra.mxu1 %v22466_v25  ;;  %v22494_v3 = vand.u32 4294901760, %v22493_v19  ;;  %v22496_v44 = vand.u32 4294901760, %v22495_v30  ;;  %v22497_v6 = vld [vmem:[#allocation30_spill] sm:$0xff]  ;;  %v22498_v25 = vand.u32 4294901760, %v20831_v54 }
 0xc95   : > { %15784 = vmatprep.subr.bf16.mxu1 %v22467_v32  ;;  %v22499_v32 = vand.u32 4294901760, %v20844_v8  ;;  %v22503_v19 = vand.u32 4294901760, %v20865_v50  ;;  %v22504_v8 = vand.u32 4294901760, %v20867_v60  ;;  %v22508_v30 = vand.u32 4294901760, %v21190_v15 }
 0xc96   : > { %v15827_v14 = vpack.c.bf16 %v22496_v44, %v22494_v3  ;;  %v22505_v3 = vand.u32 4294901760, %v20871_v61  ;;  %v22510_v50 = vand.u32 4294901760, %v21200_v2  ;;  %v22511_v60 = vand.u32 4294901760, %v21205_v16 }
 0xc97   : > { %v22512_v61 = vand.u32 4294901760, %v21209_v59  ;;  %v22515_v15 = vand.u32 4294901760, %v21216_v53  ;;  %v22517_v2 = vand.u32 4294901760, %v21220_v46  ;;  %v22518_v16 = vand.u32 4294901760, %v21222_v18 }
 0xc98   : > { %15786 = vmatpush3.bf16.msra.mxu1 %v22468_v22  ;;  %v15829_v22 = vpack.c.bf16 %v22499_v32, %v22498_v25  ;;  %v22519_v59 = vand.u32 4294901760, %v21224_v41  ;;  %v22522_v53 = vand.u32 4294901760, %v22470_v34  ;;  %v22524_v46 = vand.u32 4294901760, %v22473_v37  ;;  %v11525_v34 = vld [vmem:[%s22171_s13 + $0x180] sm:$0xff] }
 0xc99   : > { %15788 = vmatprep.subr.bf16.mxu1 %v22469_v28  ;;  %v22500_v28 = vand.u32 4294901760, %v20848_v49  ;;  %v15835_v49 = vpack.c.bf16 %v22505_v3, %v22504_v8  ;;  %v22525_v18 = vand.u32 4294901760, %v22472_v42  ;;  %v22526_v41 = vand.u32 4294901760, %v22476_v39  ;;  %v11510_v39 = vld [vmem:[%s22171_s13 + $0x108] sm:$0xff] }
 0xc9a   : > { %v12459_v42 = vand.u32 4294901760, %v11525_v34 }
 0xc9c   : > { %15790 = vmatpush3.bf16.msra.mxu1 %v22471_v63  ;;  %v22501_v63 = vand.u32 4294901760, %v20854_v4  ;;  %v22506_v4 = vand.u32 4294901760, %v20873_v51  ;;  %v22513_v51 = vand.u32 4294901760, %v21212_v57  ;;  %v22520_v57 = vand.u32 4294901760, %v21226_v26 }
 0xc9d   : > { %15792 = vmatprep.subr.bf16.mxu1 %v22474_v43  ;;  %v22527_v26 = vand.u32 4294901760, %v22475_v12  ;;  %v11509_v12 = vld [vmem:[%s22171_s13 + $0x100] sm:$0xff] }
 0xc9e   : > { %v15831_v43 = vpack.c.bf16 %v22501_v63, %v22500_v28  ;;  %v15843_v25 = vpack.c.bf16 %v22513_v51, %v22512_v61  ;;  %v15849_v28 = vpack.c.bf16 %v22519_v59, %v22518_v16  ;;  %v11515_v51 = vld [vmem:[%s22171_s13 + $0x130] sm:$0xff] }
 0xc9f   : > { %v12429_v16 = vand.u32 4294901760, %v11515_v51 }
 0xca0   : > { %15794 = vmatpush3.bf16.msra.mxu1 %v22477_v31  ;;  %v22502_v31 = vand.u32 4294901760, %v20863_v47  ;;  %v22509_v47 = vand.u32 4294901760, %v21195_v20  ;;  %v22516_v20 = vand.u32 4294901760, %v21218_v5  ;;  %v22523_v5 = vand.u32 4294901760, %v21232_v27 }
 0xca1   : > { %15796 = vmatprep.subr.bf16.mxu1 %v22478_v62 }
 0xca2   : > { %v15833_v54 = vpack.c.bf16 %v22503_v19, %v22502_v31  ;;  %v15839_v44 = vpack.c.bf16 %v22509_v47, %v22508_v30  ;;  %v15855_v31 = vpack.c.bf16 %v22525_v18, %v22524_v46  ;;  %v15857_v19 = vpack.c.bf16 %v22527_v26, %v22526_v41  ;;  %v11532_v30 = vld [vmem:[%s22171_s13 + $0x1b8] sm:$0xff]  ;;  %v11535_v41 = vld [vmem:[%s22171_s13 + $0x1d0] sm:$0xff] }
 0xca3   : > { %12025 = vmatmul.mubr.f32.vlgmr.msra.gmra.mrb[104].mxu1 %v21424_v1  ;;  %v22507_v1 = vand.u32 4294901760, %v20878_v52  ;;  %v22514_v52 = vand.u32 4294901760, %v21214_v36  ;;  %v22521_v36 = vand.u32 4294901760, %v21228_v0  ;;  %v11476_v0 = vmul.f32 0.5, %v21479_v58  ;;  %v11526_v58 = vld [vmem:[%s22171_s13 + $0x188] sm:$0xff]  ;;  %v11536_v26 = vld [vmem:[%s22171_s13 + $0x1d8] sm:$0xff] }
 0xca4   : > { %15798 = vmatpush3.bf16.msra.mxu1 %v22479_v35  ;;  %12129 = vmatprep.mubr.f32.mxu1 %v11646_v9  ;;  %v22490_v9 = vld [vmem:[#allocation29_spill] sm:$0xff]  ;;  %v12462_v37 = vand.u32 4294901760, %v11526_v58  ;;  %v12480_v61 = vand.u32 4294901760, %v11532_v30 }
 0xca5   : > { %15800 = vmatprep.subr.bf16.mxu1 %v22480_v56  ;;  %v15845_v32 = vpack.c.bf16 %v22515_v15, %v22514_v52  ;;  %v15851_v63 = vpack.c.bf16 %v22521_v36, %v22520_v57  ;;  %v21598_v27 = vand.u32 4294901760, %v11476_v0  ;;  %v11534_v52 = vld [vmem:[%s22171_s13 + $0x1c8] sm:$0xff]  ;;  %v21682_v15 = vsub.f32 %v11525_v34, %v12459_v42 }
 0xca6   : > { %v11518_v57 = vld [vmem:[%s22171_s13 + $0x148] sm:$0xff] }
 0xca8   : > { %15802 = vmatpush3.bf16.msra.mxu1 %v22481_v33 }
 0xca9   : > { %15804 = vmatprep.subr.bf16.mxu1 %v22482_v24 }
 0xcac   : > { %15806 = vmatpush3.bf16.msra.mxu1 %v22483_v48 }
 0xcad   : > { %15808 = vmatprep.subr.bf16.mxu1 %v22484_v40 }
 0xcb0   : > { %15810 = vmatpush3.bf16.msra.mxu1 %v22485_v17 }
 0xcb1   : > { %15812 = vmatprep.subr.bf16.mxu1 %v22486_v29 }
 0xcb4   : > { %15814 = vmatpush3.bf16.msra.mxu1 %v22487_v21 }
 0xcb5   : > { %15816 = vmatprep.subr.bf16.mxu1 %v22488_v10 }
 0xcb8   : > { %15818 = vmatpush3.bf16.msra.mxu1 %v22489_v55 }
 0xcb9   : > { %15820 = vmatprep.subr.bf16.mxu1 %v22490_v9 }
 0xcbc   : > { %15822 = vmatpush3.bf16.msra.mxu1 %v22491_v38 }
 0xcbd   : > { %15824 = vmatprep.subr.bf16.mxu1 %v22492_v23 }
 0xcc0   : > { %15826 = vmatpush3.bf16.msra.mxu1 %v22497_v6 }
 0xcc1   : > { %15828 = vmatprep.subr.bf16.mxu1 %v15827_v14  ;;  %v15841_v14 = vpack.c.bf16 %v22511_v60, %v22510_v50 }
 0xcc3   : > { %12133 = vmatmul.mubr.f32.vlgmr.msra.gmra.mrb[106].mxu1 %v11652_v11  ;;  %v15837_v11 = vpack.c.bf16 %v22507_v1, %v22506_v4  ;;  %v11513_v4 = vld [vmem:[%s22171_s13 + $0x120] sm:$0xff]  ;;  %v11514_v1 = vld [vmem:[%s22171_s13 + $0x128] sm:$0xff] }
 0xcc4   : > { %15830 = vmatpush3.bf16.msra.mxu1 %v15829_v22  ;;  %12299 = vmatprep.mubr.f32.mxu1 %v21421_v45  ;;  %v15847_v22 = vpack.c.bf16 %v22517_v2, %v22516_v20  ;;  %v12426_v50 = vand.u32 4294901760, %v11514_v1 }
 0xcc5   : > { %15832 = vmatprep.subr.bf16.mxu1 %v15831_v43  ;;  %v15853_v43 = vpack.c.bf16 %v22523_v5, %v22522_v53  ;;  %v12486_v5 = vand.u32 4294901760, %v11534_v52 }
 0xcc8   : > { %15834 = vmatpush3.bf16.msra.mxu1 %v15833_v54 }
 0xcc9   : > { %15836 = vmatprep.subr.bf16.mxu1 %v15835_v49 }
 0xccc   : > { %15838 = vmatpush3.bf16.msra.mxu1 %v15837_v11 }
 0xccd   : > { %15840 = vmatprep.subr.bf16.mxu1 %v15839_v44  ;;  %v12423_v44 = vand.u32 4294901760, %v11513_v4 }
 0xcd0   : > { %15842 = vmatpush3.bf16.msra.mxu1 %v15841_v14 }
 0xcd1   : > { %15844 = vmatprep.subr.bf16.mxu1 %v15843_v25  ;;  %v11533_v25 = vld [vmem:[%s22171_s13 + $0x1c0] sm:$0xff] }
 0xcd2   : > { %v12483_v53 = vand.u32 4294901760, %v11533_v25 }
 0xcd4   : > { %15846 = vmatpush3.bf16.msra.mxu1 %v15845_v32  ;;  %v21684_v32 = vsub.f32 %v11526_v58, %v12462_v37  ;;  %v21722_v58 = vsub.f32 %v11513_v4, %v12423_v44  ;;  %v21762_v4 = vld [vmem:[%s22171_s13 + $0x160] sm:$0xff] }
 0xcd5   : > { %15848 = vmatprep.subr.bf16.mxu1 %v15847_v22  ;;  %v21691_v22 = vpack.c.bf16 %v12426_v50, %v12423_v44 }
 0xcd6   : > { %v22285_v44 = vand.u32 4294901760, %v21684_v32 }
 0xcd7   : > { %22530 = vst [vmem:[#allocation27_spill] sm:$0xff] %v21691_v22 }
 0xcd8   : > { %15850 = vmatpush3.bf16.msra.mxu1 %v15849_v28  ;;  %v11517_v28 = vld [vmem:[%s22171_s13 + $0x140] sm:$0xff] }
 0xcd9   : > { %15852 = vmatprep.subr.bf16.mxu1 %v15851_v63  ;;  %v12435_v34 = vand.u32 4294901760, %v11517_v28 }
 0xcdc   : > { %15854 = vmatpush3.bf16.msra.mxu1 %v15853_v43  ;;  %v11475_v43 = vmul.f32 0.5, %v21477_v7  ;;  %v12438_v7 = vand.u32 4294901760, %v11518_v57 }
 0xcdd   : > { %15856 = vmatprep.subr.bf16.mxu1 %v15855_v31 }
 0xce0   : > { %15858 = vmatpush3.bf16.msra.mxu1 %v15857_v19 }
 0xce1   : > { %15860 = vmatprep.subr.bf16.mxu1 %v22478_v62 }
 0xce3   : > { %12301 = vmatmul.mubr.f32.vlgmr.msra.gmra.mrb[108].mxu1 %v21419_v13 }
 0xce4   : > { %15862 = vmatpush3.bf16.msra.mxu1 %v22479_v35  ;;  %12403 = vmatprep.mubr.f32.mxu1 %v21421_v45  ;;  %v21603_v45 = vsub.f32 %v11476_v0, %v21598_v27  ;;  %v11527_v35 = vld [vmem:[%s22171_s13 + $0x190] sm:$0xff] }
 0xce5   : > { %15864 = vmatprep.subr.bf16.mxu1 %v22480_v56  ;;  %v11528_v56 = vld [vmem:[%s22171_s13 + $0x198] sm:$0xff] }
 0xce6   : > { %v22283_v62 = vand.u32 4294901760, %v21603_v45 }
 0xce8   : > { %15866 = vmatpush3.bf16.msra.mxu1 %v22481_v33  ;;  %v12411_v33 = vand.u32 4294901760, %v11509_v12 }
 0xce9   : > { %15868 = vmatprep.subr.bf16.mxu1 %v22482_v24  ;;  %v12414_v24 = vand.u32 4294901760, %v11510_v39 }
 0xcea   : > { %v21686_v20 = vsub.f32 %v11509_v12, %v12411_v33 }
 0xceb   : > { %v21688_v2 = vsub.f32 %v11510_v39, %v12414_v24  ;;  %v11519_v39 = vld [vmem:[%s22171_s13 + $0x150] sm:$0xff] }
 0xcec   : > { %15870 = vmatpush3.bf16.msra.mxu1 %v22483_v48  ;;  %v21628_v48 = vpack.c.bf16 %v12462_v37, %v12459_v42  ;;  %v21724_v42 = vsub.f32 %v11514_v1, %v12426_v50  ;;  %v21767_v1 = vld [vmem:[%s22171_s13 + $0x168] sm:$0xff] }
 0xced   : > { %15872 = vmatprep.subr.bf16.mxu1 %v22484_v40  ;;  %v12465_v40 = vand.u32 4294901760, %v11527_v35 }
 0xcef   : > { %v21699_v36 = vsub.f32 %v11527_v35, %v12465_v40  ;;  %v11520_v35 = vld [vmem:[%s22171_s13 + $0x158] sm:$0xff] }
 0xcf0   : > { %15874 = vmatpush3.bf16.msra.mxu1 %v22485_v17  ;;  %v12468_v17 = vand.u32 4294901760, %v11528_v56 }
 0xcf1   : > { %15876 = vmatprep.subr.bf16.mxu1 %v22486_v29  ;;  %v11511_v29 = vld [vmem:[%s22171_s13 + $0x110] sm:$0xff] }
 0xcf2   : > { %v21649_v8 = vpack.c.bf16 %v12468_v17, %v12465_v40  ;;  %v21705_v46 = vsub.f32 %v11528_v56, %v12468_v17  ;;  %v21737_v56 = vsub.f32 %v11532_v30, %v12480_v61  ;;  %v12492_v40 = vand.u32 4294901760, %v11536_v26 }
 0xcf3   : > { %v21741_v17 = vand.u32 4294901760, %v11475_v43  ;;  %v22284_v30 = vand.u32 4294901760, %v21682_v15 }
 0xcf4   : > { %15878 = vmatpush3.bf16.msra.mxu1 %v22487_v21  ;;  %v11512_v21 = vld [vmem:[%s22171_s13 + $0x118] sm:$0xff] }
 0xcf5   : > { %15880 = vmatprep.subr.bf16.mxu1 %v22488_v10  ;;  %v12509_v10 = vsub.f32 %v21603_v45, %v22283_v62  ;;  %v12420_v54 = vand.u32 4294901760, %v11512_v21 }
 0xcf7   : > { %v12510_v11 = vand.u32 4294901760, %v12509_v10  ;;  %v21709_v31 = vsub.f32 %v11512_v21, %v12420_v54  ;;  %v21747_v10 = vsub.f32 %v11533_v25, %v12483_v53  ;;  %v21784_v25 = vsub.f32 %v11536_v26, %v12492_v40 }
 0xcf8   : > { %15882 = vmatpush3.bf16.msra.mxu1 %v22489_v55  ;;  %v11529_v55 = vld [vmem:[%s22171_s13 + $0x1a0] sm:$0xff] }
 0xcf9   : > { %15884 = vmatprep.subr.bf16.mxu1 %v22490_v9  ;;  %v11530_v9 = vld [vmem:[%s22171_s13 + $0x1a8] sm:$0xff]  ;;  %v12471_v3 = vand.u32 4294901760, %v11529_v55 }
 0xcfa   : > { %v12474_v49 = vand.u32 4294901760, %v11530_v9 }
 0xcfb   : > { %v21717_v19 = vsub.f32 %v11529_v55, %v12471_v3  ;;  %v11537_v55 = vld [vmem:[%s22171_s13 + $0x1e0] sm:$0xff] }
 0xcfc   : > { %15886 = vmatpush3.bf16.msra.mxu1 %v22491_v38  ;;  %v21646_v38 = vpack.c.bf16 %v12414_v24, %v12411_v33  ;;  %v21668_v60 = vpack.c.bf16 %v12474_v49, %v12471_v3  ;;  %v21719_v0 = vsub.f32 %v11530_v9, %v12474_v49  ;;  %v21739_v33 = vpack.c.bf16 %v12486_v5, %v12483_v53  ;;  %v11538_v9 = vld [vmem:[%s22171_s13 + $0x1e8] sm:$0xff] }
 0xcfd   : > { %15888 = vmatprep.subr.bf16.mxu1 %v22492_v23  ;;  %v12417_v23 = vand.u32 4294901760, %v11511_v29  ;;  %v12489_v24 = vand.u32 4294901760, %v11535_v41  ;;  %v12441_v3 = vand.u32 4294901760, %v11519_v39  ;;  %v12444_v49 = vand.u32 4294901760, %v11520_v35 }
 0xcfe   : > { %22529 = vst [vmem:[#allocation26_spill] sm:$0xff] %v21668_v60  ;;  %22533 = vst [vmem:[#allocation34_spill] sm:$0xff] %v21739_v33 }
 0xcff   : > { %v21665_v47 = vpack.c.bf16 %v12420_v54, %v12417_v23  ;;  %v21707_v18 = vsub.f32 %v11511_v29, %v12417_v23  ;;  %v21743_v29 = vsub.f32 %v11515_v51, %v12429_v16  ;;  %v21755_v23 = vsub.f32 %v11534_v52, %v12486_v5  ;;  %v21805_v5 = vld [vmem:[%s22171_s13 + $0x170] sm:$0xff] }
 0xd00   : > { %15890 = vmatpush3.bf16.msra.mxu1 %v22497_v6  ;;  %v11531_v6 = vld [vmem:[%s22171_s13 + $0x1b0] sm:$0xff]  ;;  %v21757_v54 = vpack.c.bf16 %v12438_v7, %v12435_v34  ;;  %v21777_v50 = vpack.c.bf16 %v12492_v40, %v12489_v24  ;;  %v12498_v51 = vand.u32 4294901760, %v11538_v9  ;;  %v12447_v52 = vand.u32 4294901760, %v21762_v4 }
 0xd01   : > { %15892 = vmatprep.subr.bf16.mxu1 %v21628_v48  ;;  %22528 = vst [vmem:[#allocation25_spill] sm:$0xff] %v21665_v47  ;;  %v12477_v14 = vand.u32 4294901760, %v11531_v6  ;;  %v21800_v53 = vsub.f32 %v11519_v39, %v12441_v3  ;;  %v21824_v40 = vsub.f32 %v11520_v35, %v12444_v49  ;;  %v22540_v39 = vand.u32 4294901760, %v21699_v36 }
 0xd02   : > { %22534 = vst [vmem:[#allocation35_spill] sm:$0xff] %v21757_v54  ;;  %22535 = vst [vmem:[#allocation38_spill] sm:$0xff] %v21777_v50 }
 0xd03   : > { %12405 = vmatmul.mubr.f32.vlgmr.msra.gmra.mrb[110].mxu1 %v21419_v13  ;;  %v11516_v13 = vld [vmem:[%s22171_s13 + $0x138] sm:$0xff]  ;;  %v21702_v63 = vpack.c.bf16 %v12480_v61, %v12477_v14  ;;  %v21726_v37 = vsub.f32 %v11531_v6, %v12477_v14  ;;  %v21772_v6 = vsub.f32 %v11518_v57, %v12438_v7  ;;  %v21779_v14 = vsub.f32 %v11535_v41, %v12489_v24 }
 0xd04   : > { %15894 = vmatpush3.bf16.msra.mxu1 %v21646_v38  ;;  %12511 = vmatprep.mubr.f32.mxu1 %v12510_v11  ;;  %v12432_v59 = vand.u32 4294901760, %v11516_v13  ;;  %v21770_v11 = vsub.f32 %v11517_v28, %v12435_v34  ;;  %v12495_v61 = vand.u32 4294901760, %v11537_v55  ;;  %v21796_v28 = vld [vmem:[%s22171_s13 + $0x1f8] sm:$0xff]  ;;  %v21798_v57 = vpack.c.bf16 %v12444_v49, %v12441_v3 }
 0xd05   : > { %15896 = vmatprep.subr.bf16.mxu1 %v21649_v8  ;;  %22531 = vst [vmem:[#allocation32_spill] sm:$0xff] %v21702_v63  ;;  %v22291_v41 = vand.u32 4294901760, %v21686_v20  ;;  %v12638_v34 = vsub.f32 %v21682_v15, %v22284_v30  ;;  %v12645_v7 = vsub.f32 %v21684_v32, %v22285_v44  ;;  %v22539_v49 = vand.u32 4294901760, %v21688_v2 }
 0xd06   : > { %v21728_v12 = vpack.c.bf16 %v12432_v59, %v12429_v16  ;;  %v21745_v21 = vsub.f32 %v11516_v13, %v12432_v59  ;;  %v21782_v13 = vsub.f32 %v11475_v43, %v21741_v17  ;;  %v22288_v16 = vand.u32 4294901760, %v21767_v1  ;;  %v21791_v59 = vld [vmem:[%s22171_s13 + $0x1f0] sm:$0xff]  ;;  %22536 = vst [vmem:[#allocation39_spill] sm:$0xff] %v21798_v57  ;;  %v21810_v43 = vld [vmem:[%s22171_s13 + $0x178] sm:$0xff] }
 0xd07   : > { %v21826_v3 = vpack.c.bf16 %v12498_v51, %v12495_v61  ;;  %v12526_v35 = vsub.f32 %v21686_v20, %v22291_v41  ;;  %v12533_v62 = vsub.f32 %v21688_v2, %v22539_v49  ;;  %v12646_v44 = vand.u32 4294901760, %v12645_v7 }
 0xd08   : > { %15898 = vmatpush3.bf16.msra.mxu1 %v21665_v47  ;;  %22532 = vst [vmem:[#allocation33_spill] sm:$0xff] %v21728_v12  ;;  %v21832_v30 = vpack.c.bf16 %v22288_v16, %v12447_v52  ;;  %v12639_v16 = vand.u32 4294901760, %v12638_v34  ;;  %v12652_v24 = vsub.f32 %v21699_v36, %v22540_v39  ;;  %v22542_v49 = vand.u32 4294901760, %v21791_v59 }
 0xd09   : > { %15900 = vmatprep.subr.bf16.mxu1 %v21668_v60  ;;  %22537 = vst [vmem:[#allocation40_spill] sm:$0xff] %v21826_v3  ;;  %v22306_v34 = vand.u32 4294901760, %v21717_v19  ;;  %v22545_v39 = vand.u32 4294901760, %v21782_v13  ;;  %v22553_v47 = vand.u32 4294901760, %v21726_v37 }
 0xd0a   : > { %22538 = vst [vmem:[#allocation41_spill] sm:$0xff] %v21832_v30 }
 0xd0c   : > { %15902 = vmatpush3.bf16.msra.mxu1 %v21691_v22 }
 0xd0d   : > { %15904 = vmatprep.subr.bf16.mxu1 %v21702_v63  ;;  %v22546_v63 = vand.u32 4294901760, %v21707_v18 }
 0xd10   : > { %15906 = vmatpush3.bf16.msra.mxu1 %v21728_v12  ;;  %v12534_v12 = vand.u32 4294901760, %v12533_v62  ;;  %v12666_v62 = vsub.f32 %v21717_v19, %v22306_v34 }
 0xd11   : > { %15908 = vmatprep.subr.bf16.mxu1 %v21739_v33  ;;  %v21853_v33 = vsub.f32 %v11537_v55, %v12495_v61  ;;  %v12527_v61 = vand.u32 4294901760, %v12526_v35  ;;  %v12653_v55 = vand.u32 4294901760, %v12652_v24  ;;  %v22552_v24 = vand.u32 4294901760, %v21724_v42 }
 0xd13   : > { %v15925_v34 = vpack.c.bf16 %v12534_v12, %v12527_v61  ;;  %v12680_v12 = vsub.f32 %v21726_v37, %v22553_v47  ;;  %v22557_v47 = vand.u32 4294901760, %v21791_v59 }
 0xd14   : > { %15910 = vmatpush3.bf16.msra.mxu1 %v21757_v54  ;;  %v22541_v54 = vand.u32 4294901760, %v21705_v46 }
 0xd15   : > { %15912 = vmatprep.subr.bf16.mxu1 %v21777_v50  ;;  %v22543_v50 = vand.u32 4294901760, %v21796_v28 }
 0xd16   : > { %v12659_v41 = vsub.f32 %v21705_v46, %v22541_v54  ;;  %v12515_v54 = vsub.f32 %v21782_v13, %v22545_v39 }
 0xd17   : > { %v21859_v26 = vpack.c.bf16 %v22543_v50, %v22542_v49  ;;  %v12540_v50 = vsub.f32 %v21707_v18, %v22546_v63  ;;  %v22547_v49 = vand.u32 4294901760, %v21709_v31  ;;  %v22550_v63 = vand.u32 4294901760, %v21719_v0 }
 0xd18   : > { %15914 = vmatpush3.bf16.msra.mxu1 %v21798_v57  ;;  %v21863_v57 = vsub.f32 %v11538_v9, %v12498_v51  ;;  %v22548_v9 = vand.u32 4294901760, %v21805_v5  ;;  %v22549_v51 = vand.u32 4294901760, %v21810_v43  ;;  %v12660_v35 = vand.u32 4294901760, %v12659_v41 }
 0xd19   : > { %15916 = vmatprep.subr.bf16.mxu1 %v21826_v3  ;;  %22544 = vst [vmem:[#allocation44_spill] sm:$0xff] %v21859_v26  ;;  %v12547_v7 = vsub.f32 %v21709_v31, %v22547_v49  ;;  %v15923_v3 = vpack.c.bf16 %v12646_v44, %v12639_v16  ;;  %v12673_v49 = vsub.f32 %v21719_v0, %v22550_v63  ;;  %v12516_v44 = vand.u32 4294901760, %v12515_v54 }
 0xd1a   : > { %v21881_v39 = vpack.c.bf16 %v22549_v51, %v22548_v9  ;;  %v21893_v9 = vsub.f32 %v21762_v4, %v12447_v52  ;;  %v22551_v16 = vand.u32 4294901760, %v21722_v58  ;;  %v12561_v51 = vsub.f32 %v21724_v42, %v22552_v24 }
 0xd1b   : > { %v12548_v60 = vand.u32 4294901760, %v12547_v7  ;;  %v22313_v63 = vand.u32 4294901760, %v21743_v29  ;;  %v15927_v22 = vpack.c.bf16 %v12660_v35, %v12653_v55  ;;  %v22314_v4 = vand.u32 4294901760, %v21745_v21 }
 0xd1c   : > { %15918 = vmatpush3.bf16.msra.mxu1 %v21832_v30  ;;  %v12554_v41 = vsub.f32 %v21722_v58, %v22551_v16  ;;  %v22315_v54 = vand.u32 4294901760, %v21755_v23  ;;  %v12667_v16 = vand.u32 4294901760, %v12666_v62  ;;  %v12674_v30 = vand.u32 4294901760, %v12673_v49 }
 0xd1d   : > { %15920 = vmatprep.subr.bf16.mxu1 %v21859_v26  ;;  %v12541_v26 = vand.u32 4294901760, %v12540_v50  ;;  %v22554_v7 = vand.u32 4294901760, %v21737_v56  ;;  %v12562_v24 = vand.u32 4294901760, %v12561_v51  ;;  %v22317_v55 = vand.u32 4294901760, %v21770_v11 }
 0xd1e   : > { %v12555_v50 = vand.u32 4294901760, %v12554_v41  ;;  %v22316_v35 = vand.u32 4294901760, %v21772_v6  ;;  %v12575_v49 = vsub.f32 %v21745_v21, %v22314_v4  ;;  %v22555_v41 = vand.u32 4294901760, %v21747_v10 }
 0xd1f   : > { %v12687_v61 = vsub.f32 %v21737_v56, %v22554_v7  ;;  %v15929_v52 = vpack.c.bf16 %v12548_v60, %v12541_v26  ;;  %v12701_v60 = vsub.f32 %v21755_v23, %v22315_v54  ;;  %v22556_v26 = vand.u32 4294901760, %v21767_v1 }
 0xd20   : > { %15922 = vmatpush3.bf16.msra.mxu1 %v21881_v39  ;;  %v12681_v7 = vand.u32 4294901760, %v12680_v12  ;;  %v21937_v4 = vsub.f32 %v21791_v59, %v22557_v47  ;;  %v15933_v62 = vpack.c.bf16 %v12562_v24, %v12555_v50  ;;  %v12589_v54 = vsub.f32 %v21772_v6, %v22316_v35 }
 0xd21   : > { %15924 = vmatprep.subr.bf16.mxu1 %v15923_v3  ;;  %v12568_v3 = vsub.f32 %v21743_v29, %v22313_v63  ;;  %v21932_v51 = vsub.f32 %v21767_v1, %v22556_v26  ;;  %v12688_v63 = vand.u32 4294901760, %v12687_v61  ;;  %v22558_v1 = vand.u32 4294901760, %v21779_v14 }
 0xd22   : > { %v12576_v50 = vand.u32 4294901760, %v12575_v49  ;;  %v12702_v47 = vand.u32 4294901760, %v12701_v60  ;;  %v22560_v26 = vand.u32 4294901760, %v21796_v28  ;;  %v22561_v59 = vand.u32 4294901760, %v21805_v5 }
 0xd23   : > { %12517 = vmatmul.mubr.f32.vlgmr.msra.gmra.mrb[112].mxu1 %v12516_v44  ;;  %v12694_v44 = vsub.f32 %v21747_v10, %v22555_v41  ;;  %v12582_v41 = vsub.f32 %v21770_v11, %v22317_v55  ;;  %v12569_v61 = vand.u32 4294901760, %v12568_v3  ;;  %v22318_v55 = vand.u32 4294901760, %v21853_v33 }
 0xd24   : > { %15926 = vmatpush3.bf16.msra.mxu1 %v15925_v34  ;;  %12747 = vmatprep.mubr.f32.mxu1 %v21598_v27  ;;  %v15931_v34 = vpack.c.bf16 %v12674_v30, %v12667_v16  ;;  %v22559_v30 = vand.u32 4294901760, %v21784_v25  ;;  %v21956_v35 = vsub.f32 %v21796_v28, %v22560_v26  ;;  %v21963_v12 = vsub.f32 %v21805_v5, %v22561_v59 }
 0xd25   : > { %15928 = vmatprep.subr.bf16.mxu1 %v15927_v22  ;;  %v12708_v22 = vsub.f32 %v21779_v14, %v22558_v1  ;;  %v12695_v24 = vand.u32 4294901760, %v12694_v44  ;;  %v15935_v1 = vpack.c.bf16 %v12688_v63, %v12681_v7  ;;  %v12583_v49 = vand.u32 4294901760, %v12582_v41 }
 0xd26   : > { %v12715_v16 = vsub.f32 %v21784_v25, %v22559_v30  ;;  %v12590_v44 = vand.u32 4294901760, %v12589_v54  ;;  %v22563_v63 = vand.u32 4294901760, %v21800_v53  ;;  %v22564_v7 = vand.u32 4294901760, %v21824_v40 }
 0xd27   : > { %v12709_v28 = vand.u32 4294901760, %v12708_v22  ;;  %v15937_v5 = vpack.c.bf16 %v12576_v50, %v12569_v61  ;;  %v15939_v59 = vpack.c.bf16 %v12702_v47, %v12695_v24  ;;  %v22321_v30 = vand.u32 4294901760, %v21893_v9 }
 0xd28   : > { %15930 = vmatpush3.bf16.msra.mxu1 %v15929_v52  ;;  %v22562_v52 = vand.u32 4294901760, %v21810_v43  ;;  %v12716_v60 = vand.u32 4294901760, %v12715_v16  ;;  %v12603_v26 = vsub.f32 %v21824_v40, %v22564_v7  ;;  %v12722_v54 = vsub.f32 %v21853_v33, %v22318_v55 }
 0xd29   : > { %15932 = vmatprep.subr.bf16.mxu1 %v15931_v34  ;;  %v12596_v34 = vsub.f32 %v21800_v53, %v22563_v63  ;;  %v22565_v41 = vand.u32 4294901760, %v21863_v57  ;;  %v22319_v16 = vand.u32 4294901760, %v21937_v4  ;;  %v12610_v47 = vsub.f32 %v21893_v9, %v22321_v30 }
 0xd2a   : > { %v21968_v3 = vsub.f32 %v21810_v43, %v22562_v52  ;;  %v22320_v43 = vand.u32 4294901760, %v21932_v51  ;;  %v12742_v52 = vand.u32 4294901760, %v21956_v35  ;;  %v15943_v61 = vpack.c.bf16 %v12716_v60, %v12709_v28 }
 0xd2b   : > { %v12729_v22 = vsub.f32 %v21863_v57, %v22565_v41  ;;  %v12597_v50 = vand.u32 4294901760, %v12596_v34  ;;  %v12604_v24 = vand.u32 4294901760, %v12603_v26  ;;  %v22322_v63 = vand.u32 4294901760, %v21963_v12 }
 0xd2c   : > { %15934 = vmatpush3.bf16.msra.mxu1 %v15933_v62  ;;  %v15941_v62 = vpack.c.bf16 %v12590_v44, %v12583_v49  ;;  %v12630_v7 = vand.u32 4294901760, %v21968_v3  ;;  %v12723_v41 = vand.u32 4294901760, %v12722_v54  ;;  %v12736_v49 = vsub.f32 %v21937_v4, %v22319_v16 }
 0xd2d   : > { %15936 = vmatprep.subr.bf16.mxu1 %v15935_v1  ;;  %v12617_v1 = vsub.f32 %v21932_v51, %v22320_v43  ;;  %v12730_v55 = vand.u32 4294901760, %v12729_v22  ;;  %v12743_v44 = vsub.f32 %v21956_v35, %v12742_v52  ;;  %v15945_v28 = vpack.c.bf16 %v12604_v24, %v12597_v50 }
 0xd2e   : > { %v12611_v60 = vand.u32 4294901760, %v12610_v47  ;;  %v12624_v26 = vsub.f32 %v21963_v12, %v22322_v63  ;;  %v12737_v54 = vand.u32 4294901760, %v12736_v49  ;;  %v15955_v63 = vpack.c.bf16 %v21684_v32, %v21682_v15 }
 0xd2f   : > { %v12618_v34 = vand.u32 4294901760, %v12617_v1  ;;  %v12744_v22 = vand.u32 4294901760, %v12743_v44  ;;  %v15969_v49 = vpack.c.bf16 %v21745_v21, %v21743_v29  ;;  %v15971_v44 = vpack.c.bf16 %v21755_v23, %v21747_v10 }
 0xd30   : > { %15938 = vmatpush3.bf16.msra.mxu1 %v15937_v5  ;;  %v12631_v5 = vsub.f32 %v21968_v3, %v12630_v7 }
 0xd31   : > { %15940 = vmatprep.subr.bf16.mxu1 %v15939_v59  ;;  %v15947_v59 = vpack.c.bf16 %v12730_v55, %v12723_v41  ;;  %v15949_v50 = vpack.c.bf16 %v12618_v34, %v12611_v60  ;;  %v15951_v47 = vpack.c.bf16 %v12744_v22, %v12737_v54  ;;  %v15957_v55 = vpack.c.bf16 %v21688_v2, %v21686_v20 }
 0xd32   : > { %v12632_v24 = vand.u32 4294901760, %v12631_v5  ;;  %v15965_v41 = vpack.c.bf16 %v21724_v42, %v21722_v58  ;;  %v15975_v60 = vpack.c.bf16 %v21784_v25, %v21779_v14  ;;  %v15977_v34 = vpack.c.bf16 %v21824_v40, %v21800_v53 }
 0xd33   : > { %v15979_v5 = vpack.c.bf16 %v21863_v57, %v21853_v33 }
 0xd34   : > { %15942 = vmatpush3.bf16.msra.mxu1 %v15941_v62  ;;  %v12625_v62 = vand.u32 4294901760, %v12624_v26  ;;  %v14420_v26 = vld [vmem:[%s22172_s14] ss:$0 sm:$0xff] }
 0xd35   : > { %15944 = vmatprep.subr.bf16.mxu1 %v15943_v61  ;;  %v15963_v61 = vpack.c.bf16 %v21719_v0, %v21717_v19 }
 0xd36   : > { %v14741_v16 = vpop.f32.mrb[100].mxu1  ;;  %v15953_v1 = vpack.c.bf16 %v12632_v24, %v12625_v62  ;;  %v15981_v62 = vpack.c.bf16 %v21932_v51, %v21893_v9  ;;  %v15983_v24 = vpack.c.bf16 %v21956_v35, %v21937_v4 }
 0xd37   : > { %v14742_v43 = vpop.f32.mrb[101].mxu1 }
 0xd38   : > { %v14743_v30 = vadd.f32 %v14742_v43, %v14741_v16  ;;  %15946 = vmatpush3.bf16.msra.mxu1 %v15945_v28  ;;  %v15959_v43 = vpack.c.bf16 %v21705_v46, %v21699_v36  ;;  %v15961_v16 = vpack.c.bf16 %v21709_v31, %v21707_v18  ;;  %v15973_v28 = vpack.c.bf16 %v21772_v6, %v21770_v11 }
 0xd39   : > { %15948 = vmatprep.subr.bf16.mxu1 %v15947_v59 }
 0xd3a   : > { %v11657_v22 = vadd.f32 %v14743_v30, %v14420_v26  ;;  %v22566_v30 = vand.u32 4294901760, %v21603_v45  ;;  %v22576_v26 = vld [vmem:[#allocation40_spill] sm:$0xff] }
 0xd3c   : > { %15950 = vmatpush3.bf16.msra.mxu1 %v15949_v50 }
 0xd3d   : > { %15952 = vmatprep.subr.bf16.mxu1 %v15951_v47 }
 0xd40   : > { %15954 = vmatpush3.bf16.msra.mxu1 %v15953_v1  ;;  %v15985_v1 = vpack.c.bf16 %v21968_v3, %v21963_v12 }
 0xd41   : > { %15956 = vmatprep.subr.bf16.mxu1 %v15955_v63  ;;  %v15967_v63 = vpack.c.bf16 %v21737_v56, %v21726_v37 }
 0xd43   : > { %12749 = vmatmul.mubr.f32.vlgmr.msra.gmra.mrb[114].mxu1 %v21741_v17 }
 0xd44   : > { %15958 = vmatpush3.bf16.msra.mxu1 %v15957_v55  ;;  %12884 = vmatprep.mubr.f32.mxu1 %v21603_v45  ;;  %v22567_v55 = vld [vmem:[#allocation25_spill] sm:$0xff] }
 0xd45   : > { %15960 = vmatprep.subr.bf16.mxu1 %v15959_v43  ;;  %v22568_v43 = vld [vmem:[#allocation26_spill] sm:$0xff] }
 0xd48   : > { %15962 = vmatpush3.bf16.msra.mxu1 %v15961_v16  ;;  %v22569_v16 = vld [vmem:[#allocation27_spill] sm:$0xff] }
 0xd49   : > { %15964 = vmatprep.subr.bf16.mxu1 %v15963_v61  ;;  %v22570_v61 = vld [vmem:[#allocation32_spill] sm:$0xff] }
 0xd4c   : > { %15966 = vmatpush3.bf16.msra.mxu1 %v15965_v41  ;;  %v22571_v41 = vld [vmem:[#allocation33_spill] sm:$0xff] }
 0xd4d   : > { %15968 = vmatprep.subr.bf16.mxu1 %v15967_v63  ;;  %v22572_v63 = vld [vmem:[#allocation34_spill] sm:$0xff] }
 0xd50   : > { %15970 = vmatpush3.bf16.msra.mxu1 %v15969_v49  ;;  %v22573_v49 = vld [vmem:[#allocation35_spill] sm:$0xff] }
 0xd51   : > { %15972 = vmatprep.subr.bf16.mxu1 %v15971_v44  ;;  %v22574_v44 = vld [vmem:[#allocation38_spill] sm:$0xff] }
 0xd54   : > { %15974 = vmatpush3.bf16.msra.mxu1 %v15973_v28 }
 0xd55   : > { %15976 = vmatprep.subr.bf16.mxu1 %v15975_v60 }
 0xd56   : > { %v14776_v59 = vpop.f32.mrb[102].mxu1 }
 0xd57   : > { %v14777_v54 = vpop.f32.mrb[103].mxu1 }
 0xd58   : > { %v14778_v50 = vadd.f32 %v14777_v54, %v14776_v59  ;;  %15978 = vmatpush3.bf16.msra.mxu1 %v15977_v34  ;;  %v22575_v34 = vld [vmem:[#allocation39_spill] sm:$0xff]  ;;  %v22577_v59 = vld [vmem:[#allocation41_spill] sm:$0xff]  ;;  %v22578_v54 = vld [vmem:[#allocation44_spill] sm:$0xff] }
 0xd59   : > { %15980 = vmatprep.subr.bf16.mxu1 %v15979_v5 }
 0xd5a   : > { %v11889_v47 = vadd.f32 %v14778_v50, %v11657_v22  ;;  %v22579_v22 = vand.u32 4294901760, %v21682_v15  ;;  %v22580_v50 = vand.u32 4294901760, %v21684_v32  ;;  %v22586_v15 = vand.u32 4294901760, %v21707_v18 }
 0xd5b   : > { %v22587_v32 = vand.u32 4294901760, %v21709_v31  ;;  %v22593_v18 = vand.u32 4294901760, %v21737_v56  ;;  %v22594_v31 = vand.u32 4294901760, %v21743_v29  ;;  %v22600_v56 = vand.u32 4294901760, %v21779_v14 }
 0xd5c   : > { %15982 = vmatpush3.bf16.msra.mxu1 %v15981_v62  ;;  %v16019_v62 = vpack.c.bf16 %v22580_v50, %v22579_v22  ;;  %v22589_v22 = vand.u32 4294901760, %v21719_v0  ;;  %v22596_v0 = vand.u32 4294901760, %v21747_v10  ;;  %v22601_v29 = vand.u32 4294901760, %v21784_v25 }
 0xd5d   : > { %15984 = vmatprep.subr.bf16.mxu1 %v15983_v24  ;;  %v22581_v24 = vand.u32 4294901760, %v21686_v20  ;;  %v16025_v20 = vpack.c.bf16 %v22587_v32, %v22586_v15  ;;  %v22603_v10 = vand.u32 4294901760, %v21824_v40  ;;  %v22606_v14 = vand.u32 4294901760, %v21893_v9 }
 0xd5e   : > { %v22607_v25 = vand.u32 4294901760, %v21932_v51 }
 0xd60   : > { %15986 = vmatpush3.bf16.msra.mxu1 %v15985_v1  ;;  %v22582_v1 = vand.u32 4294901760, %v21688_v2  ;;  %v22588_v2 = vand.u32 4294901760, %v21717_v19  ;;  %v22595_v19 = vand.u32 4294901760, %v21745_v21  ;;  %v22602_v21 = vand.u32 4294901760, %v21800_v53 }
 0xd61   : > { %15988 = vmatprep.subr.bf16.mxu1 %v21628_v48  ;;  %v22608_v53 = vand.u32 4294901760, %v21937_v4 }
 0xd63   : > { %12887 = vmatmul.mubr.f32.vlgmr.msra.gmra.mrb[116].mxu1 %v21782_v13  ;;  %v16047_v40 = vpack.c.bf16 %v12742_v52, %v22608_v53 }
 0xd64   : > { %15990 = vmatpush3.bf16.msra.mxu1 %v21646_v38  ;;  %12991 = vmatprep.mubr.f32.mxu1 %v22566_v30  ;;  %v16021_v30 = vpack.c.bf16 %v22582_v1, %v22581_v24  ;;  %v16033_v1 = vpack.c.bf16 %v22595_v19, %v22594_v31 }
 0xd65   : > { %15992 = vmatprep.subr.bf16.mxu1 %v21649_v8 }
 0xd68   : > { %15994 = vmatpush3.bf16.msra.mxu1 %v22567_v55 }
 0xd69   : > { %15996 = vmatprep.subr.bf16.mxu1 %v22568_v43 }
 0xd6c   : > { %15998 = vmatpush3.bf16.msra.mxu1 %v22569_v16 }
 0xd6d   : > { %16000 = vmatprep.subr.bf16.mxu1 %v22570_v61 }
 0xd70   : > { %16002 = vmatpush3.bf16.msra.mxu1 %v22571_v41 }
 0xd71   : > { %16004 = vmatprep.subr.bf16.mxu1 %v22572_v63 }
 0xd74   : > { %16006 = vmatpush3.bf16.msra.mxu1 %v22573_v49 }
 0xd75   : > { %16008 = vmatprep.subr.bf16.mxu1 %v22574_v44 }
 0xd76   : > { %v14811_v45 = vpop.f32.mrb[104].mxu1 }
 0xd77   : > { %v14812_v28 = vpop.f32.mrb[105].mxu1 }
 0xd78   : > { %v14813_v60 = vadd.f32 %v14812_v28, %v14811_v45  ;;  %16010 = vmatpush3.bf16.msra.mxu1 %v22575_v34  ;;  %v22583_v45 = vand.u32 4294901760, %v21699_v36  ;;  %v16027_v36 = vpack.c.bf16 %v22589_v22, %v22588_v2 }
 0xd79   : > { %16012 = vmatprep.subr.bf16.mxu1 %v22576_v26 }
 0xd7a   : > { %v12027_v5 = vadd.f32 %v14813_v60, %v11889_v47  ;;  %v22584_v47 = vand.u32 4294901760, %v21705_v46  ;;  %v22585_v60 = vand.u32 4294901760, %v21782_v13  ;;  %v22590_v46 = vand.u32 4294901760, %v21722_v58 }
 0xd7b   : > { %v22591_v13 = vand.u32 4294901760, %v21724_v42  ;;  %v22597_v58 = vand.u32 4294901760, %v21755_v23  ;;  %v22598_v42 = vand.u32 4294901760, %v21770_v11  ;;  %v22604_v23 = vand.u32 4294901760, %v21853_v33 }
 0xd7c   : > { %16014 = vmatpush3.bf16.msra.mxu1 %v22577_v59  ;;  %v16023_v28 = vpack.c.bf16 %v22584_v47, %v22583_v45  ;;  %v16039_v47 = vpack.c.bf16 %v22601_v29, %v22600_v56  ;;  %v22605_v11 = vand.u32 4294901760, %v21863_v57  ;;  %v22609_v33 = vand.u32 4294901760, %v21963_v12 }
 0xd7d   : > { %16016 = vmatprep.subr.bf16.mxu1 %v22578_v54  ;;  %v16029_v50 = vpack.c.bf16 %v22591_v13, %v22590_v46 }
 0xd7e   : > { %v16049_v57 = vpack.c.bf16 %v12630_v7, %v22609_v33 }
 0xd80   : > { %16018 = vmatpush3.bf16.msra.mxu1 %v21881_v39 }
 0xd81   : > { %16020 = vmatprep.subr.bf16.mxu1 %v16019_v62  ;;  %v22592_v62 = vand.u32 4294901760, %v21726_v37  ;;  %v22599_v37 = vand.u32 4294901760, %v21772_v6 }
 0xd83   : > { %12995 = vmatmul.mubr.f32.vlgmr.msra.gmra.mrb[118].mxu1 %v22585_v60  ;;  %v16031_v24 = vpack.c.bf16 %v22593_v18, %v22592_v62  ;;  %v16037_v45 = vpack.c.bf16 %v22599_v37, %v22598_v42  ;;  %v16043_v60 = vpack.c.bf16 %v22605_v11, %v22604_v23 }
 0xd84   : > { %16022 = vmatpush3.bf16.msra.mxu1 %v16021_v30  ;;  %13161 = vmatprep.mubr.f32.mxu1 %v21598_v27  ;;  %v16035_v30 = vpack.c.bf16 %v22597_v58, %v22596_v0 }
 0xd85   : > { %16024 = vmatprep.subr.bf16.mxu1 %v16023_v28  ;;  %v16041_v28 = vpack.c.bf16 %v22603_v10, %v22602_v21 }
 0xd88   : > { %16026 = vmatpush3.bf16.msra.mxu1 %v16025_v20  ;;  %v16045_v20 = vpack.c.bf16 %v22607_v25, %v22606_v14 }
 0xd89   : > { %16028 = vmatprep.subr.bf16.mxu1 %v16027_v36 }
 0xd8c   : > { %16030 = vmatpush3.bf16.msra.mxu1 %v16029_v50 }
 0xd8d   : > { %16032 = vmatprep.subr.bf16.mxu1 %v16031_v24 }
 0xd90   : > { %16034 = vmatpush3.bf16.msra.mxu1 %v16033_v1 }
 0xd91   : > { %16036 = vmatprep.subr.bf16.mxu1 %v16035_v30 }
 0xd94   : > { %16038 = vmatpush3.bf16.msra.mxu1 %v16037_v45 }
 0xd95   : > { %16040 = vmatprep.subr.bf16.mxu1 %v16039_v47 }
 0xd96   : > { %v14846_v6 = vpop.f32.mrb[106].mxu1 }
 0xd97   : > { %v14847_v15 = vpop.f32.mrb[107].mxu1 }
 0xd98   : > { %v14848_v32 = vadd.f32 %v14847_v15, %v14846_v6  ;;  %16042 = vmatpush3.bf16.msra.mxu1 %v16041_v28 }
 0xd99   : > { %16044 = vmatprep.subr.bf16.mxu1 %v16043_v60 }
 0xd9a   : > { %v12135_v2 = vadd.f32 %v14848_v32, %v12027_v5 }
 0xd9c   : > { %16046 = vmatpush3.bf16.msra.mxu1 %v16045_v20 }
 0xd9d   : > { %16048 = vmatprep.subr.bf16.mxu1 %v16047_v40 }
 0xda0   : > { %16050 = vmatpush3.bf16.msra.mxu1 %v16049_v57 }
 0xda1   : > { %16052 = vmatprep.subr.bf16.mxu1 %v21628_v48 }
 0xda3   : > { %13163 = vmatmul.mubr.f32.vlgmr.msra.gmra.mrb[120].mxu1 %v21741_v17 }
 0xda4   : > { %16054 = vmatpush3.bf16.msra.mxu1 %v21646_v38  ;;  %13265 = vmatprep.mubr.f32.mxu1 %v21598_v27 }
 0xda5   : > { %16056 = vmatprep.subr.bf16.mxu1 %v21649_v8 }
 0xda8   : > { %16058 = vmatpush3.bf16.msra.mxu1 %v22567_v55 }
 0xda9   : > { %16060 = vmatprep.subr.bf16.mxu1 %v22568_v43 }
 0xdac   : > { %16062 = vmatpush3.bf16.msra.mxu1 %v22569_v16 }
 0xdad   : > { %16064 = vmatprep.subr.bf16.mxu1 %v22570_v61 }
 0xdb0   : > { %16066 = vmatpush3.bf16.msra.mxu1 %v22571_v41 }
 0xdb1   : > { %16068 = vmatprep.subr.bf16.mxu1 %v22572_v63 }
 0xdb4   : > { %16070 = vmatpush3.bf16.msra.mxu1 %v22573_v49 }
 0xdb5   : > { %16072 = vmatprep.subr.bf16.mxu1 %v22574_v44 }
 0xdb6   : > { %v14881_v48 = vpop.f32.mrb[108].mxu1 }
 0xdb7   : > { %v14882_v27 = vpop.f32.mrb[109].mxu1 }
 0xdb8   : > { %v14883_v38 = vadd.f32 %v14882_v27, %v14881_v48  ;;  %16074 = vmatpush3.bf16.msra.mxu1 %v22575_v34 }
 0xdb9   : > { %16076 = vmatprep.subr.bf16.mxu1 %v22576_v26 }
 0xdba   : > { %v12303_v8 = vadd.f32 %v14883_v38, %v12135_v2 }
 0xdbc   : > { %16078 = vmatpush3.bf16.msra.mxu1 %v22577_v59 }
 0xdbd   : > { %16080 = vmatprep.subr.bf16.mxu1 %v22578_v54 }
 0xdc0   : > { %16082 = vmatpush3.bf16.msra.mxu1 %v21881_v39 }
 0xdc3   : > { %13267 = vmatmul.mubr.f32.vlgmr.msra.gmra.mrb[122].mxu1 %v21741_v17 }
 0xdd6   : > { %v14916_v9 = vpop.f32.mrb[110].mxu1 }
 0xdd7   : > { %v14917_v4 = vpop.f32.mrb[111].mxu1 }
 0xdd8   : > { %v14918_v35 = vadd.f32 %v14917_v4, %v14916_v9 }
 0xdda   : > { %v12407_v51 = vadd.f32 %v14918_v35, %v12303_v8 }
 0xdf6   : > { %v14951_v12 = vpop.f32.mrb[112].mxu1 }
 0xdf7   : > { %v14952_v3 = vpop.f32.mrb[113].mxu1 }
 0xdf8   : > { %v14953_v52 = vadd.f32 %v14952_v3, %v14951_v12 }
 0xdfa   : > { %v12519_v7 = vadd.f32 %v14953_v52, %v12407_v51 }
 0xe16   : > { %v14986_v55 = vpop.f32.mrb[114].mxu1 }
 0xe17   : > { %v14987_v43 = vpop.f32.mrb[115].mxu1 }
 0xe18   : > { %v14988_v16 = vadd.f32 %v14987_v43, %v14986_v55 }
 0xe1a   : > { %v12751_v61 = vadd.f32 %v14988_v16, %v12519_v7 }
 0xe36   : > { %v15021_v41 = vpop.f32.mrb[116].mxu1 }
 0xe37   : > { %v15022_v63 = vpop.f32.mrb[117].mxu1 }
 0xe38   : > { %v15023_v49 = vadd.f32 %v15022_v63, %v15021_v41 }
 0xe3a   : > { %v12889_v44 = vadd.f32 %v15023_v49, %v12751_v61 }
 0xe56   : > { %v15056_v34 = vpop.f32.mrb[118].mxu1 }
 0xe57   : > { %v15057_v39 = vpop.f32.mrb[119].mxu1 }
 0xe58   : > { %v15058_v26 = vadd.f32 %v15057_v39, %v15056_v34 }
 0xe5a   : > { %v12997_v17 = vadd.f32 %v15058_v26, %v12889_v44 }
 0xe76   : > { %v15091_v5 = vpop.f32.mrb[120].mxu1 }
 0xe77   : > { %v15092_v59 = vpop.f32.mrb[121].mxu1 }
 0xe78   : > { %v15093_v54 = vadd.f32 %v15092_v59, %v15091_v5 }
 0xe7a   : > { %v13165_v22 = vadd.f32 %v15093_v54, %v12997_v17 }
 0xe96   : > { %v15126_v36 = vpop.f32.mrb[122].mxu1 }
 0xe97   : > { %v15127_v46 = vpop.f32.mrb[123].mxu1 }
 0xe98   : > { %v15128_v13 = vadd.f32 %v15127_v46, %v15126_v36 }
 0xe9a   : > { %v13269_v50 = vadd.f32 %v15128_v13, %v13165_v22 }
 0xe9c   : > { %v13273_v62 = vsel %vm13272_vm3, %v13269_v50, -inf }
 0xe9d   : > { %13274 = vmax.xlane.f32.xlu0 %v13273_v62 }
 0xf2a   : > { %v13275_v18 = vpop.xlane.xlu0 %13274 }
 0xf2b   : > { %v13276_v24 = vsub.f32 %v13269_v50, %v13275_v18 }
 0xf2d   : > { %v13277_v31 = vmul.f32 1.442695, %v13276_v24 }
 0xf2f   : > { %17211 = vpow2.f32 %v13277_v31 }
 0xf39   : > { %v17212_v19 = vpop.eup %17211 }
 0xf3a   : > { %v13279_v1 = vsel %vm13272_vm3, %v17212_v19, 0.0 }
 0xf3b   : > { %13280 = vadd.xlane.f32.xlu1 %v13279_v1 }
 0xfc8   : > { %v13281_v0 = vpop.xlane.xlu1 %13280 }
 0xfc9   : > { %17213 = vrcp.f32 %v13281_v0 }
 0xfd3   : > { %v17214_v58 = vpop.eup %17213 }
 0xfd4   : > { %v13283_v30 = vmul.f32 %v17214_v58, %v17212_v19 }
 0xfd6   : > { %13284 = vst.msk [vmem:[%s492_s29] sm:$0xff] %vm13272_vm3, %v13283_v30 }
 0xfd7 PF: > { %s25_s18 = sadd.s32 1, %s17268_s18  }
 0xfd8   : > { %p22_p4 = scmp.ge.s32.totalorder %s25_s18, 4  }
 0xfda   :  { %24 = sbr.rel (!%p22_p4) target bundleno = 1 (0x1), region = 134 }

</bundles_post_ra>
